<compile_context>
chip_gen: v6e
topology: v6e:2x2x1
jax: 0.10.0
libtpu: 0.0.40
codegen_flags: <defaults>
</compile_context>

<pallas_src>
import numpy as np
import jax
import jax.numpy as jnp
from jax.experimental import pallas as pl
from jax.experimental.pallas import tpu as pltpu


def _pick_vmem_limit():
    # Generation-aware scoped-VMEM budget: ~40 MiB on 64-MiB parts (v7x),
    # 64 MiB on 128-MiB parts (v5e/v6e).
    try:
        info = pltpu.get_tpu_info()
        phys = int(getattr(info, "vmem_capacity_bytes", 64 * 1024 * 1024))
    except Exception:
        phys = 64 * 1024 * 1024
    return 40 * 1024 * 1024 if phys <= 64 * 1024 * 1024 else 64 * 1024 * 1024


_VMEM_LIMIT = _pick_vmem_limit()


# ----------------------------- Pallas kernels ------------------------------ #

def _conv3_bn_relu_kernel(xp0_ref, xp1_ref, xp2_ref, w_ref, s_ref, b_ref, o_ref):
    # One output depth slice of a 3x3x3 'SAME' conv + folded BN + ReLU.
    # xp{k}_ref: (1, 1, H+2, W+2, Cin) padded input planes at depth d+k (k = kd).
    Hp2, Wp2, ci = xp0_ref.shape[2], xp0_ref.shape[3], xp0_ref.shape[4]
    H, W = Hp2 - 2, Wp2 - 2
    co = o_ref.shape[-1]
    acc = jnp.zeros((H * W, co), jnp.float32)
    for kd, xp_ref in enumerate((xp0_ref, xp1_ref, xp2_ref)):
        xpl = xp_ref[0, 0]                         # (H+2, W+2, Cin)
        for kh in range(3):
            for kw in range(3):
                win = xpl[kh:kh + H, kw:kw + W, :].reshape(H * W, ci)
                acc = acc + jnp.dot(win, w_ref[kd, kh, kw],
                                    preferred_element_type=jnp.float32)
    y = jnp.maximum(acc * s_ref[...] + b_ref[...], 0.0)
    o_ref[...] = y.reshape(o_ref.shape).astype(o_ref.dtype)


def _tail_kernel(fh1_ref, flp_ref, wup_ref, wsa1_ref, wsa2_ref,
                 wch_ref, wcl_ref, pv_ref, o_ref):
    # Fused (all lane-dense, tap-packed 8*co = 128 columns):
    #   fh_up = relu(bn(convT_k2s2(fh1)))                      [self.up]
    #   gate  = sigmoid(conv2(relu(bn(conv1(fh_up)))))         [self.sa]
    #   flg   = gate * fl1
    #   out   = relu(bn2(relu(bn1(conv1x1(concat(fh_up, flg))))))
    pv = pv_ref[...]                                   # (16, 128) packed small params
    s_up8, b_up8 = pv[0:1, :], pv[1:2, :]
    s_c1, b_c1 = pv[2:3, :], pv[3:4, :]
    s_c2, b_c2 = pv[4:5, :], pv[5:6, :]
    s_sa, b_sa = pv[6:7, :], pv[7:8, :]
    b_sa2 = pv[8:9, :]

    # self.up: ConvTranspose3d(k=2, s=2) + BN + ReLU -> tap-packed, lane-dense.
    fh_up = jnp.dot(fh1_ref[...], wup_ref[...], preferred_element_type=jnp.float32)
    fh_up = jnp.maximum(fh_up * s_up8 + b_up8, 0.0)

    # self.sa: per-tap 1x1 convs as block-diagonal 128x128 matmuls; the per-fine-voxel
    # scalar gate is spread across its tap's co lanes by the second matmul.
    h = jnp.dot(fh_up, wsa1_ref[...], preferred_element_type=jnp.float32)
    h = jnp.maximum(h * s_sa + b_sa, 0.0)
    logit = jnp.dot(h, wsa2_ref[...], preferred_element_type=jnp.float32) + b_sa2
    gate_full = jax.nn.sigmoid(logit)

    flg = gate_full * flp_ref[...].astype(jnp.float32)

    # torch.cat + self.conv (1x1) + BN + ReLU, then trailing self.bn + self.relu.
    y = jnp.dot(fh_up, wch_ref[...], preferred_element_type=jnp.float32)
    y = y + jnp.dot(flg, wcl_ref[...], preferred_element_type=jnp.float32)
    y = jnp.maximum(y * s_c1 + b_c1, 0.0)
    y = jnp.maximum(y * s_c2 + b_c2, 0.0)
    o_ref[...] = y.astype(o_ref.dtype)


# ------------------------------- wrappers ---------------------------------- #

def conv3_bn_relu(xp, w, s, b):
    # xp: pre-padded (N, D+2, H+2, W+2, Cin); returns (N, D, H*W, Cout).
    N, Dp2, Hp2, Wp2, ci = xp.shape
    D, H, W = Dp2 - 2, Hp2 - 2, Wp2 - 2
    co = w.shape[-1]

    def plane(k):
        return pl.BlockSpec((1, 1, Hp2, Wp2, ci),
                            lambda n, d, _k=k: (n, d + _k, 0, 0, 0))

    return pl.pallas_call(
        _conv3_bn_relu_kernel,
        out_shape=jax.ShapeDtypeStruct((N, D, H * W, co), xp.dtype),
        grid=(N, D),
        in_specs=[
            plane(0), plane(1), plane(2),
            pl.BlockSpec((3, 3, 3, ci, co), lambda n, d: (0, 0, 0, 0, 0)),
            pl.BlockSpec((1, co), lambda n, d: (0, 0)),
            pl.BlockSpec((1, co), lambda n, d: (0, 0)),
        ],
        out_specs=pl.BlockSpec((1, 1, H * W, co), lambda n, d: (n, d, 0, 0)),
        compiler_params=pltpu.CompilerParams(
            dimension_semantics=("parallel", "parallel"),
            vmem_limit_bytes=_VMEM_LIMIT),
    )(xp, xp, xp, w, s, b)


def fused_up_sa_tail(fh1_flat, flp_flat, p, tm=2048):
    # fh1_flat: (M, ci) coarse voxels; flp_flat: (M, 8*co) packed fine voxels.
    M, ci = fh1_flat.shape
    co8 = flp_flat.shape[1]
    tm = min(tm, M)

    def rep(shape):
        return pl.BlockSpec(shape, lambda i, _n=len(shape): (0,) * _n)

    return pl.pallas_call(
        _tail_kernel,
        out_shape=jax.ShapeDtypeStruct((M, co8), fh1_flat.dtype),
        grid=(pl.cdiv(M, tm),),
        in_specs=[
            pl.BlockSpec((tm, ci), lambda i: (i, 0)),
            pl.BlockSpec((tm, co8), lambda i: (i, 0)),
            rep((ci, co8)),
            rep((co8, co8)),
            rep((co8, co8)),
            rep((co8, co8)),
            rep((co8, co8)),
            rep((16, co8)),
        ],
        out_specs=pl.BlockSpec((tm, co8), lambda i: (i, 0)),
        compiler_params=pltpu.CompilerParams(
            dimension_semantics=("parallel",),
            vmem_limit_bytes=_VMEM_LIMIT),
    )(fh1_flat, flp_flat, p['w_up_mat'], p['w_sa1_wide'], p['w_sa2_wide'],
      p['w_cat_h_blk'], p['w_cat_l_blk'], p['p_vec'])


def agc_forward(fh_ncdhw, fl_ncdhw, p):
    # fh: (N, Ci, D, H, W), fl: (N, Co, 2D, 2H, 2W) -- PyTorch layout.
    N, ci, D, H, W = fh_ncdhw.shape
    co = p['w_in2'].shape[-1]

    # self.in1: boundary transpose, pad, 3x3x3 conv + BN + ReLU (NDHWC).
    fh = jnp.transpose(fh_ncdhw, (0, 2, 3, 4, 1))
    fh_pad = jnp.pad(fh, ((0, 0), (1, 1), (1, 1), (1, 1), (0, 0)))
    fh1 = conv3_bn_relu(fh_pad, p['w_in1'], p['s_in1'], p['b_in1'])      # (N,D,H*W,ci)

    # self.in2: fl -> coarse-major / tap-minor packed layout (single boundary transpose),
    # pad by one coarse voxel, fine 3x3x3 conv as a coarse 3x3x3 conv on 128 packed lanes.
    flp = fl_ncdhw.reshape(N, co, D, 2, H, 2, W, 2)
    flp = jnp.transpose(flp, (0, 2, 4, 6, 3, 5, 7, 1)).reshape(N, D, H, W, 8 * co)
    flp_pad = jnp.pad(flp, ((0, 0), (1, 1), (1, 1), (1, 1), (0, 0)))
    fl1p = conv3_bn_relu(flp_pad, p['w_in2_pack'], p['s_in2_8'], p['b_in2_8'])

    # self.up + self.sa + torch.mul + torch.cat + self.conv + self.bn + self.relu, fused.
    Mc = N * D * H * W
    out_p = fused_up_sa_tail(fh1.reshape(Mc, ci), fl1p.reshape(Mc, 8 * co), p)

    # Un-pack taps + NDHWC->NCDHW in one boundary transpose.
    out = out_p.reshape(N, D, H, W, 2, 2, 2, co)
    out = jnp.transpose(out, (0, 7, 1, 4, 2, 5, 3, 6))
    return out.reshape(N, co, 2 * D, 2 * H, 2 * W)


# -------------------------- params & pure-JAX ref --------------------------- #

def _fold_bn(conv_bias, gamma, beta, mean, var, eps=1e-5):
    scale = gamma / jnp.sqrt(var + eps)
    bias = (conv_bias - mean) * scale + beta
    return scale[None, :].astype(jnp.float32), bias[None, :].astype(jnp.float32)


def init_params(key, ci, co):
    cm = max(co // 16, 1)                   # SA middle channel = out_channels // 16
    keys = iter(jax.random.split(key, 64))

    def nrm(shape, fan_in):
        return jax.random.normal(next(keys), shape, jnp.float32) / np.sqrt(fan_in)

    def cb(ch):
        return 0.1 * jax.random.normal(next(keys), (ch,), jnp.float32)

    def bn(ch):
        g = 1.0 + 0.1 * jax.random.normal(next(keys), (ch,), jnp.float32)
        b = 0.1 * jax.random.normal(next(keys), (ch,), jnp.float32)
        m = 0.1 * jax.random.normal(next(keys), (ch,), jnp.float32)
        v = 1.0 + 0.5 * jax.random.uniform(next(keys), (ch,), jnp.float32)
        return g, b, m, v

    p = {}
    # ---- reference-form parameters ----
    p['w_in1'] = nrm((3, 3, 3, ci, ci), 27 * ci)
    p['s_in1'], p['b_in1'] = _fold_bn(cb(ci), *bn(ci))
    p['w_in2'] = nrm((3, 3, 3, co, co), 27 * co)
    p['s_in2'], p['b_in2'] = _fold_bn(cb(co), *bn(co))
    p['w_up'] = nrm((ci, 2, 2, 2, co), ci)             # ConvTranspose3d(ci->co, k=2, s=2)
    p['s_up'], p['b_up'] = _fold_bn(cb(co), *bn(co))
    p['w_sa1'] = nrm((co, cm), co)
    p['s_sa'], p['b_sa'] = _fold_bn(cb(cm), *bn(cm))
    p['w_sa2'] = nrm((cm, 1), cm)
    p['b_sa2'] = cb(1)
    w_cat = nrm((2 * co, co), 2 * co)
    p['w_cat'] = w_cat
    p['s_c1'], p['b_c1'] = _fold_bn(cb(co), *bn(co))
    p['s_c2'], p['b_c2'] = _fold_bn(jnp.zeros((co,), jnp.float32), *bn(co))

    # ---- kernel-side packed parameters (tap-major, channel-minor lane packing) ----
    co8 = 8 * co

    # in2: the fine-grid 3x3x3 conv re-expressed as a coarse-grid 3x3x3 conv acting on
    # 8*co packed channels (block-structured (co8, co8) weight per coarse offset).
    w_in2_np = np.asarray(p['w_in2'])
    wp = np.zeros((3, 3, 3, co8, co8), np.float32)
    for pt in range(2):
        for qt in range(2):
            for rt in range(2):
                t_out = (pt * 2 + qt) * 2 + rt
                for kd in range(3):
                    for kh in range(3):
                        for kw in range(3):
                            ad, ah, aw = pt + kd - 1, qt + kh - 1, rt + kw - 1
                            od, pp_ = ad // 2, ad % 2
                            oh, qq_ = ah // 2, ah % 2
                            ow, rr_ = aw // 2, aw % 2
                            t_in = (pp_ * 2 + qq_) * 2 + rr_
                            wp[od + 1, oh + 1, ow + 1,
                               t_in * co:(t_in + 1) * co,
                               t_out * co:(t_out + 1) * co] += w_in2_np[kd, kh, kw]
    p['w_in2_pack'] = jnp.asarray(wp)
    p['s_in2_8'] = jnp.tile(p['s_in2'], (1, 8))
    p['b_in2_8'] = jnp.tile(p['b_in2'], (1, 8))

    # up: ConvTranspose3d(k=2, s=2) as one (ci, 8*co) matmul; columns ordered (p,q,r,co).
    p['w_up_mat'] = p['w_up'].reshape(ci, co8)

    # SA + concat 1x1 conv as block-diagonal lane-dense (co8, co8) matrices.
    eye8 = np.eye(8, dtype=np.float32)
    w_sa1_pad = np.zeros((co, co), np.float32)          # conv1 (co->cm), padded columns
    w_sa1_pad[:, :cm] = np.asarray(p['w_sa1'])
    p['w_sa1_wide'] = jnp.asarray(np.kron(eye8, w_sa1_pad))
    w_sa2_spread = np.zeros((co, co), np.float32)       # conv2 (cm->1), spread over co lanes
    w_sa2_spread[:cm, :] = np.asarray(p['w_sa2'])
    p['w_sa2_wide'] = jnp.asarray(np.kron(eye8, w_sa2_spread))
    p['w_cat_h_blk'] = jnp.asarray(np.kron(eye8, np.asarray(w_cat[:co])))
    p['w_cat_l_blk'] = jnp.asarray(np.kron(eye8, np.asarray(w_cat[co:])))

    # All small per-channel vectors packed into one (16, co8) tile.
    pv = np.zeros((16, co8), np.float32)
    pv[0] = np.tile(np.asarray(p['s_up'])[0], 8)
    pv[1] = np.tile(np.asarray(p['b_up'])[0], 8)
    pv[2] = np.tile(np.asarray(p['s_c1'])[0], 8)
    pv[3] = np.tile(np.asarray(p['b_c1'])[0], 8)
    pv[4] = np.tile(np.asarray(p['s_c2'])[0], 8)
    pv[5] = np.tile(np.asarray(p['b_c2'])[0], 8)
    s_sa_pad = np.zeros((co,), np.float32)
    s_sa_pad[:cm] = np.asarray(p['s_sa'])[0]
    b_sa_pad = np.zeros((co,), np.float32)
    b_sa_pad[:cm] = np.asarray(p['b_sa'])[0]
    pv[6] = np.tile(s_sa_pad, 8)                        # unused lanes: scale=0, bias=0 -> 0
    pv[7] = np.tile(b_sa_pad, 8)
    pv[8] = float(p['b_sa2'][0])                        # conv2 bias, broadcast to all lanes
    p['p_vec'] = jnp.asarray(pv)
    return p


def agc_reference(fh_ncdhw, fl_ncdhw, p):
    hi = jax.lax.Precision.HIGHEST
    fh = jnp.transpose(fh_ncdhw, (0, 2, 3, 4, 1)).astype(jnp.float32)
    fl = jnp.transpose(fl_ncdhw, (0, 2, 3, 4, 1)).astype(jnp.float32)

    def conv3(x, w, s, b):
        y = jax.lax.conv_general_dilated(
            x, w, (1, 1, 1), 'SAME',
            dimension_numbers=('NDHWC', 'DHWIO', 'NDHWC'), precision=hi)
        return jax.nn.relu(y * s + b)

    fh1 = conv3(fh, p['w_in1'], p['s_in1'], p['b_in1'])
    fl1 = conv3(fl, p['w_in2'], p['s_in2'], p['b_in2'])

    N, D, H, W, _ = fh1.shape
    co = p['w_up'].shape[-1]
    y = jnp.einsum('ndhwi,ipqro->ndphqwro', fh1, p['w_up'], precision=hi)
    y = y.reshape(N, 2 * D, 2 * H, 2 * W, co)
    fh_up = jax.nn.relu(y * p['s_up'] + p['b_up'])

    h = jnp.einsum('ndhwc,cm->ndhwm', fh_up, p['w_sa1'], precision=hi)
    h = jax.nn.relu(h * p['s_sa'] + p['b_sa'])
    logit = jnp.einsum('ndhwm,mo->ndhwo', h, p['w_sa2'], precision=hi) + p['b_sa2']
    gate = jax.nn.sigmoid(logit)
    flg = gate * fl1

    cat = jnp.concatenate([fh_up, flg], axis=-1)
    z = jnp.einsum('ndhwc,cf->ndhwf', cat, p['w_cat'], precision=hi)
    z = jax.nn.relu(z * p['s_c1'] + p['b_c1'])
    z = jax.nn.relu(z * p['s_c2'] + p['b_c2'])
    return jnp.transpose(z, (0, 4, 1, 2, 3))


# ---------------------------------- main ------------------------------------ #

if __name__ == "__main__":
    key = jax.random.PRNGKey(0)
    k1, k2, kp = jax.random.split(key, 3)
    N, Ci, Co = 2, 32, 16                 # in_channels=32, out_channels=16 (SA middle = 1)
    D, H, W = 4, 4, 4                     # fh spatial; fl is 2x in every spatial dim
    fh = jax.random.normal(k1, (N, Ci, D, H, W), jnp.float32)
    fl = jax.random.normal(k2, (N, Co, 2 * D, 2 * H, 2 * W), jnp.float32)
    params = init_params(kp, Ci, Co)

    out = jax.jit(agc_forward)(fh, fl, params)
    out = jax.block_until_ready(out)

    ref = agc_reference(fh, fl, params)
    np.testing.assert_allclose(np.asarray(out), np.asarray(ref),
                               rtol=5e-4, atol=5e-4)
    assert out.shape == (N, Co, 2 * D, 2 * H, 2 * W)
    print("KERNEL_OK")
</pallas_src>

<mosaic_0001>
module attributes {stable_mosaic.version = 11 : i64} {
  func.func @_conv3_bn_relu_kernel(%arg0: i32, %arg1: i32, %arg2: memref<1x1x6x6x32xf32, #tpu.memory_space<vmem>>, %arg3: memref<1x1x6x6x32xf32, #tpu.memory_space<vmem>>, %arg4: memref<1x1x6x6x32xf32, #tpu.memory_space<vmem>>, %arg5: memref<3x3x3x32x32xf32, #tpu.memory_space<vmem>>, %arg6: memref<1x32xf32, #tpu.memory_space<vmem>>, %arg7: memref<1x32xf32, #tpu.memory_space<vmem>>, %arg8: memref<1x1x16x32xf32, #tpu.memory_space<vmem>>) attributes {dimension_semantics = [#tpu.dimension_semantics<parallel>, #tpu.dimension_semantics<parallel>], iteration_bounds = array<i64: 2, 4>, scalar_prefetch = 0 : i64, scratch_operands = 0 : i64, tpu.core_type = #tpu.core_type<tc>, window_params = [{transform_indices = @transform_0, window_bounds = array<i64: 1, 1, 6, 6, 32>}, {transform_indices = @transform_1, window_bounds = array<i64: 1, 1, 6, 6, 32>}, {transform_indices = @transform_2, window_bounds = array<i64: 1, 1, 6, 6, 32>}, {pipeline_mode = #tpu.pipeline_mode<synchronous>, transform_indices = @transform_3, window_bounds = array<i64: 3, 3, 3, 32, 32>}, {pipeline_mode = #tpu.pipeline_mode<synchronous>, transform_indices = @transform_4, window_bounds = array<i64: 1, 32>}, {pipeline_mode = #tpu.pipeline_mode<synchronous>, transform_indices = @transform_5, window_bounds = array<i64: 1, 32>}, {transform_indices = @transform_6, window_bounds = array<i64: 1, 1, 16, 32>}]} {
    %cst = arith.constant 0.000000e+00 : f32
    %0 = vector.broadcast %cst : f32 to vector<16x32xf32>
    %c0 = arith.constant 0 : index
    %c0_0 = arith.constant 0 : index
    %c0_1 = arith.constant 0 : index
    %c0_2 = arith.constant 0 : index
    %c0_3 = arith.constant 0 : index
    %1 = vector.load %arg2[%c0, %c0_0, %c0_1, %c0_2, %c0_3] : memref<1x1x6x6x32xf32, #tpu.memory_space<vmem>>, vector<1x1x6x6x32xf32>
    %2 = vector.shape_cast %1 : vector<1x1x6x6x32xf32> to vector<6x6x32xf32>
    %3 = vector.extract_strided_slice %2 {offsets = [0, 0, 0], sizes = [4, 4, 32], strides = [1, 1, 1]} : vector<6x6x32xf32> to vector<4x4x32xf32>
    %4 = vector.shape_cast %3 : vector<4x4x32xf32> to vector<16x32xf32>
    %c0_4 = arith.constant 0 : index
    %c0_5 = arith.constant 0 : index
    %c0_6 = arith.constant 0 : index
    %c0_7 = arith.constant 0 : index
    %c0_8 = arith.constant 0 : index
    %5 = vector.load %arg5[%c0_4, %c0_5, %c0_6, %c0_7, %c0_8] : memref<3x3x3x32x32xf32, #tpu.memory_space<vmem>>, vector<1x1x1x32x32xf32>
    %6 = vector.shape_cast %5 : vector<1x1x1x32x32xf32> to vector<32x32xf32>
    %cst_9 = arith.constant dense<0.000000e+00> : vector<16x32xf32>
    %7 = tpu.matmul %4, %6, %cst_9 {dimension_numbers = #tpu.dot_dimension_numbers<[1], [0], [0], [1], [0, 0, 1, 1], [], []>} : vector<16x32xf32>, vector<32x32xf32>, vector<16x32xf32> -> vector<16x32xf32>
    %8 = arith.addf %0, %7 : vector<16x32xf32>
    %9 = vector.extract_strided_slice %2 {offsets = [0, 1, 0], sizes = [4, 4, 32], strides = [1, 1, 1]} : vector<6x6x32xf32> to vector<4x4x32xf32>
    %10 = vector.shape_cast %9 : vector<4x4x32xf32> to vector<16x32xf32>
    %c0_10 = arith.constant 0 : index
    %c0_11 = arith.constant 0 : index
    %c1 = arith.constant 1 : index
    %c0_12 = arith.constant 0 : index
    %c0_13 = arith.constant 0 : index
    %11 = vector.load %arg5[%c0_10, %c0_11, %c1, %c0_12, %c0_13] : memref<3x3x3x32x32xf32, #tpu.memory_space<vmem>>, vector<1x1x1x32x32xf32>
    %12 = vector.shape_cast %11 : vector<1x1x1x32x32xf32> to vector<32x32xf32>
    %cst_14 = arith.constant dense<0.000000e+00> : vector<16x32xf32>
    %13 = tpu.matmul %10, %12, %cst_14 {dimension_numbers = #tpu.dot_dimension_numbers<[1], [0], [0], [1], [0, 0, 1, 1], [], []>} : vector<16x32xf32>, vector<32x32xf32>, vector<16x32xf32> -> vector<16x32xf32>
    %14 = arith.addf %8, %13 : vector<16x32xf32>
    %15 = vector.extract_strided_slice %2 {offsets = [0, 2, 0], sizes = [4, 4, 32], strides = [1, 1, 1]} : vector<6x6x32xf32> to vector<4x4x32xf32>
    %16 = vector.shape_cast %15 : vector<4x4x32xf32> to vector<16x32xf32>
    %c0_15 = arith.constant 0 : index
    %c0_16 = arith.constant 0 : index
    %c2 = arith.constant 2 : index
    %c0_17 = arith.constant 0 : index
    %c0_18 = arith.constant 0 : index
    %17 = vector.load %arg5[%c0_15, %c0_16, %c2, %c0_17, %c0_18] : memref<3x3x3x32x32xf32, #tpu.memory_space<vmem>>, vector<1x1x1x32x32xf32>
    %18 = vector.shape_cast %17 : vector<1x1x1x32x32xf32> to vector<32x32xf32>
    %cst_19 = arith.constant dense<0.000000e+00> : vector<16x32xf32>
    %19 = tpu.matmul %16, %18, %cst_19 {dimension_numbers = #tpu.dot_dimension_numbers<[1], [0], [0], [1], [0, 0, 1, 1], [], []>} : vector<16x32xf32>, vector<32x32xf32>, vector<16x32xf32> -> vector<16x32xf32>
    %20 = arith.addf %14, %19 : vector<16x32xf32>
    %21 = vector.extract_strided_slice %2 {offsets = [1, 0, 0], sizes = [4, 4, 32], strides = [1, 1, 1]} : vector<6x6x32xf32> to vector<4x4x32xf32>
    %22 = vector.shape_cast %21 : vector<4x4x32xf32> to vector<16x32xf32>
    %c0_20 = arith.constant 0 : index
    %c1_21 = arith.constant 1 : index
    %c0_22 = arith.constant 0 : index
    %c0_23 = arith.constant 0 : index
    %c0_24 = arith.constant 0 : index
    %23 = vector.load %arg5[%c0_20, %c1_21, %c0_22, %c0_23, %c0_24] : memref<3x3x3x32x32xf32, #tpu.memory_space<vmem>>, vector<1x1x1x32x32xf32>
    %24 = vector.shape_cast %23 : vector<1x1x1x32x32xf32> to vector<32x32xf32>
    %cst_25 = arith.constant dense<0.000000e+00> : vector<16x32xf32>
    %25 = tpu.matmul %22, %24, %cst_25 {dimension_numbers = #tpu.dot_dimension_numbers<[1], [0], [0], [1], [0, 0, 1, 1], [], []>} : vector<16x32xf32>, vector<32x32xf32>, vector<16x32xf32> -> vector<16x32xf32>
    %26 = arith.addf %20, %25 : vector<16x32xf32>
    %27 = vector.extract_strided_slice %2 {offsets = [1, 1, 0], sizes = [4, 4, 32], strides = [1, 1, 1]} : vector<6x6x32xf32> to vector<4x4x32xf32>
    %28 = vector.shape_cast %27 : vector<4x4x32xf32> to vector<16x32xf32>
    %c0_26 = arith.constant 0 : index
    %c1_27 = arith.constant 1 : index
    %c1_28 = arith.constant 1 : index
    %c0_29 = arith.constant 0 : index
    %c0_30 = arith.constant 0 : index
    %29 = vector.load %arg5[%c0_26, %c1_27, %c1_28, %c0_29, %c0_30] : memref<3x3x3x32x32xf32, #tpu.memory_space<vmem>>, vector<1x1x1x32x32xf32>
    %30 = vector.shape_cast %29 : vector<1x1x1x32x32xf32> to vector<32x32xf32>
    %cst_31 = arith.constant dense<0.000000e+00> : vector<16x32xf32>
    %31 = tpu.matmul %28, %30, %cst_31 {dimension_numbers = #tpu.dot_dimension_numbers<[1], [0], [0], [1], [0, 0, 1, 1], [], []>} : vector<16x32xf32>, vector<32x32xf32>, vector<16x32xf32> -> vector<16x32xf32>
    %32 = arith.addf %26, %31 : vector<16x32xf32>
    %33 = vector.extract_strided_slice %2 {offsets = [1, 2, 0], sizes = [4, 4, 32], strides = [1, 1, 1]} : vector<6x6x32xf32> to vector<4x4x32xf32>
    %34 = vector.shape_cast %33 : vector<4x4x32xf32> to vector<16x32xf32>
    %c0_32 = arith.constant 0 : index
    %c1_33 = arith.constant 1 : index
    %c2_34 = arith.constant 2 : index
    %c0_35 = arith.constant 0 : index
    %c0_36 = arith.constant 0 : index
    %35 = vector.load %arg5[%c0_32, %c1_33, %c2_34, %c0_35, %c0_36] : memref<3x3x3x32x32xf32, #tpu.memory_space<vmem>>, vector<1x1x1x32x32xf32>
    %36 = vector.shape_cast %35 : vector<1x1x1x32x32xf32> to vector<32x32xf32>
    %cst_37 = arith.constant dense<0.000000e+00> : vector<16x32xf32>
    %37 = tpu.matmul %34, %36, %cst_37 {dimension_numbers = #tpu.dot_dimension_numbers<[1], [0], [0], [1], [0, 0, 1, 1], [], []>} : vector<16x32xf32>, vector<32x32xf32>, vector<16x32xf32> -> vector<16x32xf32>
    %38 = arith.addf %32, %37 : vector<16x32xf32>
    %39 = vector.extract_strided_slice %2 {offsets = [2, 0, 0], sizes = [4, 4, 32], strides = [1, 1, 1]} : vector<6x6x32xf32> to vector<4x4x32xf32>
    %40 = vector.shape_cast %39 : vector<4x4x32xf32> to vector<16x32xf32>
    %c0_38 = arith.constant 0 : index
    %c2_39 = arith.constant 2 : index
    %c0_40 = arith.constant 0 : index
    %c0_41 = arith.constant 0 : index
    %c0_42 = arith.constant 0 : index
    %41 = vector.load %arg5[%c0_38, %c2_39, %c0_40, %c0_41, %c0_42] : memref<3x3x3x32x32xf32, #tpu.memory_space<vmem>>, vector<1x1x1x32x32xf32>
    %42 = vector.shape_cast %41 : vector<1x1x1x32x32xf32> to vector<32x32xf32>
    %cst_43 = arith.constant dense<0.000000e+00> : vector<16x32xf32>
    %43 = tpu.matmul %40, %42, %cst_43 {dimension_numbers = #tpu.dot_dimension_numbers<[1], [0], [0], [1], [0, 0, 1, 1], [], []>} : vector<16x32xf32>, vector<32x32xf32>, vector<16x32xf32> -> vector<16x32xf32>
    %44 = arith.addf %38, %43 : vector<16x32xf32>
    %45 = vector.extract_strided_slice %2 {offsets = [2, 1, 0], sizes = [4, 4, 32], strides = [1, 1, 1]} : vector<6x6x32xf32> to vector<4x4x32xf32>
    %46 = vector.shape_cast %45 : vector<4x4x32xf32> to vector<16x32xf32>
    %c0_44 = arith.constant 0 : index
    %c2_45 = arith.constant 2 : index
    %c1_46 = arith.constant 1 : index
    %c0_47 = arith.constant 0 : index
    %c0_48 = arith.constant 0 : index
    %47 = vector.load %arg5[%c0_44, %c2_45, %c1_46, %c0_47, %c0_48] : memref<3x3x3x32x32xf32, #tpu.memory_space<vmem>>, vector<1x1x1x32x32xf32>
    %48 = vector.shape_cast %47 : vector<1x1x1x32x32xf32> to vector<32x32xf32>
    %cst_49 = arith.constant dense<0.000000e+00> : vector<16x32xf32>
    %49 = tpu.matmul %46, %48, %cst_49 {dimension_numbers = #tpu.dot_dimension_numbers<[1], [0], [0], [1], [0, 0, 1, 1], [], []>} : vector<16x32xf32>, vector<32x32xf32>, vector<16x32xf32> -> vector<16x32xf32>
    %50 = arith.addf %44, %49 : vector<16x32xf32>
    %51 = vector.extract_strided_slice %2 {offsets = [2, 2, 0], sizes = [4, 4, 32], strides = [1, 1, 1]} : vector<6x6x32xf32> to vector<4x4x32xf32>
    %52 = vector.shape_cast %51 : vector<4x4x32xf32> to vector<16x32xf32>
    %c0_50 = arith.constant 0 : index
    %c2_51 = arith.constant 2 : index
    %c2_52 = arith.constant 2 : index
    %c0_53 = arith.constant 0 : index
    %c0_54 = arith.constant 0 : index
    %53 = vector.load %arg5[%c0_50, %c2_51, %c2_52, %c0_53, %c0_54] : memref<3x3x3x32x32xf32, #tpu.memory_space<vmem>>, vector<1x1x1x32x32xf32>
    %54 = vector.shape_cast %53 : vector<1x1x1x32x32xf32> to vector<32x32xf32>
    %cst_55 = arith.constant dense<0.000000e+00> : vector<16x32xf32>
    %55 = tpu.matmul %52, %54, %cst_55 {dimension_numbers = #tpu.dot_dimension_numbers<[1], [0], [0], [1], [0, 0, 1, 1], [], []>} : vector<16x32xf32>, vector<32x32xf32>, vector<16x32xf32> -> vector<16x32xf32>
    %56 = arith.addf %50, %55 : vector<16x32xf32>
    %c0_56 = arith.constant 0 : index
    %c0_57 = arith.constant 0 : index
    %c0_58 = arith.constant 0 : index
    %c0_59 = arith.constant 0 : index
    %c0_60 = arith.constant 0 : index
    %57 = vector.load %arg3[%c0_56, %c0_57, %c0_58, %c0_59, %c0_60] : memref<1x1x6x6x32xf32, #tpu.memory_space<vmem>>, vector<1x1x6x6x32xf32>
    %58 = vector.shape_cast %57 : vector<1x1x6x6x32xf32> to vector<6x6x32xf32>
    %59 = vector.extract_strided_slice %58 {offsets = [0, 0, 0], sizes = [4, 4, 32], strides = [1, 1, 1]} : vector<6x6x32xf32> to vector<4x4x32xf32>
    %60 = vector.shape_cast %59 : vector<4x4x32xf32> to vector<16x32xf32>
    %c1_61 = arith.constant 1 : index
    %c0_62 = arith.constant 0 : index
    %c0_63 = arith.constant 0 : index
    %c0_64 = arith.constant 0 : index
    %c0_65 = arith.constant 0 : index
    %61 = vector.load %arg5[%c1_61, %c0_62, %c0_63, %c0_64, %c0_65] : memref<3x3x3x32x32xf32, #tpu.memory_space<vmem>>, vector<1x1x1x32x32xf32>
    %62 = vector.shape_cast %61 : vector<1x1x1x32x32xf32> to vector<32x32xf32>
    %cst_66 = arith.constant dense<0.000000e+00> : vector<16x32xf32>
    %63 = tpu.matmul %60, %62, %cst_66 {dimension_numbers = #tpu.dot_dimension_numbers<[1], [0], [0], [1], [0, 0, 1, 1], [], []>} : vector<16x32xf32>, vector<32x32xf32>, vector<16x32xf32> -> vector<16x32xf32>
    %64 = arith.addf %56, %63 : vector<16x32xf32>
    %65 = vector.extract_strided_slice %58 {offsets = [0, 1, 0], sizes = [4, 4, 32], strides = [1, 1, 1]} : vector<6x6x32xf32> to vector<4x4x32xf32>
    %66 = vector.shape_cast %65 : vector<4x4x32xf32> to vector<16x32xf32>
    %c1_67 = arith.constant 1 : index
    %c0_68 = arith.constant 0 : index
    %c1_69 = arith.constant 1 : index
    %c0_70 = arith.constant 0 : index
    %c0_71 = arith.constant 0 : index
    %67 = vector.load %arg5[%c1_67, %c0_68, %c1_69, %c0_70, %c0_71] : memref<3x3x3x32x32xf32, #tpu.memory_space<vmem>>, vector<1x1x1x32x32xf32>
    %68 = vector.shape_cast %67 : vector<1x1x1x32x32xf32> to vector<32x32xf32>
    %cst_72 = arith.constant dense<0.000000e+00> : vector<16x32xf32>
    %69 = tpu.matmul %66, %68, %cst_72 {dimension_numbers = #tpu.dot_dimension_numbers<[1], [0], [0], [1], [0, 0, 1, 1], [], []>} : vector<16x32xf32>, vector<32x32xf32>, vector<16x32xf32> -> vector<16x32xf32>
    %70 = arith.addf %64, %69 : vector<16x32xf32>
    %71 = vector.extract_strided_slice %58 {offsets = [0, 2, 0], sizes = [4, 4, 32], strides = [1, 1, 1]} : vector<6x6x32xf32> to vector<4x4x32xf32>
    %72 = vector.shape_cast %71 : vector<4x4x32xf32> to vector<16x32xf32>
    %c1_73 = arith.constant 1 : index
    %c0_74 = arith.constant 0 : index
    %c2_75 = arith.constant 2 : index
    %c0_76 = arith.constant 0 : index
    %c0_77 = arith.constant 0 : index
    %73 = vector.load %arg5[%c1_73, %c0_74, %c2_75, %c0_76, %c0_77] : memref<3x3x3x32x32xf32, #tpu.memory_space<vmem>>, vector<1x1x1x32x32xf32>
    %74 = vector.shape_cast %73 : vector<1x1x1x32x32xf32> to vector<32x32xf32>
    %cst_78 = arith.constant dense<0.000000e+00> : vector<16x32xf32>
    %75 = tpu.matmul %72, %74, %cst_78 {dimension_numbers = #tpu.dot_dimension_numbers<[1], [0], [0], [1], [0, 0, 1, 1], [], []>} : vector<16x32xf32>, vector<32x32xf32>, vector<16x32xf32> -> vector<16x32xf32>
    %76 = arith.addf %70, %75 : vector<16x32xf32>
    %77 = vector.extract_strided_slice %58 {offsets = [1, 0, 0], sizes = [4, 4, 32], strides = [1, 1, 1]} : vector<6x6x32xf32> to vector<4x4x32xf32>
    %78 = vector.shape_cast %77 : vector<4x4x32xf32> to vector<16x32xf32>
    %c1_79 = arith.constant 1 : index
    %c1_80 = arith.constant 1 : index
    %c0_81 = arith.constant 0 : index
    %c0_82 = arith.constant 0 : index
    %c0_83 = arith.constant 0 : index
    %79 = vector.load %arg5[%c1_79, %c1_80, %c0_81, %c0_82, %c0_83] : memref<3x3x3x32x32xf32, #tpu.memory_space<vmem>>, vector<1x1x1x32x32xf32>
    %80 = vector.shape_cast %79 : vector<1x1x1x32x32xf32> to vector<32x32xf32>
    %cst_84 = arith.constant dense<0.000000e+00> : vector<16x32xf32>
    %81 = tpu.matmul %78, %80, %cst_84 {dimension_numbers = #tpu.dot_dimension_numbers<[1], [0], [0], [1], [0, 0, 1, 1], [], []>} : vector<16x32xf32>, vector<32x32xf32>, vector<16x32xf32> -> vector<16x32xf32>
    %82 = arith.addf %76, %81 : vector<16x32xf32>
    %83 = vector.extract_strided_slice %58 {offsets = [1, 1, 0], sizes = [4, 4, 32], strides = [1, 1, 1]} : vector<6x6x32xf32> to vector<4x4x32xf32>
    %84 = vector.shape_cast %83 : vector<4x4x32xf32> to vector<16x32xf32>
    %c1_85 = arith.constant 1 : index
    %c1_86 = arith.constant 1 : index
    %c1_87 = arith.constant 1 : index
    %c0_88 = arith.constant 0 : index
    %c0_89 = arith.constant 0 : index
    %85 = vector.load %arg5[%c1_85, %c1_86, %c1_87, %c0_88, %c0_89] : memref<3x3x3x32x32xf32, #tpu.memory_space<vmem>>, vector<1x1x1x32x32xf32>
    %86 = vector.shape_cast %85 : vector<1x1x1x32x32xf32> to vector<32x32xf32>
    %cst_90 = arith.constant dense<0.000000e+00> : vector<16x32xf32>
    %87 = tpu.matmul %84, %86, %cst_90 {dimension_numbers = #tpu.dot_dimension_numbers<[1], [0], [0], [1], [0, 0, 1, 1], [], []>} : vector<16x32xf32>, vector<32x32xf32>, vector<16x32xf32> -> vector<16x32xf32>
    %88 = arith.addf %82, %87 : vector<16x32xf32>
    %89 = vector.extract_strided_slice %58 {offsets = [1, 2, 0], sizes = [4, 4, 32], strides = [1, 1, 1]} : vector<6x6x32xf32> to vector<4x4x32xf32>
    %90 = vector.shape_cast %89 : vector<4x4x32xf32> to vector<16x32xf32>
    %c1_91 = arith.constant 1 : index
    %c1_92 = arith.constant 1 : index
    %c2_93 = arith.constant 2 : index
    %c0_94 = arith.constant 0 : index
    %c0_95 = arith.constant 0 : index
    %91 = vector.load %arg5[%c1_91, %c1_92, %c2_93, %c0_94, %c0_95] : memref<3x3x3x32x32xf32, #tpu.memory_space<vmem>>, vector<1x1x1x32x32xf32>
    %92 = vector.shape_cast %91 : vector<1x1x1x32x32xf32> to vector<32x32xf32>
    %cst_96 = arith.constant dense<0.000000e+00> : vector<16x32xf32>
    %93 = tpu.matmul %90, %92, %cst_96 {dimension_numbers = #tpu.dot_dimension_numbers<[1], [0], [0], [1], [0, 0, 1, 1], [], []>} : vector<16x32xf32>, vector<32x32xf32>, vector<16x32xf32> -> vector<16x32xf32>
    %94 = arith.addf %88, %93 : vector<16x32xf32>
    %95 = vector.extract_strided_slice %58 {offsets = [2, 0, 0], sizes = [4, 4, 32], strides = [1, 1, 1]} : vector<6x6x32xf32> to vector<4x4x32xf32>
    %96 = vector.shape_cast %95 : vector<4x4x32xf32> to vector<16x32xf32>
    %c1_97 = arith.constant 1 : index
    %c2_98 = arith.constant 2 : index
    %c0_99 = arith.constant 0 : index
    %c0_100 = arith.constant 0 : index
    %c0_101 = arith.constant 0 : index
    %97 = vector.load %arg5[%c1_97, %c2_98, %c0_99, %c0_100, %c0_101] : memref<3x3x3x32x32xf32, #tpu.memory_space<vmem>>, vector<1x1x1x32x32xf32>
    %98 = vector.shape_cast %97 : vector<1x1x1x32x32xf32> to vector<32x32xf32>
    %cst_102 = arith.constant dense<0.000000e+00> : vector<16x32xf32>
    %99 = tpu.matmul %96, %98, %cst_102 {dimension_numbers = #tpu.dot_dimension_numbers<[1], [0], [0], [1], [0, 0, 1, 1], [], []>} : vector<16x32xf32>, vector<32x32xf32>, vector<16x32xf32> -> vector<16x32xf32>
    %100 = arith.addf %94, %99 : vector<16x32xf32>
    %101 = vector.extract_strided_slice %58 {offsets = [2, 1, 0], sizes = [4, 4, 32], strides = [1, 1, 1]} : vector<6x6x32xf32> to vector<4x4x32xf32>
    %102 = vector.shape_cast %101 : vector<4x4x32xf32> to vector<16x32xf32>
    %c1_103 = arith.constant 1 : index
    %c2_104 = arith.constant 2 : index
    %c1_105 = arith.constant 1 : index
    %c0_106 = arith.constant 0 : index
    %c0_107 = arith.constant 0 : index
    %103 = vector.load %arg5[%c1_103, %c2_104, %c1_105, %c0_106, %c0_107] : memref<3x3x3x32x32xf32, #tpu.memory_space<vmem>>, vector<1x1x1x32x32xf32>
    %104 = vector.shape_cast %103 : vector<1x1x1x32x32xf32> to vector<32x32xf32>
    %cst_108 = arith.constant dense<0.000000e+00> : vector<16x32xf32>
    %105 = tpu.matmul %102, %104, %cst_108 {dimension_numbers = #tpu.dot_dimension_numbers<[1], [0], [0], [1], [0, 0, 1, 1], [], []>} : vector<16x32xf32>, vector<32x32xf32>, vector<16x32xf32> -> vector<16x32xf32>
    %106 = arith.addf %100, %105 : vector<16x32xf32>
    %107 = vector.extract_strided_slice %58 {offsets = [2, 2, 0], sizes = [4, 4, 32], strides = [1, 1, 1]} : vector<6x6x32xf32> to vector<4x4x32xf32>
    %108 = vector.shape_cast %107 : vector<4x4x32xf32> to vector<16x32xf32>
    %c1_109 = arith.constant 1 : index
    %c2_110 = arith.constant 2 : index
    %c2_111 = arith.constant 2 : index
    %c0_112 = arith.constant 0 : index
    %c0_113 = arith.constant 0 : index
    %109 = vector.load %arg5[%c1_109, %c2_110, %c2_111, %c0_112, %c0_113] : memref<3x3x3x32x32xf32, #tpu.memory_space<vmem>>, vector<1x1x1x32x32xf32>
    %110 = vector.shape_cast %109 : vector<1x1x1x32x32xf32> to vector<32x32xf32>
    %cst_114 = arith.constant dense<0.000000e+00> : vector<16x32xf32>
    %111 = tpu.matmul %108, %110, %cst_114 {dimension_numbers = #tpu.dot_dimension_numbers<[1], [0], [0], [1], [0, 0, 1, 1], [], []>} : vector<16x32xf32>, vector<32x32xf32>, vector<16x32xf32> -> vector<16x32xf32>
    %112 = arith.addf %106, %111 : vector<16x32xf32>
    %c0_115 = arith.constant 0 : index
    %c0_116 = arith.constant 0 : index
    %c0_117 = arith.constant 0 : index
    %c0_118 = arith.constant 0 : index
    %c0_119 = arith.constant 0 : index
    %113 = vector.load %arg4[%c0_115, %c0_116, %c0_117, %c0_118, %c0_119] : memref<1x1x6x6x32xf32, #tpu.memory_space<vmem>>, vector<1x1x6x6x32xf32>
    %114 = vector.shape_cast %113 : vector<1x1x6x6x32xf32> to vector<6x6x32xf32>
    %115 = vector.extract_strided_slice %114 {offsets = [0, 0, 0], sizes = [4, 4, 32], strides = [1, 1, 1]} : vector<6x6x32xf32> to vector<4x4x32xf32>
    %116 = vector.shape_cast %115 : vector<4x4x32xf32> to vector<16x32xf32>
    %c2_120 = arith.constant 2 : index
    %c0_121 = arith.constant 0 : index
    %c0_122 = arith.constant 0 : index
    %c0_123 = arith.constant 0 : index
    %c0_124 = arith.constant 0 : index
    %117 = vector.load %arg5[%c2_120, %c0_121, %c0_122, %c0_123, %c0_124] : memref<3x3x3x32x32xf32, #tpu.memory_space<vmem>>, vector<1x1x1x32x32xf32>
    %118 = vector.shape_cast %117 : vector<1x1x1x32x32xf32> to vector<32x32xf32>
    %cst_125 = arith.constant dense<0.000000e+00> : vector<16x32xf32>
    %119 = tpu.matmul %116, %118, %cst_125 {dimension_numbers = #tpu.dot_dimension_numbers<[1], [0], [0], [1], [0, 0, 1, 1], [], []>} : vector<16x32xf32>, vector<32x32xf32>, vector<16x32xf32> -> vector<16x32xf32>
    %120 = arith.addf %112, %119 : vector<16x32xf32>
    %121 = vector.extract_strided_slice %114 {offsets = [0, 1, 0], sizes = [4, 4, 32], strides = [1, 1, 1]} : vector<6x6x32xf32> to vector<4x4x32xf32>
    %122 = vector.shape_cast %121 : vector<4x4x32xf32> to vector<16x32xf32>
    %c2_126 = arith.constant 2 : index
    %c0_127 = arith.constant 0 : index
    %c1_128 = arith.constant 1 : index
    %c0_129 = arith.constant 0 : index
    %c0_130 = arith.constant 0 : index
    %123 = vector.load %arg5[%c2_126, %c0_127, %c1_128, %c0_129, %c0_130] : memref<3x3x3x32x32xf32, #tpu.memory_space<vmem>>, vector<1x1x1x32x32xf32>
    %124 = vector.shape_cast %123 : vector<1x1x1x32x32xf32> to vector<32x32xf32>
    %cst_131 = arith.constant dense<0.000000e+00> : vector<16x32xf32>
    %125 = tpu.matmul %122, %124, %cst_131 {dimension_numbers = #tpu.dot_dimension_numbers<[1], [0], [0], [1], [0, 0, 1, 1], [], []>} : vector<16x32xf32>, vector<32x32xf32>, vector<16x32xf32> -> vector<16x32xf32>
    %126 = arith.addf %120, %125 : vector<16x32xf32>
    %127 = vector.extract_strided_slice %114 {offsets = [0, 2, 0], sizes = [4, 4, 32], strides = [1, 1, 1]} : vector<6x6x32xf32> to vector<4x4x32xf32>
    %128 = vector.shape_cast %127 : vector<4x4x32xf32> to vector<16x32xf32>
    %c2_132 = arith.constant 2 : index
    %c0_133 = arith.constant 0 : index
    %c2_134 = arith.constant 2 : index
    %c0_135 = arith.constant 0 : index
    %c0_136 = arith.constant 0 : index
    %129 = vector.load %arg5[%c2_132, %c0_133, %c2_134, %c0_135, %c0_136] : memref<3x3x3x32x32xf32, #tpu.memory_space<vmem>>, vector<1x1x1x32x32xf32>
    %130 = vector.shape_cast %129 : vector<1x1x1x32x32xf32> to vector<32x32xf32>
    %cst_137 = arith.constant dense<0.000000e+00> : vector<16x32xf32>
    %131 = tpu.matmul %128, %130, %cst_137 {dimension_numbers = #tpu.dot_dimension_numbers<[1], [0], [0], [1], [0, 0, 1, 1], [], []>} : vector<16x32xf32>, vector<32x32xf32>, vector<16x32xf32> -> vector<16x32xf32>
    %132 = arith.addf %126, %131 : vector<16x32xf32>
    %133 = vector.extract_strided_slice %114 {offsets = [1, 0, 0], sizes = [4, 4, 32], strides = [1, 1, 1]} : vector<6x6x32xf32> to vector<4x4x32xf32>
    %134 = vector.shape_cast %133 : vector<4x4x32xf32> to vector<16x32xf32>
    %c2_138 = arith.constant 2 : index
    %c1_139 = arith.constant 1 : index
    %c0_140 = arith.constant 0 : index
    %c0_141 = arith.constant 0 : index
    %c0_142 = arith.constant 0 : index
    %135 = vector.load %arg5[%c2_138, %c1_139, %c0_140, %c0_141, %c0_142] : memref<3x3x3x32x32xf32, #tpu.memory_space<vmem>>, vector<1x1x1x32x32xf32>
    %136 = vector.shape_cast %135 : vector<1x1x1x32x32xf32> to vector<32x32xf32>
    %cst_143 = arith.constant dense<0.000000e+00> : vector<16x32xf32>
    %137 = tpu.matmul %134, %136, %cst_143 {dimension_numbers = #tpu.dot_dimension_numbers<[1], [0], [0], [1], [0, 0, 1, 1], [], []>} : vector<16x32xf32>, vector<32x32xf32>, vector<16x32xf32> -> vector<16x32xf32>
    %138 = arith.addf %132, %137 : vector<16x32xf32>
    %139 = vector.extract_strided_slice %114 {offsets = [1, 1, 0], sizes = [4, 4, 32], strides = [1, 1, 1]} : vector<6x6x32xf32> to vector<4x4x32xf32>
    %140 = vector.shape_cast %139 : vector<4x4x32xf32> to vector<16x32xf32>
    %c2_144 = arith.constant 2 : index
    %c1_145 = arith.constant 1 : index
    %c1_146 = arith.constant 1 : index
    %c0_147 = arith.constant 0 : index
    %c0_148 = arith.constant 0 : index
    %141 = vector.load %arg5[%c2_144, %c1_145, %c1_146, %c0_147, %c0_148] : memref<3x3x3x32x32xf32, #tpu.memory_space<vmem>>, vector<1x1x1x32x32xf32>
    %142 = vector.shape_cast %141 : vector<1x1x1x32x32xf32> to vector<32x32xf32>
    %cst_149 = arith.constant dense<0.000000e+00> : vector<16x32xf32>
    %143 = tpu.matmul %140, %142, %cst_149 {dimension_numbers = #tpu.dot_dimension_numbers<[1], [0], [0], [1], [0, 0, 1, 1], [], []>} : vector<16x32xf32>, vector<32x32xf32>, vector<16x32xf32> -> vector<16x32xf32>
    %144 = arith.addf %138, %143 : vector<16x32xf32>
    %145 = vector.extract_strided_slice %114 {offsets = [1, 2, 0], sizes = [4, 4, 32], strides = [1, 1, 1]} : vector<6x6x32xf32> to vector<4x4x32xf32>
    %146 = vector.shape_cast %145 : vector<4x4x32xf32> to vector<16x32xf32>
    %c2_150 = arith.constant 2 : index
    %c1_151 = arith.constant 1 : index
    %c2_152 = arith.constant 2 : index
    %c0_153 = arith.constant 0 : index
    %c0_154 = arith.constant 0 : index
    %147 = vector.load %arg5[%c2_150, %c1_151, %c2_152, %c0_153, %c0_154] : memref<3x3x3x32x32xf32, #tpu.memory_space<vmem>>, vector<1x1x1x32x32xf32>
    %148 = vector.shape_cast %147 : vector<1x1x1x32x32xf32> to vector<32x32xf32>
    %cst_155 = arith.constant dense<0.000000e+00> : vector<16x32xf32>
    %149 = tpu.matmul %146, %148, %cst_155 {dimension_numbers = #tpu.dot_dimension_numbers<[1], [0], [0], [1], [0, 0, 1, 1], [], []>} : vector<16x32xf32>, vector<32x32xf32>, vector<16x32xf32> -> vector<16x32xf32>
    %150 = arith.addf %144, %149 : vector<16x32xf32>
    %151 = vector.extract_strided_slice %114 {offsets = [2, 0, 0], sizes = [4, 4, 32], strides = [1, 1, 1]} : vector<6x6x32xf32> to vector<4x4x32xf32>
    %152 = vector.shape_cast %151 : vector<4x4x32xf32> to vector<16x32xf32>
    %c2_156 = arith.constant 2 : index
    %c2_157 = arith.constant 2 : index
    %c0_158 = arith.constant 0 : index
    %c0_159 = arith.constant 0 : index
    %c0_160 = arith.constant 0 : index
    %153 = vector.load %arg5[%c2_156, %c2_157, %c0_158, %c0_159, %c0_160] : memref<3x3x3x32x32xf32, #tpu.memory_space<vmem>>, vector<1x1x1x32x32xf32>
    %154 = vector.shape_cast %153 : vector<1x1x1x32x32xf32> to vector<32x32xf32>
    %cst_161 = arith.constant dense<0.000000e+00> : vector<16x32xf32>
    %155 = tpu.matmul %152, %154, %cst_161 {dimension_numbers = #tpu.dot_dimension_numbers<[1], [0], [0], [1], [0, 0, 1, 1], [], []>} : vector<16x32xf32>, vector<32x32xf32>, vector<16x32xf32> -> vector<16x32xf32>
    %156 = arith.addf %150, %155 : vector<16x32xf32>
    %157 = vector.extract_strided_slice %114 {offsets = [2, 1, 0], sizes = [4, 4, 32], strides = [1, 1, 1]} : vector<6x6x32xf32> to vector<4x4x32xf32>
    %158 = vector.shape_cast %157 : vector<4x4x32xf32> to vector<16x32xf32>
    %c2_162 = arith.constant 2 : index
    %c2_163 = arith.constant 2 : index
    %c1_164 = arith.constant 1 : index
    %c0_165 = arith.constant 0 : index
    %c0_166 = arith.constant 0 : index
    %159 = vector.load %arg5[%c2_162, %c2_163, %c1_164, %c0_165, %c0_166] : memref<3x3x3x32x32xf32, #tpu.memory_space<vmem>>, vector<1x1x1x32x32xf32>
    %160 = vector.shape_cast %159 : vector<1x1x1x32x32xf32> to vector<32x32xf32>
    %cst_167 = arith.constant dense<0.000000e+00> : vector<16x32xf32>
    %161 = tpu.matmul %158, %160, %cst_167 {dimension_numbers = #tpu.dot_dimension_numbers<[1], [0], [0], [1], [0, 0, 1, 1], [], []>} : vector<16x32xf32>, vector<32x32xf32>, vector<16x32xf32> -> vector<16x32xf32>
    %162 = arith.addf %156, %161 : vector<16x32xf32>
    %163 = vector.extract_strided_slice %114 {offsets = [2, 2, 0], sizes = [4, 4, 32], strides = [1, 1, 1]} : vector<6x6x32xf32> to vector<4x4x32xf32>
    %164 = vector.shape_cast %163 : vector<4x4x32xf32> to vector<16x32xf32>
    %c2_168 = arith.constant 2 : index
    %c2_169 = arith.constant 2 : index
    %c2_170 = arith.constant 2 : index
    %c0_171 = arith.constant 0 : index
    %c0_172 = arith.constant 0 : index
    %165 = vector.load %arg5[%c2_168, %c2_169, %c2_170, %c0_171, %c0_172] : memref<3x3x3x32x32xf32, #tpu.memory_space<vmem>>, vector<1x1x1x32x32xf32>
    %166 = vector.shape_cast %165 : vector<1x1x1x32x32xf32> to vector<32x32xf32>
    %cst_173 = arith.constant dense<0.000000e+00> : vector<16x32xf32>
    %167 = tpu.matmul %164, %166, %cst_173 {dimension_numbers = #tpu.dot_dimension_numbers<[1], [0], [0], [1], [0, 0, 1, 1], [], []>} : vector<16x32xf32>, vector<32x32xf32>, vector<16x32xf32> -> vector<16x32xf32>
    %168 = arith.addf %162, %167 : vector<16x32xf32>
    %c0_174 = arith.constant 0 : index
    %c0_175 = arith.constant 0 : index
    %169 = vector.load %arg6[%c0_174, %c0_175] : memref<1x32xf32, #tpu.memory_space<vmem>>, vector<1x32xf32>
    %170 = vector.broadcast %169 : vector<1x32xf32> to vector<16x32xf32>
    %171 = arith.mulf %168, %170 : vector<16x32xf32>
    %c0_176 = arith.constant 0 : index
    %c0_177 = arith.constant 0 : index
    %172 = vector.load %arg7[%c0_176, %c0_177] : memref<1x32xf32, #tpu.memory_space<vmem>>, vector<1x32xf32>
    %173 = vector.broadcast %172 : vector<1x32xf32> to vector<16x32xf32>
    %174 = arith.addf %171, %173 : vector<16x32xf32>
    %cst_178 = arith.constant 0.000000e+00 : f32
    %175 = vector.broadcast %cst_178 : f32 to vector<16x32xf32>
    %176 = arith.maximumf %174, %175 : vector<16x32xf32>
    %177 = vector.shape_cast %176 : vector<16x32xf32> to vector<1x1x16x32xf32>
    %c0_179 = arith.constant 0 : index
    %c0_180 = arith.constant 0 : index
    %c0_181 = arith.constant 0 : index
    %c0_182 = arith.constant 0 : index
    %178 = vector.load %arg8[%c0_179, %c0_180, %c0_181, %c0_182] : memref<1x1x16x32xf32, #tpu.memory_space<vmem>>, vector<1x1x16x32xf32>
    tpu.vector_store %arg8[%c0_179, %c0_180, %c0_181, %c0_182], %177 {strides = array<i32>} : memref<1x1x16x32xf32, #tpu.memory_space<vmem>>, vector<1x1x16x32xf32>,
    return
  }
  func.func @transform_0(%arg0: i32, %arg1: i32) -> (i32, i32, i32, i32, i32) {
    %c0_i32 = arith.constant 0 : i32
    %0 = arith.addi %arg1, %c0_i32 : i32
    %c0_i32_0 = arith.constant 0 : i32
    %c0_i32_1 = arith.constant 0 : i32
    %c0_i32_2 = arith.constant 0 : i32
    %c0_i32_3 = arith.constant 0 : i32
    return %arg0, %0, %c0_i32_0, %c0_i32_1, %c0_i32_2 : i32, i32, i32, i32, i32
  }
  func.func @transform_1(%arg0: i32, %arg1: i32) -> (i32, i32, i32, i32, i32) {
    %c1_i32 = arith.constant 1 : i32
    %0 = arith.addi %arg1, %c1_i32 : i32
    %c0_i32 = arith.constant 0 : i32
    %c0_i32_0 = arith.constant 0 : i32
    %c0_i32_1 = arith.constant 0 : i32
    %c0_i32_2 = arith.constant 0 : i32
    return %arg0, %0, %c0_i32, %c0_i32_0, %c0_i32_1 : i32, i32, i32, i32, i32
  }
  func.func @transform_2(%arg0: i32, %arg1: i32) -> (i32, i32, i32, i32, i32) {
    %c2_i32 = arith.constant 2 : i32
    %0 = arith.addi %arg1, %c2_i32 : i32
    %c0_i32 = arith.constant 0 : i32
    %c0_i32_0 = arith.constant 0 : i32
    %c0_i32_1 = arith.constant 0 : i32
    %c0_i32_2 = arith.constant 0 : i32
    return %arg0, %0, %c0_i32, %c0_i32_0, %c0_i32_1 : i32, i32, i32, i32, i32
  }
  func.func @transform_3(%arg0: i32, %arg1: i32) -> (i32, i32, i32, i32, i32) {
    %c0_i32 = arith.constant 0 : i32
    %c0_i32_0 = arith.constant 0 : i32
    %c0_i32_1 = arith.constant 0 : i32
    %c0_i32_2 = arith.constant 0 : i32
    %c0_i32_3 = arith.constant 0 : i32
    %c0_i32_4 = arith.constant 0 : i32
    return %c0_i32, %c0_i32_0, %c0_i32_1, %c0_i32_2, %c0_i32_3 : i32, i32, i32, i32, i32
  }
  func.func @transform_4(%arg0: i32, %arg1: i32) -> (i32, i32) {
    %c0_i32 = arith.constant 0 : i32
    %c0_i32_0 = arith.constant 0 : i32
    %c0_i32_1 = arith.constant 0 : i32
    return %c0_i32, %c0_i32_0 : i32, i32
  }
  func.func @transform_5(%arg0: i32, %arg1: i32) -> (i32, i32) {
    %c0_i32 = arith.constant 0 : i32
    %c0_i32_0 = arith.constant 0 : i32
    %c0_i32_1 = arith.constant 0 : i32
    return %c0_i32, %c0_i32_0 : i32, i32
  }
  func.func @transform_6(%arg0: i32, %arg1: i32) -> (i32, i32, i32, i32) {
    %c0_i32 = arith.constant 0 : i32
    %c0_i32_0 = arith.constant 0 : i32
    %c0_i32_1 = arith.constant 0 : i32
    return %arg0, %arg1, %c0_i32, %c0_i32_0 : i32, i32, i32, i32
  }
}

module attributes {stable_mosaic.version = 11 : i64} {
  func.func @_tail_kernel(%arg0: i32, %arg1: memref<128x32xf32, #tpu.memory_space<vmem>>, %arg2: memref<128x128xf32, #tpu.memory_space<vmem>>, %arg3: memref<32x128xf32, #tpu.memory_space<vmem>>, %arg4: memref<128x128xf32, #tpu.memory_space<vmem>>, %arg5: memref<128x128xf32, #tpu.memory_space<vmem>>, %arg6: memref<128x128xf32, #tpu.memory_space<vmem>>, %arg7: memref<128x128xf32, #tpu.memory_space<vmem>>, %arg8: memref<16x128xf32, #tpu.memory_space<vmem>>, %arg9: memref<128x128xf32, #tpu.memory_space<vmem>>) attributes {dimension_semantics = [#tpu.dimension_semantics<parallel>], iteration_bounds = array<i64: 1>, scalar_prefetch = 0 : i64, scratch_operands = 0 : i64, tpu.core_type = #tpu.core_type<tc>, window_params = [{transform_indices = @transform_0, window_bounds = array<i64: 128, 32>}, {transform_indices = @transform_1, window_bounds = array<i64: 128, 128>}, {pipeline_mode = #tpu.pipeline_mode<synchronous>, transform_indices = @transform_2, window_bounds = array<i64: 32, 128>}, {pipeline_mode = #tpu.pipeline_mode<synchronous>, transform_indices = @transform_3, window_bounds = array<i64: 128, 128>}, {pipeline_mode = #tpu.pipeline_mode<synchronous>, transform_indices = @transform_4, window_bounds = array<i64: 128, 128>}, {pipeline_mode = #tpu.pipeline_mode<synchronous>, transform_indices = @transform_5, window_bounds = array<i64: 128, 128>}, {pipeline_mode = #tpu.pipeline_mode<synchronous>, transform_indices = @transform_6, window_bounds = array<i64: 128, 128>}, {pipeline_mode = #tpu.pipeline_mode<synchronous>, transform_indices = @transform_7, window_bounds = array<i64: 16, 128>}, {transform_indices = @transform_8, window_bounds = array<i64: 128, 128>}]} {
    %c0 = arith.constant 0 : index
    %c0_0 = arith.constant 0 : index
    %0 = vector.load %arg8[%c0, %c0_0] : memref<16x128xf32, #tpu.memory_space<vmem>>, vector<16x128xf32>
    %1 = vector.extract_strided_slice %0 {offsets = [0, 0], sizes = [1, 128], strides = [1, 1]} : vector<16x128xf32> to vector<1x128xf32>
    %2 = vector.extract_strided_slice %0 {offsets = [1, 0], sizes = [1, 128], strides = [1, 1]} : vector<16x128xf32> to vector<1x128xf32>
    %3 = vector.extract_strided_slice %0 {offsets = [2, 0], sizes = [1, 128], strides = [1, 1]} : vector<16x128xf32> to vector<1x128xf32>
    %4 = vector.extract_strided_slice %0 {offsets = [3, 0], sizes = [1, 128], strides = [1, 1]} : vector<16x128xf32> to vector<1x128xf32>
    %5 = vector.extract_strided_slice %0 {offsets = [4, 0], sizes = [1, 128], strides = [1, 1]} : vector<16x128xf32> to vector<1x128xf32>
    %6 = vector.extract_strided_slice %0 {offsets = [5, 0], sizes = [1, 128], strides = [1, 1]} : vector<16x128xf32> to vector<1x128xf32>
    %7 = vector.extract_strided_slice %0 {offsets = [6, 0], sizes = [1, 128], strides = [1, 1]} : vector<16x128xf32> to vector<1x128xf32>
    %8 = vector.extract_strided_slice %0 {offsets = [7, 0], sizes = [1, 128], strides = [1, 1]} : vector<16x128xf32> to vector<1x128xf32>
    %9 = vector.extract_strided_slice %0 {offsets = [8, 0], sizes = [1, 128], strides = [1, 1]} : vector<16x128xf32> to vector<1x128xf32>
    %c0_1 = arith.constant 0 : index
    %c0_2 = arith.constant 0 : index
    %10 = vector.load %arg1[%c0_1, %c0_2] : memref<128x32xf32, #tpu.memory_space<vmem>>, vector<128x32xf32>
    %c0_3 = arith.constant 0 : index
    %c0_4 = arith.constant 0 : index
    %11 = vector.load %arg3[%c0_3, %c0_4] : memref<32x128xf32, #tpu.memory_space<vmem>>, vector<32x128xf32>
    %cst = arith.constant dense<0.000000e+00> : vector<128x128xf32>
    %12 = tpu.matmul %10, %11, %cst {dimension_numbers = #tpu.dot_dimension_numbers<[1], [0], [0], [1], [0, 0, 1, 1], [], []>} : vector<128x32xf32>, vector<32x128xf32>, vector<128x128xf32> -> vector<128x128xf32>
    %13 = vector.broadcast %1 : vector<1x128xf32> to vector<128x128xf32>
    %14 = arith.mulf %12, %13 : vector<128x128xf32>
    %15 = vector.broadcast %2 : vector<1x128xf32> to vector<128x128xf32>
    %16 = arith.addf %14, %15 : vector<128x128xf32>
    %cst_5 = arith.constant 0.000000e+00 : f32
    %17 = vector.broadcast %cst_5 : f32 to vector<128x128xf32>
    %18 = arith.maximumf %16, %17 : vector<128x128xf32>
    %c0_6 = arith.constant 0 : index
    %c0_7 = arith.constant 0 : index
    %19 = vector.load %arg4[%c0_6, %c0_7] : memref<128x128xf32, #tpu.memory_space<vmem>>, vector<128x128xf32>
    %cst_8 = arith.constant dense<0.000000e+00> : vector<128x128xf32>
    %20 = tpu.matmul %18, %19, %cst_8 {dimension_numbers = #tpu.dot_dimension_numbers<[1], [0], [0], [1], [0, 0, 1, 1], [], []>} : vector<128x128xf32>, vector<128x128xf32>, vector<128x128xf32> -> vector<128x128xf32>
    %21 = vector.broadcast %7 : vector<1x128xf32> to vector<128x128xf32>
    %22 = arith.mulf %20, %21 : vector<128x128xf32>
    %23 = vector.broadcast %8 : vector<1x128xf32> to vector<128x128xf32>
    %24 = arith.addf %22, %23 : vector<128x128xf32>
    %cst_9 = arith.constant 0.000000e+00 : f32
    %25 = vector.broadcast %cst_9 : f32 to vector<128x128xf32>
    %26 = arith.maximumf %24, %25 : vector<128x128xf32>
    %c0_10 = arith.constant 0 : index
    %c0_11 = arith.constant 0 : index
    %27 = vector.load %arg5[%c0_10, %c0_11] : memref<128x128xf32, #tpu.memory_space<vmem>>, vector<128x128xf32>
    %cst_12 = arith.constant dense<0.000000e+00> : vector<128x128xf32>
    %28 = tpu.matmul %26, %27, %cst_12 {dimension_numbers = #tpu.dot_dimension_numbers<[1], [0], [0], [1], [0, 0, 1, 1], [], []>} : vector<128x128xf32>, vector<128x128xf32>, vector<128x128xf32> -> vector<128x128xf32>
    %29 = vector.broadcast %9 : vector<1x128xf32> to vector<128x128xf32>
    %30 = arith.addf %28, %29 : vector<128x128xf32>
    %31 = arith.negf %30 : vector<128x128xf32>
    %32 = math.exp %31 : vector<128x128xf32>
    %cst_13 = arith.constant 1.000000e+00 : f32
    %33 = vector.broadcast %cst_13 : f32 to vector<128x128xf32>
    %34 = arith.addf %33, %32 : vector<128x128xf32>
    %35 = arith.divf %33, %34 : vector<128x128xf32>
    %c0_14 = arith.constant 0 : index
    %c0_15 = arith.constant 0 : index
    %36 = vector.load %arg2[%c0_14, %c0_15] : memref<128x128xf32, #tpu.memory_space<vmem>>, vector<128x128xf32>
    %37 = arith.mulf %35, %36 : vector<128x128xf32>
    %c0_16 = arith.constant 0 : index
    %c0_17 = arith.constant 0 : index
    %38 = vector.load %arg6[%c0_16, %c0_17] : memref<128x128xf32, #tpu.memory_space<vmem>>, vector<128x128xf32>
    %cst_18 = arith.constant dense<0.000000e+00> : vector<128x128xf32>
    %39 = tpu.matmul %18, %38, %cst_18 {dimension_numbers = #tpu.dot_dimension_numbers<[1], [0], [0], [1], [0, 0, 1, 1], [], []>} : vector<128x128xf32>, vector<128x128xf32>, vector<128x128xf32> -> vector<128x128xf32>
    %c0_19 = arith.constant 0 : index
    %c0_20 = arith.constant 0 : index
    %40 = vector.load %arg7[%c0_19, %c0_20] : memref<128x128xf32, #tpu.memory_space<vmem>>, vector<128x128xf32>
    %cst_21 = arith.constant dense<0.000000e+00> : vector<128x128xf32>
    %41 = tpu.matmul %37, %40, %cst_21 {dimension_numbers = #tpu.dot_dimension_numbers<[1], [0], [0], [1], [0, 0, 1, 1], [], []>} : vector<128x128xf32>, vector<128x128xf32>, vector<128x128xf32> -> vector<128x128xf32>
    %42 = arith.addf %39, %41 : vector<128x128xf32>
    %43 = vector.broadcast %3 : vector<1x128xf32> to vector<128x128xf32>
    %44 = arith.mulf %42, %43 : vector<128x128xf32>
    %45 = vector.broadcast %4 : vector<1x128xf32> to vector<128x128xf32>
    %46 = arith.addf %44, %45 : vector<128x128xf32>
    %cst_22 = arith.constant 0.000000e+00 : f32
    %47 = vector.broadcast %cst_22 : f32 to vector<128x128xf32>
    %48 = arith.maximumf %46, %47 : vector<128x128xf32>
    %49 = vector.broadcast %5 : vector<1x128xf32> to vector<128x128xf32>
    %50 = arith.mulf %48, %49 : vector<128x128xf32>
    %51 = vector.broadcast %6 : vector<1x128xf32> to vector<128x128xf32>
    %52 = arith.addf %50, %51 : vector<128x128xf32>
    %cst_23 = arith.constant 0.000000e+00 : f32
    %53 = vector.broadcast %cst_23 : f32 to vector<128x128xf32>
    %54 = arith.maximumf %52, %53 : vector<128x128xf32>
    %c0_24 = arith.constant 0 : index
    %c0_25 = arith.constant 0 : index
    %55 = vector.load %arg9[%c0_24, %c0_25] : memref<128x128xf32, #tpu.memory_space<vmem>>, vector<128x128xf32>
    tpu.vector_store %arg9[%c0_24, %c0_25], %54 {strides = array<i32>} : memref<128x128xf32, #tpu.memory_space<vmem>>, vector<128x128xf32>,
    return
  }
  func.func @transform_0(%arg0: i32) -> (i32, i32) {
    %c0_i32 = arith.constant 0 : i32
    %c0_i32_0 = arith.constant 0 : i32
    return %arg0, %c0_i32 : i32, i32
  }
  func.func @transform_1(%arg0: i32) -> (i32, i32) {
    %c0_i32 = arith.constant 0 : i32
    %c0_i32_0 = arith.constant 0 : i32
    return %arg0, %c0_i32 : i32, i32
  }
  func.func @transform_2(%arg0: i32) -> (i32, i32) {
    %c0_i32 = arith.constant 0 : i32
    %c0_i32_0 = arith.constant 0 : i32
    %c0_i32_1 = arith.constant 0 : i32
    return %c0_i32, %c0_i32_0 : i32, i32
  }
  func.func @transform_3(%arg0: i32) -> (i32, i32) {
    %c0_i32 = arith.constant 0 : i32
    %c0_i32_0 = arith.constant 0 : i32
    %c0_i32_1 = arith.constant 0 : i32
    return %c0_i32, %c0_i32_0 : i32, i32
  }
  func.func @transform_4(%arg0: i32) -> (i32, i32) {
    %c0_i32 = arith.constant 0 : i32
    %c0_i32_0 = arith.constant 0 : i32
    %c0_i32_1 = arith.constant 0 : i32
    return %c0_i32, %c0_i32_0 : i32, i32
  }
  func.func @transform_5(%arg0: i32) -> (i32, i32) {
    %c0_i32 = arith.constant 0 : i32
    %c0_i32_0 = arith.constant 0 : i32
    %c0_i32_1 = arith.constant 0 : i32
    return %c0_i32, %c0_i32_0 : i32, i32
  }
  func.func @transform_6(%arg0: i32) -> (i32, i32) {
    %c0_i32 = arith.constant 0 : i32
    %c0_i32_0 = arith.constant 0 : i32
    %c0_i32_1 = arith.constant 0 : i32
    return %c0_i32, %c0_i32_0 : i32, i32
  }
  func.func @transform_7(%arg0: i32) -> (i32, i32) {
    %c0_i32 = arith.constant 0 : i32
    %c0_i32_0 = arith.constant 0 : i32
    %c0_i32_1 = arith.constant 0 : i32
    return %c0_i32, %c0_i32_0 : i32, i32
  }
  func.func @transform_8(%arg0: i32) -> (i32, i32) {
    %c0_i32 = arith.constant 0 : i32
    %c0_i32_0 = arith.constant 0 : i32
    return %arg0, %c0_i32 : i32, i32
  }
}

module attributes {stable_mosaic.version = 11 : i64} {
  func.func @_conv3_bn_relu_kernel(%arg0: i32, %arg1: i32, %arg2: memref<1x1x6x6x128xf32, #tpu.memory_space<vmem>>, %arg3: memref<1x1x6x6x128xf32, #tpu.memory_space<vmem>>, %arg4: memref<1x1x6x6x128xf32, #tpu.memory_space<vmem>>, %arg5: memref<3x3x3x128x128xf32, #tpu.memory_space<vmem>>, %arg6: memref<1x128xf32, #tpu.memory_space<vmem>>, %arg7: memref<1x128xf32, #tpu.memory_space<vmem>>, %arg8: memref<1x1x16x128xf32, #tpu.memory_space<vmem>>) attributes {dimension_semantics = [#tpu.dimension_semantics<parallel>, #tpu.dimension_semantics<parallel>], iteration_bounds = array<i64: 2, 4>, scalar_prefetch = 0 : i64, scratch_operands = 0 : i64, tpu.core_type = #tpu.core_type<tc>, window_params = [{transform_indices = @transform_0, window_bounds = array<i64: 1, 1, 6, 6, 128>}, {transform_indices = @transform_1, window_bounds = array<i64: 1, 1, 6, 6, 128>}, {transform_indices = @transform_2, window_bounds = array<i64: 1, 1, 6, 6, 128>}, {pipeline_mode = #tpu.pipeline_mode<synchronous>, transform_indices = @transform_3, window_bounds = array<i64: 3, 3, 3, 128, 128>}, {pipeline_mode = #tpu.pipeline_mode<synchronous>, transform_indices = @transform_4, window_bounds = array<i64: 1, 128>}, {pipeline_mode = #tpu.pipeline_mode<synchronous>, transform_indices = @transform_5, window_bounds = array<i64: 1, 128>}, {transform_indices = @transform_6, window_bounds = array<i64: 1, 1, 16, 128>}]} {
    %cst = arith.constant 0.000000e+00 : f32
    %0 = vector.broadcast %cst : f32 to vector<16x128xf32>
    %c0 = arith.constant 0 : index
    %c0_0 = arith.constant 0 : index
    %c0_1 = arith.constant 0 : index
    %c0_2 = arith.constant 0 : index
    %c0_3 = arith.constant 0 : index
    %1 = vector.load %arg2[%c0, %c0_0, %c0_1, %c0_2, %c0_3] : memref<1x1x6x6x128xf32, #tpu.memory_space<vmem>>, vector<1x1x6x6x128xf32>
    %2 = vector.shape_cast %1 : vector<1x1x6x6x128xf32> to vector<6x6x128xf32>
    %3 = vector.extract_strided_slice %2 {offsets = [0, 0, 0], sizes = [4, 4, 128], strides = [1, 1, 1]} : vector<6x6x128xf32> to vector<4x4x128xf32>
    %4 = vector.shape_cast %3 : vector<4x4x128xf32> to vector<16x128xf32>
    %c0_4 = arith.constant 0 : index
    %c0_5 = arith.constant 0 : index
    %c0_6 = arith.constant 0 : index
    %c0_7 = arith.constant 0 : index
    %c0_8 = arith.constant 0 : index
    %5 = vector.load %arg5[%c0_4, %c0_5, %c0_6, %c0_7, %c0_8] : memref<3x3x3x128x128xf32, #tpu.memory_space<vmem>>, vector<1x1x1x128x128xf32>
    %6 = vector.shape_cast %5 : vector<1x1x1x128x128xf32> to vector<128x128xf32>
    %cst_9 = arith.constant dense<0.000000e+00> : vector<16x128xf32>
    %7 = tpu.matmul %4, %6, %cst_9 {dimension_numbers = #tpu.dot_dimension_numbers<[1], [0], [0], [1], [0, 0, 1, 1], [], []>} : vector<16x128xf32>, vector<128x128xf32>, vector<16x128xf32> -> vector<16x128xf32>
    %8 = arith.addf %0, %7 : vector<16x128xf32>
    %9 = vector.extract_strided_slice %2 {offsets = [0, 1, 0], sizes = [4, 4, 128], strides = [1, 1, 1]} : vector<6x6x128xf32> to vector<4x4x128xf32>
    %10 = vector.shape_cast %9 : vector<4x4x128xf32> to vector<16x128xf32>
    %c0_10 = arith.constant 0 : index
    %c0_11 = arith.constant 0 : index
    %c1 = arith.constant 1 : index
    %c0_12 = arith.constant 0 : index
    %c0_13 = arith.constant 0 : index
    %11 = vector.load %arg5[%c0_10, %c0_11, %c1, %c0_12, %c0_13] : memref<3x3x3x128x128xf32, #tpu.memory_space<vmem>>, vector<1x1x1x128x128xf32>
    %12 = vector.shape_cast %11 : vector<1x1x1x128x128xf32> to vector<128x128xf32>
    %cst_14 = arith.constant dense<0.000000e+00> : vector<16x128xf32>
    %13 = tpu.matmul %10, %12, %cst_14 {dimension_numbers = #tpu.dot_dimension_numbers<[1], [0], [0], [1], [0, 0, 1, 1], [], []>} : vector<16x128xf32>, vector<128x128xf32>, vector<16x128xf32> -> vector<16x128xf32>
    %14 = arith.addf %8, %13 : vector<16x128xf32>
    %15 = vector.extract_strided_slice %2 {offsets = [0, 2, 0], sizes = [4, 4, 128], strides = [1, 1, 1]} : vector<6x6x128xf32> to vector<4x4x128xf32>
    %16 = vector.shape_cast %15 : vector<4x4x128xf32> to vector<16x128xf32>
    %c0_15 = arith.constant 0 : index
    %c0_16 = arith.constant 0 : index
    %c2 = arith.constant 2 : index
    %c0_17 = arith.constant 0 : index
    %c0_18 = arith.constant 0 : index
    %17 = vector.load %arg5[%c0_15, %c0_16, %c2, %c0_17, %c0_18] : memref<3x3x3x128x128xf32, #tpu.memory_space<vmem>>, vector<1x1x1x128x128xf32>
    %18 = vector.shape_cast %17 : vector<1x1x1x128x128xf32> to vector<128x128xf32>
    %cst_19 = arith.constant dense<0.000000e+00> : vector<16x128xf32>
    %19 = tpu.matmul %16, %18, %cst_19 {dimension_numbers = #tpu.dot_dimension_numbers<[1], [0], [0], [1], [0, 0, 1, 1], [], []>} : vector<16x128xf32>, vector<128x128xf32>, vector<16x128xf32> -> vector<16x128xf32>
    %20 = arith.addf %14, %19 : vector<16x128xf32>
    %21 = vector.extract_strided_slice %2 {offsets = [1, 0, 0], sizes = [4, 4, 128], strides = [1, 1, 1]} : vector<6x6x128xf32> to vector<4x4x128xf32>
    %22 = vector.shape_cast %21 : vector<4x4x128xf32> to vector<16x128xf32>
    %c0_20 = arith.constant 0 : index
    %c1_21 = arith.constant 1 : index
    %c0_22 = arith.constant 0 : index
    %c0_23 = arith.constant 0 : index
    %c0_24 = arith.constant 0 : index
    %23 = vector.load %arg5[%c0_20, %c1_21, %c0_22, %c0_23, %c0_24] : memref<3x3x3x128x128xf32, #tpu.memory_space<vmem>>, vector<1x1x1x128x128xf32>
    %24 = vector.shape_cast %23 : vector<1x1x1x128x128xf32> to vector<128x128xf32>
    %cst_25 = arith.constant dense<0.000000e+00> : vector<16x128xf32>
    %25 = tpu.matmul %22, %24, %cst_25 {dimension_numbers = #tpu.dot_dimension_numbers<[1], [0], [0], [1], [0, 0, 1, 1], [], []>} : vector<16x128xf32>, vector<128x128xf32>, vector<16x128xf32> -> vector<16x128xf32>
    %26 = arith.addf %20, %25 : vector<16x128xf32>
    %27 = vector.extract_strided_slice %2 {offsets = [1, 1, 0], sizes = [4, 4, 128], strides = [1, 1, 1]} : vector<6x6x128xf32> to vector<4x4x128xf32>
    %28 = vector.shape_cast %27 : vector<4x4x128xf32> to vector<16x128xf32>
    %c0_26 = arith.constant 0 : index
    %c1_27 = arith.constant 1 : index
    %c1_28 = arith.constant 1 : index
    %c0_29 = arith.constant 0 : index
    %c0_30 = arith.constant 0 : index
    %29 = vector.load %arg5[%c0_26, %c1_27, %c1_28, %c0_29, %c0_30] : memref<3x3x3x128x128xf32, #tpu.memory_space<vmem>>, vector<1x1x1x128x128xf32>
    %30 = vector.shape_cast %29 : vector<1x1x1x128x128xf32> to vector<128x128xf32>
    %cst_31 = arith.constant dense<0.000000e+00> : vector<16x128xf32>
    %31 = tpu.matmul %28, %30, %cst_31 {dimension_numbers = #tpu.dot_dimension_numbers<[1], [0], [0], [1], [0, 0, 1, 1], [], []>} : vector<16x128xf32>, vector<128x128xf32>, vector<16x128xf32> -> vector<16x128xf32>
    %32 = arith.addf %26, %31 : vector<16x128xf32>
    %33 = vector.extract_strided_slice %2 {offsets = [1, 2, 0], sizes = [4, 4, 128], strides = [1, 1, 1]} : vector<6x6x128xf32> to vector<4x4x128xf32>
    %34 = vector.shape_cast %33 : vector<4x4x128xf32> to vector<16x128xf32>
    %c0_32 = arith.constant 0 : index
    %c1_33 = arith.constant 1 : index
    %c2_34 = arith.constant 2 : index
    %c0_35 = arith.constant 0 : index
    %c0_36 = arith.constant 0 : index
    %35 = vector.load %arg5[%c0_32, %c1_33, %c2_34, %c0_35, %c0_36] : memref<3x3x3x128x128xf32, #tpu.memory_space<vmem>>, vector<1x1x1x128x128xf32>
    %36 = vector.shape_cast %35 : vector<1x1x1x128x128xf32> to vector<128x128xf32>
    %cst_37 = arith.constant dense<0.000000e+00> : vector<16x128xf32>
    %37 = tpu.matmul %34, %36, %cst_37 {dimension_numbers = #tpu.dot_dimension_numbers<[1], [0], [0], [1], [0, 0, 1, 1], [], []>} : vector<16x128xf32>, vector<128x128xf32>, vector<16x128xf32> -> vector<16x128xf32>
    %38 = arith.addf %32, %37 : vector<16x128xf32>
    %39 = vector.extract_strided_slice %2 {offsets = [2, 0, 0], sizes = [4, 4, 128], strides = [1, 1, 1]} : vector<6x6x128xf32> to vector<4x4x128xf32>
    %40 = vector.shape_cast %39 : vector<4x4x128xf32> to vector<16x128xf32>
    %c0_38 = arith.constant 0 : index
    %c2_39 = arith.constant 2 : index
    %c0_40 = arith.constant 0 : index
    %c0_41 = arith.constant 0 : index
    %c0_42 = arith.constant 0 : index
    %41 = vector.load %arg5[%c0_38, %c2_39, %c0_40, %c0_41, %c0_42] : memref<3x3x3x128x128xf32, #tpu.memory_space<vmem>>, vector<1x1x1x128x128xf32>
    %42 = vector.shape_cast %41 : vector<1x1x1x128x128xf32> to vector<128x128xf32>
    %cst_43 = arith.constant dense<0.000000e+00> : vector<16x128xf32>
    %43 = tpu.matmul %40, %42, %cst_43 {dimension_numbers = #tpu.dot_dimension_numbers<[1], [0], [0], [1], [0, 0, 1, 1], [], []>} : vector<16x128xf32>, vector<128x128xf32>, vector<16x128xf32> -> vector<16x128xf32>
    %44 = arith.addf %38, %43 : vector<16x128xf32>
    %45 = vector.extract_strided_slice %2 {offsets = [2, 1, 0], sizes = [4, 4, 128], strides = [1, 1, 1]} : vector<6x6x128xf32> to vector<4x4x128xf32>
    %46 = vector.shape_cast %45 : vector<4x4x128xf32> to vector<16x128xf32>
    %c0_44 = arith.constant 0 : index
    %c2_45 = arith.constant 2 : index
    %c1_46 = arith.constant 1 : index
    %c0_47 = arith.constant 0 : index
    %c0_48 = arith.constant 0 : index
    %47 = vector.load %arg5[%c0_44, %c2_45, %c1_46, %c0_47, %c0_48] : memref<3x3x3x128x128xf32, #tpu.memory_space<vmem>>, vector<1x1x1x128x128xf32>
    %48 = vector.shape_cast %47 : vector<1x1x1x128x128xf32> to vector<128x128xf32>
    %cst_49 = arith.constant dense<0.000000e+00> : vector<16x128xf32>
    %49 = tpu.matmul %46, %48, %cst_49 {dimension_numbers = #tpu.dot_dimension_numbers<[1], [0], [0], [1], [0, 0, 1, 1], [], []>} : vector<16x128xf32>, vector<128x128xf32>, vector<16x128xf32> -> vector<16x128xf32>
    %50 = arith.addf %44, %49 : vector<16x128xf32>
    %51 = vector.extract_strided_slice %2 {offsets = [2, 2, 0], sizes = [4, 4, 128], strides = [1, 1, 1]} : vector<6x6x128xf32> to vector<4x4x128xf32>
    %52 = vector.shape_cast %51 : vector<4x4x128xf32> to vector<16x128xf32>
    %c0_50 = arith.constant 0 : index
    %c2_51 = arith.constant 2 : index
    %c2_52 = arith.constant 2 : index
    %c0_53 = arith.constant 0 : index
    %c0_54 = arith.constant 0 : index
    %53 = vector.load %arg5[%c0_50, %c2_51, %c2_52, %c0_53, %c0_54] : memref<3x3x3x128x128xf32, #tpu.memory_space<vmem>>, vector<1x1x1x128x128xf32>
    %54 = vector.shape_cast %53 : vector<1x1x1x128x128xf32> to vector<128x128xf32>
    %cst_55 = arith.constant dense<0.000000e+00> : vector<16x128xf32>
    %55 = tpu.matmul %52, %54, %cst_55 {dimension_numbers = #tpu.dot_dimension_numbers<[1], [0], [0], [1], [0, 0, 1, 1], [], []>} : vector<16x128xf32>, vector<128x128xf32>, vector<16x128xf32> -> vector<16x128xf32>
    %56 = arith.addf %50, %55 : vector<16x128xf32>
    %c0_56 = arith.constant 0 : index
    %c0_57 = arith.constant 0 : index
    %c0_58 = arith.constant 0 : index
    %c0_59 = arith.constant 0 : index
    %c0_60 = arith.constant 0 : index
    %57 = vector.load %arg3[%c0_56, %c0_57, %c0_58, %c0_59, %c0_60] : memref<1x1x6x6x128xf32, #tpu.memory_space<vmem>>, vector<1x1x6x6x128xf32>
    %58 = vector.shape_cast %57 : vector<1x1x6x6x128xf32> to vector<6x6x128xf32>
    %59 = vector.extract_strided_slice %58 {offsets = [0, 0, 0], sizes = [4, 4, 128], strides = [1, 1, 1]} : vector<6x6x128xf32> to vector<4x4x128xf32>
    %60 = vector.shape_cast %59 : vector<4x4x128xf32> to vector<16x128xf32>
    %c1_61 = arith.constant 1 : index
    %c0_62 = arith.constant 0 : index
    %c0_63 = arith.constant 0 : index
    %c0_64 = arith.constant 0 : index
    %c0_65 = arith.constant 0 : index
    %61 = vector.load %arg5[%c1_61, %c0_62, %c0_63, %c0_64, %c0_65] : memref<3x3x3x128x128xf32, #tpu.memory_space<vmem>>, vector<1x1x1x128x128xf32>
    %62 = vector.shape_cast %61 : vector<1x1x1x128x128xf32> to vector<128x128xf32>
    %cst_66 = arith.constant dense<0.000000e+00> : vector<16x128xf32>
    %63 = tpu.matmul %60, %62, %cst_66 {dimension_numbers = #tpu.dot_dimension_numbers<[1], [0], [0], [1], [0, 0, 1, 1], [], []>} : vector<16x128xf32>, vector<128x128xf32>, vector<16x128xf32> -> vector<16x128xf32>
    %64 = arith.addf %56, %63 : vector<16x128xf32>
    %65 = vector.extract_strided_slice %58 {offsets = [0, 1, 0], sizes = [4, 4, 128], strides = [1, 1, 1]} : vector<6x6x128xf32> to vector<4x4x128xf32>
    %66 = vector.shape_cast %65 : vector<4x4x128xf32> to vector<16x128xf32>
    %c1_67 = arith.constant 1 : index
    %c0_68 = arith.constant 0 : index
    %c1_69 = arith.constant 1 : index
    %c0_70 = arith.constant 0 : index
    %c0_71 = arith.constant 0 : index
    %67 = vector.load %arg5[%c1_67, %c0_68, %c1_69, %c0_70, %c0_71] : memref<3x3x3x128x128xf32, #tpu.memory_space<vmem>>, vector<1x1x1x128x128xf32>
    %68 = vector.shape_cast %67 : vector<1x1x1x128x128xf32> to vector<128x128xf32>
    %cst_72 = arith.constant dense<0.000000e+00> : vector<16x128xf32>
    %69 = tpu.matmul %66, %68, %cst_72 {dimension_numbers = #tpu.dot_dimension_numbers<[1], [0], [0], [1], [0, 0, 1, 1], [], []>} : vector<16x128xf32>, vector<128x128xf32>, vector<16x128xf32> -> vector<16x128xf32>
    %70 = arith.addf %64, %69 : vector<16x128xf32>
    %71 = vector.extract_strided_slice %58 {offsets = [0, 2, 0], sizes = [4, 4, 128], strides = [1, 1, 1]} : vector<6x6x128xf32> to vector<4x4x128xf32>
    %72 = vector.shape_cast %71 : vector<4x4x128xf32> to vector<16x128xf32>
    %c1_73 = arith.constant 1 : index
    %c0_74 = arith.constant 0 : index
    %c2_75 = arith.constant 2 : index
    %c0_76 = arith.constant 0 : index
    %c0_77 = arith.constant 0 : index
    %73 = vector.load %arg5[%c1_73, %c0_74, %c2_75, %c0_76, %c0_77] : memref<3x3x3x128x128xf32, #tpu.memory_space<vmem>>, vector<1x1x1x128x128xf32>
    %74 = vector.shape_cast %73 : vector<1x1x1x128x128xf32> to vector<128x128xf32>
    %cst_78 = arith.constant dense<0.000000e+00> : vector<16x128xf32>
    %75 = tpu.matmul %72, %74, %cst_78 {dimension_numbers = #tpu.dot_dimension_numbers<[1], [0], [0], [1], [0, 0, 1, 1], [], []>} : vector<16x128xf32>, vector<128x128xf32>, vector<16x128xf32> -> vector<16x128xf32>
    %76 = arith.addf %70, %75 : vector<16x128xf32>
    %77 = vector.extract_strided_slice %58 {offsets = [1, 0, 0], sizes = [4, 4, 128], strides = [1, 1, 1]} : vector<6x6x128xf32> to vector<4x4x128xf32>
    %78 = vector.shape_cast %77 : vector<4x4x128xf32> to vector<16x128xf32>
    %c1_79 = arith.constant 1 : index
    %c1_80 = arith.constant 1 : index
    %c0_81 = arith.constant 0 : index
    %c0_82 = arith.constant 0 : index
    %c0_83 = arith.constant 0 : index
    %79 = vector.load %arg5[%c1_79, %c1_80, %c0_81, %c0_82, %c0_83] : memref<3x3x3x128x128xf32, #tpu.memory_space<vmem>>, vector<1x1x1x128x128xf32>
    %80 = vector.shape_cast %79 : vector<1x1x1x128x128xf32> to vector<128x128xf32>
    %cst_84 = arith.constant dense<0.000000e+00> : vector<16x128xf32>
    %81 = tpu.matmul %78, %80, %cst_84 {dimension_numbers = #tpu.dot_dimension_numbers<[1], [0], [0], [1], [0, 0, 1, 1], [], []>} : vector<16x128xf32>, vector<128x128xf32>, vector<16x128xf32> -> vector<16x128xf32>
    %82 = arith.addf %76, %81 : vector<16x128xf32>
    %83 = vector.extract_strided_slice %58 {offsets = [1, 1, 0], sizes = [4, 4, 128], strides = [1, 1, 1]} : vector<6x6x128xf32> to vector<4x4x128xf32>
    %84 = vector.shape_cast %83 : vector<4x4x128xf32> to vector<16x128xf32>
    %c1_85 = arith.constant 1 : index
    %c1_86 = arith.constant 1 : index
    %c1_87 = arith.constant 1 : index
    %c0_88 = arith.constant 0 : index
    %c0_89 = arith.constant 0 : index
    %85 = vector.load %arg5[%c1_85, %c1_86, %c1_87, %c0_88, %c0_89] : memref<3x3x3x128x128xf32, #tpu.memory_space<vmem>>, vector<1x1x1x128x128xf32>
    %86 = vector.shape_cast %85 : vector<1x1x1x128x128xf32> to vector<128x128xf32>
    %cst_90 = arith.constant dense<0.000000e+00> : vector<16x128xf32>
    %87 = tpu.matmul %84, %86, %cst_90 {dimension_numbers = #tpu.dot_dimension_numbers<[1], [0], [0], [1], [0, 0, 1, 1], [], []>} : vector<16x128xf32>, vector<128x128xf32>, vector<16x128xf32> -> vector<16x128xf32>
    %88 = arith.addf %82, %87 : vector<16x128xf32>
    %89 = vector.extract_strided_slice %58 {offsets = [1, 2, 0], sizes = [4, 4, 128], strides = [1, 1, 1]} : vector<6x6x128xf32> to vector<4x4x128xf32>
    %90 = vector.shape_cast %89 : vector<4x4x128xf32> to vector<16x128xf32>
    %c1_91 = arith.constant 1 : index
    %c1_92 = arith.constant 1 : index
    %c2_93 = arith.constant 2 : index
    %c0_94 = arith.constant 0 : index
    %c0_95 = arith.constant 0 : index
    %91 = vector.load %arg5[%c1_91, %c1_92, %c2_93, %c0_94, %c0_95] : memref<3x3x3x128x128xf32, #tpu.memory_space<vmem>>, vector<1x1x1x128x128xf32>
    %92 = vector.shape_cast %91 : vector<1x1x1x128x128xf32> to vector<128x128xf32>
    %cst_96 = arith.constant dense<0.000000e+00> : vector<16x128xf32>
    %93 = tpu.matmul %90, %92, %cst_96 {dimension_numbers = #tpu.dot_dimension_numbers<[1], [0], [0], [1], [0, 0, 1, 1], [], []>} : vector<16x128xf32>, vector<128x128xf32>, vector<16x128xf32> -> vector<16x128xf32>
    %94 = arith.addf %88, %93 : vector<16x128xf32>
    %95 = vector.extract_strided_slice %58 {offsets = [2, 0, 0], sizes = [4, 4, 128], strides = [1, 1, 1]} : vector<6x6x128xf32> to vector<4x4x128xf32>
    %96 = vector.shape_cast %95 : vector<4x4x128xf32> to vector<16x128xf32>
    %c1_97 = arith.constant 1 : index
    %c2_98 = arith.constant 2 : index
    %c0_99 = arith.constant 0 : index
    %c0_100 = arith.constant 0 : index
    %c0_101 = arith.constant 0 : index
    %97 = vector.load %arg5[%c1_97, %c2_98, %c0_99, %c0_100, %c0_101] : memref<3x3x3x128x128xf32, #tpu.memory_space<vmem>>, vector<1x1x1x128x128xf32>
    %98 = vector.shape_cast %97 : vector<1x1x1x128x128xf32> to vector<128x128xf32>
    %cst_102 = arith.constant dense<0.000000e+00> : vector<16x128xf32>
    %99 = tpu.matmul %96, %98, %cst_102 {dimension_numbers = #tpu.dot_dimension_numbers<[1], [0], [0], [1], [0, 0, 1, 1], [], []>} : vector<16x128xf32>, vector<128x128xf32>, vector<16x128xf32> -> vector<16x128xf32>
    %100 = arith.addf %94, %99 : vector<16x128xf32>
    %101 = vector.extract_strided_slice %58 {offsets = [2, 1, 0], sizes = [4, 4, 128], strides = [1, 1, 1]} : vector<6x6x128xf32> to vector<4x4x128xf32>
    %102 = vector.shape_cast %101 : vector<4x4x128xf32> to vector<16x128xf32>
    %c1_103 = arith.constant 1 : index
    %c2_104 = arith.constant 2 : index
    %c1_105 = arith.constant 1 : index
    %c0_106 = arith.constant 0 : index
    %c0_107 = arith.constant 0 : index
    %103 = vector.load %arg5[%c1_103, %c2_104, %c1_105, %c0_106, %c0_107] : memref<3x3x3x128x128xf32, #tpu.memory_space<vmem>>, vector<1x1x1x128x128xf32>
    %104 = vector.shape_cast %103 : vector<1x1x1x128x128xf32> to vector<128x128xf32>
    %cst_108 = arith.constant dense<0.000000e+00> : vector<16x128xf32>
    %105 = tpu.matmul %102, %104, %cst_108 {dimension_numbers = #tpu.dot_dimension_numbers<[1], [0], [0], [1], [0, 0, 1, 1], [], []>} : vector<16x128xf32>, vector<128x128xf32>, vector<16x128xf32> -> vector<16x128xf32>
    %106 = arith.addf %100, %105 : vector<16x128xf32>
    %107 = vector.extract_strided_slice %58 {offsets = [2, 2, 0], sizes = [4, 4, 128], strides = [1, 1, 1]} : vector<6x6x128xf32> to vector<4x4x128xf32>
    %108 = vector.shape_cast %107 : vector<4x4x128xf32> to vector<16x128xf32>
    %c1_109 = arith.constant 1 : index
    %c2_110 = arith.constant 2 : index
    %c2_111 = arith.constant 2 : index
    %c0_112 = arith.constant 0 : index
    %c0_113 = arith.constant 0 : index
    %109 = vector.load %arg5[%c1_109, %c2_110, %c2_111, %c0_112, %c0_113] : memref<3x3x3x128x128xf32, #tpu.memory_space<vmem>>, vector<1x1x1x128x128xf32>
    %110 = vector.shape_cast %109 : vector<1x1x1x128x128xf32> to vector<128x128xf32>
    %cst_114 = arith.constant dense<0.000000e+00> : vector<16x128xf32>
    %111 = tpu.matmul %108, %110, %cst_114 {dimension_numbers = #tpu.dot_dimension_numbers<[1], [0], [0], [1], [0, 0, 1, 1], [], []>} : vector<16x128xf32>, vector<128x128xf32>, vector<16x128xf32> -> vector<16x128xf32>
    %112 = arith.addf %106, %111 : vector<16x128xf32>
    %c0_115 = arith.constant 0 : index
    %c0_116 = arith.constant 0 : index
    %c0_117 = arith.constant 0 : index
    %c0_118 = arith.constant 0 : index
    %c0_119 = arith.constant 0 : index
    %113 = vector.load %arg4[%c0_115, %c0_116, %c0_117, %c0_118, %c0_119] : memref<1x1x6x6x128xf32, #tpu.memory_space<vmem>>, vector<1x1x6x6x128xf32>
    %114 = vector.shape_cast %113 : vector<1x1x6x6x128xf32> to vector<6x6x128xf32>
    %115 = vector.extract_strided_slice %114 {offsets = [0, 0, 0], sizes = [4, 4, 128], strides = [1, 1, 1]} : vector<6x6x128xf32> to vector<4x4x128xf32>
    %116 = vector.shape_cast %115 : vector<4x4x128xf32> to vector<16x128xf32>
    %c2_120 = arith.constant 2 : index
    %c0_121 = arith.constant 0 : index
    %c0_122 = arith.constant 0 : index
    %c0_123 = arith.constant 0 : index
    %c0_124 = arith.constant 0 : index
    %117 = vector.load %arg5[%c2_120, %c0_121, %c0_122, %c0_123, %c0_124] : memref<3x3x3x128x128xf32, #tpu.memory_space<vmem>>, vector<1x1x1x128x128xf32>
    %118 = vector.shape_cast %117 : vector<1x1x1x128x128xf32> to vector<128x128xf32>
    %cst_125 = arith.constant dense<0.000000e+00> : vector<16x128xf32>
    %119 = tpu.matmul %116, %118, %cst_125 {dimension_numbers = #tpu.dot_dimension_numbers<[1], [0], [0], [1], [0, 0, 1, 1], [], []>} : vector<16x128xf32>, vector<128x128xf32>, vector<16x128xf32> -> vector<16x128xf32>
    %120 = arith.addf %112, %119 : vector<16x128xf32>
    %121 = vector.extract_strided_slice %114 {offsets = [0, 1, 0], sizes = [4, 4, 128], strides = [1, 1, 1]} : vector<6x6x128xf32> to vector<4x4x128xf32>
    %122 = vector.shape_cast %121 : vector<4x4x128xf32> to vector<16x128xf32>
    %c2_126 = arith.constant 2 : index
    %c0_127 = arith.constant 0 : index
    %c1_128 = arith.constant 1 : index
    %c0_129 = arith.constant 0 : index
    %c0_130 = arith.constant 0 : index
    %123 = vector.load %arg5[%c2_126, %c0_127, %c1_128, %c0_129, %c0_130] : memref<3x3x3x128x128xf32, #tpu.memory_space<vmem>>, vector<1x1x1x128x128xf32>
    %124 = vector.shape_cast %123 : vector<1x1x1x128x128xf32> to vector<128x128xf32>
    %cst_131 = arith.constant dense<0.000000e+00> : vector<16x128xf32>
    %125 = tpu.matmul %122, %124, %cst_131 {dimension_numbers = #tpu.dot_dimension_numbers<[1], [0], [0], [1], [0, 0, 1, 1], [], []>} : vector<16x128xf32>, vector<128x128xf32>, vector<16x128xf32> -> vector<16x128xf32>
    %126 = arith.addf %120, %125 : vector<16x128xf32>
    %127 = vector.extract_strided_slice %114 {offsets = [0, 2, 0], sizes = [4, 4, 128], strides = [1, 1, 1]} : vector<6x6x128xf32> to vector<4x4x128xf32>
    %128 = vector.shape_cast %127 : vector<4x4x128xf32> to vector<16x128xf32>
    %c2_132 = arith.constant 2 : index
    %c0_133 = arith.constant 0 : index
    %c2_134 = arith.constant 2 : index
    %c0_135 = arith.constant 0 : index
    %c0_136 = arith.constant 0 : index
    %129 = vector.load %arg5[%c2_132, %c0_133, %c2_134, %c0_135, %c0_136] : memref<3x3x3x128x128xf32, #tpu.memory_space<vmem>>, vector<1x1x1x128x128xf32>
    %130 = vector.shape_cast %129 : vector<1x1x1x128x128xf32> to vector<128x128xf32>
    %cst_137 = arith.constant dense<0.000000e+00> : vector<16x128xf32>
    %131 = tpu.matmul %128, %130, %cst_137 {dimension_numbers = #tpu.dot_dimension_numbers<[1], [0], [0], [1], [0, 0, 1, 1], [], []>} : vector<16x128xf32>, vector<128x128xf32>, vector<16x128xf32> -> vector<16x128xf32>
    %132 = arith.addf %126, %131 : vector<16x128xf32>
    %133 = vector.extract_strided_slice %114 {offsets = [1, 0, 0], sizes = [4, 4, 128], strides = [1, 1, 1]} : vector<6x6x128xf32> to vector<4x4x128xf32>
    %134 = vector.shape_cast %133 : vector<4x4x128xf32> to vector<16x128xf32>
    %c2_138 = arith.constant 2 : index
    %c1_139 = arith.constant 1 : index
    %c0_140 = arith.constant 0 : index
    %c0_141 = arith.constant 0 : index
    %c0_142 = arith.constant 0 : index
    %135 = vector.load %arg5[%c2_138, %c1_139, %c0_140, %c0_141, %c0_142] : memref<3x3x3x128x128xf32, #tpu.memory_space<vmem>>, vector<1x1x1x128x128xf32>
    %136 = vector.shape_cast %135 : vector<1x1x1x128x128xf32> to vector<128x128xf32>
    %cst_143 = arith.constant dense<0.000000e+00> : vector<16x128xf32>
    %137 = tpu.matmul %134, %136, %cst_143 {dimension_numbers = #tpu.dot_dimension_numbers<[1], [0], [0], [1], [0, 0, 1, 1], [], []>} : vector<16x128xf32>, vector<128x128xf32>, vector<16x128xf32> -> vector<16x128xf32>
    %138 = arith.addf %132, %137 : vector<16x128xf32>
    %139 = vector.extract_strided_slice %114 {offsets = [1, 1, 0], sizes = [4, 4, 128], strides = [1, 1, 1]} : vector<6x6x128xf32> to vector<4x4x128xf32>
    %140 = vector.shape_cast %139 : vector<4x4x128xf32> to vector<16x128xf32>
    %c2_144 = arith.constant 2 : index
    %c1_145 = arith.constant 1 : index
    %c1_146 = arith.constant 1 : index
    %c0_147 = arith.constant 0 : index
    %c0_148 = arith.constant 0 : index
    %141 = vector.load %arg5[%c2_144, %c1_145, %c1_146, %c0_147, %c0_148] : memref<3x3x3x128x128xf32, #tpu.memory_space<vmem>>, vector<1x1x1x128x128xf32>
    %142 = vector.shape_cast %141 : vector<1x1x1x128x128xf32> to vector<128x128xf32>
    %cst_149 = arith.constant dense<0.000000e+00> : vector<16x128xf32>
    %143 = tpu.matmul %140, %142, %cst_149 {dimension_numbers = #tpu.dot_dimension_numbers<[1], [0], [0], [1], [0, 0, 1, 1], [], []>} : vector<16x128xf32>, vector<128x128xf32>, vector<16x128xf32> -> vector<16x128xf32>
    %144 = arith.addf %138, %143 : vector<16x128xf32>
    %145 = vector.extract_strided_slice %114 {offsets = [1, 2, 0], sizes = [4, 4, 128], strides = [1, 1, 1]} : vector<6x6x128xf32> to vector<4x4x128xf32>
    %146 = vector.shape_cast %145 : vector<4x4x128xf32> to vector<16x128xf32>
    %c2_150 = arith.constant 2 : index
    %c1_151 = arith.constant 1 : index
    %c2_152 = arith.constant 2 : index
    %c0_153 = arith.constant 0 : index
    %c0_154 = arith.constant 0 : index
    %147 = vector.load %arg5[%c2_150, %c1_151, %c2_152, %c0_153, %c0_154] : memref<3x3x3x128x128xf32, #tpu.memory_space<vmem>>, vector<1x1x1x128x128xf32>
    %148 = vector.shape_cast %147 : vector<1x1x1x128x128xf32> to vector<128x128xf32>
    %cst_155 = arith.constant dense<0.000000e+00> : vector<16x128xf32>
    %149 = tpu.matmul %146, %148, %cst_155 {dimension_numbers = #tpu.dot_dimension_numbers<[1], [0], [0], [1], [0, 0, 1, 1], [], []>} : vector<16x128xf32>, vector<128x128xf32>, vector<16x128xf32> -> vector<16x128xf32>
    %150 = arith.addf %144, %149 : vector<16x128xf32>
    %151 = vector.extract_strided_slice %114 {offsets = [2, 0, 0], sizes = [4, 4, 128], strides = [1, 1, 1]} : vector<6x6x128xf32> to vector<4x4x128xf32>
    %152 = vector.shape_cast %151 : vector<4x4x128xf32> to vector<16x128xf32>
    %c2_156 = arith.constant 2 : index
    %c2_157 = arith.constant 2 : index
    %c0_158 = arith.constant 0 : index
    %c0_159 = arith.constant 0 : index
    %c0_160 = arith.constant 0 : index
    %153 = vector.load %arg5[%c2_156, %c2_157, %c0_158, %c0_159, %c0_160] : memref<3x3x3x128x128xf32, #tpu.memory_space<vmem>>, vector<1x1x1x128x128xf32>
    %154 = vector.shape_cast %153 : vector<1x1x1x128x128xf32> to vector<128x128xf32>
    %cst_161 = arith.constant dense<0.000000e+00> : vector<16x128xf32>
    %155 = tpu.matmul %152, %154, %cst_161 {dimension_numbers = #tpu.dot_dimension_numbers<[1], [0], [0], [1], [0, 0, 1, 1], [], []>} : vector<16x128xf32>, vector<128x128xf32>, vector<16x128xf32> -> vector<16x128xf32>
    %156 = arith.addf %150, %155 : vector<16x128xf32>
    %157 = vector.extract_strided_slice %114 {offsets = [2, 1, 0], sizes = [4, 4, 128], strides = [1, 1, 1]} : vector<6x6x128xf32> to vector<4x4x128xf32>
    %158 = vector.shape_cast %157 : vector<4x4x128xf32> to vector<16x128xf32>
    %c2_162 = arith.constant 2 : index
    %c2_163 = arith.constant 2 : index
    %c1_164 = arith.constant 1 : index
    %c0_165 = arith.constant 0 : index
    %c0_166 = arith.constant 0 : index
    %159 = vector.load %arg5[%c2_162, %c2_163, %c1_164, %c0_165, %c0_166] : memref<3x3x3x128x128xf32, #tpu.memory_space<vmem>>, vector<1x1x1x128x128xf32>
    %160 = vector.shape_cast %159 : vector<1x1x1x128x128xf32> to vector<128x128xf32>
    %cst_167 = arith.constant dense<0.000000e+00> : vector<16x128xf32>
    %161 = tpu.matmul %158, %160, %cst_167 {dimension_numbers = #tpu.dot_dimension_numbers<[1], [0], [0], [1], [0, 0, 1, 1], [], []>} : vector<16x128xf32>, vector<128x128xf32>, vector<16x128xf32> -> vector<16x128xf32>
    %162 = arith.addf %156, %161 : vector<16x128xf32>
    %163 = vector.extract_strided_slice %114 {offsets = [2, 2, 0], sizes = [4, 4, 128], strides = [1, 1, 1]} : vector<6x6x128xf32> to vector<4x4x128xf32>
    %164 = vector.shape_cast %163 : vector<4x4x128xf32> to vector<16x128xf32>
    %c2_168 = arith.constant 2 : index
    %c2_169 = arith.constant 2 : index
    %c2_170 = arith.constant 2 : index
    %c0_171 = arith.constant 0 : index
    %c0_172 = arith.constant 0 : index
    %165 = vector.load %arg5[%c2_168, %c2_169, %c2_170, %c0_171, %c0_172] : memref<3x3x3x128x128xf32, #tpu.memory_space<vmem>>, vector<1x1x1x128x128xf32>
    %166 = vector.shape_cast %165 : vector<1x1x1x128x128xf32> to vector<128x128xf32>
    %cst_173 = arith.constant dense<0.000000e+00> : vector<16x128xf32>
    %167 = tpu.matmul %164, %166, %cst_173 {dimension_numbers = #tpu.dot_dimension_numbers<[1], [0], [0], [1], [0, 0, 1, 1], [], []>} : vector<16x128xf32>, vector<128x128xf32>, vector<16x128xf32> -> vector<16x128xf32>
    %168 = arith.addf %162, %167 : vector<16x128xf32>
    %c0_174 = arith.constant 0 : index
    %c0_175 = arith.constant 0 : index
    %169 = vector.load %arg6[%c0_174, %c0_175] : memref<1x128xf32, #tpu.memory_space<vmem>>, vector<1x128xf32>
    %170 = vector.broadcast %169 : vector<1x128xf32> to vector<16x128xf32>
    %171 = arith.mulf %168, %170 : vector<16x128xf32>
    %c0_176 = arith.constant 0 : index
    %c0_177 = arith.constant 0 : index
    %172 = vector.load %arg7[%c0_176, %c0_177] : memref<1x128xf32, #tpu.memory_space<vmem>>, vector<1x128xf32>
    %173 = vector.broadcast %172 : vector<1x128xf32> to vector<16x128xf32>
    %174 = arith.addf %171, %173 : vector<16x128xf32>
    %cst_178 = arith.constant 0.000000e+00 : f32
    %175 = vector.broadcast %cst_178 : f32 to vector<16x128xf32>
    %176 = arith.maximumf %174, %175 : vector<16x128xf32>
    %177 = vector.shape_cast %176 : vector<16x128xf32> to vector<1x1x16x128xf32>
    %c0_179 = arith.constant 0 : index
    %c0_180 = arith.constant 0 : index
    %c0_181 = arith.constant 0 : index
    %c0_182 = arith.constant 0 : index
    %178 = vector.load %arg8[%c0_179, %c0_180, %c0_181, %c0_182] : memref<1x1x16x128xf32, #tpu.memory_space<vmem>>, vector<1x1x16x128xf32>
    tpu.vector_store %arg8[%c0_179, %c0_180, %c0_181, %c0_182], %177 {strides = array<i32>} : memref<1x1x16x128xf32, #tpu.memory_space<vmem>>, vector<1x1x16x128xf32>,
    return
  }
  func.func @transform_0(%arg0: i32, %arg1: i32) -> (i32, i32, i32, i32, i32) {
    %c0_i32 = arith.constant 0 : i32
    %0 = arith.addi %arg1, %c0_i32 : i32
    %c0_i32_0 = arith.constant 0 : i32
    %c0_i32_1 = arith.constant 0 : i32
    %c0_i32_2 = arith.constant 0 : i32
    %c0_i32_3 = arith.constant 0 : i32
    return %arg0, %0, %c0_i32_0, %c0_i32_1, %c0_i32_2 : i32, i32, i32, i32, i32
  }
  func.func @transform_1(%arg0: i32, %arg1: i32) -> (i32, i32, i32, i32, i32) {
    %c1_i32 = arith.constant 1 : i32
    %0 = arith.addi %arg1, %c1_i32 : i32
    %c0_i32 = arith.constant 0 : i32
    %c0_i32_0 = arith.constant 0 : i32
    %c0_i32_1 = arith.constant 0 : i32
    %c0_i32_2 = arith.constant 0 : i32
    return %arg0, %0, %c0_i32, %c0_i32_0, %c0_i32_1 : i32, i32, i32, i32, i32
  }
  func.func @transform_2(%arg0: i32, %arg1: i32) -> (i32, i32, i32, i32, i32) {
    %c2_i32 = arith.constant 2 : i32
    %0 = arith.addi %arg1, %c2_i32 : i32
    %c0_i32 = arith.constant 0 : i32
    %c0_i32_0 = arith.constant 0 : i32
    %c0_i32_1 = arith.constant 0 : i32
    %c0_i32_2 = arith.constant 0 : i32
    return %arg0, %0, %c0_i32, %c0_i32_0, %c0_i32_1 : i32, i32, i32, i32, i32
  }
  func.func @transform_3(%arg0: i32, %arg1: i32) -> (i32, i32, i32, i32, i32) {
    %c0_i32 = arith.constant 0 : i32
    %c0_i32_0 = arith.constant 0 : i32
    %c0_i32_1 = arith.constant 0 : i32
    %c0_i32_2 = arith.constant 0 : i32
    %c0_i32_3 = arith.constant 0 : i32
    %c0_i32_4 = arith.constant 0 : i32
    return %c0_i32, %c0_i32_0, %c0_i32_1, %c0_i32_2, %c0_i32_3 : i32, i32, i32, i32, i32
  }
  func.func @transform_4(%arg0: i32, %arg1: i32) -> (i32, i32) {
    %c0_i32 = arith.constant 0 : i32
    %c0_i32_0 = arith.constant 0 : i32
    %c0_i32_1 = arith.constant 0 : i32
    return %c0_i32, %c0_i32_0 : i32, i32
  }
  func.func @transform_5(%arg0: i32, %arg1: i32) -> (i32, i32) {
    %c0_i32 = arith.constant 0 : i32
    %c0_i32_0 = arith.constant 0 : i32
    %c0_i32_1 = arith.constant 0 : i32
    return %c0_i32, %c0_i32_0 : i32, i32
  }
  func.func @transform_6(%arg0: i32, %arg1: i32) -> (i32, i32, i32, i32) {
    %c0_i32 = arith.constant 0 : i32
    %c0_i32_0 = arith.constant 0 : i32
    %c0_i32_1 = arith.constant 0 : i32
    return %arg0, %arg1, %c0_i32, %c0_i32_0 : i32, i32, i32, i32
  }
}

</mosaic_0001>

<bundles_post_ra>
// kernel: agc_forward.5
= control target key start
LH: loop header
LB: loop body
LE: loop exit
PB: predicated region body
PF: predicated region fallthrough
CT: control target
= control target key end

     0   :  { %vm51_vm0 = vcmask 261120   ;;  %v245_v48 = vlaneseq  ;;  %s2606_s2 = inlined_call_operand.vmem [shape: f32[32,128], index: 2, kind: input, shape index: {}]   ;;  %s2607_s0 = inlined_call_operand.vmem [shape: f32[128,32], index: 0, kind: input, shape index: {}]   ;;  %s2608_s3 = inlined_call_operand.vmem [shape: f32[128,128], index: 3, kind: input, shape index: {}]   ;;  %s2609_s4 = inlined_call_operand.vmem [shape: f32[128,128], index: 4, kind: input, shape index: {}]   ;;  %s2610_s7 = inlined_call_operand.vmem [shape: f32[16,128], index: 7, kind: input, shape index: {}]   ;;  %s2611_s5 = inlined_call_operand.vmem [shape: f32[128,128], index: 5, kind: input, shape index: {}]   ;;  %s2612_s6 = inlined_call_operand.vmem [shape: f32[128,128], index: 6, kind: input, shape index: {}]   ;;  %s2613_s1 = inlined_call_operand.vmem [shape: f32[128,128], index: 1, kind: input, shape index: {}]   ;;  %s2614_s8 = inlined_call_operand.vmem [shape: f32[128,128], index: 8, kind: output, shape index: {}]  }
   0x1   :  { %v50_v0 = vld [vmem:[%s2606_s2 + $0x18] sm:$0xff]  ;;  %v49_v1 = vld [vmem:[%s2606_s2 + $0x10] sm:$0xff]  ;;  %v31_v2 = vld [vmem:[%s2607_s0] sm:$0xff] }
   0x2   :  { %1445 = vmatprep.subr.mxu0 %v50_v0  ;;  %v48_v3 = vld [vmem:[%s2606_s2 + $0x8] sm:$0xff]  ;;  %1453 = vmatprep.mubr.msk.f32.mxu0 %vm51_vm0, %v31_v2  ;;  %v47_v4 = vld [vmem:[%s2606_s2] sm:$0xff]  ;;  %v316_v6 = vld [vmem:[%s2608_s3 + $0x78] sm:$0xff]  ;;  %v2003_v49 = vshrl.u32 %v245_v48, 7 }
   0x3   :  { %1446 = vmatpush3.msra.mxu0 %v50_v0  ;;  %v32_v5 = vld [vmem:[%s2607_s0 + $0x8] sm:$0xff]  ;;  %v33_v7 = vld [vmem:[%s2607_s0 + $0x10] sm:$0xff]  ;;  %1477 = vmatprep.subr.mxu1 %v316_v6  ;;  %v34_v10 = vld [vmem:[%s2607_s0 + $0x18] sm:$0xff] }
   0x4   :  { %1447 = vmatprep.subr.mxu0 %v49_v1  ;;  %v315_v8 = vld [vmem:[%s2608_s3 + $0x70] sm:$0xff]  ;;  %1478 = vmatpush3.msra.mxu1 %v316_v6  ;;  %v314_v9 = vld [vmem:[%s2608_s3 + $0x68] sm:$0xff]  ;;  %v313_v11 = vld [vmem:[%s2608_s3 + $0x60] sm:$0xff]  ;;  %v247_v50 = vsub.s32 0, %v2003_v49  ;;  %v267_v52 = vsub.s32 1, %v2003_v49 }
   0x5   :  { %1448 = vmatpush3.msra.mxu0 %v49_v1  ;;  %1479 = vmatprep.subr.mxu1 %v315_v8  ;;  %v35_v12 = vld [vmem:[%s2607_s0 + $0x20] sm:$0xff]  ;;  %v312_v13 = vld [vmem:[%s2608_s3 + $0x58] sm:$0xff]  ;;  %v36_v14 = vld [vmem:[%s2607_s0 + $0x28] sm:$0xff] }
   0x6   :  { %1449 = vmatprep.subr.mxu0 %v48_v3  ;;  %1480 = vmatpush3.msra.mxu1 %v315_v8  ;;  %v311_v15 = vld [vmem:[%s2608_s3 + $0x50] sm:$0xff]  ;;  %v310_v17 = vld [vmem:[%s2608_s3 + $0x48] sm:$0xff]  ;;  %v38_v18 = vld [vmem:[%s2607_s0 + $0x38] sm:$0xff] }
   0x7   :  { %1450 = vmatpush3.msra.mxu0 %v48_v3  ;;  %1481 = vmatprep.subr.mxu1 %v314_v9  ;;  %v37_v16 = vld [vmem:[%s2607_s0 + $0x30] sm:$0xff]  ;;  %v309_v19 = vld [vmem:[%s2608_s3 + $0x40] sm:$0xff]  ;;  %v308_v21 = vld [vmem:[%s2608_s3 + $0x38] sm:$0xff] }
   0x8   :  { %1451 = vmatprep.subr.mxu0 %v47_v4  ;;  %1482 = vmatpush3.msra.mxu1 %v314_v9  ;;  %v39_v20 = vld [vmem:[%s2607_s0 + $0x40] sm:$0xff]  ;;  %v40_v22 = vld [vmem:[%s2607_s0 + $0x48] sm:$0xff]  ;;  %v307_v23 = vld [vmem:[%s2608_s3 + $0x30] sm:$0xff] }
   0x9   :  { %1452 = vmatpush3.msra.mxu0 %v47_v4  ;;  %1483 = vmatprep.subr.mxu1 %v313_v11  ;;  %v41_v24 = vld [vmem:[%s2607_s0 + $0x50] sm:$0xff]  ;;  %v306_v25 = vld [vmem:[%s2608_s3 + $0x28] sm:$0xff]  ;;  %v42_v26 = vld [vmem:[%s2607_s0 + $0x58] sm:$0xff] }
   0xa   :  { %1454 = vmatmul.mubr.msk.f32.vlgmr.msra.gmra.mxu0 %vm51_vm0, %v32_v5  ;;  %1484 = vmatpush3.msra.mxu1 %v313_v11  ;;  %v43_v27 = vld [vmem:[%s2607_s0 + $0x60] sm:$0xff]  ;;  %v44_v28 = vld [vmem:[%s2607_s0 + $0x68] sm:$0xff]  ;;  %v45_v29 = vld [vmem:[%s2607_s0 + $0x70] sm:$0xff] }
   0xb   :  { %1456 = vmatprep.mubr.msk.f32.mxu0 %vm51_vm0, %v33_v7  ;;  %1485 = vmatprep.subr.mxu1 %v312_v13  ;;  %v46_v30 = vld [vmem:[%s2607_s0 + $0x78] sm:$0xff]  ;;  %v305_v31 = vld [vmem:[%s2608_s3 + $0x20] sm:$0xff]  ;;  %v303_v33 = vld [vmem:[%s2608_s3 + $0x10] sm:$0xff] }
   0xc   :  { %1486 = vmatpush3.msra.mxu1 %v312_v13  ;;  %v304_v32 = vld [vmem:[%s2608_s3 + $0x18] sm:$0xff]  ;;  %v302_v34 = vld [vmem:[%s2608_s3 + $0x8] sm:$0xff]  ;;  %v301_v35 = vld [vmem:[%s2608_s3] sm:$0xff] }
   0xd   :  { %1487 = vmatprep.subr.mxu1 %v311_v15  ;;  %v533_v36 = vld [vmem:[%s2609_s4 + $0x78] sm:$0xff]  ;;  %v532_v37 = vld [vmem:[%s2609_s4 + $0x70] sm:$0xff]  ;;  %v531_v38 = vld [vmem:[%s2609_s4 + $0x68] sm:$0xff] }
   0xe   :  { %1457 = vmatmul.mubr.msk.f32.gmra.mxu0 %vm51_vm0, %v34_v10  ;;  %1488 = vmatpush3.msra.mxu1 %v311_v15  ;;  %v530_v39 = vld [vmem:[%s2609_s4 + $0x60] sm:$0xff]  ;;  %v529_v40 = vld [vmem:[%s2609_s4 + $0x58] sm:$0xff]  ;;  %v528_v41 = vld [vmem:[%s2609_s4 + $0x50] sm:$0xff] }
   0xf   :  { %1459 = vmatprep.mubr.msk.f32.mxu0 %vm51_vm0, %v35_v12  ;;  %1489 = vmatprep.subr.mxu1 %v310_v17  ;;  %v527_v42 = vld [vmem:[%s2609_s4 + $0x48] sm:$0xff]  ;;  %v526_v43 = vld [vmem:[%s2609_s4 + $0x40] sm:$0xff]  ;;  %v525_v44 = vld [vmem:[%s2609_s4 + $0x38] sm:$0xff] }
  0x10   :  { %1490 = vmatpush3.msra.mxu1 %v310_v17  ;;  %1533 = vmatprep.subr.mxu0 %v533_v36  ;;  %v524_v45 = vld [vmem:[%s2609_s4 + $0x30] sm:$0xff]  ;;  %v523_v46 = vld [vmem:[%s2609_s4 + $0x28] sm:$0xff]  ;;  %v522_v47 = vld [vmem:[%s2609_s4 + $0x20] sm:$0xff] }
  0x11   :  { %1491 = vmatprep.subr.mxu1 %v309_v19  ;;  %1534 = vmatpush3.msra.mxu0 %v533_v36  ;;  %v2009_v51 = vld [vmem:[%s2610_s7] sm:$0xff] }
  0x12   :  { %1460 = vmatmul.mubr.msk.f32.gmra.mxu0 %vm51_vm0, %v36_v14  ;;  %1492 = vmatpush3.msra.mxu1 %v309_v19  ;;  %v2015_v53 = vrot.slane %v2009_v51, %v247_v50  ;;  %v2018_v55 = vrot.slane %v2009_v51, %v267_v52 }
  0x13   :  { %1462 = vmatprep.mubr.msk.f32.mxu0 %vm51_vm0, %v37_v16  ;;  %1493 = vmatprep.subr.mxu1 %v308_v21 }
  0x14   :  { %1494 = vmatpush3.msra.mxu1 %v308_v21  ;;  %1535 = vmatprep.subr.mxu0 %v532_v37 }
  0x15   :  { %1495 = vmatprep.subr.mxu1 %v307_v23  ;;  %1536 = vmatpush3.msra.mxu0 %v532_v37 }
  0x16   :  { %1463 = vmatmul.mubr.msk.f32.gmra.mxu0 %vm51_vm0, %v38_v18  ;;  %1496 = vmatpush3.msra.mxu1 %v307_v23 }
  0x17   :  { %1465 = vmatprep.mubr.msk.f32.mxu0 %vm51_vm0, %v39_v20  ;;  %1497 = vmatprep.subr.mxu1 %v306_v25 }
  0x18   :  { %1498 = vmatpush3.msra.mxu1 %v306_v25  ;;  %1537 = vmatprep.subr.mxu0 %v531_v38 }
  0x19   :  { %1499 = vmatprep.subr.mxu1 %v305_v31  ;;  %1538 = vmatpush3.msra.mxu0 %v531_v38 }
  0x1a   :  { %1466 = vmatmul.mubr.msk.f32.gmra.mxu0 %vm51_vm0, %v40_v22  ;;  %1500 = vmatpush3.msra.mxu1 %v305_v31 }
  0x1b   :  { %1468 = vmatprep.mubr.msk.f32.mxu0 %vm51_vm0, %v41_v24  ;;  %1501 = vmatprep.subr.mxu1 %v304_v32 }
  0x1c   :  { %1502 = vmatpush3.msra.mxu1 %v304_v32  ;;  %1539 = vmatprep.subr.mxu0 %v530_v39 }
  0x1d   :  { %1503 = vmatprep.subr.mxu1 %v303_v33  ;;  %1540 = vmatpush3.msra.mxu0 %v530_v39 }
  0x1e   :  { %1469 = vmatmul.mubr.msk.f32.gmra.mxu0 %vm51_vm0, %v42_v26  ;;  %1504 = vmatpush3.msra.mxu1 %v303_v33 }
  0x1f   :  { %1471 = vmatprep.mubr.msk.f32.mxu0 %vm51_vm0, %v43_v27  ;;  %1505 = vmatprep.subr.mxu1 %v302_v34 }
  0x20   :  { %1506 = vmatpush3.msra.mxu1 %v302_v34  ;;  %1541 = vmatprep.subr.mxu0 %v529_v40 }
  0x21   :  { %1507 = vmatprep.subr.mxu1 %v301_v35  ;;  %1542 = vmatpush3.msra.mxu0 %v529_v40 }
  0x22   :  { %1472 = vmatmul.mubr.msk.f32.gmra.mxu0 %vm51_vm0, %v44_v28  ;;  %1508 = vmatpush3.msra.mxu1 %v301_v35 }
  0x23   :  { %1474 = vmatprep.mubr.msk.f32.mxu0 %vm51_vm0, %v45_v29  ;;  %1543 = vmatprep.subr.mxu0 %v528_v41 }
  0x24   :  { %1544 = vmatpush3.msra.mxu0 %v528_v41 }
  0x25   :  { %1545 = vmatprep.subr.mxu0 %v527_v42 }
  0x26   :  { %1475 = vmatmul.mubr.msk.f32.gmra.mxu0 %vm51_vm0, %v46_v30 }
  0x27   :  { %1546 = vmatpush3.msra.mxu0 %v527_v42 }
  0x28   :  { %1547 = vmatprep.subr.mxu0 %v526_v43 }
  0x29   :  { %1548 = vmatpush3.msra.mxu0 %v526_v43 }
  0x2a   :  { %1549 = vmatprep.subr.mxu0 %v525_v44 }
  0x2b   :  { %1550 = vmatpush3.msra.mxu0 %v525_v44 }
  0x2c   :  { %1551 = vmatprep.subr.mxu0 %v524_v45 }
  0x2d   :  { %1552 = vmatpush3.msra.mxu0 %v524_v45 }
  0x2e   :  { %1553 = vmatprep.subr.mxu0 %v523_v46 }
  0x2f   :  { %1554 = vmatpush3.msra.mxu0 %v523_v46 }
  0x30   :  { %1555 = vmatprep.subr.mxu0 %v522_v47 }
  0x31   :  { %1556 = vmatpush3.msra.mxu0 %v522_v47 }
  0xca   :  { %v1455_v54 = vpop.f32.mrf.mxu0 }
  0xcb   :  { %v250_v56 = vmul.f32 %v1455_v54, %v2015_v53 }
  0xcc   :  { %v166_v57 = vpop.f32.mrf.mxu0 }
  0xcd   :  { %v249_v58 = vmul.f32 %v2015_v53, %v166_v57  ;;  %v2023_v59 = vadd.f32 %v2018_v55, %v250_v56 }
  0xce   :  { %v1458_v60 = vpop.f32.mrf.mxu0 }
  0xcf   :  { %v252_v61 = vmul.f32 %v1458_v60, %v2015_v53  ;;  %v2027_v62 = vadd.f32 %v2018_v55, %v249_v58  ;;  %v286_v2 = vmax.f32 %v2023_v59, 0.0  ;;  %v842_v59 = vld [vmem:[%s2612_s6 + $0x78] sm:$0xff] }
  0xd0   :  { %v176_v63 = vpop.f32.mrf.mxu0  ;;  %1589 = vmatprep.subr.mxu1 %v842_v59 }
  0xd1   :  { %v251_v0 = vmul.f32 %v2015_v53, %v176_v63  ;;  %v285_v1 = vmax.f32 %v2027_v62, 0.0  ;;  %v2033_v3 = vadd.f32 %v2018_v55, %v252_v61  ;;  %v519_v61 = vld [vmem:[%s2609_s4 + $0x8] sm:$0xff]  ;;  %v518_v63 = vld [vmem:[%s2609_s4] sm:$0xff]  ;;  %v841_v62 = vld [vmem:[%s2612_s6 + $0x70] sm:$0xff] }
  0xd2   :  { %v1461_v4 = vpop.f32.mrf.mxu0 }
  0xd3   :  { %v2036_v5 = vadd.f32 %v2018_v55, %v251_v0  ;;  %v254_v6 = vmul.f32 %v1461_v4, %v2015_v53  ;;  %1509 = vmatprep.mubr.f32.mxu1 %v285_v1  ;;  %v288_v10 = vmax.f32 %v2033_v3, 0.0  ;;  %v2147_v0 = vld [vmem:[%s2611_s5 + $0x78] sm:$0xff]  ;;  %v464_v4 = vsub.s32 6, %v2003_v49 }
  0xd4   :  { %v186_v7 = vpop.f32.mrf.mxu0  ;;  %1510 = vmatmul.mubr.f32.vlgmr.msra.gmra.mxu1 %v286_v2  ;;  %v838_v3 = vld [vmem:[%s2612_s6 + $0x58] sm:$0xff] }
  0xd5   :  { %v287_v8 = vmax.f32 %v2036_v5, 0.0  ;;  %v253_v9 = vmul.f32 %v2015_v53, %v186_v7  ;;  %v2047_v11 = vadd.f32 %v2018_v55, %v254_v6  ;;  %v484_v6 = vsub.s32 7, %v2003_v49  ;;  %1590 = vmatpush3.msra.mxu1 %v842_v59  ;;  %v837_v5 = vld [vmem:[%s2612_s6 + $0x50] sm:$0xff] }
  0xd6   :  { %v1464_v12 = vpop.f32.mrf.mxu0  ;;  %v2153_v7 = vrot.slane %v2009_v51, %v464_v4  ;;  %1591 = vmatprep.subr.mxu1 %v841_v62 }
  0xd7   :  { %v2050_v13 = vadd.f32 %v2018_v55, %v253_v9  ;;  %v256_v14 = vmul.f32 %v1464_v12, %v2015_v53  ;;  %1512 = vmatprep.mubr.f32.mxu1 %v287_v8  ;;  %v290_v18 = vmax.f32 %v2047_v11, 0.0  ;;  %v2156_v12 = vrot.slane %v2009_v51, %v484_v6  ;;  %v2187_v6 = vld [vmem:[%s2611_s5 + $0x60] sm:$0xff]  ;;  %1592 = vmatpush3.msra.mxu1 %v841_v62  ;;  %v834_v11 = vld [vmem:[%s2612_s6 + $0x38] sm:$0xff] }
  0xd8   :  { %v196_v15 = vpop.f32.mrf.mxu0  ;;  %1513 = vmatmul.mubr.f32.gmra.mxu1 %v288_v10 }
  0xd9   :  { %v289_v16 = vmax.f32 %v2050_v13, 0.0  ;;  %v255_v17 = vmul.f32 %v2015_v53, %v196_v15  ;;  %v2061_v19 = vadd.f32 %v2018_v55, %v256_v14  ;;  %v833_v13 = vld [vmem:[%s2612_s6 + $0x30] sm:$0xff] }
  0xda   :  { %v1467_v20 = vpop.f32.mrf.mxu0 }
  0xdb   :  { %v2064_v21 = vadd.f32 %v2018_v55, %v255_v17  ;;  %v258_v22 = vmul.f32 %v1467_v20, %v2015_v53  ;;  %1515 = vmatprep.mubr.f32.mxu1 %v289_v16  ;;  %v292_v26 = vmax.f32 %v2061_v19, 0.0  ;;  %v830_v19 = vld [vmem:[%s2612_s6 + $0x18] sm:$0xff] }
  0xdc   :  { %v206_v23 = vpop.f32.mrf.mxu0  ;;  %1516 = vmatmul.mubr.f32.gmra.mxu1 %v290_v18 }
  0xdd   :  { %v291_v24 = vmax.f32 %v2064_v21, 0.0  ;;  %v257_v25 = vmul.f32 %v2015_v53, %v206_v23  ;;  %v2075_v27 = vadd.f32 %v2018_v55, %v258_v22  ;;  %v829_v21 = vld [vmem:[%s2612_s6 + $0x10] sm:$0xff] }
  0xde   :  { %v1470_v28 = vpop.f32.mrf.mxu0 }
  0xdf   :  { %v2078_v29 = vadd.f32 %v2018_v55, %v257_v25  ;;  %v260_v30 = vmul.f32 %v1470_v28, %v2015_v53  ;;  %1518 = vmatprep.mubr.f32.mxu1 %v291_v24  ;;  %v294_v34 = vmax.f32 %v2075_v27, 0.0  ;;  %v30_v27 = vld [vmem:[%s2610_s7 + $0x8] sm:$0xff] }
  0xe0   :  { %v216_v31 = vpop.f32.mrf.mxu0  ;;  %1519 = vmatmul.mubr.f32.gmra.mxu1 %v292_v26 }
  0xe1   :  { %v293_v32 = vmax.f32 %v2078_v29, 0.0  ;;  %v259_v33 = vmul.f32 %v2015_v53, %v216_v31  ;;  %v2089_v35 = vadd.f32 %v2018_v55, %v260_v30  ;;  %v2378_v29 = vrot.slane %v30_v27, %v247_v50 }
  0xe2   :  { %v1473_v36 = vpop.f32.mrf.mxu0 }
  0xe3   :  { %v2092_v37 = vadd.f32 %v2018_v55, %v259_v33  ;;  %v262_v38 = vmul.f32 %v1473_v36, %v2015_v53  ;;  %1521 = vmatprep.mubr.f32.mxu1 %v293_v32  ;;  %v296_v42 = vmax.f32 %v2089_v35, 0.0 }
  0xe4   :  { %v226_v39 = vpop.f32.mrf.mxu0  ;;  %1522 = vmatmul.mubr.f32.gmra.mxu1 %v294_v34 }
  0xe5   :  { %v295_v40 = vmax.f32 %v2092_v37, 0.0  ;;  %v261_v41 = vmul.f32 %v2015_v53, %v226_v39  ;;  %v2103_v43 = vadd.f32 %v2018_v55, %v262_v38 }
  0xe6   :  { %v1476_v44 = vpop.f32.mrf.mxu0 }
  0xe7   :  { %v2106_v45 = vadd.f32 %v2018_v55, %v261_v41  ;;  %v264_v46 = vmul.f32 %v1476_v44, %v2015_v53  ;;  %1524 = vmatprep.mubr.f32.mxu1 %v295_v40  ;;  %v298_v54 = vmax.f32 %v2103_v43, 0.0  ;;  %v2170_v41 = vld [vmem:[%s2611_s5 + $0x70] sm:$0xff] }
  0xe8   :  { %v236_v47 = vpop.f32.mrf.mxu0  ;;  %1525 = vmatmul.mubr.f32.gmra.mxu1 %v296_v42 }
  0xe9   :  { %v297_v48 = vmax.f32 %v2106_v45, 0.0  ;;  %v263_v52 = vmul.f32 %v2015_v53, %v236_v47  ;;  %v2117_v56 = vadd.f32 %v2018_v55, %v264_v46  ;;  %v521_v53 = vld [vmem:[%s2609_s4 + $0x18] sm:$0xff] }
  0xea   :  { %1557 = vmatprep.subr.mxu0 %v521_v53 }
  0xeb   :  { %v2120_v57 = vadd.f32 %v2018_v55, %v263_v52  ;;  %1527 = vmatprep.mubr.f32.mxu1 %v297_v48  ;;  %v300_v60 = vmax.f32 %v2117_v56, 0.0  ;;  %1558 = vmatpush3.msra.mxu0 %v521_v53  ;;  %v520_v55 = vld [vmem:[%s2609_s4 + $0x10] sm:$0xff]  ;;  %v2177_v52 = vld [vmem:[%s2611_s5 + $0x68] sm:$0xff] }
  0xec   :  { %1528 = vmatmul.mubr.f32.gmra.mxu1 %v298_v54  ;;  %1559 = vmatprep.subr.mxu0 %v520_v55 }
  0xed   :  { %v299_v58 = vmax.f32 %v2120_v57, 0.0  ;;  %1560 = vmatpush3.msra.mxu0 %v520_v55  ;;  %v1797_v57 = vld [vmem:[%s2610_s7] sm:$0xff] }
  0xee   :  { %1561 = vmatprep.subr.mxu0 %v519_v61 }
  0xef   :  { %1530 = vmatprep.mubr.f32.mxu1 %v299_v58  ;;  %1562 = vmatpush3.msra.mxu0 %v519_v61 }
  0xf0   :  { %1531 = vmatmul.mubr.f32.gmra.mxu1 %v300_v60  ;;  %1563 = vmatprep.subr.mxu0 %v518_v63 }
  0xf1   :  { %1564 = vmatpush3.msra.mxu0 %v518_v63 }
  0xf2   :  { %1645 = vmatprep.subr.mxu0 %v2147_v0 }
 0x194   :  { %v1511_v9 = vpop.f32.mrf.mxu1 }
 0x195   :  { %v467_v14 = vmul.f32 %v1511_v9, %v2153_v7 }
 0x196   :  { %v383_v15 = vpop.f32.mrf.mxu1 }
 0x197   :  { %v466_v17 = vmul.f32 %v2153_v7, %v383_v15  ;;  %v487_v20 = vadd.f32 %v2156_v12, %v467_v14 }
 0x198   :  { %v1514_v22 = vpop.f32.mrf.mxu1 }
 0x199   :  { %v486_v23 = vadd.f32 %v2156_v12, %v466_v17  ;;  %v469_v25 = vmul.f32 %v1514_v22, %v2153_v7  ;;  %v503_v33 = vmax.f32 %v487_v20, 0.0  ;;  %v2195_v17 = vld [vmem:[%s2611_s5 + $0x58] sm:$0xff] }
 0x19a   :  { %v393_v28 = vpop.f32.mrf.mxu1 }
 0x19b   :  { %v502_v30 = vmax.f32 %v486_v23, 0.0  ;;  %v468_v31 = vmul.f32 %v2153_v7, %v393_v28  ;;  %v489_v51 = vadd.f32 %v2156_v12, %v469_v25 }
 0x19c   :  { %v1517_v36 = vpop.f32.mrf.mxu1 }
 0x19d   :  { %v488_v38 = vadd.f32 %v2156_v12, %v468_v31  ;;  %v471_v39 = vmul.f32 %v1517_v36, %v2153_v7  ;;  %1565 = vmatprep.mubr.f32.mxu0 %v502_v30  ;;  %v505_v53 = vmax.f32 %v489_v51, 0.0  ;;  %v2205_v30 = vld [vmem:[%s2611_s5 + $0x50] sm:$0xff]  ;;  %v2213_v36 = vld [vmem:[%s2611_s5 + $0x48] sm:$0xff] }
 0x19e   :  { %v403_v44 = vpop.f32.mrf.mxu1  ;;  %1566 = vmatmul.mubr.f32.vlgmr.msra.gmra.mxu0 %v503_v33 }
 0x19f   :  { %v504_v46 = vmax.f32 %v488_v38, 0.0  ;;  %v470_v47 = vmul.f32 %v2153_v7, %v403_v44  ;;  %1646 = vmatpush3.msra.mxu0 %v2147_v0  ;;  %v491_v55 = vadd.f32 %v2156_v12, %v471_v39 }
 0x1a0   :  { %v1520_v61 = vpop.f32.mrf.mxu1  ;;  %1647 = vmatprep.subr.mxu0 %v2170_v41 }
 0x1a1   :  { %v490_v63 = vadd.f32 %v2156_v12, %v470_v47  ;;  %v473_v4 = vmul.f32 %v1520_v61, %v2153_v7  ;;  %1568 = vmatprep.mubr.f32.mxu0 %v504_v46  ;;  %1648 = vmatpush3.msra.mxu0 %v2170_v41  ;;  %v507_v20 = vmax.f32 %v491_v55, 0.0 }
 0x1a2   :  { %v413_v9 = vpop.f32.mrf.mxu1  ;;  %1569 = vmatmul.mubr.f32.gmra.mxu0 %v505_v53  ;;  %1649 = vmatprep.subr.mxu0 %v2177_v52  ;;  %v2223_v53 = vld [vmem:[%s2611_s5 + $0x40] sm:$0xff] }
 0x1a3   :  { %v506_v14 = vmax.f32 %v490_v63, 0.0  ;;  %v472_v15 = vmul.f32 %v2153_v7, %v413_v9  ;;  %1650 = vmatpush3.msra.mxu0 %v2177_v52  ;;  %v493_v22 = vadd.f32 %v2156_v12, %v473_v4  ;;  %v2231_v4 = vld [vmem:[%s2611_s5 + $0x38] sm:$0xff] }
 0x1a4   :  { %v1523_v23 = vpop.f32.mrf.mxu1  ;;  %1651 = vmatprep.subr.mxu0 %v2187_v6 }
 0x1a5   :  { %v492_v25 = vadd.f32 %v2156_v12, %v472_v15  ;;  %v475_v28 = vmul.f32 %v1523_v23, %v2153_v7  ;;  %1571 = vmatprep.mubr.f32.mxu0 %v506_v14  ;;  %1652 = vmatpush3.msra.mxu0 %v2187_v6  ;;  %v509_v38 = vmax.f32 %v493_v22, 0.0  ;;  %v2241_v23 = vld [vmem:[%s2611_s5 + $0x30] sm:$0xff] }
 0x1a6   :  { %v423_v31 = vpop.f32.mrf.mxu1  ;;  %1572 = vmatmul.mubr.f32.gmra.mxu0 %v507_v20  ;;  %1653 = vmatprep.subr.mxu0 %v2195_v17 }
 0x1a7   :  { %v508_v33 = vmax.f32 %v492_v25, 0.0  ;;  %v474_v51 = vmul.f32 %v2153_v7, %v423_v31  ;;  %1654 = vmatpush3.msra.mxu0 %v2195_v17  ;;  %v495_v39 = vadd.f32 %v2156_v12, %v475_v28 }
 0x1a8   :  { %v1526_v44 = vpop.f32.mrf.mxu1  ;;  %1655 = vmatprep.subr.mxu0 %v2205_v30 }
 0x1a9   :  { %v494_v46 = vadd.f32 %v2156_v12, %v474_v51  ;;  %v477_v47 = vmul.f32 %v1526_v44, %v2153_v7  ;;  %1574 = vmatprep.mubr.f32.mxu0 %v508_v33  ;;  %1656 = vmatpush3.msra.mxu0 %v2205_v30  ;;  %v511_v9 = vmax.f32 %v495_v39, 0.0  ;;  %v2249_v33 = vld [vmem:[%s2611_s5 + $0x28] sm:$0xff] }
 0x1aa   :  { %v433_v55 = vpop.f32.mrf.mxu1  ;;  %1575 = vmatmul.mubr.f32.gmra.mxu0 %v509_v38  ;;  %1657 = vmatprep.subr.mxu0 %v2213_v36 }
 0x1ab   :  { %v510_v61 = vmax.f32 %v494_v46, 0.0  ;;  %v476_v63 = vmul.f32 %v2153_v7, %v433_v55  ;;  %1658 = vmatpush3.msra.mxu0 %v2213_v36  ;;  %v497_v14 = vadd.f32 %v2156_v12, %v477_v47  ;;  %v2259_v47 = vld [vmem:[%s2611_s5 + $0x20] sm:$0xff] }
 0x1ac   :  { %v1529_v15 = vpop.f32.mrf.mxu1  ;;  %1659 = vmatprep.subr.mxu0 %v2223_v53 }
 0x1ad   :  { %v496_v20 = vadd.f32 %v2156_v12, %v476_v63  ;;  %v479_v22 = vmul.f32 %v1529_v15, %v2153_v7  ;;  %1577 = vmatprep.mubr.f32.mxu0 %v510_v61  ;;  %1660 = vmatpush3.msra.mxu0 %v2223_v53  ;;  %v513_v51 = vmax.f32 %v497_v14, 0.0 }
 0x1ae   :  { %v443_v25 = vpop.f32.mrf.mxu1  ;;  %1578 = vmatmul.mubr.f32.gmra.mxu0 %v511_v9  ;;  %1661 = vmatprep.subr.mxu0 %v2231_v4  ;;  %v2267_v9 = vld [vmem:[%s2611_s5 + $0x18] sm:$0xff] }
 0x1af   :  { %v512_v28 = vmax.f32 %v496_v20, 0.0  ;;  %v478_v31 = vmul.f32 %v2153_v7, %v443_v25  ;;  %1662 = vmatpush3.msra.mxu0 %v2231_v4  ;;  %v499_v38 = vadd.f32 %v2156_v12, %v479_v22  ;;  %v2283_v25 = vld [vmem:[%s2611_s5 + $0x8] sm:$0xff] }
 0x1b0   :  { %v1532_v39 = vpop.f32.mrf.mxu1  ;;  %1663 = vmatprep.subr.mxu0 %v2241_v23 }
 0x1b1   :  { %v498_v44 = vadd.f32 %v2156_v12, %v478_v31  ;;  %v481_v46 = vmul.f32 %v1532_v39, %v2153_v7  ;;  %1580 = vmatprep.mubr.f32.mxu0 %v512_v28  ;;  %1664 = vmatpush3.msra.mxu0 %v2241_v23  ;;  %v515_v14 = vmax.f32 %v499_v38, 0.0  ;;  %v2290_v28 = vld [vmem:[%s2611_s5] sm:$0xff] }
 0x1b2   :  { %v453_v55 = vpop.f32.mrf.mxu1  ;;  %1581 = vmatmul.mubr.f32.gmra.mxu0 %v513_v51  ;;  %1665 = vmatprep.subr.mxu0 %v2249_v33 }
 0x1b3   :  { %v514_v61 = vmax.f32 %v498_v44, 0.0  ;;  %v480_v63 = vmul.f32 %v2153_v7, %v453_v55  ;;  %1666 = vmatpush3.msra.mxu0 %v2249_v33  ;;  %v501_v15 = vadd.f32 %v2156_v12, %v481_v46  ;;  %v2276_v7 = vld [vmem:[%s2611_s5 + $0x10] sm:$0xff] }
 0x1b4   :  { %1667 = vmatprep.subr.mxu0 %v2259_v47 }
 0x1b5   :  { %v500_v20 = vadd.f32 %v2156_v12, %v480_v63  ;;  %1583 = vmatprep.mubr.f32.mxu0 %v514_v61  ;;  %1668 = vmatpush3.msra.mxu0 %v2259_v47  ;;  %v517_v12 = vmax.f32 %v501_v15, 0.0 }
 0x1b6   :  { %1584 = vmatmul.mubr.f32.gmra.mxu0 %v515_v14  ;;  %1669 = vmatprep.subr.mxu0 %v2267_v9 }
 0x1b7   :  { %v516_v22 = vmax.f32 %v500_v20, 0.0  ;;  %1670 = vmatpush3.msra.mxu0 %v2267_v9 }
 0x1b8   :  { %1671 = vmatprep.subr.mxu0 %v2276_v7 }
 0x1b9   :  { %1586 = vmatprep.mubr.f32.mxu0 %v516_v22  ;;  %1672 = vmatpush3.msra.mxu0 %v2276_v7 }
 0x1ba   :  { %1587 = vmatmul.mubr.f32.gmra.mxu0 %v517_v12  ;;  %1673 = vmatprep.subr.mxu0 %v2283_v25 }
 0x1bb   :  { %1674 = vmatpush3.msra.mxu0 %v2283_v25  ;;  %1677 = vmatprep.mubr.f32.mxu0 %v285_v1  ;;  %v840_v1 = vld [vmem:[%s2612_s6 + $0x68] sm:$0xff] }
 0x1bc   :  { %1675 = vmatprep.subr.mxu0 %v2290_v28  ;;  %1593 = vmatprep.subr.mxu1 %v840_v1 }
 0x1bd   :  { %1676 = vmatpush3.msra.mxu0 %v2290_v28  ;;  %1594 = vmatpush3.msra.mxu1 %v840_v1 }
 0x1be   :  { %1678 = vmatmul.mubr.f32.vlgmr.msra.gmra.mxu0 %v286_v2  ;;  %v839_v2 = vld [vmem:[%s2612_s6 + $0x60] sm:$0xff] }
 0x1bf   :  { %1680 = vmatprep.mubr.f32.mxu0 %v287_v8  ;;  %1595 = vmatprep.subr.mxu1 %v839_v2  ;;  %v836_v8 = vld [vmem:[%s2612_s6 + $0x48] sm:$0xff] }
 0x1c0   :  { %1596 = vmatpush3.msra.mxu1 %v839_v2 }
 0x1c1   :  { %1597 = vmatprep.subr.mxu1 %v838_v3 }
 0x1c2   :  { %1681 = vmatmul.mubr.f32.gmra.mxu0 %v288_v10  ;;  %1598 = vmatpush3.msra.mxu1 %v838_v3  ;;  %v835_v10 = vld [vmem:[%s2612_s6 + $0x40] sm:$0xff] }
 0x1c3   :  { %1683 = vmatprep.mubr.f32.mxu0 %v289_v16  ;;  %1599 = vmatprep.subr.mxu1 %v837_v5  ;;  %v832_v16 = vld [vmem:[%s2612_s6 + $0x28] sm:$0xff] }
 0x1c4   :  { %1600 = vmatpush3.msra.mxu1 %v837_v5 }
 0x1c5   :  { %1601 = vmatprep.subr.mxu1 %v836_v8 }
 0x1c6   :  { %1684 = vmatmul.mubr.f32.gmra.mxu0 %v290_v18  ;;  %1602 = vmatpush3.msra.mxu1 %v836_v8  ;;  %v831_v18 = vld [vmem:[%s2612_s6 + $0x20] sm:$0xff] }
 0x1c7   :  { %1686 = vmatprep.mubr.f32.mxu0 %v291_v24  ;;  %1603 = vmatprep.subr.mxu1 %v835_v10  ;;  %v828_v24 = vld [vmem:[%s2612_s6 + $0x8] sm:$0xff] }
 0x1c8   :  { %1604 = vmatpush3.msra.mxu1 %v835_v10 }
 0x1c9   :  { %1605 = vmatprep.subr.mxu1 %v834_v11 }
 0x1ca   :  { %1687 = vmatmul.mubr.f32.gmra.mxu0 %v292_v26  ;;  %1606 = vmatpush3.msra.mxu1 %v834_v11  ;;  %v827_v26 = vld [vmem:[%s2612_s6] sm:$0xff] }
 0x1cb   :  { %1689 = vmatprep.mubr.f32.mxu0 %v293_v32  ;;  %1607 = vmatprep.subr.mxu1 %v833_v13 }
 0x1cc   :  { %1608 = vmatpush3.msra.mxu1 %v833_v13 }
 0x1cd   :  { %1609 = vmatprep.subr.mxu1 %v832_v16 }
 0x1ce   :  { %1690 = vmatmul.mubr.f32.gmra.mxu0 %v294_v34  ;;  %1610 = vmatpush3.msra.mxu1 %v832_v16 }
 0x1cf   :  { %1692 = vmatprep.mubr.f32.mxu0 %v295_v40  ;;  %1611 = vmatprep.subr.mxu1 %v831_v18 }
 0x1d0   :  { %1612 = vmatpush3.msra.mxu1 %v831_v18 }
 0x1d1   :  { %1613 = vmatprep.subr.mxu1 %v830_v19 }
 0x1d2   :  { %1693 = vmatmul.mubr.f32.gmra.mxu0 %v296_v42  ;;  %1614 = vmatpush3.msra.mxu1 %v830_v19 }
 0x1d3   :  { %1695 = vmatprep.mubr.f32.mxu0 %v297_v48  ;;  %1615 = vmatprep.subr.mxu1 %v829_v21 }
 0x1d4   :  { %1616 = vmatpush3.msra.mxu1 %v829_v21 }
 0x1d5   :  { %1617 = vmatprep.subr.mxu1 %v828_v24 }
 0x1d6   :  { %1696 = vmatmul.mubr.f32.gmra.mxu0 %v298_v54  ;;  %1618 = vmatpush3.msra.mxu1 %v828_v24 }
 0x1d7   :  { %1619 = vmatprep.subr.mxu1 %v827_v26 }
 0x1d8   :  { %1620 = vmatpush3.msra.mxu1 %v827_v26 }
 0x1d9   :  { %1701 = vmatprep.subr.mxu1 %v2147_v0 }
 0x25e   :  { %v1567_v32 = vpop.f32.mrf.mxu0 }
 0x25f   :  { %v610_v34 = vadd.f32 %v1567_v32, %v2378_v29 }
 0x260   :  { %v604_v35 = vpop.f32.mrf.mxu0 }
 0x261   :  { %v1282_v37 = vmul.f32 -1.442695, %v610_v34  ;;  %v605_v40 = vadd.f32 %v604_v35, %v2378_v29 }
 0x262   :  { %v1570_v42 = vpop.f32.mrf.mxu0 }
 0x263   :  { %1733 = vpow2.f32 %v1282_v37  ;;  %v1281_v43 = vmul.f32 -1.442695, %v605_v40  ;;  %v620_v45 = vadd.f32 %v1570_v42, %v2378_v29 }
 0x264   :  { %v614_v48 = vpop.f32.mrf.mxu0 }
 0x265   :  { %1735 = vpow2.f32 %v1281_v43  ;;  %v1284_v54 = vmul.f32 -1.442695, %v620_v45  ;;  %v615_v31 = vadd.f32 %v614_v48, %v2378_v29 }
 0x266   :  { %v1573_v51 = vpop.f32.mrf.mxu0 }
 0x267   :  { %1737 = vpow2.f32 %v1284_v54  ;;  %v1283_v50 = vmul.f32 -1.442695, %v615_v31  ;;  %v630_v38 = vadd.f32 %v1573_v51, %v2378_v29 }
 0x268   :  { %v624_v39 = vpop.f32.mrf.mxu0 }
 0x269   :  { %1739 = vpow2.f32 %v1283_v50  ;;  %v1286_v44 = vmul.f32 -1.442695, %v630_v38  ;;  %v625_v46 = vadd.f32 %v624_v39, %v2378_v29 }
 0x26a   :  { %v1576_v55 = vpop.f32.mrf.mxu0 }
 0x26b   :  { %1741 = vpow2.f32 %v1286_v44  ;;  %v1285_v61 = vmul.f32 -1.442695, %v625_v46  ;;  %v640_v63 = vadd.f32 %v1576_v55, %v2378_v29 }
 0x26c   :  { %v634_v14 = vpop.f32.mrf.mxu0 }
 0x26d   :  { %1743 = vpow2.f32 %v1285_v61  ;;  %v1288_v15 = vmul.f32 -1.442695, %v640_v63  ;;  %v635_v20 = vadd.f32 %v634_v14, %v2378_v29 }
 0x26e   :  { %v1579_v22 = vpop.f32.mrf.mxu0 }
 0x26f   :  { %1745 = vpow2.f32 %v1288_v15  ;;  %v1287_v12 = vmul.f32 -1.442695, %v635_v20  ;;  %v650_v59 = vadd.f32 %v1579_v22, %v2378_v29  ;;  %v779_v22 = vld [vmem:[%s2613_s1] sm:$0xff] }
 0x270   :  { %v1734_v62 = vpop.eup %1733  ;;  %v644_v1 = vpop.f32.mrf.mxu0 }
 0x271   :  { %v732_v2 = vadd.f32 1.0, %v1734_v62  ;;  %1747 = vpow2.f32 %v1287_v12  ;;  %v1290_v3 = vmul.f32 -1.442695, %v650_v59  ;;  %v645_v5 = vadd.f32 %v644_v1, %v2378_v29  ;;  %v780_v59 = vld [vmem:[%s2613_s1 + $0x8] sm:$0xff] }
 0x272   :  { %v1736_v8 = vpop.eup %1735  ;;  %v1582_v10 = vpop.f32.mrf.mxu0 }
 0x273   :  { %1749 = vrcp.f32 %v732_v2  ;;  %v731_v11 = vadd.f32 1.0, %v1736_v8  ;;  %v1289_v13 = vmul.f32 -1.442695, %v645_v5  ;;  %v660_v16 = vadd.f32 %v1582_v10, %v2378_v29  ;;  %v781_v10 = vld [vmem:[%s2613_s1 + $0x10] sm:$0xff] }
 0x274   :  { %v1738_v18 = vpop.eup %1737  ;;  %1751 = vpow2.f32 %v1290_v3  ;;  %v654_v19 = vpop.f32.mrf.mxu0 }
 0x275   :  { %1753 = vrcp.f32 %v731_v11  ;;  %v734_v21 = vadd.f32 1.0, %v1738_v18  ;;  %v1292_v24 = vmul.f32 -1.442695, %v660_v16  ;;  %v655_v26 = vadd.f32 %v654_v19, %v2378_v29 }
 0x276   :  { %v1740_v27 = vpop.eup %1739  ;;  %1755 = vpow2.f32 %v1289_v13  ;;  %v1585_v32 = vpop.f32.mrf.mxu0  ;;  %v782_v13 = vld [vmem:[%s2613_s1 + $0x18] sm:$0xff] }
 0x277   :  { %1757 = vrcp.f32 %v734_v21  ;;  %v733_v34 = vadd.f32 1.0, %v1740_v27  ;;  %v1291_v35 = vmul.f32 -1.442695, %v655_v26  ;;  %v670_v37 = vadd.f32 %v1585_v32, %v2378_v29  ;;  %v783_v32 = vld [vmem:[%s2613_s1 + $0x20] sm:$0xff] }
 0x278   :  { %v1742_v40 = vpop.eup %1741  ;;  %1759 = vpow2.f32 %v1292_v24  ;;  %v664_v42 = vpop.f32.mrf.mxu0 }
 0x279   :  { %1761 = vrcp.f32 %v733_v34  ;;  %v736_v43 = vadd.f32 1.0, %v1742_v40  ;;  %v1294_v45 = vmul.f32 -1.442695, %v670_v37  ;;  %v665_v48 = vadd.f32 %v664_v42, %v2378_v29 }
 0x27a   :  { %v1744_v54 = vpop.eup %1743  ;;  %1763 = vpow2.f32 %v1291_v35  ;;  %v1588_v31 = vpop.f32.mrf.mxu0  ;;  %v784_v35 = vld [vmem:[%s2613_s1 + $0x28] sm:$0xff] }
 0x27b   :  { %1765 = vrcp.f32 %v736_v43  ;;  %v735_v51 = vadd.f32 1.0, %v1744_v54  ;;  %v1293_v50 = vmul.f32 -1.442695, %v665_v48  ;;  %v680_v38 = vadd.f32 %v1588_v31, %v2378_v29  ;;  %v785_v48 = vld [vmem:[%s2613_s1 + $0x30] sm:$0xff]  ;;  %v786_v31 = vld [vmem:[%s2613_s1 + $0x38] sm:$0xff] }
 0x27c   :  { %v1746_v39 = vpop.eup %1745  ;;  %1767 = vpow2.f32 %v1294_v45  ;;  %v674_v44 = vpop.f32.mrf.mxu0 }
 0x27d   :  { %1769 = vrcp.f32 %v735_v51  ;;  %v738_v46 = vadd.f32 1.0, %v1746_v39  ;;  %v1296_v55 = vmul.f32 -1.442695, %v680_v38  ;;  %v675_v61 = vadd.f32 %v674_v44, %v2378_v29 }
 0x27e   :  { %v1748_v63 = vpop.eup %1747  ;;  %1771 = vpow2.f32 %v1293_v50 }
 0x27f   :  { %1773 = vrcp.f32 %v738_v46  ;;  %v737_v14 = vadd.f32 1.0, %v1748_v63  ;;  %v1295_v15 = vmul.f32 -1.442695, %v675_v61  ;;  %v789_v63 = vld [vmem:[%s2613_s1 + $0x50] sm:$0xff] }
 0x280   :  { %v1750_v20 = vpop.eup %1749  ;;  %1775 = vpow2.f32 %v1296_v55 }
 0x281   :  { %v1752_v12 = vpop.eup %1751  ;;  %1777 = vrcp.f32 %v737_v14  ;;  %v796_v8 = vmul.f32 %v1750_v20, %v780_v59  ;;  %v792_v59 = vld [vmem:[%s2613_s1 + $0x68] sm:$0xff] }
 0x282   :  { %v1754_v62 = vpop.eup %1753  ;;  %v740_v1 = vadd.f32 1.0, %v1752_v12  ;;  %1779 = vpow2.f32 %v1295_v15  ;;  %v790_v15 = vld [vmem:[%s2613_s1 + $0x58] sm:$0xff] }
 0x283   :  { %v1756_v29 = vpop.eup %1755  ;;  %v795_v2 = vmul.f32 %v1754_v62, %v779_v22  ;;  %v791_v22 = vld [vmem:[%s2613_s1 + $0x60] sm:$0xff] }
 0x284   :  { %v1758_v3 = vpop.eup %1757  ;;  %v739_v5 = vadd.f32 1.0, %v1756_v29  ;;  %1781 = vrcp.f32 %v740_v1  ;;  %v793_v29 = vld [vmem:[%s2613_s1 + $0x70] sm:$0xff] }
 0x285   :  { %v1760_v11 = vpop.eup %1759  ;;  %1621 = vmatprep.mubr.f32.mxu1 %v795_v2  ;;  %v798_v27 = vmul.f32 %v1758_v3, %v782_v13  ;;  %v794_v2 = vld [vmem:[%s2613_s1 + $0x78] sm:$0xff]  ;;  %v1135_v13 = vsub.s32 2, %v2003_v49 }
 0x286   :  { %v1762_v16 = vpop.eup %1761  ;;  %1783 = vrcp.f32 %v739_v5  ;;  %v742_v18 = vadd.f32 1.0, %v1760_v11  ;;  %1622 = vmatmul.mubr.f32.vlgmr.msra.gmra.mxu1 %v796_v8 }
 0x287   :  { %v1764_v19 = vpop.eup %1763  ;;  %1717 = vmatpush3.msra.mxu1 %v2147_v0  ;;  %v797_v21 = vmul.f32 %v1762_v16, %v781_v10 }
 0x288   :  { %v1766_v24 = vpop.eup %1765  ;;  %v741_v26 = vadd.f32 1.0, %v1764_v19  ;;  %1702 = vmatprep.subr.mxu1 %v2170_v41  ;;  %1785 = vrcp.f32 %v742_v18  ;;  %v1191_v18 = vsub.s32 4, %v2003_v49  ;;  %v1211_v19 = vsub.s32 5, %v2003_v49 }
 0x289   :  { %v1768_v34 = vpop.eup %1767  ;;  %1718 = vmatpush3.msra.mxu1 %v2170_v41  ;;  %1624 = vmatprep.mubr.f32.mxu1 %v797_v21  ;;  %v800_v41 = vmul.f32 %v1766_v24, %v784_v35 }
 0x28a   :  { %v1770_v0 = vpop.eup %1769  ;;  %1787 = vrcp.f32 %v741_v26  ;;  %v744_v37 = vadd.f32 1.0, %v1768_v34  ;;  %1703 = vmatprep.subr.mxu1 %v2177_v52  ;;  %1625 = vmatmul.mubr.f32.gmra.mxu1 %v798_v27  ;;  %v2492_v35 = vrot.slane %v1797_v57, %v1191_v18 }
 0x28b   :  { %v1772_v40 = vpop.eup %1771  ;;  %1719 = vmatpush3.msra.mxu1 %v2177_v52  ;;  %v799_v42 = vmul.f32 %v1770_v0, %v783_v32 }
 0x28c   :  { %v1774_v43 = vpop.eup %1773  ;;  %v743_v45 = vadd.f32 1.0, %v1772_v40  ;;  %1704 = vmatprep.subr.mxu1 %v2187_v6  ;;  %1789 = vrcp.f32 %v744_v37  ;;  %v2495_v40 = vrot.slane %v1797_v57, %v1211_v19 }
 0x28d   :  { %v1776_v54 = vpop.eup %1775  ;;  %1720 = vmatpush3.msra.mxu1 %v2187_v6  ;;  %1627 = vmatprep.mubr.f32.mxu1 %v799_v42  ;;  %v802_v44 = vmul.f32 %v1774_v43, %v786_v31  ;;  %v787_v6 = vld [vmem:[%s2613_s1 + $0x40] sm:$0xff] }
 0x28e   :  { %v1778_v52 = vpop.eup %1777  ;;  %1791 = vrcp.f32 %v743_v45  ;;  %v746_v51 = vadd.f32 1.0, %v1776_v54  ;;  %1705 = vmatprep.subr.mxu1 %v2195_v17  ;;  %1628 = vmatmul.mubr.f32.gmra.mxu1 %v800_v41 }
 0x28f   :  { %v1780_v50 = vpop.eup %1779  ;;  %1721 = vmatpush3.msra.mxu1 %v2195_v17  ;;  %v801_v38 = vmul.f32 %v1778_v52, %v785_v48  ;;  %v788_v17 = vld [vmem:[%s2613_s1 + $0x48] sm:$0xff] }
 0x290   :  { %v745_v39 = vadd.f32 1.0, %v1780_v50  ;;  %1706 = vmatprep.subr.mxu1 %v2205_v30  ;;  %1793 = vrcp.f32 %v746_v51 }
 0x291   :  { %1722 = vmatpush3.msra.mxu1 %v2205_v30  ;;  %1630 = vmatprep.mubr.f32.mxu1 %v801_v38  ;;  %v1782_v46 = vpop.eup %1781 }
 0x292   :  { %1795 = vrcp.f32 %v745_v39  ;;  %1707 = vmatprep.subr.mxu1 %v2213_v36  ;;  %1631 = vmatmul.mubr.f32.gmra.mxu1 %v802_v44  ;;  %v804_v61 = vmul.f32 %v1782_v46, %v788_v17 }
 0x293   :  { %v1784_v55 = vpop.eup %1783  ;;  %1723 = vmatpush3.msra.mxu1 %v2213_v36 }
 0x294   :  { %1708 = vmatprep.subr.mxu1 %v2223_v53  ;;  %v803_v30 = vmul.f32 %v1784_v55, %v787_v6 }
 0x295   :  { %1724 = vmatpush3.msra.mxu1 %v2223_v53  ;;  %v1786_v14 = vpop.eup %1785 }
 0x296   :  { %1633 = vmatprep.mubr.f32.mxu1 %v803_v30  ;;  %1709 = vmatprep.subr.mxu1 %v2231_v4  ;;  %v806_v53 = vmul.f32 %v1786_v14, %v790_v15 }
 0x297   :  { %v1788_v20 = vpop.eup %1787  ;;  %1634 = vmatmul.mubr.f32.gmra.mxu1 %v804_v61 }
 0x298   :  { %1725 = vmatpush3.msra.mxu1 %v2231_v4  ;;  %v805_v36 = vmul.f32 %v1788_v20, %v789_v63 }
 0x299   :  { %1710 = vmatprep.subr.mxu1 %v2241_v23  ;;  %v1790_v12 = vpop.eup %1789 }
 0x29a   :  { %1726 = vmatpush3.msra.mxu1 %v2241_v23  ;;  %1636 = vmatprep.mubr.f32.mxu1 %v805_v36  ;;  %v808_v1 = vmul.f32 %v1790_v12, %v792_v59 }
 0x29b   :  { %v1792_v62 = vpop.eup %1791  ;;  %1711 = vmatprep.subr.mxu1 %v2249_v33  ;;  %1637 = vmatmul.mubr.f32.gmra.mxu1 %v806_v53 }
 0x29c   :  { %1727 = vmatpush3.msra.mxu1 %v2249_v33  ;;  %v807_v4 = vmul.f32 %v1792_v62, %v791_v22 }
 0x29d   :  { %1712 = vmatprep.subr.mxu1 %v2259_v47  ;;  %v1794_v23 = vpop.eup %1793 }
 0x29e   :  { %1728 = vmatpush3.msra.mxu1 %v2259_v47  ;;  %1639 = vmatprep.mubr.f32.mxu1 %v807_v4  ;;  %v810_v5 = vmul.f32 %v1794_v23, %v794_v2  ;;  %v1679_v47 = vpop.f32.mrf.mxu0 }
 0x29f   :  { %v1796_v3 = vpop.eup %1795  ;;  %1713 = vmatprep.subr.mxu1 %v2267_v9  ;;  %1640 = vmatmul.mubr.f32.gmra.mxu1 %v808_v1 }
 0x2a0   :  { %1729 = vmatpush3.msra.mxu1 %v2267_v9  ;;  %v809_v33 = vmul.f32 %v1796_v3, %v793_v29  ;;  %v1054_v9 = vpop.f32.mrf.mxu0 }
 0x2a1   :  { %1714 = vmatprep.subr.mxu1 %v2276_v7 }
 0x2a2   :  { %1730 = vmatpush3.msra.mxu1 %v2276_v7  ;;  %1642 = vmatprep.mubr.f32.mxu1 %v809_v33  ;;  %v1682_v8 = vpop.f32.mrf.mxu0 }
 0x2a3   :  { %1715 = vmatprep.subr.mxu1 %v2283_v25  ;;  %1643 = vmatmul.mubr.f32.gmra.mxu1 %v810_v5 }
 0x2a4   :  { %1731 = vmatpush3.msra.mxu1 %v2283_v25  ;;  %1698 = vmatprep.mubr.f32.mxu1 %v299_v58  ;;  %v1064_v7 = vpop.f32.mrf.mxu0  ;;  %v1155_v25 = vsub.s32 3, %v2003_v49  ;;  %v2484_v58 = vrot.slane %v1797_v57, %v1135_v13 }
 0x2a5   :  { %1716 = vmatprep.subr.mxu1 %v2290_v28 }
 0x2a6   :  { %1732 = vmatpush3.msra.mxu1 %v2290_v28  ;;  %v1685_v10 = vpop.f32.mrf.mxu0 }
 0x2a7   :  { %1699 = vmatmul.mubr.f32.vlgmr.msra.gmra.mxu1 %v300_v60  ;;  %v2486_v60 = vrot.slane %v1797_v57, %v1155_v25 }
 0x2a8   :  { %v1074_v11 = vpop.f32.mrf.mxu0 }
 0x2aa   :  { %v1688_v16 = vpop.f32.mrf.mxu0 }
 0x2ac   :  { %v1084_v24 = vpop.f32.mrf.mxu0 }
 0x2ae   :  { %v1691_v43 = vpop.f32.mrf.mxu0 }
 0x2b0   :  { %v1094_v44 = vpop.f32.mrf.mxu0 }
 0x2b2   :  { %v1694_v62 = vpop.f32.mrf.mxu0 }
 0x2b4   :  { %v1104_v25 = vpop.f32.mrf.mxu0 }
 0x346   :  { %v1623_v28 = vpop.f32.mrf.mxu1 }
 0x347   :  { %v1060_v56 = vadd.f32 %v1679_v47, %v1623_v28 }
 0x348   :  { %v909_v21 = vpop.f32.mrf.mxu1 }
 0x349   :  { %v1138_v26 = vmul.f32 %v2484_v58, %v1060_v56  ;;  %v1055_v27 = vadd.f32 %v1054_v9, %v909_v21 }
 0x34a   :  { %v1626_v32 = vpop.f32.mrf.mxu1 }
 0x34b   :  { %v1158_v34 = vadd.f32 %v2486_v60, %v1138_v26  ;;  %v1137_v0 = vmul.f32 %v2484_v58, %v1055_v27  ;;  %v1070_v37 = vadd.f32 %v1682_v8, %v1626_v32 }
 0x34c   :  { %v919_v42 = vpop.f32.mrf.mxu1 }
 0x34d   :  { %v1174_v45 = vmax.f32 %v1158_v34, 0.0  ;;  %v1157_v49 = vadd.f32 %v2486_v60, %v1137_v0  ;;  %v1140_v41 = vmul.f32 %v2484_v58, %v1070_v37  ;;  %v1065_v48 = vadd.f32 %v1064_v7, %v919_v42  ;;  %v1697_v42 = vpop.f32.mrf.mxu0 }
 0x34e   :  { %v1629_v54 = vpop.f32.mrf.mxu1 }
 0x34f   :  { %v1194_v31 = vmul.f32 %v2492_v35, %v1174_v45  ;;  %v1173_v52 = vmax.f32 %v1157_v49, 0.0  ;;  %v1160_v51 = vadd.f32 %v2486_v60, %v1140_v41  ;;  %v1139_v50 = vmul.f32 %v2484_v58, %v1065_v48 }
 0x350   :  { %v1080_v38 = vadd.f32 %v1685_v10, %v1629_v54  ;;  %v929_v39 = vpop.f32.mrf.mxu1 }
 0x351   :  { %v1214_v6 = vadd.f32 %v2495_v40, %v1194_v31  ;;  %v1193_v46 = vmul.f32 %v2492_v35, %v1173_v52  ;;  %v1176_v17 = vmax.f32 %v1160_v51, 0.0  ;;  %v1159_v55 = vadd.f32 %v2486_v60, %v1139_v50 }
 0x352   :  { %v1142_v30 = vmul.f32 %v2484_v58, %v1080_v38  ;;  %v1075_v61 = vadd.f32 %v1074_v11, %v929_v39  ;;  %v1632_v63 = vpop.f32.mrf.mxu1 }
 0x353   :  { %v1230_v14 = vmax.f32 %v1214_v6, 0.0  ;;  %v1213_v15 = vadd.f32 %v2495_v40, %v1193_v46  ;;  %v1196_v20 = vmul.f32 %v2492_v35, %v1176_v17  ;;  %v1175_v36 = vmax.f32 %v1159_v55, 0.0  ;;  %v1114_v55 = vpop.f32.mrf.mxu0 }
 0x354   :  { %v1162_v53 = vadd.f32 %v2486_v60, %v1142_v30  ;;  %v1141_v22 = vmul.f32 %v2484_v58, %v1075_v61  ;;  %v1090_v12 = vadd.f32 %v1688_v16, %v1632_v63  ;;  %v939_v59 = vpop.f32.mrf.mxu1 }
 0x355   :  { %1246 = vst [vmem:[%s2614_s8 + $0x8] sm:$0xff] %v1230_v14  ;;  %v1229_v4 = vmax.f32 %v1213_v15, 0.0  ;;  %v1216_v1 = vadd.f32 %v2495_v40, %v1196_v20  ;;  %v1195_v29 = vmul.f32 %v2492_v35, %v1175_v36  ;;  %v1085_v23 = vadd.f32 %v1084_v24, %v939_v59 }
 0x356   :  { %v1178_v2 = vmax.f32 %v1162_v53, 0.0  ;;  %v1161_v3 = vadd.f32 %v2486_v60, %v1141_v22  ;;  %v1144_v33 = vmul.f32 %v2484_v58, %v1090_v12 }
 0x357   :  { %1245 = vst [vmem:[%s2614_s8] sm:$0xff] %v1229_v4  ;;  %v1232_v5 = vmax.f32 %v1216_v1, 0.0  ;;  %v1215_v47 = vadd.f32 %v2495_v40, %v1195_v29  ;;  %v1143_v9 = vmul.f32 %v2484_v58, %v1085_v23  ;;  %v1635_v8 = vpop.f32.mrf.mxu1 }
 0x358   :  { %v1198_v7 = vmul.f32 %v2492_v35, %v1178_v2  ;;  %v1177_v10 = vmax.f32 %v1161_v3, 0.0  ;;  %v1164_v11 = vadd.f32 %v2486_v60, %v1144_v33  ;;  %v1100_v13 = vadd.f32 %v1691_v43, %v1635_v8 }
 0x359   :  { %1248 = vst [vmem:[%s2614_s8 + $0x18] sm:$0xff] %v1232_v5  ;;  %v1231_v16 = vmax.f32 %v1215_v47, 0.0  ;;  %v1163_v57 = vadd.f32 %v2486_v60, %v1143_v9  ;;  %v949_v28 = vpop.f32.mrf.mxu1 }
 0x35a   :  { %v1218_v56 = vadd.f32 %v2495_v40, %v1198_v7  ;;  %v1197_v18 = vmul.f32 %v2492_v35, %v1177_v10  ;;  %v1180_v19 = vmax.f32 %v1164_v11, 0.0  ;;  %v1146_v21 = vmul.f32 %v2484_v58, %v1100_v13 }
 0x35b   :  { %1247 = vst [vmem:[%s2614_s8 + $0x10] sm:$0xff] %v1231_v16  ;;  %v1179_v24 = vmax.f32 %v1163_v57, 0.0  ;;  %v1095_v26 = vadd.f32 %v1094_v44, %v949_v28  ;;  %v1638_v27 = vpop.f32.mrf.mxu1 }
 0x35c   :  { %v1234_v32 = vmax.f32 %v1218_v56, 0.0  ;;  %v1217_v34 = vadd.f32 %v2495_v40, %v1197_v18  ;;  %v1200_v0 = vmul.f32 %v2492_v35, %v1180_v19  ;;  %v1166_v37 = vadd.f32 %v2486_v60, %v1146_v21 }
 0x35d   :  { %v1199_v43 = vmul.f32 %v2492_v35, %v1179_v24  ;;  %v1145_v45 = vmul.f32 %v2484_v58, %v1095_v26  ;;  %v1110_v49 = vadd.f32 %v1694_v62, %v1638_v27  ;;  %v959_v41 = vpop.f32.mrf.mxu1 }
 0x35e   :  { %1250 = vst [vmem:[%s2614_s8 + $0x28] sm:$0xff] %v1234_v32  ;;  %v1233_v48 = vmax.f32 %v1217_v34, 0.0  ;;  %v1220_v54 = vadd.f32 %v2495_v40, %v1200_v0  ;;  %v1182_v31 = vmax.f32 %v1166_v37, 0.0  ;;  %v1105_v52 = vadd.f32 %v1104_v25, %v959_v41 }
 0x35f   :  { %v1219_v51 = vadd.f32 %v2495_v40, %v1199_v43  ;;  %v1165_v50 = vadd.f32 %v2486_v60, %v1145_v45  ;;  %v1148_v38 = vmul.f32 %v2484_v58, %v1110_v49  ;;  %v1641_v39 = vpop.f32.mrf.mxu1 }
 0x360   :  { %1249 = vst [vmem:[%s2614_s8 + $0x20] sm:$0xff] %v1233_v48  ;;  %v1236_v44 = vmax.f32 %v1220_v54, 0.0  ;;  %v1202_v6 = vmul.f32 %v2492_v35, %v1182_v31  ;;  %v1147_v46 = vmul.f32 %v2484_v58, %v1105_v52  ;;  %v1120_v17 = vadd.f32 %v1697_v42, %v1641_v39 }
 0x361   :  { %v1235_v30 = vmax.f32 %v1219_v51, 0.0  ;;  %v1181_v61 = vmax.f32 %v1165_v50, 0.0  ;;  %v1168_v63 = vadd.f32 %v2486_v60, %v1148_v38  ;;  %v969_v14 = vpop.f32.mrf.mxu1 }
 0x362   :  { %1252 = vst [vmem:[%s2614_s8 + $0x38] sm:$0xff] %v1236_v44  ;;  %v1222_v15 = vadd.f32 %v2495_v40, %v1202_v6  ;;  %v1167_v20 = vadd.f32 %v2486_v60, %v1147_v46  ;;  %v1150_v36 = vmul.f32 %v2484_v58, %v1120_v17  ;;  %v1115_v53 = vadd.f32 %v1114_v55, %v969_v14 }
 0x363   :  { %1251 = vst [vmem:[%s2614_s8 + $0x30] sm:$0xff] %v1235_v30  ;;  %v1201_v22 = vmul.f32 %v2492_v35, %v1181_v61  ;;  %v1184_v12 = vmax.f32 %v1168_v63, 0.0  ;;  %v1644_v59 = vpop.f32.mrf.mxu1 }
 0x364   :  { %v1238_v62 = vmax.f32 %v1222_v15, 0.0  ;;  %v1183_v4 = vmax.f32 %v1167_v20, 0.0  ;;  %v1170_v1 = vadd.f32 %v2486_v60, %v1150_v36  ;;  %v1149_v29 = vmul.f32 %v2484_v58, %v1115_v53 }
 0x365   :  { %v1221_v23 = vadd.f32 %v2495_v40, %v1201_v22  ;;  %v1204_v2 = vmul.f32 %v2492_v35, %v1184_v12  ;;  %v979_v3 = vpop.f32.mrf.mxu1 }
 0x366   :  { %1254 = vst [vmem:[%s2614_s8 + $0x48] sm:$0xff] %v1238_v62  ;;  %v1203_v33 = vmul.f32 %v2492_v35, %v1183_v4  ;;  %v1186_v5 = vmax.f32 %v1170_v1, 0.0  ;;  %v1169_v47 = vadd.f32 %v2486_v60, %v1149_v29 }
 0x367   :  { %v1237_v9 = vmax.f32 %v1221_v23, 0.0  ;;  %v1224_v8 = vadd.f32 %v2495_v40, %v1204_v2  ;;  %v1700_v7 = vpop.f32.mrf.mxu1 }
 0x368   :  { %v1223_v10 = vadd.f32 %v2495_v40, %v1203_v33  ;;  %v1206_v11 = vmul.f32 %v2492_v35, %v1186_v5  ;;  %v1185_v13 = vmax.f32 %v1169_v47, 0.0  ;;  %v1130_v25 = vadd.f32 %v1700_v7, %v1644_v59 }
 0x369   :  { %1253 = vst [vmem:[%s2614_s8 + $0x40] sm:$0xff] %v1237_v9  ;;  %v1240_v16 = vmax.f32 %v1224_v8, 0.0  ;;  %v1124_v57 = vpop.f32.mrf.mxu1 }
 0x36a   :  { %v1239_v28 = vmax.f32 %v1223_v10, 0.0  ;;  %v1226_v56 = vadd.f32 %v2495_v40, %v1206_v11  ;;  %v1205_v18 = vmul.f32 %v2492_v35, %v1185_v13  ;;  %v1152_v19 = vmul.f32 %v2484_v58, %v1130_v25 }
 0x36b   :  { %1256 = vst [vmem:[%s2614_s8 + $0x58] sm:$0xff] %v1240_v16  ;;  %v1125_v21 = vadd.f32 %v1124_v57, %v979_v3 }
 0x36c   :  { %1255 = vst [vmem:[%s2614_s8 + $0x50] sm:$0xff] %v1239_v28  ;;  %v1242_v24 = vmax.f32 %v1226_v56, 0.0  ;;  %v1225_v26 = vadd.f32 %v2495_v40, %v1205_v18  ;;  %v1172_v27 = vadd.f32 %v2486_v60, %v1152_v19 }
 0x36d   :  { %v1151_v32 = vmul.f32 %v2484_v58, %v1125_v21 }
 0x36e   :  { %1258 = vst [vmem:[%s2614_s8 + $0x68] sm:$0xff] %v1242_v24  ;;  %v1241_v34 = vmax.f32 %v1225_v26, 0.0  ;;  %v1188_v0 = vmax.f32 %v1172_v27, 0.0 }
 0x36f   :  { %v1171_v37 = vadd.f32 %v2486_v60, %v1151_v32 }
 0x370   :  { %1257 = vst [vmem:[%s2614_s8 + $0x60] sm:$0xff] %v1241_v34  ;;  %v1208_v42 = vmul.f32 %v2492_v35, %v1188_v0 }
 0x371   :  { %v1187_v43 = vmax.f32 %v1171_v37, 0.0 }
 0x372   :  { %v1228_v45 = vadd.f32 %v2495_v40, %v1208_v42 }
 0x373   :  { %v1207_v49 = vmul.f32 %v2492_v35, %v1187_v43 }
 0x374   :  { %v1244_v58 = vmax.f32 %v1228_v45, 0.0 }
 0x375   :  { %v1227_v41 = vadd.f32 %v2495_v40, %v1207_v49 }
 0x376   :  { %1260 = vst [vmem:[%s2614_s8 + $0x78] sm:$0xff] %v1244_v58 }
 0x377   :  { %v1243_v48 = vmax.f32 %v1227_v41, 0.0 }
 0x379   :  { %1259 = vst [vmem:[%s2614_s8 + $0x70] sm:$0xff] %v1243_v48 }

// kernel: agc_forward.3
= control target key start
LH: loop header
LB: loop body
LE: loop exit
PB: predicated region body
PF: predicated region fallthrough
CT: control target
= control target key end

     0   :  { %11 = vsyncpa [#allocation3], 0  ;;  %s4675_s0 = inlined_call_operand.vmem [shape: f32[2,6,6,6,32], index: 0, kind: input, shape index: {}, may-alias: {0,1,2}]   ;;  %s4676_s1 = inlined_call_operand.vmem [shape: f32[2,6,6,6,32], index: 1, kind: input, shape index: {}, may-alias: {0,1,2}]   ;;  %s4677_s2 = inlined_call_operand.vmem [shape: f32[2,6,6,6,32], index: 2, kind: input, shape index: {}, may-alias: {0,1,2}]   ;;  %s4678_s3 = inlined_call_operand.hbm [shape: f32[3,3,3,32,32], index: 3, kind: input, shape index: {}]   ;;  %s4679_s4 = inlined_call_operand.hbm [shape: f32[1,32], index: 4, kind: input, shape index: {}]   ;;  %s4680_s5 = inlined_call_operand.hbm [shape: f32[1,32], index: 5, kind: input, shape index: {}]   ;;  %s4681_s6 = inlined_call_operand.vmem [shape: f32[2,4,16,32], index: 6, kind: output, shape index: {}]  }
   0x1   :  { %12 = vsyncpa [#allocation5], 0  ;;  %s3996_s21 = smov 0   ;;  %s3998_s22 = smov 0  }
   0x2   :  { %s4000_s23 = smov 0   ;;  %s4002_s24 = smov 0  }
   0x3   :  { %s4004_s25 = smov 0  }
   0x4 LB: > { %s3956_s26 = smov [#allocation4]   ;;  %s3150_s28 = sadd.s32 4294967295, %s3954_s25   ;;  %s3954_s25 = sphi %s4004_s25, %s18_s25   ;;  %s3950_s24 = sphi %s4002_s24, %s4695_s24   ;;  %s3946_s23 = sphi %s4000_s23, %s4694_s23   ;;  %s3942_s22 = sphi %s3998_s22, %s4693_s22   ;;  %s3938_s21 = sphi %s3996_s21, %s4692_s21  }
   0x5   : > { %s240_s27 = sshll.u32 %s3956_s26, 4  ;;  %p3152_p0 = scmp.ge.s32.totalorder %s3954_s25, 1  ;;  %s241_s27 = int_to_ptr.vmem [resolvable:$true] %s240_s27 }
   0x6   : > { %p214_p1 = scmp.lt.s32.totalorder %s3954_s25, 9  ;;  %p4024_p2 = scmp.eq.s32.totalorder %s3150_s28, 0 }
   0x7   : > { %s27_s8 = sadd.s32 1, %s3946_s23  ;;  %s3841_s10 = scalar_lea.vmem %s241_s27, 16 }
   0x8   : > { %p4028_p3 = pnand %p3152_p0, %p214_p1  ;;  %p4041_p6 = scmp.ge.s32.totalorder %s27_s8, 4 }
   0x9   : > { %p3842_p8 = scmp.ne.s32.totalorder %s241_s27, %s3841_s10  ;;  %s3848_s11 = scalar_lea.vmem %s241_s27, 32 }
   0xa   : > { %p3736_p4 = pneg %p4028_p3  ;;  %p3849_p11 = scmp.lt.s32.totalorder %s241_s27, %s241_s27 }
   0xb   : > { %p3850_p12 = scmp.lt.s32.totalorder %s3848_s11, %s3841_s10 }
   0xc   : > { %p4036_p5 = pnand %p4024_p2, %p3736_p4 }
   0xd   : > { %p3851_p13 = por %p3850_p12, %p3849_p11 }
   0xe   : > { %p3832_p7 = pneg %p4036_p5 }
  0x10   : > { %p3844_p9 = pnand %p3842_p8, %p3832_p7 }
  0x12   : > { %p3845_p10 = pneg %p3844_p9 }
  0x14   : > { %p3852_p0 = pnand %p3851_p13, %p3845_p10 }
  0x16   : > { %3855 = shalt.err (!%p3852_p0)
}
  0x17   : > { %3742 = dma.hbm_to_vmem [thread:$0]  (!%p4036_p5), %s4679_s4, 16, %s241_s27, [#allocation5]  }
  0x18   : > { %s4697_s8 = smov (%p4041_p6, %s27_s8), 0  ;;  %s30_s14 = sadd.s32 1, %s3950_s24 }
  0x19   : > { %s4699_s14 = smov (!%p4041_p6, %s30_s14), %s3950_s24  ;;  %s3957_s15 = smov [#allocation2]  }
  0x1a   : > { %s226_s16 = sshll.u32 %s3957_s15, 4  ;;  %p32_p1 = scmp.ge.s32.totalorder %s4699_s14, 2  ;;  %s227_s16 = int_to_ptr.vmem [resolvable:$true] %s226_s16 }
  0x1b   : > { %s3867_s17 = scalar_lea.vmem %s227_s16, 13824  ;;  %p3875_p10 = scmp.lt.s32.totalorder %s227_s16, %s227_s16 }
  0x1c   : > { %s4701_s14 = smov (%p32_p1, %s4699_s14), 0  ;;  %p3868_p4 = scmp.ne.s32.totalorder %s227_s16, %s3867_s17 }
  0x1d   : > { %p3876_p11 = scmp.lt.s32.totalorder %s3867_s17, %s3867_s17 }
  0x1e   : > { %p3870_p8 = pnand %p3868_p4, %p3832_p7 }
  0x1f   : > { %p3877_p12 = por %p3876_p11, %p3875_p10 }
  0x20   : > { %p3871_p9 = pneg %p3870_p8 }
  0x22   : > { %p3878_p13 = pnand %p3877_p12, %p3871_p9 }
  0x24   : > { %3881 = shalt.err (!%p3878_p13)
}
  0x25   : > { %s3958_s18 = smov 128   ;;  %s3959_s19 = smov 8  }
  0x26   : > { %3739 = dma.hbm_to_vmem [thread:$0]  (!%p4036_p5), %s4678_s3, 13824, %s227_s16, [#allocation3], %s3958_s18, %s3958_s18, %s3959_s19  }
  0x27   : > { %s3960_s27 = smov [#allocation6]  }
  0x28   : > { %s251_s28 = sshll.u32 %s3960_s27, 4  ;;  %s252_s28 = int_to_ptr.vmem [resolvable:$true] %s251_s28 }
  0x29   : > { %s3893_s9 = scalar_lea.vmem %s252_s28, 16  ;;  %s3900_s10 = scalar_lea.vmem %s252_s28, 32 }
  0x2a   : > { %p3894_p6 = scmp.ne.s32.totalorder %s252_s28, %s3893_s9  ;;  %p3901_p4 = scmp.lt.s32.totalorder %s252_s28, %s252_s28 }
  0x2b   : > { %p3902_p8 = scmp.lt.s32.totalorder %s3900_s10, %s3893_s9 }
  0x2c   : > { %p3896_p0 = pnand %p3894_p6, %p3832_p7 }
  0x2d   : > { %p3903_p9 = por %p3902_p8, %p3901_p4 }
  0x2e   : > { %p3897_p1 = pneg %p3896_p0 }
  0x30   : > { %p3904_p10 = pnand %p3903_p9, %p3897_p1 }
  0x32   : > { %3907 = shalt.err (!%p3904_p10)
}
  0x33   : > { %3745 = dma.hbm_to_vmem [thread:$0]  (!%p4036_p5), %s4680_s5, 16, %s252_s28, [#allocation5]  }
  0x34   : > { %304 = sbr.rel (%p4028_p3) target bundleno = 409 (0x199), region = 44 }
  0x39   : > { %3929 = dma.done.wait (%p4024_p2), [#allocation3], 13824  }
  0x3a   : > { %3931 = vsyncadd (%p4024_p2), [#allocation3], 4294953472 }
  0x3b   : > { %3933 = dma.done.wait (%p4024_p2), [#allocation5], 32  }
  0x3c   : > { %3935 = vsyncadd (%p4024_p2), [#allocation5], 4294967264  ;;  %p370_p5 = scmp.lt.s32.totalorder %s3942_s22, 1  ;;  %p372_p7 = scmp.lt.s32.totalorder %s3938_s21, 5  ;;  %v451_v0 = vld [vmem:[#allocation2 + $0x38] sm:$0xff]  ;;  %v450_v2 = vld [vmem:[#allocation2 + $0x30] sm:$0xff] }
  0x3d   : > { %v419_v1 = vld [vmem:[#allocation2 + $0x18] sm:$0xff]  ;;  %3423 = vmatprep.subr.mxu0 %v451_v0  ;;  %v418_v3 = vld [vmem:[#allocation2 + $0x10] sm:$0xff]  ;;  %v449_v4 = vld [vmem:[#allocation2 + $0x28] sm:$0xff]  ;;  %vm428_vm0 = vcmask 1042432   ;;  %vm429_vm1 = vcmask 1046532   ;;  %s379_s19 = sadd.s32 1, %s3938_s21 }
  0x3e   : > { %s4703_s22 = smov (!%p370_p5, %s3942_s22), 1  ;;  %3434 = vmatprep.subr.mxu1 %v419_v1  ;;  %3424 = vmatpush3.msra.mxu0 %v451_v0  ;;  %v417_v5 = vld [vmem:[#allocation2 + $0x8] sm:$0xff]  ;;  %v448_v9 = vld [vmem:[#allocation2 + $0x20] sm:$0xff]  ;;  %vm4134_vm2 = vmor %vm428_vm0, %vm429_vm1  ;;  %vm454_vm3 = vcmask 261120   ;;  %vm615_vm4 = vcmask 1041408   ;;  %vm616_vm5 = vcmask 1045508  }
  0x3f   : > { %s373_s30 = scalar_select %p372_p7, %s3938_s21, 5  ;;  %3435 = vmatpush3.msra.mxu1 %v419_v1  ;;  %3425 = vmatprep.subr.mxu0 %v450_v2  ;;  %v416_v10 = vld [vmem:[#allocation2] sm:$0xff]  ;;  %v638_v24 = vld [vmem:[#allocation2 + $0x58] sm:$0xff]  ;;  %v637_v38 = vld [vmem:[#allocation2 + $0x50] sm:$0xff] }
  0x40   : > { %s4098_s7 = smul.u32 36, %s4703_s22  ;;  %3436 = vmatprep.subr.mxu1 %v418_v3  ;;  %3426 = vmatpush3.msra.mxu0 %v450_v2  ;;  %v726_v25 = vld [vmem:[#allocation2 + $0x78] sm:$0xff]  ;;  %s390_s20 = sadd.s32 2, %s3938_s21  ;;  %vm4183_vm6 = vmor %vm615_vm4, %vm616_vm5  ;;  %v636_v45 = vld [vmem:[#allocation2 + $0x48] sm:$0xff] }
  0x41   : > { %s3720_s13 = smul.u32 6, %s373_s30  ;;  %3437 = vmatpush3.msra.mxu1 %v418_v3  ;;  %3427 = vmatprep.subr.mxu0 %v449_v4  ;;  %p4164_p2 = scmp.lt.s32.totalorder %s379_s19, 5  ;;  %v725_v46 = vld [vmem:[#allocation2 + $0x70] sm:$0xff]  ;;  %v635_v50 = vld [vmem:[#allocation2 + $0x40] sm:$0xff]  ;;  %v724_v51 = vld [vmem:[#allocation2 + $0x68] sm:$0xff] }
  0x42   : > { %3438 = vmatprep.subr.mxu1 %v417_v5  ;;  %3428 = vmatpush3.msra.mxu0 %v449_v4  ;;  %p4189_p3 = scmp.lt.s32.totalorder %s390_s20, 5  ;;  %v723_v58 = vld [vmem:[#allocation2 + $0x60] sm:$0xff]  ;;  %v820_v59 = vld [vmem:[#allocation2 + $0x98] sm:$0xff]  ;;  %v819_v1 = vld [vmem:[#allocation2 + $0x90] sm:$0xff]  ;;  %p403_p11 = scmp.lt.s32.totalorder %s3938_s21, 3 }
  0x43   : > { %s376_s15 = sadd.s32 %s4098_s7, %s3720_s13  ;;  %3439 = vmatpush3.msra.mxu1 %v417_v5  ;;  %3429 = vmatprep.subr.mxu0 %v448_v9  ;;  %s4705_s19 = smov (!%p4164_p2, %s379_s19), 5  ;;  %v912_v2 = vld [vmem:[#allocation2 + $0xb8] sm:$0xff] }
  0x44   : > { %s3161_s29 = sshll.u32 %s376_s15, 3  ;;  %3440 = vmatprep.subr.mxu1 %v416_v10  ;;  %3430 = vmatpush3.msra.mxu0 %v448_v9  ;;  %s4707_s20 = smov (!%p4189_p3, %s390_s20), 5  ;;  %v2120_v16 = vld [vmem:[#allocation2 + $0x258] sm:$0xff] }
  0x45   : > { %s4104_s18 = scalar_lea.vmem %s4675_s0, %s3161_s29  ;;  %3441 = vmatpush3.msra.mxu1 %v416_v10  ;;  %3445 = vmatprep.subr.mxu0 %v638_v24  ;;  %s3722_s28 = smul.u32 6, %s4705_s19  ;;  %v2232_v39 = vld [vmem:[#allocation2 + $0x278] sm:$0xff] }
  0x46   : > { %v4107_v6 = vld [vmem:[%s4104_s18] sm:$0x3f]  ;;  %v4110_v7 = vld [vmem:[%s4104_s18 + $0x8] sm:$0x3f]  ;;  %v4113_v8 = vld [vmem:[%s4104_s18 + $0x10] sm:$0x3f]  ;;  %3456 = vmatprep.subr.mxu1 %v726_v25 }
  0x47   : > { %v4116_v11 = vld [vmem:[%s4104_s18 + $0x18] sm:$0x3f]  ;;  %v424_v12 = vcombine.high %v4107_v6, %v4107_v6  ;;  %v4122_v13 = vcombine.high %v4110_v7, %v4110_v7  ;;  %v4126_v14 = vcombine.high %v4113_v8, %v4113_v8  ;;  %v3167_v17 = vrot.slane %v4107_v6, 9  ;;  %v4194_v40 = vld [vmem:[%s4104_s18 + $0x20] sm:$0x3f]  ;;  %s3723_s9 = smul.u32 6, %s4707_s20  ;;  %s4255_s10 = sadd.s32 %s3722_s28, %s4098_s7 }
  0x48   : > { %v4130_v15 = vcombine.high %v4116_v11, %v4116_v11  ;;  %v3168_v18 = vrot.slane %v4110_v7, 9  ;;  %v3169_v19 = vrot.slane %v4113_v8, 9  ;;  %v3170_v23 = vrot.slane %v4116_v11, 9  ;;  %v4241_v57 = vld [vmem:[%s4104_s18 + $0x28] sm:$0x3f]  ;;  %s3162_s12 = sshll.u32 %s4255_s10, 3 }
  0x49   : > { %v433_v20 = vrot.slane %v424_v12, 5  ;;  %v437_v21 = vrot.slane %v4122_v13, 5  ;;  %v441_v22 = vrot.slane %v4126_v14, 5  ;;  %v620_v33 = vrot.slane %v424_v12, 6  ;;  %s4265_s11 = sadd.s32 %s3723_s9, %s4098_s7  ;;  %v910_v12 = vld [vmem:[#allocation2 + $0xa8] sm:$0xff]  ;;  %s4282_s15 = scalar_lea.vmem %s4676_s1, %s3162_s12 }
  0x4a   : > { %v445_v26 = vrot.slane %v4130_v15, 5  ;;  %v624_v34 = vrot.slane %v4122_v13, 6  ;;  %v628_v35 = vrot.slane %v4126_v14, 6  ;;  %v534_v36 = vcombine.low %v4107_v6, %v4110_v7  ;;  %s3163_s30 = sshll.u32 %s4265_s11, 3  ;;  %s4709_s21 = smov (!%p403_p11, %s3938_s21), 3 }
  0x4b   : > { %v434_v27 = vsel %vm4134_vm2, %v3167_v17, %v433_v20  ;;  %v4150_v28 = vsel %vm4134_vm2, %v3168_v18, %v437_v21  ;;  %v4154_v29 = vsel %vm4134_vm2, %v3169_v19, %v441_v22  ;;  %v4179_v37 = vcombine.low %v4113_v8, %v4116_v11  ;;  %v909_v18 = vld [vmem:[#allocation2 + $0xa0] sm:$0xff]  ;;  %v1000_v19 = vld [vmem:[#allocation2 + $0xd8] sm:$0xff]  ;;  %s4296_s17 = scalar_lea.vmem %s4677_s2, %s3163_s30  ;;  %s3164_s18 = sshll.u32 %s4709_s21, 1 }
  0x4c   : > { %v4159_v30 = vsel %vm4134_vm2, %v3170_v23, %v445_v26  ;;  %v452_v31 = vcombine.low %v434_v27, %v4150_v28  ;;  %v632_v41 = vrot.slane %v4130_v15, 6  ;;  %v3175_v42 = vrot.slane %v4107_v6, 10  ;;  %3442 = vmatprep.mubr.msk.f32.mxu1 %vm454_vm3, %v534_v36  ;;  %v818_v6 = vld [vmem:[#allocation2 + $0x88] sm:$0xff]  ;;  %v999_v23 = vld [vmem:[#allocation2 + $0xd0] sm:$0xff]  ;;  %v1091_v27 = vld [vmem:[#allocation2 + $0xf8] sm:$0xff]  ;;  %s3165_s19 = sshll.u32 %s4703_s22, 3 }
  0x4d   : > { %v4170_v32 = vcombine.low %v4154_v29, %v4159_v30  ;;  %v3176_v43 = vrot.slane %v4110_v7, 10  ;;  %v3177_v44 = vrot.slane %v4113_v8, 10  ;;  %v3178_v47 = vrot.slane %v4116_v11, 10  ;;  %3443 = vmatmul.mubr.msk.f32.vlgmr.msra.gmra.mxu1 %vm454_vm3, %v4179_v37  ;;  %v4307_v26 = vld [vmem:[%s4282_s15 + $0x8] sm:$0x3f]  ;;  %v1090_v36 = vld [vmem:[#allocation2 + $0xf0] sm:$0xff]  ;;  %s407_s20 = sadd.s32 %s3165_s19, %s3164_s18 }
  0x4e   : > { %3431 = vmatprep.mubr.msk.f32.mxu0 %vm454_vm3, %v452_v31  ;;  %v621_v48 = vsel %vm4183_vm6, %v3175_v42, %v620_v33  ;;  %v811_v49 = vcombine.high %v4194_v40, %v4194_v40  ;;  %3457 = vmatpush3.msra.mxu1 %v726_v25  ;;  %v728_v60 = vcombine.low %v4110_v7, %v4113_v8  ;;  %v3183_v61 = vrot.slane %v4194_v40, 9  ;;  %v911_v7 = vld [vmem:[#allocation2 + $0xb0] sm:$0xff]  ;;  %v4304_v25 = vld [vmem:[%s4282_s15] sm:$0x3f]  ;;  %v4322_v33 = vld [vmem:[%s4296_s17 + $0x8] sm:$0x3f] }
  0x4f   : > { %3432 = vmatmul.mubr.msk.f32.vlgmr.msra.gmra.mxu0 %vm454_vm3, %v4170_v32  ;;  %v4218_v52 = vsel %vm4183_vm6, %v3176_v43, %v624_v34  ;;  %v4222_v53 = vsel %vm4183_vm6, %v3177_v44, %v628_v35  ;;  %3458 = vmatprep.subr.mxu1 %v725_v46  ;;  %v4233_v55 = vsel %vm4183_vm6, %v3178_v47, %v632_v41  ;;  %v3186_v4 = vrot.slane %v4194_v40, 10  ;;  %v4319_v31 = vld [vmem:[%s4296_s17] sm:$0x3f]  ;;  %v4325_v34 = vld [vmem:[%s4296_s17 + $0x10] sm:$0x3f]  ;;  %v998_v35 = vld [vmem:[#allocation2 + $0xc8] sm:$0xff] }
  0x50   : > { %3446 = vmatpush3.msra.mxu0 %v638_v24  ;;  %v639_v54 = vcombine.low %v621_v48, %v4218_v52  ;;  %3459 = vmatpush3.msra.mxu1 %v725_v46  ;;  %v4237_v56 = vcombine.low %v4222_v53, %v4233_v55  ;;  %v814_v62 = vrot.slane %v811_v49, 5  ;;  %v729_v63 = vcombine.low %v4116_v11, %v4194_v40  ;;  %v817_v11 = vld [vmem:[#allocation2 + $0x80] sm:$0xff]  ;;  %v4335_v43 = vld [vmem:[%s4296_s17 + $0x18] sm:$0x3f]  ;;  %v1089_v48 = vld [vmem:[#allocation2 + $0xe8] sm:$0xff]  ;;  %s3166_s26 = sshll.u32 %s407_s20, 3 }
  0x51   : > { %3447 = vmatprep.subr.mxu0 %v637_v38  ;;  %3460 = vmatprep.subr.mxu1 %v724_v51  ;;  %v1082_v0 = vcombine.high %v4241_v57, %v4241_v57  ;;  %v906_v3 = vrot.slane %v811_v49, 6  ;;  %v821_v8 = vcombine.low %v4150_v28, %v4154_v29  ;;  %v3191_v9 = vrot.slane %v4241_v57, 9  ;;  %v4310_v28 = vld [vmem:[%s4282_s15 + $0x10] sm:$0x3f]  ;;  %v4313_v29 = vld [vmem:[%s4282_s15 + $0x18] sm:$0x3f]  ;;  %s409_s9 = scalar_lea.vmem %s4681_s6, %s3166_s26 }
  0x52   : > { %3448 = vmatpush3.msra.mxu0 %v637_v38  ;;  %3453 = vmatprep.mubr.msk.f32.mxu0 %vm454_vm3, %v639_v54  ;;  %v4261_v5 = vsel %vm4134_vm2, %v3183_v61, %v814_v62  ;;  %v3194_v15 = vrot.slane %v4241_v57, 10  ;;  %v913_v20 = vcombine.low %v4218_v52, %v4222_v53  ;;  %v1002_v38 = vcombine.low %v4194_v40, %v4241_v57  ;;  %v997_v47 = vld [vmem:[#allocation2 + $0xc0] sm:$0xff] }
  0x53   : > { %3449 = vmatprep.subr.mxu0 %v636_v45  ;;  %3461 = vmatpush3.msra.mxu1 %v724_v51  ;;  %v1085_v10 = vrot.slane %v1082_v0, 5  ;;  %v822_v13 = vcombine.low %v4159_v30, %v4261_v5  ;;  %v4275_v14 = vsel %vm4183_vm6, %v3186_v4, %v906_v3  ;;  %v1174_v17 = vrot.slane %v1082_v0, 6  ;;  %v1088_v62 = vld [vmem:[#allocation2 + $0xe0] sm:$0xff] }
  0x54   : > { %3450 = vmatpush3.msra.mxu0 %v636_v45  ;;  %3462 = vmatprep.subr.mxu1 %v723_v58  ;;  %v914_v22 = vcombine.low %v4233_v55, %v4275_v14  ;;  %v1276_v42 = vcombine.low %v4304_v25, %v4307_v26  ;;  %v4339_v44 = vcombine.low %v4310_v28, %v4313_v29  ;;  %v3229_v40 = vrot.slane %v4319_v31, 9 }
  0x55   : > { %3451 = vmatprep.subr.mxu0 %v635_v50  ;;  %3463 = vmatpush3.msra.mxu1 %v723_v58  ;;  %v4288_v21 = vsel %vm4134_vm2, %v3191_v9, %v1085_v10  ;;  %v4301_v24 = vsel %vm4183_vm6, %v3194_v15, %v1174_v17  ;;  %v4343_v45 = vcombine.high %v4304_v25, %v4304_v25  ;;  %v3230_v46 = vrot.slane %v4322_v33, 9 }
  0x56   : > { %3452 = vmatpush3.msra.mxu0 %v635_v50  ;;  %3464 = vmatprep.mubr.msk.f32.mxu1 %vm454_vm3, %v728_v60  ;;  %v1092_v30 = vcombine.low %v4261_v5, %v4288_v21  ;;  %v1181_v41 = vcombine.low %v4275_v14, %v4301_v24  ;;  %v2208_v49 = vcombine.high %v4319_v31, %v4319_v31  ;;  %v3231_v52 = vrot.slane %v4325_v34, 9 }
  0x57   : > { %3454 = vmatmul.mubr.msk.f32.vlgmr.msra.gmra.mxu0 %vm454_vm3, %v4237_v56  ;;  %3467 = vmatprep.subr.mxu0 %v820_v59  ;;  %v2209_v50 = vcombine.high %v4322_v33, %v4322_v33  ;;  %v2210_v51 = vcombine.high %v4325_v34, %v4325_v34  ;;  %v2211_v53 = vcombine.high %v4335_v43, %v4335_v43  ;;  %v3232_v54 = vrot.slane %v4335_v43, 9 }
  0x58   : > { %3468 = vmatpush3.msra.mxu0 %v820_v59  ;;  %3465 = vmatmul.mubr.msk.f32.vlgmr.msra.gmra.mxu1 %vm454_vm3, %v729_v63  ;;  %v3235_v55 = vrot.slane %v4319_v31, 10  ;;  %v3236_v57 = vrot.slane %v4322_v33, 10  ;;  %v2214_v58 = vrot.slane %v2208_v49, 5  ;;  %v2318_v61 = vrot.slane %v2208_v49, 6  ;;  %v1180_v63 = vld [vmem:[#allocation2 + $0x118] sm:$0xff]  ;;  %v1177_v49 = vld [vmem:[#allocation2 + $0x100] sm:$0xff] }
  0x59   : > { %3469 = vmatprep.subr.mxu0 %v819_v1  ;;  %3478 = vmatprep.subr.mxu1 %v912_v2  ;;  %v2218_v59 = vrot.slane %v2209_v50, 5  ;;  %v2222_v60 = vrot.slane %v2210_v51, 5  ;;  %v2226_v0 = vrot.slane %v2211_v53, 5  ;;  %v2326_v3 = vrot.slane %v2210_v51, 6 }
  0x5a   : > { %3470 = vmatpush3.msra.mxu0 %v819_v1  ;;  %3479 = vmatpush3.msra.mxu1 %v912_v2  ;;  %v2322_v1 = vrot.slane %v2209_v50, 6  ;;  %v3237_v2 = vrot.slane %v4325_v34, 10  ;;  %v4364_v4 = vsel %vm4134_vm2, %v3229_v40, %v2214_v58  ;;  %v4384_v10 = vsel %vm4183_vm6, %v3235_v55, %v2318_v61  ;;  %v1269_v50 = vld [vmem:[#allocation2 + $0x128] sm:$0xff] }
  0x5b   : > { %3471 = vmatprep.subr.mxu0 %v818_v6  ;;  %3480 = vmatprep.subr.mxu1 %v911_v7  ;;  %v4380_v9 = vsel %vm4134_vm2, %v3232_v54, %v2226_v0  ;;  %v4424_v40 = vcombine.high %v4310_v28, %v4310_v28  ;;  %v4440_v51 = vcombine.high %v4313_v29, %v4313_v29  ;;  %v1365_v55 = vrot.slane %v4343_v45, 5  ;;  %v1268_v0 = vld [vmem:[#allocation2 + $0x120] sm:$0xff] }
  0x5c   : > { %3472 = vmatpush3.msra.mxu0 %v818_v6  ;;  %3481 = vmatpush3.msra.mxu1 %v911_v7  ;;  %v4368_v6 = vsel %vm4134_vm2, %v3230_v46, %v2218_v59  ;;  %v4372_v7 = vsel %vm4134_vm2, %v3231_v52, %v2222_v60  ;;  %v4392_v17 = vsel %vm4183_vm6, %v3236_v57, %v2322_v1  ;;  %v3201_v52 = vrot.slane %v4310_v28, 9  ;;  %v1383_v1 = vld [vmem:[#allocation2 + $0x158] sm:$0xff] }
  0x5d   : > { %3473 = vmatprep.subr.mxu0 %v817_v11  ;;  %3482 = vmatprep.subr.mxu1 %v910_v12  ;;  %v4388_v15 = vcombine.low %v4372_v7, %v4380_v9  ;;  %v3202_v60 = vrot.slane %v4313_v29, 9  ;;  %v3205_v61 = vrot.slane %v4304_v25, 10 }
  0x5e   : > { %3474 = vmatpush3.msra.mxu0 %v817_v11  ;;  %3475 = vmatprep.mubr.msk.f32.mxu0 %vm454_vm3, %v821_v8  ;;  %v3238_v8 = vrot.slane %v4335_v43, 10  ;;  %v2330_v11 = vrot.slane %v2211_v53, 6 }
  0x5f   : > { %3483 = vmatpush3.msra.mxu1 %v910_v12  ;;  %3476 = vmatmul.mubr.msk.f32.vlgmr.msra.gmra.mxu0 %vm454_vm3, %v822_v13  ;;  %v1179_v12 = vld [vmem:[#allocation2 + $0x110] sm:$0xff]  ;;  %v1271_v13 = vld [vmem:[#allocation2 + $0x138] sm:$0xff] }
  0x60   : > { %3484 = vmatprep.subr.mxu1 %v909_v18  ;;  %3489 = vmatprep.subr.mxu0 %v1000_v19 }
  0x61   : > { %3485 = vmatpush3.msra.mxu1 %v909_v18  ;;  %3486 = vmatprep.mubr.msk.f32.mxu1 %vm454_vm3, %v913_v20  ;;  %v4396_v18 = vsel %vm4183_vm6, %v3237_v2, %v2326_v3  ;;  %v4405_v20 = vcombine.high %v4307_v26, %v4307_v26  ;;  %v1373_v3 = vrot.slane %v4424_v40, 5 }
  0x62   : > { %3490 = vmatpush3.msra.mxu0 %v1000_v19  ;;  %3487 = vmatmul.mubr.msk.f32.vlgmr.msra.gmra.mxu1 %vm454_vm3, %v914_v22  ;;  %v4399_v19 = vld [vmem:[%s4296_s17 + $0x20] sm:$0x3f]  ;;  %v3199_v22 = vrot.slane %v4304_v25, 9 }
  0x63   : > { %3491 = vmatprep.subr.mxu0 %v999_v23  ;;  %3500 = vmatprep.subr.mxu1 %v1091_v27  ;;  %v2509_v5 = vcombine.high %v4399_v19, %v4399_v19  ;;  %v3243_v21 = vrot.slane %v4399_v19, 9  ;;  %v1369_v2 = vrot.slane %v4405_v20, 5  ;;  %v1473_v24 = vrot.slane %v4405_v20, 6 }
  0x64   : > { %3492 = vmatpush3.msra.mxu0 %v999_v23  ;;  %3501 = vmatpush3.msra.mxu1 %v1091_v27  ;;  %v2337_v23 = vcombine.low %v4384_v10, %v4392_v17  ;;  %v4412_v27 = vsel %vm4183_vm6, %v3238_v8, %v2330_v11  ;;  %v1366_v14 = vsel %vm4134_vm2, %v3199_v22, %v1365_v55  ;;  %v3208_v22 = vrot.slane %v4313_v29, 10  ;;  %v1381_v55 = vld [vmem:[#allocation2 + $0x148] sm:$0xff] }
  0x65   : > { %3493 = vmatprep.subr.mxu0 %v998_v35  ;;  %3502 = vmatprep.subr.mxu1 %v1090_v36  ;;  %v4428_v46 = vcombine.low %v4396_v18, %v4412_v27  ;;  %v2512_v57 = vrot.slane %v2509_v5, 5  ;;  %v2604_v58 = vrot.slane %v2509_v5, 6  ;;  %v3206_v5 = vrot.slane %v4307_v26, 10  ;;  %v2608_v10 = vld [vmem:[#allocation2 + $0x2e8] sm:$0xff] }
  0x66   : > { %3494 = vmatpush3.msra.mxu0 %v998_v35  ;;  %3503 = vmatpush3.msra.mxu1 %v1090_v36  ;;  %v4415_v35 = vld [vmem:[%s4296_s17 + $0x28] sm:$0x3f]  ;;  %v1270_v36 = vld [vmem:[#allocation2 + $0x130] sm:$0xff]  ;;  %v1481_v20 = vrot.slane %v4440_v51, 6  ;;  %v4506_v25 = vsel %vm4134_vm2, %v3201_v52, %v1373_v3  ;;  %v4520_v52 = vld [vmem:[%s4282_s15 + $0x20] sm:$0x3f] }
  0x67   : > { %3495 = vmatprep.subr.mxu0 %v997_v47  ;;  %3504 = vmatprep.subr.mxu1 %v1089_v48  ;;  %v2780_v53 = vcombine.high %v4415_v35, %v4415_v35  ;;  %v3251_v54 = vrot.slane %v4415_v35, 9  ;;  %v3254_v59 = vrot.slane %v4415_v35, 10  ;;  %v4454_v8 = vsel %vm4134_vm2, %v3243_v21, %v2512_v57  ;;  %v1486_v57 = vld [vmem:[#allocation2 + $0x170] sm:$0xff] }
  0x68   : > { %3496 = vmatpush3.msra.mxu0 %v997_v47  ;;  %3497 = vmatprep.mubr.msk.f32.mxu0 %vm454_vm3, %v4179_v37  ;;  %v2233_v37 = vcombine.low %v4364_v4, %v4368_v6  ;;  %v2519_v47 = vcombine.low %v4368_v6, %v4372_v7  ;;  %v2421_v4 = vld [vmem:[#allocation2 + $0x2a0] sm:$0xff]  ;;  %v2696_v6 = vld [vmem:[#allocation2 + $0x308] sm:$0xff]  ;;  %v2788_v7 = vld [vmem:[#allocation2 + $0x330] sm:$0xff] }
  0x69   : > { %3505 = vmatpush3.msra.mxu1 %v1089_v48  ;;  %3498 = vmatmul.mubr.msk.f32.vlgmr.msra.gmra.mxu0 %vm454_vm3, %v1002_v38  ;;  %v3200_v38 = vrot.slane %v4307_v26, 9  ;;  %v3246_v48 = vrot.slane %v4399_v19, 10 }
  0x6a   : > { %3506 = vmatprep.subr.mxu1 %v1088_v62  ;;  %3511 = vmatprep.subr.mxu0 %v1180_v63 }
  0x6b   : > { %3507 = vmatpush3.msra.mxu1 %v1088_v62  ;;  %3508 = vmatprep.mubr.msk.f32.mxu1 %vm454_vm3, %v4170_v32  ;;  %v1178_v32 = vld [vmem:[#allocation2 + $0x108] sm:$0xff]  ;;  %v2783_v62 = vrot.slane %v2780_v53, 5  ;;  %v4458_v11 = vsel %vm4183_vm6, %v3246_v48, %v2604_v58 }
  0x6c   : > { %3512 = vmatpush3.msra.mxu0 %v1180_v63  ;;  %3509 = vmatmul.mubr.msk.f32.vlgmr.msra.gmra.mxu1 %vm454_vm3, %v1092_v30  ;;  %v2611_v30 = vcombine.low %v4392_v17, %v4396_v18  ;;  %v2872_v63 = vrot.slane %v2780_v53, 6  ;;  %v4497_v53 = vsel %vm4134_vm2, %v3200_v38, %v1369_v2  ;;  %v1380_v38 = vld [vmem:[#allocation2 + $0x140] sm:$0xff]  ;;  %v1660_v2 = vcombine.high %v4520_v52, %v4520_v52 }
  0x6d   : > { %3513 = vmatprep.subr.mxu0 %v1179_v12  ;;  %3522 = vmatprep.subr.mxu1 %v1271_v13  ;;  %v2700_v17 = vcombine.low %v4399_v19, %v4415_v35  ;;  %v2786_v18 = vld [vmem:[#allocation2 + $0x320] sm:$0xff] }
  0x6e   : > { %3514 = vmatpush3.msra.mxu0 %v1179_v12  ;;  %3523 = vmatpush3.msra.mxu1 %v1271_v13  ;;  %v1377_v12 = vrot.slane %v4440_v51, 5  ;;  %v2520_v13 = vcombine.low %v4380_v9, %v4454_v8  ;;  %v4481_v48 = vsel %vm4183_vm6, %v3254_v59, %v2872_v63  ;;  %v1384_v51 = vcombine.low %v1366_v14, %v4497_v53  ;;  %v1668_v14 = vld [vmem:[#allocation2 + $0x1b0] sm:$0xff]  ;;  %v2695_v9 = vld [vmem:[#allocation2 + $0x300] sm:$0xff] }
  0x6f   : > { %3515 = vmatprep.subr.mxu0 %v1178_v32  ;;  %3524 = vmatprep.subr.mxu1 %v1270_v36  ;;  %v4517_v59 = vsel %vm4183_vm6, %v3206_v5, %v1473_v24  ;;  %v4532_v63 = vsel %vm4183_vm6, %v3208_v22, %v1481_v20  ;;  %v3213_v5 = vrot.slane %v4520_v52, 9  ;;  %v1572_v24 = vld [vmem:[#allocation2 + $0x180] sm:$0xff]  ;;  %v1578_v22 = vcombine.low %v4313_v29, %v4520_v52 }
  0x70   : > { %3516 = vmatpush3.msra.mxu0 %v1178_v32  ;;  %3525 = vmatpush3.msra.mxu1 %v1270_v36  ;;  %v2612_v32 = vcombine.low %v4412_v27, %v4458_v11  ;;  %v4469_v36 = vsel %vm4134_vm2, %v3251_v54, %v2783_v62  ;;  %v1477_v54 = vrot.slane %v4424_v40, 6  ;;  %v1485_v40 = vld [vmem:[#allocation2 + $0x168] sm:$0xff]  ;;  %v1755_v29 = vrot.slane %v1660_v2, 6  ;;  %v2878_v27 = vld [vmem:[#allocation2 + $0x358] sm:$0xff]  ;;  %v2875_v35 = vld [vmem:[#allocation2 + $0x340] sm:$0xff] }
  0x71   : > { %3517 = vmatprep.subr.mxu0 %v1177_v49  ;;  %3526 = vmatprep.subr.mxu1 %v1269_v50  ;;  %v2790_v21 = vcombine.low %v4454_v8, %v4469_v36 }
  0x72   : > { %3518 = vmatpush3.msra.mxu0 %v1177_v49  ;;  %3519 = vmatprep.mubr.msk.f32.mxu0 %vm454_vm3, %v4237_v56  ;;  %v1469_v56 = vrot.slane %v4343_v45, 6  ;;  %v1382_v49 = vld [vmem:[#allocation2 + $0x150] sm:$0xff]  ;;  %v2879_v45 = vcombine.low %v4458_v11, %v4481_v48 }
  0x73   : > { %3527 = vmatpush3.msra.mxu1 %v1269_v50  ;;  %3520 = vmatmul.mubr.msk.f32.vlgmr.msra.gmra.mxu0 %vm454_vm3, %v1181_v41  ;;  %v1487_v50 = vld [vmem:[#allocation2 + $0x178] sm:$0xff]  ;;  %v3207_v41 = vrot.slane %v4310_v28, 10 }
  0x74   : > { %3528 = vmatprep.subr.mxu1 %v1268_v0  ;;  %3533 = vmatprep.subr.mxu0 %v1383_v1  ;;  %v1470_v58 = vsel %vm4183_vm6, %v3205_v61, %v1469_v56  ;;  %v1484_v61 = vld [vmem:[#allocation2 + $0x160] sm:$0xff]  ;;  %v1669_v56 = vld [vmem:[#allocation2 + $0x1b8] sm:$0xff] }
  0x75   : > { %3529 = vmatpush3.msra.mxu1 %v1268_v0  ;;  %3530 = vmatprep.mubr.msk.f32.mxu1 %vm454_vm3, %v1276_v42  ;;  %v4510_v42 = vsel %vm4134_vm2, %v3202_v60, %v1377_v12  ;;  %v4528_v62 = vsel %vm4183_vm6, %v3207_v41, %v1477_v54  ;;  %v1575_v0 = vld [vmem:[#allocation2 + $0x198] sm:$0xff]  ;;  %v1574_v12 = vld [vmem:[#allocation2 + $0x190] sm:$0xff]  ;;  %v1667_v41 = vld [vmem:[#allocation2 + $0x1a8] sm:$0xff]  ;;  %v1577_v54 = vcombine.low %v4307_v26, %v4310_v28  ;;  %v3216_v28 = vrot.slane %v4520_v52, 10 }
  0x76   : > { %3534 = vmatpush3.msra.mxu0 %v1383_v1  ;;  %3531 = vmatmul.mubr.msk.f32.vlgmr.msra.gmra.mxu1 %vm454_vm3, %v4339_v44  ;;  %v4524_v60 = vcombine.low %v4506_v25, %v4510_v42  ;;  %v1488_v1 = vcombine.low %v1470_v58, %v4517_v59  ;;  %v4540_v3 = vcombine.low %v4528_v62, %v4532_v63  ;;  %v1848_v58 = vld [vmem:[#allocation2 + $0x1f0] sm:$0xff] }
  0x77   : > { %3535 = vmatprep.subr.mxu0 %v1382_v49  ;;  %3544 = vmatprep.subr.mxu1 %v1487_v50 }
  0x78   : > { %3536 = vmatpush3.msra.mxu0 %v1382_v49  ;;  %3545 = vmatpush3.msra.mxu1 %v1487_v50  ;;  %v1663_v49 = vrot.slane %v1660_v2, 5  ;;  %v1573_v50 = vld [vmem:[#allocation2 + $0x188] sm:$0xff] }
  0x79   : > { %3537 = vmatprep.subr.mxu0 %v1381_v55  ;;  %3546 = vmatprep.subr.mxu1 %v1486_v57 }
  0x7a   : > { %3538 = vmatpush3.msra.mxu0 %v1381_v55  ;;  %3547 = vmatpush3.msra.mxu1 %v1486_v57  ;;  %v4554_v20 = vsel %vm4134_vm2, %v3213_v5, %v1663_v49  ;;  %v1666_v55 = vld [vmem:[#allocation2 + $0x1a0] sm:$0xff]  ;;  %v1761_v57 = vld [vmem:[#allocation2 + $0x1d8] sm:$0xff] }
  0x7b   : > { %3539 = vmatprep.subr.mxu0 %v1380_v38  ;;  %3548 = vmatprep.subr.mxu1 %v1485_v40  ;;  %v1671_v26 = vcombine.low %v4510_v42, %v4554_v20  ;;  %v4568_v42 = vsel %vm4183_vm6, %v3216_v28, %v1755_v29  ;;  %v1940_v5 = vld [vmem:[#allocation2 + $0x218] sm:$0xff]  ;;  %v2118_v28 = vld [vmem:[#allocation2 + $0x248] sm:$0xff]  ;;  %v2231_v29 = vld [vmem:[#allocation2 + $0x270] sm:$0xff] }
  0x7c   : > { %3540 = vmatpush3.msra.mxu0 %v1380_v38  ;;  %3541 = vmatprep.mubr.msk.f32.mxu0 %vm454_vm3, %v1384_v51  ;;  %v1670_v38 = vcombine.low %v4497_v53, %v4506_v25  ;;  %v1849_v51 = vld [vmem:[#allocation2 + $0x1f8] sm:$0xff]  ;;  %v1266_v53 = vld [vmem:[%s4282_s15 + $0x28] sm:$0x3f] }
  0x7d   : > { %3549 = vmatpush3.msra.mxu1 %v1485_v40  ;;  %3542 = vmatmul.mubr.msk.f32.vlgmr.msra.gmra.mxu0 %vm454_vm3, %v4524_v60  ;;  %v1760_v40 = vld [vmem:[#allocation2 + $0x1d0] sm:$0xff]  ;;  %v1759_v25 = vld [vmem:[#allocation2 + $0x1c8] sm:$0xff]  ;;  %v1931_v2 = vcombine.high %v1266_v53, %v1266_v53  ;;  %v1851_v49 = vcombine.low %v4520_v52, %v1266_v53 }
  0x7e   : > { %3550 = vmatprep.subr.mxu1 %v1484_v61  ;;  %3555 = vmatprep.subr.mxu0 %v1575_v0  ;;  %v2028_v52 = vld [vmem:[#allocation2 + $0x230] sm:$0xff] }
  0x7f   : > { %3551 = vmatpush3.msra.mxu1 %v1484_v61  ;;  %3552 = vmatprep.mubr.msk.f32.mxu1 %vm454_vm3, %v1488_v1  ;;  %v1758_v61 = vld [vmem:[#allocation2 + $0x1c0] sm:$0xff]  ;;  %v1762_v1 = vcombine.low %v4517_v59, %v4528_v62  ;;  %v1939_v59 = vld [vmem:[#allocation2 + $0x210] sm:$0xff]  ;;  %v2029_v62 = vld [vmem:[#allocation2 + $0x238] sm:$0xff] }
  0x80   : > { %3556 = vmatpush3.msra.mxu0 %v1575_v0  ;;  %3553 = vmatmul.mubr.msk.f32.vlgmr.msra.gmra.mxu1 %vm454_vm3, %v4540_v3  ;;  %v1847_v0 = vld [vmem:[#allocation2 + $0x1e8] sm:$0xff] }
  0x81   : > { %3557 = vmatprep.subr.mxu0 %v1574_v12  ;;  %3566 = vmatprep.subr.mxu1 %v1669_v56 }
  0x82   : > { %3558 = vmatpush3.msra.mxu0 %v1574_v12  ;;  %3567 = vmatpush3.msra.mxu1 %v1669_v56  ;;  %v1763_v12 = vcombine.low %v4532_v63, %v4568_v42  ;;  %v1846_v56 = vld [vmem:[#allocation2 + $0x1e0] sm:$0xff]  ;;  %v3224_v63 = vrot.slane %v1266_v53, 10 }
  0x83   : > { %3559 = vmatprep.subr.mxu0 %v1573_v50  ;;  %3568 = vmatprep.subr.mxu1 %v1668_v14 }
  0x84   : > { %3560 = vmatpush3.msra.mxu0 %v1573_v50  ;;  %3569 = vmatpush3.msra.mxu1 %v1668_v14  ;;  %v3221_v50 = vrot.slane %v1266_v53, 9  ;;  %v1934_v14 = vrot.slane %v1931_v2, 5  ;;  %v4596_v53 = vcombine.low %v4325_v34, %v4335_v43 }
  0x85   : > { %3561 = vmatprep.subr.mxu0 %v1572_v24  ;;  %3570 = vmatprep.subr.mxu1 %v1667_v41 }
  0x86   : > { %3562 = vmatpush3.msra.mxu0 %v1572_v24  ;;  %3563 = vmatprep.mubr.msk.f32.mxu0 %vm454_vm3, %v1577_v54  ;;  %v2023_v24 = vrot.slane %v1931_v2, 6  ;;  %v1935_v54 = vsel %vm4134_vm2, %v3221_v50, %v1934_v14  ;;  %v2426_v2 = vcombine.low %v4322_v33, %v4325_v34  ;;  %v2609_v34 = vld [vmem:[#allocation2 + $0x2f0] sm:$0xff]  ;;  %v2789_v14 = vld [vmem:[#allocation2 + $0x338] sm:$0xff] }
  0x87   : > { %3571 = vmatpush3.msra.mxu1 %v1667_v41  ;;  %3564 = vmatmul.mubr.msk.f32.vlgmr.msra.gmra.mxu0 %vm454_vm3, %v1578_v22  ;;  %v1938_v41 = vld [vmem:[#allocation2 + $0x208] sm:$0xff]  ;;  %v1937_v22 = vld [vmem:[#allocation2 + $0x200] sm:$0xff]  ;;  %v2697_v50 = vld [vmem:[#allocation2 + $0x310] sm:$0xff] }
  0x88   : > { %3572 = vmatprep.subr.mxu1 %v1666_v55  ;;  %3577 = vmatprep.subr.mxu0 %v1761_v57 }
  0x89   : > { %3573 = vmatpush3.msra.mxu1 %v1666_v55  ;;  %3574 = vmatprep.mubr.msk.f32.mxu1 %vm454_vm3, %v1670_v38  ;;  %v2027_v55 = vld [vmem:[#allocation2 + $0x228] sm:$0xff]  ;;  %v2026_v38 = vld [vmem:[#allocation2 + $0x220] sm:$0xff] }
  0x8a   : > { %3578 = vmatpush3.msra.mxu0 %v1761_v57  ;;  %3575 = vmatmul.mubr.msk.f32.vlgmr.msra.gmra.mxu1 %vm454_vm3, %v1671_v26  ;;  %v2024_v57 = vsel %vm4183_vm6, %v3224_v63, %v2023_v24 }
  0x8b   : > { %3579 = vmatprep.subr.mxu0 %v1760_v40  ;;  %3588 = vmatprep.subr.mxu1 %v1849_v51  ;;  %v2030_v26 = vcombine.low %v4568_v42, %v2024_v57  ;;  %v2334_v42 = vld [vmem:[#allocation2 + $0x288] sm:$0xff] }
  0x8c   : > { %3580 = vmatpush3.msra.mxu0 %v1760_v40  ;;  %3589 = vmatpush3.msra.mxu1 %v1849_v51  ;;  %v2230_v40 = vld [vmem:[#allocation2 + $0x268] sm:$0xff]  ;;  %v2125_v51 = vcombine.low %v4319_v31, %v4322_v33  ;;  %v2335_v31 = vld [vmem:[#allocation2 + $0x290] sm:$0xff] }
  0x8d   : > { %3581 = vmatprep.subr.mxu0 %v1759_v25  ;;  %3590 = vmatprep.subr.mxu1 %v1848_v58  ;;  %v2516_v33 = vld [vmem:[#allocation2 + $0x2c8] sm:$0xff] }
  0x8e   : > { %3582 = vmatpush3.msra.mxu0 %v1759_v25  ;;  %3591 = vmatpush3.msra.mxu1 %v1848_v58  ;;  %v2336_v25 = vld [vmem:[#allocation2 + $0x298] sm:$0xff] }
  0x8f   : > { %3583 = vmatprep.subr.mxu0 %v1758_v61  ;;  %3592 = vmatprep.subr.mxu1 %v1847_v0  ;;  %v2424_v58 = vld [vmem:[#allocation2 + $0x2b8] sm:$0xff] }
  0x90   : > { %3584 = vmatpush3.msra.mxu0 %v1758_v61  ;;  %3585 = vmatprep.mubr.msk.f32.mxu0 %vm454_vm3, %v1762_v1  ;;  %v2423_v61 = vld [vmem:[#allocation2 + $0x2b0] sm:$0xff]  ;;  %v2422_v1 = vld [vmem:[#allocation2 + $0x2a8] sm:$0xff] }
  0x91   : > { %3593 = vmatpush3.msra.mxu1 %v1847_v0  ;;  %3586 = vmatmul.mubr.msk.f32.vlgmr.msra.gmra.mxu0 %vm454_vm3, %v1763_v12  ;;  %v2333_v0 = vld [vmem:[#allocation2 + $0x280] sm:$0xff]  ;;  %v2427_v12 = vcombine.low %v4335_v43, %v4399_v19  ;;  %v2876_v19 = vld [vmem:[#allocation2 + $0x348] sm:$0xff] }
  0x92   : > { %3594 = vmatprep.subr.mxu1 %v1846_v56  ;;  %3599 = vmatprep.subr.mxu0 %v1940_v5  ;;  %v2515_v43 = vld [vmem:[#allocation2 + $0x2c0] sm:$0xff] }
  0x93   : > { %3595 = vmatpush3.msra.mxu1 %v1846_v56  ;;  %3596 = vmatprep.mubr.msk.f32.mxu1 %vm454_vm3, %v4339_v44  ;;  %v1941_v44 = vcombine.low %v4554_v20, %v1935_v54  ;;  %v2119_v20 = vld [vmem:[#allocation2 + $0x250] sm:$0xff] }
  0x94   : > { %3600 = vmatpush3.msra.mxu0 %v1940_v5  ;;  %3597 = vmatmul.mubr.msk.f32.vlgmr.msra.gmra.mxu1 %vm454_vm3, %v1851_v49  ;;  %v2517_v56 = vld [vmem:[#allocation2 + $0x2d0] sm:$0xff]  ;;  %v2610_v5 = vld [vmem:[#allocation2 + $0x2f8] sm:$0xff] }
  0x95   : > { %3601 = vmatprep.subr.mxu0 %v1939_v59  ;;  %3610 = vmatprep.subr.mxu1 %v2029_v62  ;;  %v2698_v49 = vld [vmem:[#allocation2 + $0x318] sm:$0xff] }
  0x96   : > { %3602 = vmatpush3.msra.mxu0 %v1939_v59  ;;  %3611 = vmatpush3.msra.mxu1 %v2029_v62 }
  0x97   : > { %3603 = vmatprep.subr.mxu0 %v1938_v41  ;;  %3612 = vmatprep.subr.mxu1 %v2028_v52 }
  0x98   : > { %3604 = vmatpush3.msra.mxu0 %v1938_v41  ;;  %3613 = vmatpush3.msra.mxu1 %v2028_v52 }
  0x99   : > { %3605 = vmatprep.subr.mxu0 %v1937_v22  ;;  %3614 = vmatprep.subr.mxu1 %v2027_v55 }
  0x9a   : > { %3606 = vmatpush3.msra.mxu0 %v1937_v22  ;;  %3607 = vmatprep.mubr.msk.f32.mxu0 %vm454_vm3, %v4524_v60  ;;  %v2117_v60 = vld [vmem:[#allocation2 + $0x240] sm:$0xff] }
  0x9b   : > { %3615 = vmatpush3.msra.mxu1 %v2027_v55  ;;  %3608 = vmatmul.mubr.msk.f32.vlgmr.msra.gmra.mxu0 %vm454_vm3, %v1941_v44 }
  0x9c   : > { %3616 = vmatprep.subr.mxu1 %v2026_v38  ;;  %3621 = vmatprep.subr.mxu0 %v2120_v16 }
  0x9d   : > { %3617 = vmatpush3.msra.mxu1 %v2026_v38  ;;  %3618 = vmatprep.mubr.msk.f32.mxu1 %vm454_vm3, %v4540_v3  ;;  %v2229_v3 = vld [vmem:[#allocation2 + $0x260] sm:$0xff] }
  0x9e   : > { %3622 = vmatpush3.msra.mxu0 %v2120_v16  ;;  %3619 = vmatmul.mubr.msk.f32.vlgmr.msra.gmra.mxu1 %vm454_vm3, %v2030_v26 }
  0x9f   : > { %3623 = vmatprep.subr.mxu0 %v2119_v20  ;;  %3632 = vmatprep.subr.mxu1 %v2232_v39 }
  0xa0   : > { %3624 = vmatpush3.msra.mxu0 %v2119_v20  ;;  %3633 = vmatpush3.msra.mxu1 %v2232_v39 }
  0xa1   : > { %3625 = vmatprep.subr.mxu0 %v2118_v28  ;;  %3634 = vmatprep.subr.mxu1 %v2231_v29 }
  0xa2   : > { %3626 = vmatpush3.msra.mxu0 %v2118_v28  ;;  %3635 = vmatpush3.msra.mxu1 %v2231_v29 }
  0xa3   : > { %3627 = vmatprep.subr.mxu0 %v2117_v60  ;;  %3636 = vmatprep.subr.mxu1 %v2230_v40 }
  0xa4   : > { %3628 = vmatpush3.msra.mxu0 %v2117_v60  ;;  %3629 = vmatprep.mubr.msk.f32.mxu0 %vm454_vm3, %v2125_v51 }
  0xa5   : > { %3637 = vmatpush3.msra.mxu1 %v2230_v40  ;;  %3630 = vmatmul.mubr.msk.f32.vlgmr.msra.gmra.mxu0 %vm454_vm3, %v4596_v53 }
  0xa6   : > { %3638 = vmatprep.subr.mxu1 %v2229_v3  ;;  %3643 = vmatprep.subr.mxu0 %v2336_v25 }
  0xa7   : > { %3639 = vmatpush3.msra.mxu1 %v2229_v3  ;;  %3640 = vmatprep.mubr.msk.f32.mxu1 %vm454_vm3, %v2233_v37  ;;  %v2518_v37 = vld [vmem:[#allocation2 + $0x2d8] sm:$0xff] }
  0xa8   : > { %3644 = vmatpush3.msra.mxu0 %v2336_v25  ;;  %3641 = vmatmul.mubr.msk.f32.vlgmr.msra.gmra.mxu1 %vm454_vm3, %v4388_v15 }
  0xa9   : > { %3645 = vmatprep.subr.mxu0 %v2335_v31  ;;  %3654 = vmatprep.subr.mxu1 %v2424_v58 }
  0xaa   : > { %3646 = vmatpush3.msra.mxu0 %v2335_v31  ;;  %3655 = vmatpush3.msra.mxu1 %v2424_v58 }
  0xab   : > { %3647 = vmatprep.subr.mxu0 %v2334_v42  ;;  %3656 = vmatprep.subr.mxu1 %v2423_v61 }
  0xac   : > { %3648 = vmatpush3.msra.mxu0 %v2334_v42  ;;  %3657 = vmatpush3.msra.mxu1 %v2423_v61 }
  0xad   : > { %3649 = vmatprep.subr.mxu0 %v2333_v0  ;;  %3658 = vmatprep.subr.mxu1 %v2422_v1 }
  0xae   : > { %3650 = vmatpush3.msra.mxu0 %v2333_v0  ;;  %3651 = vmatprep.mubr.msk.f32.mxu0 %vm454_vm3, %v2337_v23  ;;  %v2607_v23 = vld [vmem:[#allocation2 + $0x2e0] sm:$0xff] }
  0xaf   : > { %3659 = vmatpush3.msra.mxu1 %v2422_v1  ;;  %3652 = vmatmul.mubr.msk.f32.vlgmr.msra.gmra.mxu0 %vm454_vm3, %v4428_v46 }
  0xb0   : > { %3660 = vmatprep.subr.mxu1 %v2421_v4  ;;  %3665 = vmatprep.subr.mxu0 %v2518_v37 }
  0xb1   : > { %3661 = vmatpush3.msra.mxu1 %v2421_v4  ;;  %3662 = vmatprep.mubr.msk.f32.mxu1 %vm454_vm3, %v2426_v2 }
  0xb2   : > { %3666 = vmatpush3.msra.mxu0 %v2518_v37  ;;  %3663 = vmatmul.mubr.msk.f32.vlgmr.msra.gmra.mxu1 %vm454_vm3, %v2427_v12 }
  0xb3   : > { %3667 = vmatprep.subr.mxu0 %v2517_v56  ;;  %3676 = vmatprep.subr.mxu1 %v2610_v5 }
  0xb4   : > { %3668 = vmatpush3.msra.mxu0 %v2517_v56  ;;  %3677 = vmatpush3.msra.mxu1 %v2610_v5 }
  0xb5   : > { %3669 = vmatprep.subr.mxu0 %v2516_v33  ;;  %3678 = vmatprep.subr.mxu1 %v2609_v34 }
  0xb6   : > { %3670 = vmatpush3.msra.mxu0 %v2516_v33  ;;  %3679 = vmatpush3.msra.mxu1 %v2609_v34 }
  0xb7   : > { %3671 = vmatprep.subr.mxu0 %v2515_v43  ;;  %3680 = vmatprep.subr.mxu1 %v2608_v10 }
  0xb8   : > { %3672 = vmatpush3.msra.mxu0 %v2515_v43  ;;  %3673 = vmatprep.mubr.msk.f32.mxu0 %vm454_vm3, %v2519_v47  ;;  %v2787_v47 = vld [vmem:[#allocation2 + $0x328] sm:$0xff] }
  0xb9   : > { %3681 = vmatpush3.msra.mxu1 %v2608_v10  ;;  %3674 = vmatmul.mubr.msk.f32.vlgmr.msra.gmra.mxu0 %vm454_vm3, %v2520_v13 }
  0xba   : > { %3682 = vmatprep.subr.mxu1 %v2607_v23  ;;  %3687 = vmatprep.subr.mxu0 %v2698_v49 }
  0xbb   : > { %3683 = vmatpush3.msra.mxu1 %v2607_v23  ;;  %3684 = vmatprep.mubr.msk.f32.mxu1 %vm454_vm3, %v2611_v30  ;;  %v2877_v30 = vld [vmem:[#allocation2 + $0x350] sm:$0xff] }
  0xbc   : > { %3688 = vmatpush3.msra.mxu0 %v2698_v49  ;;  %3685 = vmatmul.mubr.msk.f32.vlgmr.msra.gmra.mxu1 %vm454_vm3, %v2612_v32 }
  0xbd   : > { %3689 = vmatprep.subr.mxu0 %v2697_v50  ;;  %3698 = vmatprep.subr.mxu1 %v2789_v14 }
  0xbe   : > { %3690 = vmatpush3.msra.mxu0 %v2697_v50  ;;  %3699 = vmatpush3.msra.mxu1 %v2789_v14 }
  0xbf   : > { %3691 = vmatprep.subr.mxu0 %v2696_v6  ;;  %3700 = vmatprep.subr.mxu1 %v2788_v7 }
  0xc0   : > { %3692 = vmatpush3.msra.mxu0 %v2696_v6  ;;  %3701 = vmatpush3.msra.mxu1 %v2788_v7 }
  0xc1   : > { %3693 = vmatprep.subr.mxu0 %v2695_v9  ;;  %3702 = vmatprep.subr.mxu1 %v2787_v47 }
  0xc2   : > { %3694 = vmatpush3.msra.mxu0 %v2695_v9  ;;  %3695 = vmatprep.mubr.msk.f32.mxu0 %vm454_vm3, %v4596_v53 }
  0xc3   : > { %3703 = vmatpush3.msra.mxu1 %v2787_v47  ;;  %3696 = vmatmul.mubr.msk.f32.vlgmr.msra.gmra.mxu0 %vm454_vm3, %v2700_v17 }
  0xc4   : > { %3704 = vmatprep.subr.mxu1 %v2786_v18  ;;  %3709 = vmatprep.subr.mxu0 %v2878_v27 }
  0xc5   : > { %3705 = vmatpush3.msra.mxu1 %v2786_v18  ;;  %3706 = vmatprep.mubr.msk.f32.mxu1 %vm454_vm3, %v4388_v15 }
  0xc6   : > { %3710 = vmatpush3.msra.mxu0 %v2878_v27  ;;  %3707 = vmatmul.mubr.msk.f32.vlgmr.msra.gmra.mxu1 %vm454_vm3, %v2790_v21 }
  0xc7   : > { %3711 = vmatprep.subr.mxu0 %v2877_v30  ;;  %3717 = vmatprep.mubr.msk.f32.mxu0 %vm454_vm3, %v4428_v46 }
  0xc8   : > { %3712 = vmatpush3.msra.mxu0 %v2877_v30 }
  0xc9   : > { %3713 = vmatprep.subr.mxu0 %v2876_v19 }
  0xca   : > { %3714 = vmatpush3.msra.mxu0 %v2876_v19 }
  0xcb   : > { %3715 = vmatprep.subr.mxu0 %v2875_v35 }
  0xcc   : > { %3716 = vmatpush3.msra.mxu0 %v2875_v35 }
  0xcd   : > { %3718 = vmatmul.mubr.msk.f32.vlgmr.msra.gmra.mxu0 %vm454_vm3, %v2879_v45 }
 0x10d   : > { %v3444_v8 = vpop.f32.mrf.mxu1 }
 0x10f   : > { %v3433_v15 = vpop.f32.mrf.mxu0  ;;  %v606_v36 = vpop.f32.mrf.mxu1 }
 0x110   : > { %v612_v21 = vadd.f32 %v3444_v8, %v3433_v15 }
 0x111   : > { %v525_v13 = vpop.f32.mrf.mxu0 }
 0x112   : > { %v607_v46 = vadd.f32 %v606_v36, %v525_v13 }
 0x117   : > { %v3455_v32 = vpop.f32.mrf.mxu0 }
 0x118   : > { %v3466_v62 = vpop.f32.mrf.mxu1  ;;  %v721_v63 = vadd.f32 %v3455_v32, %v612_v21 }
 0x119   : > { %v711_v59 = vpop.f32.mrf.mxu0 }
 0x11a   : > { %v720_v41 = vadd.f32 %v711_v59, %v607_v46  ;;  %v800_v52 = vpop.f32.mrf.mxu1  ;;  %v810_v54 = vadd.f32 %v3466_v62, %v721_v63 }
 0x11c   : > { %v809_v44 = vadd.f32 %v800_v52, %v720_v41 }
 0x11f   : > { %v3477_v24 = vpop.f32.mrf.mxu0 }
 0x120   : > { %v903_v11 = vadd.f32 %v3477_v24, %v810_v54 }
 0x121   : > { %v893_v22 = vpop.f32.mrf.mxu0 }
 0x122   : > { %v3488_v55 = vpop.f32.mrf.mxu1  ;;  %v902_v45 = vadd.f32 %v893_v22, %v809_v44 }
 0x123   : > { %v995_v38 = vadd.f32 %v3488_v55, %v903_v11 }
 0x124   : > { %v985_v57 = vpop.f32.mrf.mxu1 }
 0x125   : > { %v994_v20 = vadd.f32 %v985_v57, %v902_v45 }
 0x129   : > { %v3499_v48 = vpop.f32.mrf.mxu0 }
 0x12a   : > { %v1081_v39 = vadd.f32 %v3499_v48, %v995_v38 }
 0x12b   : > { %v1071_v16 = vpop.f32.mrf.mxu0 }
 0x12c   : > { %v3510_v26 = vpop.f32.mrf.mxu1  ;;  %v1080_v29 = vadd.f32 %v1071_v16, %v994_v20 }
 0x12d   : > { %v1171_v40 = vadd.f32 %v3510_v26, %v1081_v39 }
 0x12e   : > { %v1161_v60 = vpop.f32.mrf.mxu1 }
 0x12f   : > { %v1170_v3 = vadd.f32 %v1161_v60, %v1080_v29 }
 0x133   : > { %v3521_v28 = vpop.f32.mrf.mxu0 }
 0x134   : > { %v1260_v25 = vadd.f32 %v3521_v28, %v1171_v40 }
 0x135   : > { %v1250_v51 = vpop.f32.mrf.mxu0 }
 0x136   : > { %v3532_v53 = vpop.f32.mrf.mxu1  ;;  %v1259_v58 = vadd.f32 %v1250_v51, %v1170_v3 }
 0x137   : > { %v1358_v61 = vadd.f32 %v3532_v53, %v1260_v25 }
 0x138   : > { %v1348_v42 = vpop.f32.mrf.mxu1 }
 0x139   : > { %v1357_v4 = vadd.f32 %v1348_v42, %v1259_v58 }
 0x13d   : > { %v3543_v31 = vpop.f32.mrf.mxu0 }
 0x13e   : > { %v1466_v37 = vadd.f32 %v3543_v31, %v1358_v61 }
 0x13f   : > { %v1456_v0 = vpop.f32.mrf.mxu0 }
 0x140   : > { %v3554_v1 = vpop.f32.mrf.mxu1  ;;  %v1465_v12 = vadd.f32 %v1456_v0, %v1357_v4  ;;  %v3257_v0 = vld [vmem:[#allocation4] ss:$0 sm:$0xff] }
 0x141   : > { %v1570_v5 = vadd.f32 %v3554_v1, %v1466_v37  ;;  %v3258_v37 = vld [vmem:[#allocation6] ss:$0 sm:$0xff] }
 0x142   : > { %v1560_v56 = vpop.f32.mrf.mxu1 }
 0x143   : > { %v1569_v43 = vadd.f32 %v1560_v56, %v1465_v12 }
 0x147   : > { %v3565_v2 = vpop.f32.mrf.mxu0 }
 0x148   : > { %v1659_v10 = vadd.f32 %v3565_v2, %v1570_v5 }
 0x149   : > { %v1649_v33 = vpop.f32.mrf.mxu0 }
 0x14a   : > { %v3576_v34 = vpop.f32.mrf.mxu1  ;;  %v1658_v49 = vadd.f32 %v1649_v33, %v1569_v43 }
 0x14b   : > { %v1752_v14 = vadd.f32 %v3576_v34, %v1659_v10 }
 0x14c   : > { %v1742_v50 = vpop.f32.mrf.mxu1 }
 0x14d   : > { %v1751_v9 = vadd.f32 %v1742_v50, %v1658_v49 }
 0x151   : > { %v3587_v23 = vpop.f32.mrf.mxu0 }
 0x152   : > { %v1844_v47 = vadd.f32 %v3587_v23, %v1752_v14 }
 0x153   : > { %v1834_v6 = vpop.f32.mrf.mxu0 }
 0x154   : > { %v3598_v7 = vpop.f32.mrf.mxu1  ;;  %v1843_v18 = vadd.f32 %v1834_v6, %v1751_v9 }
 0x155   : > { %v1930_v30 = vadd.f32 %v3598_v7, %v1844_v47 }
 0x156   : > { %v1920_v27 = vpop.f32.mrf.mxu1 }
 0x157   : > { %v1929_v15 = vadd.f32 %v1920_v27, %v1843_v18 }
 0x15b   : > { %v3609_v17 = vpop.f32.mrf.mxu0 }
 0x15c   : > { %v2020_v8 = vadd.f32 %v3609_v17, %v1930_v30 }
 0x15d   : > { %v2010_v19 = vpop.f32.mrf.mxu0 }
 0x15e   : > { %v3620_v35 = vpop.f32.mrf.mxu1  ;;  %v2019_v32 = vadd.f32 %v2010_v19, %v1929_v15 }
 0x15f   : > { %v2109_v21 = vadd.f32 %v3620_v35, %v2020_v8 }
 0x160   : > { %v2099_v36 = vpop.f32.mrf.mxu1 }
 0x161   : > { %v2108_v46 = vadd.f32 %v2099_v36, %v2019_v32 }
 0x165   : > { %v3631_v13 = vpop.f32.mrf.mxu0 }
 0x166   : > { %v2207_v63 = vadd.f32 %v3631_v13, %v2109_v21 }
 0x167   : > { %v2197_v59 = vpop.f32.mrf.mxu0 }
 0x168   : > { %v3642_v62 = vpop.f32.mrf.mxu1  ;;  %v2206_v41 = vadd.f32 %v2197_v59, %v2108_v46 }
 0x169   : > { %v2315_v54 = vadd.f32 %v3642_v62, %v2207_v63 }
 0x16a   : > { %v2305_v52 = vpop.f32.mrf.mxu1 }
 0x16b   : > { %v2314_v44 = vadd.f32 %v2305_v52, %v2206_v41 }
 0x16f   : > { %v3653_v24 = vpop.f32.mrf.mxu0 }
 0x170   : > { %v2419_v11 = vadd.f32 %v3653_v24, %v2315_v54 }
 0x171   : > { %v2409_v22 = vpop.f32.mrf.mxu0 }
 0x172   : > { %v3664_v55 = vpop.f32.mrf.mxu1  ;;  %v2418_v45 = vadd.f32 %v2409_v22, %v2314_v44 }
 0x173   : > { %v2508_v38 = vadd.f32 %v3664_v55, %v2419_v11 }
 0x174   : > { %v2498_v57 = vpop.f32.mrf.mxu1 }
 0x175   : > { %v2507_v20 = vadd.f32 %v2498_v57, %v2418_v45 }
 0x179   : > { %v3675_v48 = vpop.f32.mrf.mxu0 }
 0x17a   : > { %v2601_v39 = vadd.f32 %v3675_v48, %v2508_v38 }
 0x17b   : > { %v2591_v16 = vpop.f32.mrf.mxu0 }
 0x17c   : > { %v3686_v26 = vpop.f32.mrf.mxu1  ;;  %v2600_v29 = vadd.f32 %v2591_v16, %v2507_v20 }
 0x17d   : > { %v2693_v40 = vadd.f32 %v3686_v26, %v2601_v39 }
 0x17e   : > { %v2683_v60 = vpop.f32.mrf.mxu1 }
 0x17f   : > { %v2692_v3 = vadd.f32 %v2683_v60, %v2600_v29 }
 0x183   : > { %v3697_v28 = vpop.f32.mrf.mxu0 }
 0x184   : > { %v2779_v25 = vadd.f32 %v3697_v28, %v2693_v40 }
 0x185   : > { %v2769_v51 = vpop.f32.mrf.mxu0 }
 0x186   : > { %v3708_v53 = vpop.f32.mrf.mxu1  ;;  %v2778_v31 = vadd.f32 %v2769_v51, %v2692_v3 }
 0x187   : > { %v2869_v42 = vadd.f32 %v3708_v53, %v2779_v25 }
 0x188   : > { %v2859_v58 = vpop.f32.mrf.mxu1 }
 0x189   : > { %v2868_v1 = vadd.f32 %v2859_v58, %v2778_v31 }
 0x18d   : > { %v3719_v61 = vpop.f32.mrf.mxu0 }
 0x18e   : > { %v2958_v4 = vadd.f32 %v3719_v61, %v2869_v42 }
 0x18f   : > { %v2948_v2 = vpop.f32.mrf.mxu0 }
 0x190   : > { %v2967_v12 = vmul.f32 %v3257_v0, %v2958_v4  ;;  %v2957_v56 = vadd.f32 %v2948_v2, %v2868_v1 }
 0x192   : > { %v2976_v5 = vadd.f32 %v3258_v37, %v2967_v12  ;;  %v2966_v33 = vmul.f32 %v3257_v0, %v2957_v56 }
 0x194   : > { %v2978_v34 = vmax.f32 %v2976_v5, 0.0  ;;  %v2975_v43 = vadd.f32 %v3258_v37, %v2966_v33 }
 0x196   : > { %2980 = vst.msk [vmem:[%s409_s9 + $0x8] sm:$0xff] %vm454_vm3, %v2978_v34  ;;  %v2977_v10 = vmax.f32 %v2975_v43, 0.0 }
 0x198   : > { %2979 = vst.msk [vmem:[%s409_s9] sm:$0xff] %vm454_vm3, %v2977_v10 }
 0x199 PF: > { %s18_s25 = sadd.s32 1, %s3954_s25   ;;  %s4692_s21 = smov %s3946_s23 }
 0x19a   : > { %p15_p12 = scmp.ge.s32.totalorder %s18_s25, 10   ;;  %s4693_s22 = smov %s3950_s24 }
 0x19b   : > { %s4694_s23 = smov %s4697_s8  ;;  %s4695_s24 = smov %s4701_s14 }
 0x19c   :  { %17 = sbr.rel (!%p15_p12) target bundleno = 4 (0x4), region = 119 }
 0x1a1   :  { %3010 = vsyncpa [#allocation3], 1 }
 0x1a2   :  { %3012 = vsyncpa [#allocation3 + $0x1], 1 }
 0x1a3   :  { %3013 = vsyncpa [#allocation5], 1 }

// kernel: agc_forward.4
= control target key start
LH: loop header
LB: loop body
LE: loop exit
PB: predicated region body
PF: predicated region fallthrough
CT: control target
= control target key end

     0   :  { %s5406_s21 = smov 0   ;;  %s5408_s22 = smov 0   ;;  %s7240_s0 = inlined_call_operand.vmem [shape: f32[2,6,6,6,128], index: 0, kind: input, shape index: {}, may-alias: {0,1,2}]   ;;  %s7241_s1 = inlined_call_operand.vmem [shape: f32[2,6,6,6,128], index: 1, kind: input, shape index: {}, may-alias: {0,1,2}]   ;;  %s7242_s2 = inlined_call_operand.vmem [shape: f32[2,6,6,6,128], index: 2, kind: input, shape index: {}, may-alias: {0,1,2}]   ;;  %s7243_s3 = inlined_call_operand.vmem [shape: f32[3,3,3,128,128], index: 3, kind: input, shape index: {}]   ;;  %s7244_s4 = inlined_call_operand.vmem [shape: f32[1,128], index: 4, kind: input, shape index: {}]   ;;  %s7245_s5 = inlined_call_operand.vmem [shape: f32[1,128], index: 5, kind: input, shape index: {}]   ;;  %s7246_s6 = inlined_call_operand.vmem [shape: f32[2,4,16,128], index: 6, kind: output, shape index: {}]  }
   0x1   :  { %s5410_s23 = smov 0   ;;  %s5412_s24 = smov 0  }
   0x2   :  { %s5414_s25 = smov 0  }
   0x3 LB: > { %s25_s26 = sadd.s32 1, %s5361_s23  ;;  %s28_s27 = sadd.s32 1, %s5365_s24  ;;  %s5369_s25 = sphi %s5414_s25, %s16_s25   ;;  %s5365_s24 = sphi %s5412_s24, %s7254_s24   ;;  %s5361_s23 = sphi %s5410_s23, %s7253_s23   ;;  %s5357_s22 = sphi %s5408_s22, %s7252_s22   ;;  %s5353_s21 = sphi %s5406_s21, %s7251_s21  }
   0x4   : > { %p26_p0 = scmp.ge.s32.totalorder %s25_s26, 4  ;;  %p3360_p1 = scmp.ge.s32.totalorder %s5369_s25, 1 }
   0x5   : > { %p272_p2 = scmp.lt.s32.totalorder %s5369_s25, 9 }
   0x6   : > { %s7256_s26 = smov (%p26_p0, %s25_s26), 0  ;;  %s7258_s27 = smov (!%p26_p0, %s28_s27), %s5365_s24 }
   0x7   : > { %p273_p3 = pnand %p3360_p1, %p272_p2  ;;  %p30_p4 = scmp.ge.s32.totalorder %s7258_s27, 2 }
   0x8   : > { %p330_p5 = scmp.lt.s32.totalorder (!%p273_p3), %s5357_s22, 1  ;;  %p332_p6 = scmp.lt.s32.totalorder (!%p273_p3), %s5353_s21, 5 }
   0x9   : > { %s7260_s27 = smov (%p30_p4, %s7258_s27), 0  ;;  %276 = sbr.rel (%p273_p3) target bundleno = 692 (0x2b4), region = 44 }
   0xa   : > { %s350_s17 = sadd.s32 (!%p273_p3), 2, %s5353_s21  ;;  %p363_p9 = scmp.lt.s32.totalorder (!%p273_p3), %s5353_s21, 3 }
   0xb   : > { %p353_p8 = scmp.lt.s32.totalorder (!%p273_p3), %s350_s17, 5 }
   0xe   : > { %v3386_v0 = vld [vmem:[%s7243_s3 + $0xf8] sm:$0xff]  ;;  %v3385_v2 = vld [vmem:[%s7243_s3 + $0xf0] sm:$0xff]  ;;  %v3384_v4 = vld [vmem:[%s7243_s3 + $0xe8] sm:$0xff]  ;;  %s7262_s22 = smov (!%p330_p5, %s5357_s22), 1  ;;  %vm400_vm0 = vcmask 1042432   ;;  %vm401_vm1 = vcmask 1046532  }
   0xf   : > { %v391_v1 = vld [vmem:[%s7243_s3 + $0x78] sm:$0xff]  ;;  %4309 = vmatprep.subr.mxu0 %v3386_v0  ;;  %v390_v3 = vld [vmem:[%s7243_s3 + $0x70] sm:$0xff]  ;;  %v389_v5 = vld [vmem:[%s7243_s3 + $0x68] sm:$0xff]  ;;  %s333_s16 = scalar_select %p332_p6, %s5353_s21, 5  ;;  %vm594_vm3 = vcmask 1041408   ;;  %vm595_vm4 = vcmask 1045508  }
  0x10   : > { %4344 = vmatprep.subr.mxu1 %v391_v1  ;;  %4310 = vmatpush3.msra.mxu0 %v3386_v0  ;;  %v3383_v6 = vld [vmem:[%s7243_s3 + $0xe0] sm:$0xff]  ;;  %s5467_s28 = smul.u32 36, %s7262_s22  ;;  %v3382_v8 = vld [vmem:[%s7243_s3 + $0xd8] sm:$0xff]  ;;  %v3381_v10 = vld [vmem:[%s7243_s3 + $0xd0] sm:$0xff]  ;;  %s7266_s17 = smov (!%p353_p8, %s350_s17), 5 }
  0x11   : > { %4345 = vmatpush3.msra.mxu1 %v391_v1  ;;  %4311 = vmatprep.subr.mxu0 %v3385_v2  ;;  %v388_v7 = vld [vmem:[%s7243_s3 + $0x60] sm:$0xff]  ;;  %s5254_s29 = smul.u32 6, %s333_s16  ;;  %v387_v9 = vld [vmem:[%s7243_s3 + $0x58] sm:$0xff]  ;;  %v386_v11 = vld [vmem:[%s7243_s3 + $0x50] sm:$0xff] }
  0x12   : > { %4346 = vmatprep.subr.mxu1 %v390_v3  ;;  %4312 = vmatpush3.msra.mxu0 %v3385_v2  ;;  %v3380_v12 = vld [vmem:[%s7243_s3 + $0xc8] sm:$0xff]  ;;  %v3379_v16 = vld [vmem:[%s7243_s3 + $0xc0] sm:$0xff]  ;;  %vm5517_vm2 = vmor %vm400_vm0, %vm401_vm1  ;;  %s5257_s9 = smul.u32 6, %s7266_s17 }
  0x13   : > { %4347 = vmatpush3.msra.mxu1 %v390_v3  ;;  %4313 = vmatprep.subr.mxu0 %v3384_v4  ;;  %s336_s10 = sadd.s32 %s5467_s28, %s5254_s29  ;;  %v385_v13 = vld [vmem:[%s7243_s3 + $0x48] sm:$0xff]  ;;  %v384_v17 = vld [vmem:[%s7243_s3 + $0x40] sm:$0xff]  ;;  %v3378_v23 = vld [vmem:[%s7243_s3 + $0xb8] sm:$0xff] }
  0x14   : > { %4348 = vmatprep.subr.mxu1 %v389_v5  ;;  %4314 = vmatpush3.msra.mxu0 %v3384_v4  ;;  %s3361_s15 = sshll.u32 %s336_s10, 3  ;;  %v383_v24 = vld [vmem:[%s7243_s3 + $0x38] sm:$0xff]  ;;  %v3377_v28 = vld [vmem:[%s7243_s3 + $0xb0] sm:$0xff]  ;;  %v3376_v35 = vld [vmem:[%s7243_s3 + $0xa8] sm:$0xff]  ;;  %s357_s19 = sadd.s32 %s5257_s9, %s5467_s28 }
  0x15   : > { %4349 = vmatpush3.msra.mxu1 %v389_v5  ;;  %4315 = vmatprep.subr.mxu0 %v3383_v6  ;;  %s5485_s18 = scalar_lea.vmem %s7240_s0, %s3361_s15  ;;  %v382_v29 = vld [vmem:[%s7243_s3 + $0x30] sm:$0xff]  ;;  %v381_v36 = vld [vmem:[%s7243_s3 + $0x28] sm:$0xff]  ;;  %v3375_v38 = vld [vmem:[%s7243_s3 + $0xa0] sm:$0xff]  ;;  %s3363_s9 = sshll.u32 %s357_s19, 3 }
  0x16   : > { %4350 = vmatprep.subr.mxu1 %v388_v7  ;;  %4316 = vmatpush3.msra.mxu0 %v3383_v6  ;;  %v5494_v14 = vld [vmem:[%s5485_s18 + $0x8] sm:$0x3f]  ;;  %v5497_v15 = vld [vmem:[%s5485_s18 + $0x10] sm:$0x3f]  ;;  %v5528_v25 = vld [vmem:[%s5485_s18] sm:$0x3f]  ;;  %s6492_s19 = scalar_lea.vmem %s7242_s2, %s3363_s9 }
  0x17   : > { %4351 = vmatpush3.msra.mxu1 %v388_v7  ;;  %4317 = vmatprep.subr.mxu0 %v3382_v8  ;;  %v5507_v18 = vcombine.high %v5494_v14, %v5494_v14  ;;  %v5511_v19 = vcombine.high %v5497_v15, %v5497_v15  ;;  %v3368_v20 = vrot.slane %v5494_v14, 9  ;;  %v3369_v21 = vrot.slane %v5497_v15, 9  ;;  %v5547_v32 = vld [vmem:[%s5485_s18 + $0x18] sm:$0x3f]  ;;  %v380_v39 = vld [vmem:[%s7243_s3 + $0x20] sm:$0xff]  ;;  %v3373_v46 = vld [vmem:[%s7243_s3 + $0x90] sm:$0xff] }
  0x18   : > { %4352 = vmatprep.subr.mxu1 %v387_v9  ;;  %4318 = vmatpush3.msra.mxu0 %v3382_v8  ;;  %v5551_v33 = vcombine.high %v5528_v25, %v5528_v25  ;;  %v5563_v37 = vcombine.high %v5547_v32, %v5547_v32  ;;  %v3367_v40 = vrot.slane %v5528_v25, 9  ;;  %v3374_v42 = vld [vmem:[%s7243_s3 + $0x98] sm:$0xff]  ;;  %v3370_v44 = vrot.slane %v5547_v32, 9  ;;  %v378_v47 = vld [vmem:[%s7243_s3 + $0x10] sm:$0xff]  ;;  %v3372_v49 = vld [vmem:[%s7243_s3 + $0x88] sm:$0xff] }
  0x19   : > { %4353 = vmatpush3.msra.mxu1 %v387_v9  ;;  %4319 = vmatprep.subr.mxu0 %v3381_v10  ;;  %v409_v26 = vrot.slane %v5507_v18, 5  ;;  %v413_v27 = vrot.slane %v5511_v19, 5  ;;  %v379_v43 = vld [vmem:[%s7243_s3 + $0x18] sm:$0xff]  ;;  %v377_v50 = vld [vmem:[%s7243_s3 + $0x8] sm:$0xff]  ;;  %v3371_v52 = vld [vmem:[%s7243_s3 + $0x80] sm:$0xff]  ;;  %v515_v55 = vcombine.low %v5528_v25, %v5494_v14  ;;  %v5614_v57 = vcombine.low %v5497_v15, %v5547_v32 }
  0x1a   : > { %4354 = vmatprep.subr.mxu1 %v386_v11  ;;  %4320 = vmatpush3.msra.mxu0 %v3381_v10  ;;  %v405_v41 = vrot.slane %v5551_v33, 5  ;;  %v417_v45 = vrot.slane %v5563_v37, 5  ;;  %v376_v53 = vld [vmem:[%s7243_s3] sm:$0xff]  ;;  %v3406_v58 = vld [vmem:[%s7243_s3 + $0x178] sm:$0xff]  ;;  %v3405_v60 = vld [vmem:[%s7243_s3 + $0x170] sm:$0xff] }
  0x1b   : > { %4355 = vmatpush3.msra.mxu1 %v386_v11  ;;  %4321 = vmatprep.subr.mxu0 %v3380_v12  ;;  %v5540_v30 = vsel %vm5517_vm2, %v3368_v20, %v409_v26  ;;  %v5544_v31 = vsel %vm5517_vm2, %v3369_v21, %v413_v27  ;;  %v3422_v59 = vld [vmem:[%s7243_s3 + $0x1f8] sm:$0xff]  ;;  %v3421_v61 = vld [vmem:[%s7243_s3 + $0x1f0] sm:$0xff]  ;;  %v3404_v62 = vld [vmem:[%s7243_s3 + $0x168] sm:$0xff] }
  0x1c   : > { %4356 = vmatprep.subr.mxu1 %v385_v13  ;;  %4322 = vmatpush3.msra.mxu0 %v3380_v12  ;;  %v832_v34 = vcombine.low %v5540_v30, %v5544_v31  ;;  %v406_v48 = vsel %vm5517_vm2, %v3367_v40, %v405_v41  ;;  %v5597_v51 = vsel %vm5517_vm2, %v3370_v44, %v417_v45  ;;  %v3420_v63 = vld [vmem:[%s7243_s3 + $0x1e8] sm:$0xff]  ;;  %v3403_v0 = vld [vmem:[%s7243_s3 + $0x160] sm:$0xff]  ;;  %v3402_v2 = vld [vmem:[%s7243_s3 + $0x158] sm:$0xff]  ;;  %v3387_v41 = vrot.slane %v5528_v25, 10 }
  0x1d   : > { %4357 = vmatpush3.msra.mxu1 %v385_v13  ;;  %4323 = vmatprep.subr.mxu0 %v3379_v16  ;;  %v436_v54 = vcombine.low %v406_v48, %v5540_v30  ;;  %v5610_v56 = vcombine.low %v5544_v31, %v5597_v51  ;;  %v3419_v1 = vld [vmem:[%s7243_s3 + $0x1e0] sm:$0xff]  ;;  %v3418_v3 = vld [vmem:[%s7243_s3 + $0x1d8] sm:$0xff]  ;;  %v3401_v5 = vld [vmem:[%s7243_s3 + $0x150] sm:$0xff]  ;;  %v603_v44 = vrot.slane %v5507_v18, 6  ;;  %v607_v25 = vrot.slane %v5511_v19, 6 }
  0x1e   : > { %4358 = vmatprep.subr.mxu1 %v384_v17  ;;  %4324 = vmatpush3.msra.mxu0 %v3379_v16  ;;  %v5649_v4 = vld [vmem:[%s5485_s18 + $0x20] sm:$0x3f]  ;;  %v3417_v6 = vld [vmem:[%s7243_s3 + $0x1d0] sm:$0xff]  ;;  %v3400_v8 = vld [vmem:[%s7243_s3 + $0x148] sm:$0xff]  ;;  %v3390_v48 = vrot.slane %v5547_v32, 10 }
  0x1f   : > { %4359 = vmatpush3.msra.mxu1 %v384_v17  ;;  %4325 = vmatprep.subr.mxu0 %v3378_v23  ;;  %v5659_v7 = vcombine.high %v5649_v4, %v5649_v4  ;;  %v3416_v9 = vld [vmem:[%s7243_s3 + $0x1c8] sm:$0xff]  ;;  %v3440_v10 = vrot.slane %v5649_v4, 10  ;;  %v3399_v20 = vld [vmem:[%s7243_s3 + $0x140] sm:$0xff]  ;;  %v3414_v26 = vld [vmem:[%s7243_s3 + $0x1b8] sm:$0xff] }
  0x20   : > { %4360 = vmatprep.subr.mxu1 %v383_v24  ;;  %4326 = vmatpush3.msra.mxu0 %v3378_v23  ;;  %v5669_v11 = vld [vmem:[%s5485_s18 + $0x28] sm:$0x3f]  ;;  %v3415_v21 = vld [vmem:[%s7243_s3 + $0x1c0] sm:$0xff]  ;;  %vm5694_vm5 = vmor %vm594_vm3, %vm595_vm4  ;;  %s339_s18 = sadd.s32 1, %s5353_s21  ;;  %s7268_s21 = smov (!%p363_p9, %s5353_s21), 3 }
  0x21   : > { %4361 = vmatpush3.msra.mxu1 %v383_v24  ;;  %4327 = vmatprep.subr.mxu0 %v3377_v28  ;;  %v915_v12 = vrot.slane %v5659_v7, 6  ;;  %v1033_v13 = vcombine.low %v5649_v4, %v5669_v11  ;;  %v5676_v16 = vcombine.high %v5669_v11, %v5669_v11  ;;  %v3490_v17 = vrot.slane %v5669_v11, 10  ;;  %v3398_v24 = vld [vmem:[%s7243_s3 + $0x138] sm:$0xff]  ;;  %v3412_v40 = vld [vmem:[%s7243_s3 + $0x1a8] sm:$0xff]  ;;  %v3395_v45 = vld [vmem:[%s7243_s3 + $0x120] sm:$0xff]  ;;  %p342_p7 = scmp.lt.s32.totalorder %s339_s18, 5 }
  0x22   : > { %4362 = vmatprep.subr.mxu1 %v382_v29  ;;  %4328 = vmatpush3.msra.mxu0 %v3377_v28  ;;  %v3394_v18 = vld [vmem:[%s7243_s3 + $0x118] sm:$0xff]  ;;  %v3470_v30 = vld [vmem:[%s7243_s3 + $0x368] sm:$0xff]  ;;  %v3488_v31 = vld [vmem:[%s7243_s3 + $0x3f0] sm:$0xff]  ;;  %s3364_s14 = sshll.u32 %s7268_s21, 1 }
  0x23   : > { %4363 = vmatpush3.msra.mxu1 %v382_v29  ;;  %4329 = vmatprep.subr.mxu0 %v3376_v35  ;;  %v1215_v23 = vrot.slane %v5676_v16, 6  ;;  %v5700_v28 = vsel %vm5694_vm5, %v3440_v10, %v915_v12  ;;  %v3452_v10 = vld [vmem:[%s7243_s3 + $0x2d8] sm:$0xff]  ;;  %v3433_v12 = vld [vmem:[%s7243_s3 + $0x248] sm:$0xff]  ;;  %s7264_s18 = smov (!%p342_p7, %s339_s18), 5  ;;  %v3817_v22 = vld [vmem:[%s7243_s3 + $0xd70] sm:$0xff] }
  0x24   : > { %4364 = vmatprep.subr.mxu1 %v381_v36  ;;  %4330 = vmatpush3.msra.mxu0 %v3376_v35  ;;  %v3397_v35 = vld [vmem:[%s7243_s3 + $0x130] sm:$0xff]  ;;  %s5256_s7 = smul.u32 6, %s7264_s18 }
  0x25   : > { %4365 = vmatpush3.msra.mxu1 %v381_v36  ;;  %4331 = vmatprep.subr.mxu0 %v3375_v38  ;;  %v5704_v29 = vsel %vm5694_vm5, %v3490_v17, %v1215_v23  ;;  %v3413_v36 = vld [vmem:[%s7243_s3 + $0x1b0] sm:$0xff]  ;;  %v3431_v23 = vld [vmem:[%s7243_s3 + $0x238] sm:$0xff] }
  0x26   : > { %4366 = vmatprep.subr.mxu1 %v380_v39  ;;  %4332 = vmatpush3.msra.mxu0 %v3375_v38  ;;  %v1234_v38 = vcombine.low %v5700_v28, %v5704_v29  ;;  %v3451_v17 = vld [vmem:[%s7243_s3 + $0x2d0] sm:$0xff]  ;;  %s346_s15 = sadd.s32 %s5256_s7, %s5467_s28 }
  0x27   : > { %4367 = vmatpush3.msra.mxu1 %v380_v39  ;;  %4333 = vmatprep.subr.mxu0 %v3374_v42  ;;  %v3396_v39 = vld [vmem:[%s7243_s3 + $0x128] sm:$0xff]  ;;  %s3362_s29 = sshll.u32 %s346_s15, 3  ;;  %v3561_v29 = vld [vmem:[%s7243_s3 + $0x5f0] sm:$0xff] }
  0x28   : > { %4368 = vmatprep.subr.mxu1 %v379_v43  ;;  %4334 = vmatpush3.msra.mxu0 %v3374_v42  ;;  %v599_v42 = vrot.slane %v5551_v33, 6  ;;  %v3410_v33 = vld [vmem:[%s7243_s3 + $0x198] sm:$0xff]  ;;  %s5910_s18 = scalar_lea.vmem %s7241_s1, %s3362_s29 }
  0x29   : > { %4369 = vmatpush3.msra.mxu1 %v379_v43  ;;  %4335 = vmatprep.subr.mxu0 %v3373_v46  ;;  %v3388_v43 = vrot.slane %v5494_v14, 10 }
  0x2a   : > { %4370 = vmatprep.subr.mxu1 %v378_v47  ;;  %4336 = vmatpush3.msra.mxu0 %v3373_v46  ;;  %v3411_v46 = vld [vmem:[%s7243_s3 + $0x1a0] sm:$0xff]  ;;  %v600_v19 = vsel %vm5694_vm5, %v3387_v41, %v599_v42  ;;  %v3446_v41 = vld [vmem:[%s7243_s3 + $0x2a8] sm:$0xff]  ;;  %v3423_v42 = vrot.slane %v5649_v4, 9 }
  0x2b   : > { %4371 = vmatpush3.msra.mxu1 %v378_v47  ;;  %4337 = vmatprep.subr.mxu0 %v3372_v49  ;;  %v3389_v47 = vrot.slane %v5497_v15, 10 }
  0x2c   : > { %4372 = vmatprep.subr.mxu1 %v377_v50  ;;  %4338 = vmatpush3.msra.mxu0 %v3372_v49  ;;  %v611_v49 = vrot.slane %v5563_v37, 6  ;;  %v3392_v37 = vld [vmem:[%s7243_s3 + $0x108] sm:$0xff] }
  0x2d   : > { %4373 = vmatpush3.msra.mxu1 %v377_v50  ;;  %4339 = vmatprep.subr.mxu0 %v3371_v52  ;;  %v5744_v50 = vsel %vm5694_vm5, %v3388_v43, %v603_v44  ;;  %v813_v43 = vrot.slane %v5659_v7, 5  ;;  %v3427_v44 = vld [vmem:[%s7243_s3 + $0x218] sm:$0xff] }
  0x2e   : > { %4374 = vmatprep.subr.mxu1 %v376_v53  ;;  %4340 = vmatpush3.msra.mxu0 %v3371_v52  ;;  %v3393_v52 = vld [vmem:[%s7243_s3 + $0x110] sm:$0xff]  ;;  %v3444_v7 = vld [vmem:[%s7243_s3 + $0x298] sm:$0xff] }
  0x2f   : > { %4341 = vmatprep.mubr.f32.mxu0 %v436_v54  ;;  %4375 = vmatpush3.msra.mxu1 %v376_v53  ;;  %v3409_v53 = vld [vmem:[%s7243_s3 + $0x190] sm:$0xff]  ;;  %v3408_v54 = vld [vmem:[%s7243_s3 + $0x188] sm:$0xff] }
  0x30   : > { %4376 = vmatprep.mubr.f32.mxu1 %v515_v55  ;;  %4342 = vmatmul.mubr.f32.vlgmr.msra.gmra.mxu0 %v5610_v56  ;;  %v630_v55 = vcombine.low %v600_v19, %v5744_v50  ;;  %v3441_v19 = vld [vmem:[%s7243_s3 + $0x280] sm:$0xff] }
  0x31   : > { %4377 = vmatmul.mubr.f32.vlgmr.msra.gmra.mxu1 %v5614_v57  ;;  %4379 = vmatprep.subr.mxu0 %v3406_v58 }
  0x32   : > { %4414 = vmatprep.subr.mxu1 %v3422_v59  ;;  %4380 = vmatpush3.msra.mxu0 %v3406_v58  ;;  %v5761_v58 = vsel %vm5694_vm5, %v3389_v47, %v607_v25  ;;  %v5871_v25 = vsel %vm5517_vm2, %v3423_v42, %v813_v43  ;;  %v3424_v47 = vld [vmem:[%s7243_s3 + $0x200] sm:$0xff]  ;;  %v3506_v42 = vld [vmem:[%s7243_s3 + $0x478] sm:$0xff] }
  0x33   : > { %4415 = vmatpush3.msra.mxu1 %v3422_v59  ;;  %4381 = vmatprep.subr.mxu0 %v3405_v60  ;;  %v5765_v59 = vsel %vm5694_vm5, %v3390_v48, %v611_v49  ;;  %v3442_v48 = vld [vmem:[%s7243_s3 + $0x288] sm:$0xff]  ;;  %v833_v49 = vcombine.low %v5597_v51, %v5871_v25 }
  0x34   : > { %4416 = vmatprep.subr.mxu1 %v3421_v61  ;;  %4382 = vmatpush3.msra.mxu0 %v3405_v60  ;;  %v3391_v60 = vld [vmem:[%s7243_s3 + $0x100] sm:$0xff]  ;;  %v935_v51 = vcombine.low %v5765_v59, %v5700_v28  ;;  %v3540_v28 = vld [vmem:[%s7243_s3 + $0x568] sm:$0xff] }
  0x35   : > { %4417 = vmatpush3.msra.mxu1 %v3421_v61  ;;  %4383 = vmatprep.subr.mxu0 %v3404_v62  ;;  %v5772_v61 = vcombine.low %v5761_v58, %v5765_v59 }
  0x36   : > { %4418 = vmatprep.subr.mxu1 %v3420_v63  ;;  %4384 = vmatpush3.msra.mxu0 %v3404_v62  ;;  %v3407_v62 = vld [vmem:[%s7243_s3 + $0x180] sm:$0xff] }
  0x37   : > { %4419 = vmatpush3.msra.mxu1 %v3420_v63  ;;  %4385 = vmatprep.subr.mxu0 %v3403_v0  ;;  %v3439_v63 = vld [vmem:[%s7243_s3 + $0x278] sm:$0xff] }
  0x38   : > { %4420 = vmatprep.subr.mxu1 %v3419_v1  ;;  %4386 = vmatpush3.msra.mxu0 %v3403_v0  ;;  %v729_v0 = vcombine.low %v5494_v14, %v5497_v15  ;;  %v3437_v14 = vld [vmem:[%s7243_s3 + $0x268] sm:$0xff]  ;;  %v3455_v15 = vld [vmem:[%s7243_s3 + $0x2f0] sm:$0xff] }
  0x39   : > { %4421 = vmatpush3.msra.mxu1 %v3419_v1  ;;  %4387 = vmatprep.subr.mxu0 %v3402_v2  ;;  %v730_v1 = vcombine.low %v5547_v32, %v5649_v4  ;;  %v3436_v32 = vld [vmem:[%s7243_s3 + $0x260] sm:$0xff]  ;;  %v3504_v4 = vld [vmem:[%s7243_s3 + $0x468] sm:$0xff] }
  0x3a   : > { %4422 = vmatprep.subr.mxu1 %v3418_v3  ;;  %4388 = vmatpush3.msra.mxu0 %v3402_v2  ;;  %v3438_v2 = vld [vmem:[%s7243_s3 + $0x270] sm:$0xff] }
  0x3b   : > { %4423 = vmatpush3.msra.mxu1 %v3418_v3  ;;  %4389 = vmatprep.subr.mxu0 %v3401_v5  ;;  %v3456_v3 = vld [vmem:[%s7243_s3 + $0x2f8] sm:$0xff] }
  0x3c   : > { %4424 = vmatprep.subr.mxu1 %v3417_v6  ;;  %4390 = vmatpush3.msra.mxu0 %v3401_v5  ;;  %v3454_v5 = vld [vmem:[%s7243_s3 + $0x2e8] sm:$0xff] }
  0x3d   : > { %4425 = vmatpush3.msra.mxu1 %v3417_v6  ;;  %4391 = vmatprep.subr.mxu0 %v3400_v8  ;;  %v3435_v6 = vld [vmem:[%s7243_s3 + $0x258] sm:$0xff] }
  0x3e   : > { %4426 = vmatprep.subr.mxu1 %v3416_v9  ;;  %4392 = vmatpush3.msra.mxu0 %v3400_v8  ;;  %v3453_v8 = vld [vmem:[%s7243_s3 + $0x2e0] sm:$0xff] }
  0x3f   : > { %4427 = vmatpush3.msra.mxu1 %v3416_v9  ;;  %4393 = vmatprep.subr.mxu0 %v3399_v20  ;;  %v3434_v9 = vld [vmem:[%s7243_s3 + $0x250] sm:$0xff] }
  0x40   : > { %4428 = vmatprep.subr.mxu1 %v3415_v21  ;;  %4394 = vmatpush3.msra.mxu0 %v3399_v20  ;;  %v3432_v20 = vld [vmem:[%s7243_s3 + $0x240] sm:$0xff] }
  0x41   : > { %4429 = vmatpush3.msra.mxu1 %v3415_v21  ;;  %4395 = vmatprep.subr.mxu0 %v3398_v24  ;;  %v3450_v21 = vld [vmem:[%s7243_s3 + $0x2c8] sm:$0xff] }
  0x42   : > { %4430 = vmatprep.subr.mxu1 %v3414_v26  ;;  %4396 = vmatpush3.msra.mxu0 %v3398_v24  ;;  %v3449_v24 = vld [vmem:[%s7243_s3 + $0x2c0] sm:$0xff] }
  0x43   : > { %4431 = vmatpush3.msra.mxu1 %v3414_v26  ;;  %4397 = vmatprep.subr.mxu0 %v3397_v35  ;;  %v3430_v26 = vld [vmem:[%s7243_s3 + $0x230] sm:$0xff] }
  0x44   : > { %4432 = vmatprep.subr.mxu1 %v3413_v36  ;;  %4398 = vmatpush3.msra.mxu0 %v3397_v35  ;;  %v3448_v35 = vld [vmem:[%s7243_s3 + $0x2b8] sm:$0xff] }
  0x45   : > { %4433 = vmatpush3.msra.mxu1 %v3413_v36  ;;  %4399 = vmatprep.subr.mxu0 %v3396_v39  ;;  %v3429_v36 = vld [vmem:[%s7243_s3 + $0x228] sm:$0xff] }
  0x46   : > { %4434 = vmatprep.subr.mxu1 %v3412_v40  ;;  %4400 = vmatpush3.msra.mxu0 %v3396_v39  ;;  %v3447_v39 = vld [vmem:[%s7243_s3 + $0x2b0] sm:$0xff] }
  0x47   : > { %4435 = vmatpush3.msra.mxu1 %v3412_v40  ;;  %4401 = vmatprep.subr.mxu0 %v3395_v45  ;;  %v3428_v40 = vld [vmem:[%s7243_s3 + $0x220] sm:$0xff] }
  0x48   : > { %4436 = vmatprep.subr.mxu1 %v3411_v46  ;;  %4402 = vmatpush3.msra.mxu0 %v3395_v45  ;;  %v3445_v45 = vld [vmem:[%s7243_s3 + $0x2a0] sm:$0xff] }
  0x49   : > { %4437 = vmatpush3.msra.mxu1 %v3411_v46  ;;  %4403 = vmatprep.subr.mxu0 %v3394_v18  ;;  %v3426_v46 = vld [vmem:[%s7243_s3 + $0x210] sm:$0xff] }
  0x4a   : > { %4438 = vmatprep.subr.mxu1 %v3410_v33  ;;  %4404 = vmatpush3.msra.mxu0 %v3394_v18  ;;  %v3425_v18 = vld [vmem:[%s7243_s3 + $0x208] sm:$0xff] }
  0x4b   : > { %4439 = vmatpush3.msra.mxu1 %v3410_v33  ;;  %4405 = vmatprep.subr.mxu0 %v3393_v52  ;;  %v3443_v33 = vld [vmem:[%s7243_s3 + $0x290] sm:$0xff] }
  0x4c   : > { %4440 = vmatprep.subr.mxu1 %v3409_v53  ;;  %4406 = vmatpush3.msra.mxu0 %v3393_v52  ;;  %v3472_v52 = vld [vmem:[%s7243_s3 + $0x378] sm:$0xff] }
  0x4d   : > { %4441 = vmatpush3.msra.mxu1 %v3409_v53  ;;  %4407 = vmatprep.subr.mxu0 %v3392_v37  ;;  %v934_v53 = vcombine.low %v5744_v50, %v5761_v58  ;;  %v3489_v50 = vld [vmem:[%s7243_s3 + $0x3f8] sm:$0xff]  ;;  %v3487_v58 = vld [vmem:[%s7243_s3 + $0x3e8] sm:$0xff] }
  0x4e   : > { %4442 = vmatprep.subr.mxu1 %v3408_v54  ;;  %4408 = vmatpush3.msra.mxu0 %v3392_v37  ;;  %v3471_v37 = vld [vmem:[%s7243_s3 + $0x370] sm:$0xff] }
  0x4f   : > { %4411 = vmatprep.mubr.f32.mxu0 %v630_v55  ;;  %4409 = vmatprep.subr.mxu0 %v3391_v60  ;;  %v3469_v55 = vld [vmem:[%s7243_s3 + $0x360] sm:$0xff] }
  0x50   : > { %4443 = vmatpush3.msra.mxu1 %v3408_v54  ;;  %4410 = vmatpush3.msra.mxu0 %v3391_v60  ;;  %v5922_v54 = vld [vmem:[%s5910_s18 + $0x10] sm:$0x3f]  ;;  %v3468_v60 = vld [vmem:[%s7243_s3 + $0x358] sm:$0xff] }
  0x51   : > { %4444 = vmatprep.subr.mxu1 %v3407_v62  ;;  %4412 = vmatmul.mubr.f32.vlgmr.msra.gmra.mxu0 %v5772_v61 }
  0x52   : > { %4449 = vmatprep.subr.mxu0 %v3439_v63  ;;  %4445 = vmatpush3.msra.mxu1 %v3407_v62  ;;  %v3486_v62 = vld [vmem:[%s7243_s3 + $0x3e0] sm:$0xff] }
  0x53   : > { %4446 = vmatprep.mubr.f32.mxu1 %v729_v0  ;;  %4450 = vmatpush3.msra.mxu0 %v3439_v63  ;;  %v3467_v63 = vld [vmem:[%s7243_s3 + $0x350] sm:$0xff]  ;;  %v3485_v0 = vld [vmem:[%s7243_s3 + $0x3d8] sm:$0xff] }
  0x54   : > { %4447 = vmatmul.mubr.f32.vlgmr.msra.gmra.mxu1 %v730_v1  ;;  %4451 = vmatprep.subr.mxu0 %v3438_v2  ;;  %v3466_v1 = vld [vmem:[%s7243_s3 + $0x348] sm:$0xff] }
  0x55   : > { %4484 = vmatprep.subr.mxu1 %v3456_v3  ;;  %4452 = vmatpush3.msra.mxu0 %v3438_v2  ;;  %v3484_v2 = vld [vmem:[%s7243_s3 + $0x3d0] sm:$0xff] }
  0x56   : > { %4485 = vmatpush3.msra.mxu1 %v3456_v3  ;;  %4453 = vmatprep.subr.mxu0 %v3437_v14  ;;  %v3465_v3 = vld [vmem:[%s7243_s3 + $0x340] sm:$0xff] }
  0x57   : > { %4486 = vmatprep.subr.mxu1 %v3455_v15  ;;  %4454 = vmatpush3.msra.mxu0 %v3437_v14  ;;  %v3483_v14 = vld [vmem:[%s7243_s3 + $0x3c8] sm:$0xff] }
  0x58   : > { %4487 = vmatpush3.msra.mxu1 %v3455_v15  ;;  %4455 = vmatprep.subr.mxu0 %v3436_v32  ;;  %v3464_v15 = vld [vmem:[%s7243_s3 + $0x338] sm:$0xff] }
  0x59   : > { %4488 = vmatprep.subr.mxu1 %v3454_v5  ;;  %4456 = vmatpush3.msra.mxu0 %v3436_v32  ;;  %v3482_v32 = vld [vmem:[%s7243_s3 + $0x3c0] sm:$0xff] }
  0x5a   : > { %4489 = vmatpush3.msra.mxu1 %v3454_v5  ;;  %4457 = vmatprep.subr.mxu0 %v3435_v6  ;;  %v3463_v5 = vld [vmem:[%s7243_s3 + $0x330] sm:$0xff] }
  0x5b   : > { %4490 = vmatprep.subr.mxu1 %v3453_v8  ;;  %4458 = vmatpush3.msra.mxu0 %v3435_v6  ;;  %v3481_v6 = vld [vmem:[%s7243_s3 + $0x3b8] sm:$0xff] }
  0x5c   : > { %4491 = vmatpush3.msra.mxu1 %v3453_v8  ;;  %4459 = vmatprep.subr.mxu0 %v3434_v9  ;;  %v3462_v8 = vld [vmem:[%s7243_s3 + $0x328] sm:$0xff] }
  0x5d   : > { %4492 = vmatprep.subr.mxu1 %v3452_v10  ;;  %4460 = vmatpush3.msra.mxu0 %v3434_v9  ;;  %v3480_v9 = vld [vmem:[%s7243_s3 + $0x3b0] sm:$0xff] }
  0x5e   : > { %4493 = vmatpush3.msra.mxu1 %v3452_v10  ;;  %4461 = vmatprep.subr.mxu0 %v3433_v12  ;;  %v3461_v10 = vld [vmem:[%s7243_s3 + $0x320] sm:$0xff] }
  0x5f   : > { %4494 = vmatprep.subr.mxu1 %v3451_v17  ;;  %4462 = vmatpush3.msra.mxu0 %v3433_v12  ;;  %v3479_v12 = vld [vmem:[%s7243_s3 + $0x3a8] sm:$0xff] }
  0x60   : > { %4495 = vmatpush3.msra.mxu1 %v3451_v17  ;;  %4463 = vmatprep.subr.mxu0 %v3432_v20  ;;  %v3460_v17 = vld [vmem:[%s7243_s3 + $0x318] sm:$0xff] }
  0x61   : > { %4496 = vmatprep.subr.mxu1 %v3450_v21  ;;  %4464 = vmatpush3.msra.mxu0 %v3432_v20  ;;  %v3478_v20 = vld [vmem:[%s7243_s3 + $0x3a0] sm:$0xff] }
  0x62   : > { %4497 = vmatpush3.msra.mxu1 %v3450_v21  ;;  %4465 = vmatprep.subr.mxu0 %v3431_v23  ;;  %v3459_v21 = vld [vmem:[%s7243_s3 + $0x310] sm:$0xff] }
  0x63   : > { %4498 = vmatprep.subr.mxu1 %v3449_v24  ;;  %4466 = vmatpush3.msra.mxu0 %v3431_v23  ;;  %v3477_v23 = vld [vmem:[%s7243_s3 + $0x398] sm:$0xff] }
  0x64   : > { %4499 = vmatpush3.msra.mxu1 %v3449_v24  ;;  %4467 = vmatprep.subr.mxu0 %v3430_v26  ;;  %v3473_v24 = vrot.slane %v5669_v11, 9  ;;  %v3521_v11 = vld [vmem:[%s7243_s3 + $0x4f0] sm:$0xff] }
  0x65   : > { %4500 = vmatprep.subr.mxu1 %v3448_v35  ;;  %4468 = vmatpush3.msra.mxu0 %v3430_v26  ;;  %v1115_v26 = vrot.slane %v5676_v16, 5  ;;  %v3475_v16 = vld [vmem:[%s7243_s3 + $0x388] sm:$0xff] }
  0x66   : > { %4501 = vmatpush3.msra.mxu1 %v3448_v35  ;;  %4469 = vmatprep.subr.mxu0 %v3429_v36  ;;  %v3458_v35 = vld [vmem:[%s7243_s3 + $0x308] sm:$0xff] }
  0x67   : > { %4502 = vmatprep.subr.mxu1 %v3447_v39  ;;  %4470 = vmatpush3.msra.mxu0 %v3429_v36  ;;  %v3476_v36 = vld [vmem:[%s7243_s3 + $0x390] sm:$0xff] }
  0x68   : > { %4503 = vmatpush3.msra.mxu1 %v3447_v39  ;;  %4471 = vmatprep.subr.mxu0 %v3428_v40  ;;  %v3457_v39 = vld [vmem:[%s7243_s3 + $0x300] sm:$0xff] }
  0x69   : > { %4504 = vmatprep.subr.mxu1 %v3446_v41  ;;  %4472 = vmatpush3.msra.mxu0 %v3428_v40  ;;  %v1116_v40 = vsel %vm5517_vm2, %v3473_v24, %v1115_v26  ;;  %v3541_v24 = vld [vmem:[%s7243_s3 + $0x570] sm:$0xff]  ;;  %v3562_v26 = vld [vmem:[%s7243_s3 + $0x5f8] sm:$0xff] }
  0x6a   : > { %4505 = vmatpush3.msra.mxu1 %v3446_v41  ;;  %4473 = vmatprep.subr.mxu0 %v3427_v44  ;;  %v3474_v41 = vld [vmem:[%s7243_s3 + $0x380] sm:$0xff] }
  0x6b   : > { %4506 = vmatprep.subr.mxu1 %v3445_v45  ;;  %4474 = vmatpush3.msra.mxu0 %v3427_v44  ;;  %v6020_v44 = vcombine.high %v5922_v54, %v5922_v54 }
  0x6c   : > { %4507 = vmatpush3.msra.mxu1 %v3445_v45  ;;  %4475 = vmatprep.subr.mxu0 %v3426_v46  ;;  %v1134_v45 = vcombine.low %v5871_v25, %v1116_v40  ;;  %v3522_v25 = vld [vmem:[%s7243_s3 + $0x4f8] sm:$0xff]  ;;  %v3536_v40 = vld [vmem:[%s7243_s3 + $0x548] sm:$0xff] }
  0x6d   : > { %4508 = vmatprep.subr.mxu1 %v3444_v7  ;;  %4476 = vmatpush3.msra.mxu0 %v3426_v46 }
  0x6e   : > { %4509 = vmatpush3.msra.mxu1 %v3444_v7  ;;  %4477 = vmatprep.subr.mxu0 %v3425_v18 }
  0x6f   : > { %4510 = vmatprep.subr.mxu1 %v3443_v33  ;;  %4478 = vmatpush3.msra.mxu0 %v3425_v18  ;;  %v3545_v18 = vrot.slane %v5922_v54, 10 }
  0x70   : > { %4511 = vmatpush3.msra.mxu1 %v3443_v33  ;;  %4479 = vmatprep.subr.mxu0 %v3424_v47  ;;  %v1549_v33 = vrot.slane %v6020_v44, 6 }
  0x71   : > { %4512 = vmatprep.subr.mxu1 %v3442_v48  ;;  %4480 = vmatpush3.msra.mxu0 %v3424_v47 }
  0x72   : > { %4481 = vmatprep.mubr.f32.mxu0 %v832_v34  ;;  %4513 = vmatpush3.msra.mxu1 %v3442_v48  ;;  %v5919_v34 = vld [vmem:[%s5910_s18 + $0x8] sm:$0x3f]  ;;  %v6050_v47 = vsel %vm5694_vm5, %v3545_v18, %v1549_v33  ;;  %v3533_v18 = vld [vmem:[%s7243_s3 + $0x530] sm:$0xff]  ;;  %v3554_v33 = vld [vmem:[%s7243_s3 + $0x5b8] sm:$0xff] }
  0x73   : > { %4482 = vmatmul.mubr.f32.vlgmr.msra.gmra.mxu0 %v833_v49  ;;  %4514 = vmatprep.subr.mxu1 %v3441_v19  ;;  %v1671_v59 = vcombine.low %v5919_v34, %v5922_v54  ;;  %v6016_v43 = vcombine.high %v5919_v34, %v5919_v34  ;;  %v3544_v46 = vrot.slane %v5919_v34, 10  ;;  %v3520_v48 = vld [vmem:[%s7243_s3 + $0x4e8] sm:$0xff] }
  0x74   : > { %4519 = vmatprep.subr.mxu0 %v3472_v52  ;;  %4515 = vmatpush3.msra.mxu1 %v3441_v19  ;;  %v3502_v19 = vld [vmem:[%s7243_s3 + $0x458] sm:$0xff] }
  0x75   : > { %4516 = vmatprep.mubr.f32.mxu1 %v934_v53  ;;  %4520 = vmatpush3.msra.mxu0 %v3472_v52  ;;  %v1545_v7 = vrot.slane %v6016_v43, 6  ;;  %v3519_v52 = vld [vmem:[%s7243_s3 + $0x4e0] sm:$0xff]  ;;  %v3501_v53 = vld [vmem:[%s7243_s3 + $0x450] sm:$0xff] }
  0x76   : > { %4517 = vmatmul.mubr.f32.vlgmr.msra.gmra.mxu1 %v935_v51  ;;  %4521 = vmatprep.subr.mxu0 %v3471_v37  ;;  %v3518_v51 = vld [vmem:[%s7243_s3 + $0x4d8] sm:$0xff] }
  0x77   : > { %4554 = vmatprep.subr.mxu1 %v3489_v50  ;;  %4522 = vmatpush3.msra.mxu0 %v3471_v37  ;;  %v3500_v37 = vld [vmem:[%s7243_s3 + $0x448] sm:$0xff] }
  0x78   : > { %4555 = vmatpush3.msra.mxu1 %v3489_v50  ;;  %4523 = vmatprep.subr.mxu0 %v3470_v30  ;;  %v3517_v50 = vld [vmem:[%s7243_s3 + $0x4d0] sm:$0xff] }
  0x79   : > { %4556 = vmatprep.subr.mxu1 %v3488_v31  ;;  %4524 = vmatpush3.msra.mxu0 %v3470_v30  ;;  %v3499_v30 = vld [vmem:[%s7243_s3 + $0x440] sm:$0xff] }
  0x7a   : > { %4557 = vmatpush3.msra.mxu1 %v3488_v31  ;;  %4525 = vmatprep.subr.mxu0 %v3469_v55  ;;  %v3516_v31 = vld [vmem:[%s7243_s3 + $0x4c8] sm:$0xff] }
  0x7b   : > { %4558 = vmatprep.subr.mxu1 %v3487_v58  ;;  %4526 = vmatpush3.msra.mxu0 %v3469_v55  ;;  %v3498_v55 = vld [vmem:[%s7243_s3 + $0x438] sm:$0xff] }
  0x7c   : > { %4559 = vmatpush3.msra.mxu1 %v3487_v58  ;;  %4527 = vmatprep.subr.mxu0 %v3468_v60  ;;  %v3515_v58 = vld [vmem:[%s7243_s3 + $0x4c0] sm:$0xff] }
  0x7d   : > { %4560 = vmatprep.subr.mxu1 %v3486_v62  ;;  %4528 = vmatpush3.msra.mxu0 %v3468_v60  ;;  %v3497_v60 = vld [vmem:[%s7243_s3 + $0x430] sm:$0xff] }
  0x7e   : > { %4561 = vmatpush3.msra.mxu1 %v3486_v62  ;;  %4529 = vmatprep.subr.mxu0 %v3467_v63  ;;  %v3514_v62 = vld [vmem:[%s7243_s3 + $0x4b8] sm:$0xff] }
  0x7f   : > { %4562 = vmatprep.subr.mxu1 %v3485_v0  ;;  %4530 = vmatpush3.msra.mxu0 %v3467_v63  ;;  %v3496_v63 = vld [vmem:[%s7243_s3 + $0x428] sm:$0xff] }
  0x80   : > { %4563 = vmatpush3.msra.mxu1 %v3485_v0  ;;  %4531 = vmatprep.subr.mxu0 %v3466_v1  ;;  %v3513_v0 = vld [vmem:[%s7243_s3 + $0x4b0] sm:$0xff] }
  0x81   : > { %4564 = vmatprep.subr.mxu1 %v3484_v2  ;;  %4532 = vmatpush3.msra.mxu0 %v3466_v1  ;;  %v3495_v1 = vld [vmem:[%s7243_s3 + $0x420] sm:$0xff] }
  0x82   : > { %4565 = vmatpush3.msra.mxu1 %v3484_v2  ;;  %4533 = vmatprep.subr.mxu0 %v3465_v3  ;;  %v3512_v2 = vld [vmem:[%s7243_s3 + $0x4a8] sm:$0xff] }
  0x83   : > { %4566 = vmatprep.subr.mxu1 %v3483_v14  ;;  %4534 = vmatpush3.msra.mxu0 %v3465_v3  ;;  %v3494_v3 = vld [vmem:[%s7243_s3 + $0x418] sm:$0xff] }
  0x84   : > { %4567 = vmatpush3.msra.mxu1 %v3483_v14  ;;  %4535 = vmatprep.subr.mxu0 %v3464_v15  ;;  %v3511_v14 = vld [vmem:[%s7243_s3 + $0x4a0] sm:$0xff] }
  0x85   : > { %4568 = vmatprep.subr.mxu1 %v3482_v32  ;;  %4536 = vmatpush3.msra.mxu0 %v3464_v15  ;;  %v3493_v15 = vld [vmem:[%s7243_s3 + $0x410] sm:$0xff] }
  0x86   : > { %4569 = vmatpush3.msra.mxu1 %v3482_v32  ;;  %4537 = vmatprep.subr.mxu0 %v3463_v5  ;;  %v3510_v32 = vld [vmem:[%s7243_s3 + $0x498] sm:$0xff] }
  0x87   : > { %4570 = vmatprep.subr.mxu1 %v3481_v6  ;;  %4538 = vmatpush3.msra.mxu0 %v3463_v5  ;;  %v3492_v5 = vld [vmem:[%s7243_s3 + $0x408] sm:$0xff] }
  0x88   : > { %4571 = vmatpush3.msra.mxu1 %v3481_v6  ;;  %4539 = vmatprep.subr.mxu0 %v3462_v8  ;;  %v3509_v6 = vld [vmem:[%s7243_s3 + $0x490] sm:$0xff] }
  0x89   : > { %4572 = vmatprep.subr.mxu1 %v3480_v9  ;;  %4540 = vmatpush3.msra.mxu0 %v3462_v8  ;;  %v3491_v8 = vld [vmem:[%s7243_s3 + $0x400] sm:$0xff] }
  0x8a   : > { %4573 = vmatpush3.msra.mxu1 %v3480_v9  ;;  %4541 = vmatprep.subr.mxu0 %v3461_v10  ;;  %v3508_v9 = vld [vmem:[%s7243_s3 + $0x488] sm:$0xff] }
  0x8b   : > { %4574 = vmatprep.subr.mxu1 %v3479_v12  ;;  %4542 = vmatpush3.msra.mxu0 %v3461_v10  ;;  %v6133_v10 = vld [vmem:[%s5910_s18] sm:$0x3f] }
  0x8c   : > { %4575 = vmatpush3.msra.mxu1 %v3479_v12  ;;  %4543 = vmatprep.subr.mxu0 %v3460_v17  ;;  %v6136_v12 = vld [vmem:[%s5910_s18 + $0x18] sm:$0x3f] }
  0x8d   : > { %4576 = vmatprep.subr.mxu1 %v3478_v20  ;;  %4544 = vmatpush3.msra.mxu0 %v3460_v17  ;;  %v3507_v17 = vld [vmem:[%s7243_s3 + $0x480] sm:$0xff] }
  0x8e   : > { %4577 = vmatpush3.msra.mxu1 %v3478_v20  ;;  %4545 = vmatprep.subr.mxu0 %v3459_v21  ;;  %v3542_v20 = vld [vmem:[%s7243_s3 + $0x578] sm:$0xff] }
  0x8f   : > { %4578 = vmatprep.subr.mxu1 %v3477_v23  ;;  %4546 = vmatpush3.msra.mxu0 %v3459_v21  ;;  %v1340_v21 = vcombine.low %v6133_v10, %v5919_v34 }
  0x90   : > { %4579 = vmatpush3.msra.mxu1 %v3477_v23  ;;  %4547 = vmatprep.subr.mxu0 %v3458_v35  ;;  %v6149_v23 = vcombine.low %v5922_v54, %v6136_v12 }
  0x91   : > { %4580 = vmatprep.subr.mxu1 %v3476_v36  ;;  %4548 = vmatpush3.msra.mxu0 %v3458_v35  ;;  %v3538_v35 = vld [vmem:[%s7243_s3 + $0x558] sm:$0xff] }
  0x92   : > { %4581 = vmatpush3.msra.mxu1 %v3476_v36  ;;  %4549 = vmatprep.subr.mxu0 %v3457_v39  ;;  %v3559_v36 = vld [vmem:[%s7243_s3 + $0x5e0] sm:$0xff] }
  0x93   : > { %4582 = vmatprep.subr.mxu1 %v3475_v16  ;;  %4550 = vmatpush3.msra.mxu0 %v3457_v39  ;;  %v3537_v39 = vld [vmem:[%s7243_s3 + $0x550] sm:$0xff] }
  0x94   : > { %4551 = vmatprep.mubr.f32.mxu0 %v5614_v57  ;;  %4583 = vmatpush3.msra.mxu1 %v3475_v16  ;;  %v3505_v57 = vld [vmem:[%s7243_s3 + $0x470] sm:$0xff]  ;;  %v3558_v16 = vld [vmem:[%s7243_s3 + $0x5d8] sm:$0xff] }
  0x95   : > { %4552 = vmatmul.mubr.f32.vlgmr.msra.gmra.mxu0 %v1033_v13  ;;  %4584 = vmatprep.subr.mxu1 %v3474_v41  ;;  %v6046_v13 = vsel %vm5694_vm5, %v3544_v46, %v1545_v7  ;;  %v3534_v46 = vld [vmem:[%s7243_s3 + $0x538] sm:$0xff]  ;;  %v3555_v7 = vld [vmem:[%s7243_s3 + $0x5c0] sm:$0xff] }
  0x96   : > { %4589 = vmatprep.subr.mxu0 %v3506_v42  ;;  %4585 = vmatpush3.msra.mxu1 %v3474_v41  ;;  %v1876_v49 = vcombine.low %v6046_v13, %v6050_v47  ;;  %v3557_v41 = vld [vmem:[%s7243_s3 + $0x5d0] sm:$0xff] }
  0x97   : > { %4586 = vmatprep.mubr.f32.mxu1 %v5610_v56  ;;  %4590 = vmatpush3.msra.mxu0 %v3506_v42  ;;  %v3503_v56 = vld [vmem:[%s7243_s3 + $0x460] sm:$0xff] }
  0x98   : > { %4587 = vmatmul.mubr.f32.vlgmr.msra.gmra.mxu1 %v1134_v45  ;;  %4591 = vmatprep.subr.mxu0 %v3505_v57  ;;  %v3535_v42 = vld [vmem:[%s7243_s3 + $0x540] sm:$0xff]  ;;  %v3556_v45 = vld [vmem:[%s7243_s3 + $0x5c8] sm:$0xff] }
  0x99   : > { %4624 = vmatprep.subr.mxu1 %v3522_v25  ;;  %4592 = vmatpush3.msra.mxu0 %v3505_v57  ;;  %v1421_v57 = vcombine.high %v6133_v10, %v6133_v10 }
  0x9a   : > { %4625 = vmatpush3.msra.mxu1 %v3522_v25  ;;  %4593 = vmatprep.subr.mxu0 %v3504_v4  ;;  %v3532_v25 = vld [vmem:[%s7243_s3 + $0x528] sm:$0xff] }
  0x9b   : > { %4626 = vmatprep.subr.mxu1 %v3521_v11  ;;  %4594 = vmatpush3.msra.mxu0 %v3504_v4  ;;  %v3553_v4 = vld [vmem:[%s7243_s3 + $0x5b0] sm:$0xff] }
  0x9c   : > { %4627 = vmatpush3.msra.mxu1 %v3521_v11  ;;  %4595 = vmatprep.subr.mxu0 %v3503_v56  ;;  %v1424_v11 = vcombine.high %v6136_v12, %v6136_v12 }
  0x9d   : > { %4628 = vmatprep.subr.mxu1 %v3520_v48  ;;  %4596 = vmatpush3.msra.mxu0 %v3503_v56  ;;  %v3531_v56 = vld [vmem:[%s7243_s3 + $0x520] sm:$0xff] }
  0x9e   : > { %4629 = vmatpush3.msra.mxu1 %v3520_v48  ;;  %4597 = vmatprep.subr.mxu0 %v3502_v19  ;;  %v3552_v48 = vld [vmem:[%s7243_s3 + $0x5a8] sm:$0xff] }
  0x9f   : > { %4630 = vmatprep.subr.mxu1 %v3519_v52  ;;  %4598 = vmatpush3.msra.mxu0 %v3502_v19  ;;  %v3523_v19 = vrot.slane %v6133_v10, 9 }
  0xa0   : > { %4631 = vmatpush3.msra.mxu1 %v3519_v52  ;;  %4599 = vmatprep.subr.mxu0 %v3501_v53  ;;  %v1427_v52 = vrot.slane %v1421_v57, 5 }
  0xa1   : > { %4632 = vmatprep.subr.mxu1 %v3518_v51  ;;  %4600 = vmatpush3.msra.mxu0 %v3501_v53  ;;  %v3524_v53 = vrot.slane %v5919_v34, 9  ;;  %v3610_v34 = vld [vmem:[%s7243_s3 + $0x768] sm:$0xff] }
  0xa2   : > { %4633 = vmatpush3.msra.mxu1 %v3518_v51  ;;  %4601 = vmatprep.subr.mxu0 %v3500_v37  ;;  %v1431_v51 = vrot.slane %v6016_v43, 5  ;;  %v3529_v43 = vld [vmem:[%s7243_s3 + $0x510] sm:$0xff] }
  0xa3   : > { %4634 = vmatprep.subr.mxu1 %v3517_v50  ;;  %4602 = vmatpush3.msra.mxu0 %v3500_v37  ;;  %v3530_v37 = vld [vmem:[%s7243_s3 + $0x518] sm:$0xff] }
  0xa4   : > { %4635 = vmatpush3.msra.mxu1 %v3517_v50  ;;  %4603 = vmatprep.subr.mxu0 %v3499_v30  ;;  %v3551_v50 = vld [vmem:[%s7243_s3 + $0x5a0] sm:$0xff] }
  0xa5   : > { %4636 = vmatprep.subr.mxu1 %v3516_v31  ;;  %4604 = vmatpush3.msra.mxu0 %v3499_v30  ;;  %v3525_v30 = vrot.slane %v5922_v54, 9  ;;  %v3627_v54 = vld [vmem:[%s7243_s3 + $0x7f0] sm:$0xff] }
  0xa6   : > { %4637 = vmatpush3.msra.mxu1 %v3516_v31  ;;  %4605 = vmatprep.subr.mxu0 %v3498_v55  ;;  %v1435_v31 = vrot.slane %v6020_v44, 5  ;;  %v1428_v44 = vsel %vm5517_vm2, %v3523_v19, %v1427_v52  ;;  %v3585_v19 = vld [vmem:[%s7243_s3 + $0x6a8] sm:$0xff] }
  0xa7   : > { %4638 = vmatprep.subr.mxu1 %v3515_v58  ;;  %4606 = vmatpush3.msra.mxu0 %v3498_v55  ;;  %v3526_v55 = vrot.slane %v6136_v12, 9 }
  0xa8   : > { %4639 = vmatpush3.msra.mxu1 %v3515_v58  ;;  %4607 = vmatprep.subr.mxu0 %v3497_v60  ;;  %v1439_v58 = vrot.slane %v1424_v11, 5 }
  0xa9   : > { %4640 = vmatprep.subr.mxu1 %v3514_v62  ;;  %4608 = vmatpush3.msra.mxu0 %v3497_v60  ;;  %v3550_v60 = vld [vmem:[%s7243_s3 + $0x598] sm:$0xff] }
  0xaa   : > { %4641 = vmatpush3.msra.mxu1 %v3514_v62  ;;  %4609 = vmatprep.subr.mxu0 %v3496_v63  ;;  %v3543_v62 = vrot.slane %v6133_v10, 10 }
  0xab   : > { %4642 = vmatprep.subr.mxu1 %v3513_v0  ;;  %4610 = vmatpush3.msra.mxu0 %v3496_v63  ;;  %v1541_v63 = vrot.slane %v1421_v57, 6  ;;  %v3569_v57 = vld [vmem:[%s7243_s3 + $0x630] sm:$0xff] }
  0xac   : > { %4643 = vmatpush3.msra.mxu1 %v3513_v0  ;;  %4611 = vmatprep.subr.mxu0 %v3495_v1  ;;  %v6248_v0 = vsel %vm5517_vm2, %v3524_v53, %v1431_v51  ;;  %v3566_v53 = vld [vmem:[%s7243_s3 + $0x618] sm:$0xff]  ;;  %v3584_v51 = vld [vmem:[%s7243_s3 + $0x6a0] sm:$0xff] }
  0xad   : > { %4644 = vmatprep.subr.mxu1 %v3512_v2  ;;  %4612 = vmatpush3.msra.mxu0 %v3495_v1  ;;  %v3546_v1 = vrot.slane %v6136_v12, 10 }
  0xae   : > { %4645 = vmatpush3.msra.mxu1 %v3512_v2  ;;  %4613 = vmatprep.subr.mxu0 %v3494_v3  ;;  %v1553_v2 = vrot.slane %v1424_v11, 6  ;;  %v3586_v11 = vld [vmem:[%s7243_s3 + $0x6b0] sm:$0xff] }
  0xaf   : > { %4646 = vmatprep.subr.mxu1 %v3511_v14  ;;  %4614 = vmatpush3.msra.mxu0 %v3494_v3  ;;  %v3528_v3 = vld [vmem:[%s7243_s3 + $0x508] sm:$0xff] }
  0xb0   : > { %4647 = vmatpush3.msra.mxu1 %v3511_v14  ;;  %4615 = vmatprep.subr.mxu0 %v3493_v15  ;;  %v3549_v14 = vld [vmem:[%s7243_s3 + $0x590] sm:$0xff] }
  0xb1   : > { %4648 = vmatprep.subr.mxu1 %v3510_v32  ;;  %4616 = vmatpush3.msra.mxu0 %v3493_v15  ;;  %v6259_v15 = vsel %vm5517_vm2, %v3525_v30, %v1435_v31 }
  0xb2   : > { %4649 = vmatpush3.msra.mxu1 %v3510_v32  ;;  %4617 = vmatprep.subr.mxu0 %v3492_v5  ;;  %v6263_v32 = vsel %vm5517_vm2, %v3526_v55, %v1439_v58  ;;  %v3564_v55 = vld [vmem:[%s7243_s3 + $0x608] sm:$0xff]  ;;  %v3582_v58 = vld [vmem:[%s7243_s3 + $0x690] sm:$0xff] }
  0xb3   : > { %4650 = vmatprep.subr.mxu1 %v3509_v6  ;;  %4618 = vmatpush3.msra.mxu0 %v3492_v5  ;;  %v3527_v5 = vld [vmem:[%s7243_s3 + $0x500] sm:$0xff]  ;;  %v6276_v10 = vcombine.low %v6259_v15, %v6263_v32 }
  0xb4   : > { %4651 = vmatpush3.msra.mxu1 %v3509_v6  ;;  %4619 = vmatprep.subr.mxu0 %v3491_v8  ;;  %v3548_v6 = vld [vmem:[%s7243_s3 + $0x588] sm:$0xff] }
  0xb5   : > { %4652 = vmatprep.subr.mxu1 %v3508_v9  ;;  %4620 = vmatpush3.msra.mxu0 %v3491_v8  ;;  %v1458_v8 = vcombine.low %v1428_v44, %v6248_v0  ;;  %v3580_v44 = vld [vmem:[%s7243_s3 + $0x680] sm:$0xff] }
  0xb6   : > { %4621 = vmatprep.mubr.f32.mxu0 %v5772_v61  ;;  %4653 = vmatpush3.msra.mxu1 %v3508_v9  ;;  %v3560_v61 = vld [vmem:[%s7243_s3 + $0x5e8] sm:$0xff]  ;;  %v1542_v9 = vsel %vm5694_vm5, %v3543_v62, %v1541_v63 }
  0xb7   : > { %4622 = vmatmul.mubr.f32.vlgmr.msra.gmra.mxu0 %v1234_v38  ;;  %4654 = vmatprep.subr.mxu1 %v3507_v17  ;;  %v3539_v38 = vld [vmem:[%s7243_s3 + $0x560] sm:$0xff] }
  0xb8   : > { %4659 = vmatprep.subr.mxu0 %v3542_v20  ;;  %4655 = vmatpush3.msra.mxu1 %v3507_v17  ;;  %v6280_v17 = vsel %vm5694_vm5, %v3546_v1, %v1553_v2  ;;  %v3612_v1 = vld [vmem:[%s7243_s3 + $0x778] sm:$0xff]  ;;  %v1774_v2 = vcombine.low %v6248_v0, %v6259_v15 }
  0xb9   : > { %4656 = vmatprep.mubr.f32.mxu1 %v1340_v21  ;;  %4660 = vmatpush3.msra.mxu0 %v3542_v20  ;;  %v3547_v20 = vld [vmem:[%s7243_s3 + $0x580] sm:$0xff]  ;;  %v3578_v21 = vld [vmem:[%s7243_s3 + $0x678] sm:$0xff] }
  0xba   : > { %4657 = vmatmul.mubr.f32.vlgmr.msra.gmra.mxu1 %v6149_v23  ;;  %4661 = vmatprep.subr.mxu0 %v3541_v24  ;;  %v3628_v0 = vld [vmem:[%s7243_s3 + $0x7f8] sm:$0xff] }
  0xbb   : > { %4694 = vmatprep.subr.mxu1 %v3562_v26  ;;  %4662 = vmatpush3.msra.mxu0 %v3541_v24  ;;  %v1572_v24 = vcombine.low %v1542_v9, %v6046_v13  ;;  %v3608_v15 = vld [vmem:[%s7243_s3 + $0x758] sm:$0xff]  ;;  %v3623_v9 = vld [vmem:[%s7243_s3 + $0x7d0] sm:$0xff] }
  0xbc   : > { %4695 = vmatpush3.msra.mxu1 %v3562_v26  ;;  %4663 = vmatprep.subr.mxu0 %v3540_v28  ;;  %v6291_v26 = vcombine.low %v6050_v47, %v6280_v17  ;;  %v3644_v13 = vld [vmem:[%s7243_s3 + $0x870] sm:$0xff]  ;;  %v3662_v47 = vld [vmem:[%s7243_s3 + $0x8f8] sm:$0xff] }
  0xbd   : > { %4696 = vmatprep.subr.mxu1 %v3561_v29  ;;  %4664 = vmatpush3.msra.mxu0 %v3540_v28  ;;  %v3577_v28 = vld [vmem:[%s7243_s3 + $0x670] sm:$0xff] }
  0xbe   : > { %4697 = vmatpush3.msra.mxu1 %v3561_v29  ;;  %4665 = vmatprep.subr.mxu0 %v3539_v38  ;;  %v3595_v29 = vld [vmem:[%s7243_s3 + $0x6f8] sm:$0xff] }
  0xbf   : > { %4698 = vmatprep.subr.mxu1 %v3560_v61  ;;  %4666 = vmatpush3.msra.mxu0 %v3539_v38  ;;  %v3576_v38 = vld [vmem:[%s7243_s3 + $0x668] sm:$0xff] }
  0xc0   : > { %4699 = vmatpush3.msra.mxu1 %v3560_v61  ;;  %4667 = vmatprep.subr.mxu0 %v3538_v35  ;;  %v3594_v61 = vld [vmem:[%s7243_s3 + $0x6f0] sm:$0xff] }
  0xc1   : > { %4700 = vmatprep.subr.mxu1 %v3559_v36  ;;  %4668 = vmatpush3.msra.mxu0 %v3538_v35  ;;  %v3575_v35 = vld [vmem:[%s7243_s3 + $0x660] sm:$0xff] }
  0xc2   : > { %4701 = vmatpush3.msra.mxu1 %v3559_v36  ;;  %4669 = vmatprep.subr.mxu0 %v3537_v39  ;;  %v3593_v36 = vld [vmem:[%s7243_s3 + $0x6e8] sm:$0xff] }
  0xc3   : > { %4702 = vmatprep.subr.mxu1 %v3558_v16  ;;  %4670 = vmatpush3.msra.mxu0 %v3537_v39  ;;  %v3574_v39 = vld [vmem:[%s7243_s3 + $0x658] sm:$0xff] }
  0xc4   : > { %4703 = vmatpush3.msra.mxu1 %v3558_v16  ;;  %4671 = vmatprep.subr.mxu0 %v3536_v40  ;;  %v3592_v16 = vld [vmem:[%s7243_s3 + $0x6e0] sm:$0xff] }
  0xc5   : > { %4704 = vmatprep.subr.mxu1 %v3557_v41  ;;  %4672 = vmatpush3.msra.mxu0 %v3536_v40  ;;  %v3573_v40 = vld [vmem:[%s7243_s3 + $0x650] sm:$0xff] }
  0xc6   : > { %4705 = vmatpush3.msra.mxu1 %v3557_v41  ;;  %4673 = vmatprep.subr.mxu0 %v3535_v42  ;;  %v3591_v41 = vld [vmem:[%s7243_s3 + $0x6d8] sm:$0xff] }
  0xc7   : > { %4706 = vmatprep.subr.mxu1 %v3556_v45  ;;  %4674 = vmatpush3.msra.mxu0 %v3535_v42  ;;  %v3572_v42 = vld [vmem:[%s7243_s3 + $0x648] sm:$0xff] }
  0xc8   : > { %4707 = vmatpush3.msra.mxu1 %v3556_v45  ;;  %4675 = vmatprep.subr.mxu0 %v3534_v46  ;;  %v3590_v45 = vld [vmem:[%s7243_s3 + $0x6d0] sm:$0xff] }
  0xc9   : > { %4708 = vmatprep.subr.mxu1 %v3555_v7  ;;  %4676 = vmatpush3.msra.mxu0 %v3534_v46  ;;  %v3571_v46 = vld [vmem:[%s7243_s3 + $0x640] sm:$0xff] }
  0xca   : > { %4709 = vmatpush3.msra.mxu1 %v3555_v7  ;;  %4677 = vmatprep.subr.mxu0 %v3533_v18  ;;  %v3589_v7 = vld [vmem:[%s7243_s3 + $0x6c8] sm:$0xff] }
  0xcb   : > { %4710 = vmatprep.subr.mxu1 %v3554_v33  ;;  %4678 = vmatpush3.msra.mxu0 %v3533_v18  ;;  %v3570_v18 = vld [vmem:[%s7243_s3 + $0x638] sm:$0xff] }
  0xcc   : > { %4711 = vmatpush3.msra.mxu1 %v3554_v33  ;;  %4679 = vmatprep.subr.mxu0 %v3532_v25  ;;  %v3588_v33 = vld [vmem:[%s7243_s3 + $0x6c0] sm:$0xff] }
  0xcd   : > { %4712 = vmatprep.subr.mxu1 %v3553_v4  ;;  %4680 = vmatpush3.msra.mxu0 %v3532_v25  ;;  %v3587_v25 = vld [vmem:[%s7243_s3 + $0x6b8] sm:$0xff] }
  0xce   : > { %4713 = vmatpush3.msra.mxu1 %v3553_v4  ;;  %4681 = vmatprep.subr.mxu0 %v3531_v56  ;;  %v3568_v4 = vld [vmem:[%s7243_s3 + $0x628] sm:$0xff] }
  0xcf   : > { %4714 = vmatprep.subr.mxu1 %v3552_v48  ;;  %4682 = vmatpush3.msra.mxu0 %v3531_v56  ;;  %v6356_v56 = vld [vmem:[%s5910_s18 + $0x20] sm:$0x3f] }
  0xd0   : > { %4715 = vmatpush3.msra.mxu1 %v3552_v48  ;;  %4683 = vmatprep.subr.mxu0 %v3530_v37  ;;  %v3567_v48 = vld [vmem:[%s7243_s3 + $0x620] sm:$0xff]  ;;  %v6366_v52 = vcombine.high %v6356_v56, %v6356_v56  ;;  %v3579_v30 = vrot.slane %v6356_v56, 9  ;;  %v1672_v62 = vcombine.low %v6136_v12, %v6356_v56 }
  0xd1   : > { %4716 = vmatprep.subr.mxu1 %v3551_v50  ;;  %4684 = vmatpush3.msra.mxu0 %v3530_v37  ;;  %v3565_v37 = vld [vmem:[%s7243_s3 + $0x610] sm:$0xff] }
  0xd2   : > { %4717 = vmatpush3.msra.mxu1 %v3551_v50  ;;  %4685 = vmatprep.subr.mxu0 %v3529_v43  ;;  %v3583_v50 = vld [vmem:[%s7243_s3 + $0x698] sm:$0xff]  ;;  %v1755_v31 = vrot.slane %v6366_v52, 5 }
  0xd3   : > { %4718 = vmatprep.subr.mxu1 %v3550_v60  ;;  %4686 = vmatpush3.msra.mxu0 %v3529_v43  ;;  %v3563_v43 = vld [vmem:[%s7243_s3 + $0x600] sm:$0xff] }
  0xd4   : > { %4719 = vmatpush3.msra.mxu1 %v3550_v60  ;;  %4687 = vmatprep.subr.mxu0 %v3528_v3  ;;  %v3581_v60 = vld [vmem:[%s7243_s3 + $0x688] sm:$0xff]  ;;  %v6398_v63 = vsel %vm5517_vm2, %v3579_v30, %v1755_v31 }
  0xd5   : > { %4720 = vmatprep.subr.mxu1 %v3549_v14  ;;  %4688 = vmatpush3.msra.mxu0 %v3528_v3  ;;  %v1775_v12 = vcombine.low %v6263_v32, %v6398_v63  ;;  %v3611_v3 = vld [vmem:[%s7243_s3 + $0x770] sm:$0xff]  ;;  %v3625_v32 = vld [vmem:[%s7243_s3 + $0x7e0] sm:$0xff] }
  0xd6   : > { %4721 = vmatpush3.msra.mxu1 %v3549_v14  ;;  %4689 = vmatprep.subr.mxu0 %v3527_v5  ;;  %v3626_v14 = vld [vmem:[%s7243_s3 + $0x7e8] sm:$0xff] }
  0xd7   : > { %4722 = vmatprep.subr.mxu1 %v3548_v6  ;;  %4690 = vmatpush3.msra.mxu0 %v3527_v5  ;;  %v3607_v5 = vld [vmem:[%s7243_s3 + $0x750] sm:$0xff] }
  0xd8   : > { %4691 = vmatprep.mubr.f32.mxu0 %v1458_v8  ;;  %4723 = vmatpush3.msra.mxu1 %v3548_v6  ;;  %v3624_v6 = vld [vmem:[%s7243_s3 + $0x7d8] sm:$0xff]  ;;  %v3606_v8 = vld [vmem:[%s7243_s3 + $0x748] sm:$0xff] }
  0xd9   : > { %4692 = vmatmul.mubr.f32.vlgmr.msra.gmra.mxu0 %v6276_v10  ;;  %4724 = vmatprep.subr.mxu1 %v3547_v20 }
  0xda   : > { %4729 = vmatprep.subr.mxu0 %v3578_v21  ;;  %4725 = vmatpush3.msra.mxu1 %v3547_v20  ;;  %v3605_v20 = vld [vmem:[%s7243_s3 + $0x740] sm:$0xff] }
  0xdb   : > { %4726 = vmatprep.mubr.f32.mxu1 %v1572_v24  ;;  %4730 = vmatpush3.msra.mxu0 %v3578_v21  ;;  %v3622_v21 = vld [vmem:[%s7243_s3 + $0x7c8] sm:$0xff]  ;;  %v3604_v24 = vld [vmem:[%s7243_s3 + $0x738] sm:$0xff] }
  0xdc   : > { %4727 = vmatmul.mubr.f32.vlgmr.msra.gmra.mxu1 %v6291_v26  ;;  %4731 = vmatprep.subr.mxu0 %v3577_v28 }
  0xdd   : > { %4764 = vmatprep.subr.mxu1 %v3595_v29  ;;  %4732 = vmatpush3.msra.mxu0 %v3577_v28  ;;  %v3621_v28 = vld [vmem:[%s7243_s3 + $0x7c0] sm:$0xff] }
  0xde   : > { %4765 = vmatpush3.msra.mxu1 %v3595_v29  ;;  %4733 = vmatprep.subr.mxu0 %v3576_v38  ;;  %v3603_v29 = vld [vmem:[%s7243_s3 + $0x730] sm:$0xff] }
  0xdf   : > { %4766 = vmatprep.subr.mxu1 %v3594_v61  ;;  %4734 = vmatpush3.msra.mxu0 %v3576_v38  ;;  %v3620_v38 = vld [vmem:[%s7243_s3 + $0x7b8] sm:$0xff] }
  0xe0   : > { %4767 = vmatpush3.msra.mxu1 %v3594_v61  ;;  %4735 = vmatprep.subr.mxu0 %v3575_v35  ;;  %v3602_v61 = vld [vmem:[%s7243_s3 + $0x728] sm:$0xff] }
  0xe1   : > { %4768 = vmatprep.subr.mxu1 %v3593_v36  ;;  %4736 = vmatpush3.msra.mxu0 %v3575_v35  ;;  %v3619_v35 = vld [vmem:[%s7243_s3 + $0x7b0] sm:$0xff] }
  0xe2   : > { %4769 = vmatpush3.msra.mxu1 %v3593_v36  ;;  %4737 = vmatprep.subr.mxu0 %v3574_v39  ;;  %v3601_v36 = vld [vmem:[%s7243_s3 + $0x720] sm:$0xff] }
  0xe3   : > { %4770 = vmatprep.subr.mxu1 %v3592_v16  ;;  %4738 = vmatpush3.msra.mxu0 %v3574_v39  ;;  %v3618_v39 = vld [vmem:[%s7243_s3 + $0x7a8] sm:$0xff] }
  0xe4   : > { %4771 = vmatpush3.msra.mxu1 %v3592_v16  ;;  %4739 = vmatprep.subr.mxu0 %v3573_v40  ;;  %v3600_v16 = vld [vmem:[%s7243_s3 + $0x718] sm:$0xff] }
  0xe5   : > { %4772 = vmatprep.subr.mxu1 %v3591_v41  ;;  %4740 = vmatpush3.msra.mxu0 %v3573_v40  ;;  %v3617_v40 = vld [vmem:[%s7243_s3 + $0x7a0] sm:$0xff] }
  0xe6   : > { %4773 = vmatpush3.msra.mxu1 %v3591_v41  ;;  %4741 = vmatprep.subr.mxu0 %v3572_v42  ;;  %v3596_v41 = vrot.slane %v6356_v56, 10 }
  0xe7   : > { %4774 = vmatprep.subr.mxu1 %v3590_v45  ;;  %4742 = vmatpush3.msra.mxu0 %v3572_v42  ;;  %v1857_v42 = vrot.slane %v6366_v52, 6 }
  0xe8   : > { %4775 = vmatpush3.msra.mxu1 %v3590_v45  ;;  %4743 = vmatprep.subr.mxu0 %v3571_v46  ;;  %v3599_v45 = vld [vmem:[%s7243_s3 + $0x710] sm:$0xff] }
  0xe9   : > { %4776 = vmatprep.subr.mxu1 %v3589_v7  ;;  %4744 = vmatpush3.msra.mxu0 %v3571_v46  ;;  %v3616_v46 = vld [vmem:[%s7243_s3 + $0x798] sm:$0xff] }
  0xea   : > { %4777 = vmatpush3.msra.mxu1 %v3589_v7  ;;  %4745 = vmatprep.subr.mxu0 %v3570_v18  ;;  %v3598_v7 = vld [vmem:[%s7243_s3 + $0x708] sm:$0xff] }
  0xeb   : > { %4778 = vmatprep.subr.mxu1 %v3588_v33  ;;  %4746 = vmatpush3.msra.mxu0 %v3570_v18  ;;  %v3615_v18 = vld [vmem:[%s7243_s3 + $0x790] sm:$0xff] }
  0xec   : > { %4779 = vmatpush3.msra.mxu1 %v3588_v33  ;;  %4747 = vmatprep.subr.mxu0 %v3569_v57  ;;  %v6508_v33 = vsel %vm5694_vm5, %v3596_v41, %v1857_v42  ;;  %v3630_v41 = vld [vmem:[%s7243_s3 + $0x800] sm:$0xff]  ;;  %v3648_v42 = vld [vmem:[%s7243_s3 + $0x888] sm:$0xff] }
  0xed   : > { %4780 = vmatprep.subr.mxu1 %v3587_v25  ;;  %4748 = vmatpush3.msra.mxu0 %v3569_v57  ;;  %v6511_v57 = vld [vmem:[%s6492_s19 + $0x8] sm:$0x3f] }
  0xee   : > { %4781 = vmatpush3.msra.mxu1 %v3587_v25  ;;  %4749 = vmatprep.subr.mxu0 %v3568_v4  ;;  %v6514_v25 = vld [vmem:[%s6492_s19 + $0x10] sm:$0x3f]  ;;  %v6529_v52 = vcombine.high %v6511_v57, %v6511_v57 }
  0xef   : > { %4782 = vmatprep.subr.mxu1 %v3586_v11  ;;  %4750 = vmatpush3.msra.mxu0 %v3568_v4  ;;  %v3597_v4 = vld [vmem:[%s7243_s3 + $0x700] sm:$0xff]  ;;  %v3681_v31 = vrot.slane %v6514_v25, 9 }
  0xf0   : > { %4783 = vmatpush3.msra.mxu1 %v3586_v11  ;;  %4751 = vmatprep.subr.mxu0 %v3567_v48  ;;  %v3614_v11 = vld [vmem:[%s7243_s3 + $0x788] sm:$0xff]  ;;  %v2373_v30 = vrot.slane %v6529_v52, 5 }
  0xf1   : > { %4784 = vmatprep.subr.mxu1 %v3585_v19  ;;  %4752 = vmatpush3.msra.mxu0 %v3567_v48  ;;  %v1877_v48 = vcombine.low %v6280_v17, %v6508_v33  ;;  %v3645_v17 = vld [vmem:[%s7243_s3 + $0x878] sm:$0xff] }
  0xf2   : > { %4785 = vmatpush3.msra.mxu1 %v3585_v19  ;;  %4753 = vmatprep.subr.mxu0 %v3566_v53  ;;  %v6525_v19 = vld [vmem:[%s5910_s18 + $0x28] sm:$0x3f] }
  0xf3   : > { %4786 = vmatprep.subr.mxu1 %v3584_v51  ;;  %4754 = vmatpush3.msra.mxu0 %v3566_v53  ;;  %v6533_v53 = vcombine.high %v6514_v25, %v6514_v25 }
  0xf4   : > { %4787 = vmatpush3.msra.mxu1 %v3584_v51  ;;  %4755 = vmatprep.subr.mxu0 %v3565_v37  ;;  %v3613_v51 = vld [vmem:[%s7243_s3 + $0x780] sm:$0xff] }
  0xf5   : > { %4788 = vmatprep.subr.mxu1 %v3583_v50  ;;  %4756 = vmatpush3.msra.mxu0 %v3565_v37  ;;  %v1975_v37 = vcombine.low %v6356_v56, %v6525_v19  ;;  %v3661_v56 = vld [vmem:[%s7243_s3 + $0x8f0] sm:$0xff] }
  0xf6   : > { %4789 = vmatpush3.msra.mxu1 %v3583_v50  ;;  %4757 = vmatprep.subr.mxu0 %v3564_v55  ;;  %v3680_v50 = vrot.slane %v6511_v57, 9 }
  0xf7   : > { %4790 = vmatprep.subr.mxu1 %v3582_v58  ;;  %4758 = vmatpush3.msra.mxu0 %v3564_v55  ;;  %v2377_v55 = vrot.slane %v6533_v53, 5 }
  0xf8   : > { %4791 = vmatpush3.msra.mxu1 %v3582_v58  ;;  %4759 = vmatprep.subr.mxu0 %v3563_v43  ;;  %v6565_v58 = vsel %vm5517_vm2, %v3680_v50, %v2373_v30  ;;  %v3672_v50 = vld [vmem:[%s7243_s3 + $0x948] sm:$0xff]  ;;  %v3693_v30 = vld [vmem:[%s7243_s3 + $0x9d0] sm:$0xff] }
  0xf9   : > { %4792 = vmatprep.subr.mxu1 %v3581_v60  ;;  %4760 = vmatpush3.msra.mxu0 %v3563_v43  ;;  %v6569_v43 = vsel %vm5517_vm2, %v3681_v31, %v2377_v55  ;;  %v3671_v31 = vld [vmem:[%s7243_s3 + $0x940] sm:$0xff]  ;;  %v3692_v55 = vld [vmem:[%s7243_s3 + $0x9c8] sm:$0xff] }
  0xfa   : > { %4761 = vmatprep.mubr.f32.mxu0 %v1671_v59  ;;  %4793 = vmatpush3.msra.mxu1 %v3581_v60  ;;  %v3609_v59 = vld [vmem:[%s7243_s3 + $0x760] sm:$0xff]  ;;  %v3660_v60 = vld [vmem:[%s7243_s3 + $0x8e8] sm:$0xff] }
  0xfb   : > { %4762 = vmatmul.mubr.f32.vlgmr.msra.gmra.mxu0 %v1672_v62  ;;  %4794 = vmatprep.subr.mxu1 %v3580_v44  ;;  %v2716_v62 = vcombine.low %v6565_v58, %v6569_v43 }
  0xfc   : > { %4799 = vmatprep.subr.mxu0 %v3612_v1  ;;  %4795 = vmatpush3.msra.mxu1 %v3580_v44  ;;  %v3641_v44 = vld [vmem:[%s7243_s3 + $0x858] sm:$0xff] }
  0xfd   : > { %4796 = vmatprep.mubr.f32.mxu1 %v1774_v2  ;;  %4800 = vmatpush3.msra.mxu0 %v3612_v1  ;;  %v3659_v1 = vld [vmem:[%s7243_s3 + $0x8e0] sm:$0xff]  ;;  %v3640_v2 = vld [vmem:[%s7243_s3 + $0x850] sm:$0xff] }
  0xfe   : > { %4797 = vmatmul.mubr.f32.vlgmr.msra.gmra.mxu1 %v1775_v12  ;;  %4801 = vmatprep.subr.mxu0 %v3611_v3  ;;  %v3658_v12 = vld [vmem:[%s7243_s3 + $0x8d8] sm:$0xff] }
  0xff   : > { %4834 = vmatprep.subr.mxu1 %v3628_v0  ;;  %4802 = vmatpush3.msra.mxu0 %v3611_v3  ;;  %v3639_v3 = vld [vmem:[%s7243_s3 + $0x848] sm:$0xff] }
 0x100   : > { %4835 = vmatpush3.msra.mxu1 %v3628_v0  ;;  %4803 = vmatprep.subr.mxu0 %v3610_v34  ;;  %v3657_v0 = vld [vmem:[%s7243_s3 + $0x8d0] sm:$0xff] }
 0x101   : > { %4836 = vmatprep.subr.mxu1 %v3627_v54  ;;  %4804 = vmatpush3.msra.mxu0 %v3610_v34  ;;  %v3638_v34 = vld [vmem:[%s7243_s3 + $0x840] sm:$0xff] }
 0x102   : > { %4837 = vmatpush3.msra.mxu1 %v3627_v54  ;;  %4805 = vmatprep.subr.mxu0 %v3609_v59  ;;  %v3656_v54 = vld [vmem:[%s7243_s3 + $0x8c8] sm:$0xff] }
 0x103   : > { %4838 = vmatprep.subr.mxu1 %v3626_v14  ;;  %4806 = vmatpush3.msra.mxu0 %v3609_v59  ;;  %v3637_v59 = vld [vmem:[%s7243_s3 + $0x838] sm:$0xff] }
 0x104   : > { %4839 = vmatpush3.msra.mxu1 %v3626_v14  ;;  %4807 = vmatprep.subr.mxu0 %v3608_v15  ;;  %v3655_v14 = vld [vmem:[%s7243_s3 + $0x8c0] sm:$0xff] }
 0x105   : > { %4840 = vmatprep.subr.mxu1 %v3625_v32  ;;  %4808 = vmatpush3.msra.mxu0 %v3608_v15  ;;  %v3636_v15 = vld [vmem:[%s7243_s3 + $0x830] sm:$0xff] }
 0x106   : > { %4841 = vmatpush3.msra.mxu1 %v3625_v32  ;;  %4809 = vmatprep.subr.mxu0 %v3607_v5  ;;  %v3654_v32 = vld [vmem:[%s7243_s3 + $0x8b8] sm:$0xff] }
 0x107   : > { %4842 = vmatprep.subr.mxu1 %v3624_v6  ;;  %4810 = vmatpush3.msra.mxu0 %v3607_v5  ;;  %v3635_v5 = vld [vmem:[%s7243_s3 + $0x828] sm:$0xff] }
 0x108   : > { %4843 = vmatpush3.msra.mxu1 %v3624_v6  ;;  %4811 = vmatprep.subr.mxu0 %v3606_v8  ;;  %v3653_v6 = vld [vmem:[%s7243_s3 + $0x8b0] sm:$0xff] }
 0x109   : > { %4844 = vmatprep.subr.mxu1 %v3623_v9  ;;  %4812 = vmatpush3.msra.mxu0 %v3606_v8  ;;  %v2054_v8 = vcombine.high %v6525_v19, %v6525_v19 }
 0x10a   : > { %4845 = vmatpush3.msra.mxu1 %v3623_v9  ;;  %4813 = vmatprep.subr.mxu0 %v3605_v20  ;;  %v3634_v9 = vld [vmem:[%s7243_s3 + $0x820] sm:$0xff] }
 0x10b   : > { %4846 = vmatprep.subr.mxu1 %v3622_v21  ;;  %4814 = vmatpush3.msra.mxu0 %v3605_v20  ;;  %v3652_v20 = vld [vmem:[%s7243_s3 + $0x8a8] sm:$0xff] }
 0x10c   : > { %4847 = vmatpush3.msra.mxu1 %v3622_v21  ;;  %4815 = vmatprep.subr.mxu0 %v3604_v24  ;;  %v3633_v21 = vld [vmem:[%s7243_s3 + $0x818] sm:$0xff] }
 0x10d   : > { %4848 = vmatprep.subr.mxu1 %v3621_v28  ;;  %4816 = vmatpush3.msra.mxu0 %v3604_v24  ;;  %v3651_v24 = vld [vmem:[%s7243_s3 + $0x8a0] sm:$0xff] }
 0x10e   : > { %4849 = vmatpush3.msra.mxu1 %v3621_v28  ;;  %4817 = vmatprep.subr.mxu0 %v3603_v29  ;;  %v3629_v28 = vrot.slane %v6525_v19, 9 }
 0x10f   : > { %4850 = vmatprep.subr.mxu1 %v3620_v38  ;;  %4818 = vmatpush3.msra.mxu0 %v3603_v29  ;;  %v2057_v29 = vrot.slane %v2054_v8, 5 }
 0x110   : > { %4851 = vmatpush3.msra.mxu1 %v3620_v38  ;;  %4819 = vmatprep.subr.mxu0 %v3602_v61  ;;  %v3632_v38 = vld [vmem:[%s7243_s3 + $0x810] sm:$0xff] }
 0x111   : > { %4852 = vmatprep.subr.mxu1 %v3619_v35  ;;  %4820 = vmatpush3.msra.mxu0 %v3602_v61  ;;  %v3650_v61 = vld [vmem:[%s7243_s3 + $0x898] sm:$0xff] }
 0x112   : > { %4853 = vmatpush3.msra.mxu1 %v3619_v35  ;;  %4821 = vmatprep.subr.mxu0 %v3601_v36  ;;  %v3646_v35 = vrot.slane %v6525_v19, 10  ;;  %v3674_v19 = vld [vmem:[%s7243_s3 + $0x958] sm:$0xff] }
 0x113   : > { %4854 = vmatprep.subr.mxu1 %v3618_v39  ;;  %4822 = vmatpush3.msra.mxu0 %v3601_v36  ;;  %v2157_v36 = vrot.slane %v2054_v8, 6  ;;  %v3664_v8 = vld [vmem:[%s7243_s3 + $0x908] sm:$0xff] }
 0x114   : > { %4855 = vmatpush3.msra.mxu1 %v3618_v39  ;;  %4823 = vmatprep.subr.mxu0 %v3600_v16  ;;  %v3631_v39 = vld [vmem:[%s7243_s3 + $0x808] sm:$0xff] }
 0x115   : > { %4856 = vmatprep.subr.mxu1 %v3617_v40  ;;  %4824 = vmatpush3.msra.mxu0 %v3600_v16  ;;  %v3649_v16 = vld [vmem:[%s7243_s3 + $0x890] sm:$0xff] }
 0x116   : > { %4857 = vmatpush3.msra.mxu1 %v3617_v40  ;;  %4825 = vmatprep.subr.mxu0 %v3599_v45  ;;  %v2058_v40 = vsel %vm5517_vm2, %v3629_v28, %v2057_v29 }
 0x117   : > { %4858 = vmatprep.subr.mxu1 %v3616_v46  ;;  %4826 = vmatpush3.msra.mxu0 %v3599_v45  ;;  %v2076_v45 = vcombine.low %v6398_v63, %v2058_v40  ;;  %v3734_v40 = vld [vmem:[%s7243_s3 + $0xaf8] sm:$0xff] }
 0x118   : > { %4859 = vmatpush3.msra.mxu1 %v3616_v46  ;;  %4827 = vmatprep.subr.mxu0 %v3598_v7  ;;  %v2158_v46 = vsel %vm5694_vm5, %v3646_v35, %v2157_v36  ;;  %v3718_v35 = vld [vmem:[%s7243_s3 + $0xa78] sm:$0xff] }
 0x119   : > { %4860 = vmatprep.subr.mxu1 %v3615_v18  ;;  %4828 = vmatpush3.msra.mxu0 %v3598_v7  ;;  %v3647_v7 = vld [vmem:[%s7243_s3 + $0x880] sm:$0xff]  ;;  %v2176_v63 = vcombine.low %v6508_v33, %v2158_v46  ;;  %v3697_v33 = vld [vmem:[%s7243_s3 + $0x9f0] sm:$0xff]  ;;  %v3732_v46 = vld [vmem:[%s7243_s3 + $0xae8] sm:$0xff] }
 0x11a   : > { %4861 = vmatpush3.msra.mxu1 %v3615_v18  ;;  %4829 = vmatprep.subr.mxu0 %v3597_v4  ;;  %v3678_v18 = vld [vmem:[%s7243_s3 + $0x978] sm:$0xff] }
 0x11b   : > { %4862 = vmatprep.subr.mxu1 %v3614_v11  ;;  %4830 = vmatpush3.msra.mxu0 %v3597_v4  ;;  %v3677_v4 = vld [vmem:[%s7243_s3 + $0x970] sm:$0xff] }
 0x11c   : > { %4831 = vmatprep.mubr.f32.mxu0 %v1876_v49  ;;  %4863 = vmatpush3.msra.mxu1 %v3614_v11  ;;  %v3643_v49 = vld [vmem:[%s7243_s3 + $0x868] sm:$0xff]  ;;  %v3698_v11 = vld [vmem:[%s7243_s3 + $0x9f8] sm:$0xff] }
 0x11d   : > { %4832 = vmatmul.mubr.f32.vlgmr.msra.gmra.mxu0 %v1877_v48  ;;  %4864 = vmatprep.subr.mxu1 %v3613_v51  ;;  %v3675_v48 = vld [vmem:[%s7243_s3 + $0x960] sm:$0xff] }
 0x11e   : > { %4869 = vmatprep.subr.mxu0 %v3645_v17  ;;  %4865 = vmatpush3.msra.mxu1 %v3613_v51  ;;  %v3695_v51 = vld [vmem:[%s7243_s3 + $0x9e0] sm:$0xff] }
 0x11f   : > { %4866 = vmatprep.mubr.f32.mxu1 %v6149_v23  ;;  %4870 = vmatpush3.msra.mxu0 %v3645_v17  ;;  %v3642_v23 = vld [vmem:[%s7243_s3 + $0x860] sm:$0xff]  ;;  %v3673_v17 = vld [vmem:[%s7243_s3 + $0x950] sm:$0xff] }
 0x120   : > { %4867 = vmatmul.mubr.f32.vlgmr.msra.gmra.mxu1 %v1975_v37  ;;  %4871 = vmatprep.subr.mxu0 %v3644_v13  ;;  %v3694_v37 = vld [vmem:[%s7243_s3 + $0x9d8] sm:$0xff] }
 0x121   : > { %4904 = vmatprep.subr.mxu1 %v3662_v47  ;;  %4872 = vmatpush3.msra.mxu0 %v3644_v13  ;;  %v3670_v13 = vld [vmem:[%s7243_s3 + $0x938] sm:$0xff] }
 0x122   : > { %4905 = vmatpush3.msra.mxu1 %v3662_v47  ;;  %4873 = vmatprep.subr.mxu0 %v3643_v49  ;;  %v3691_v47 = vld [vmem:[%s7243_s3 + $0x9c0] sm:$0xff] }
 0x123   : > { %4906 = vmatprep.subr.mxu1 %v3661_v56  ;;  %4874 = vmatpush3.msra.mxu0 %v3643_v49  ;;  %v3669_v49 = vld [vmem:[%s7243_s3 + $0x930] sm:$0xff] }
 0x124   : > { %4907 = vmatpush3.msra.mxu1 %v3661_v56  ;;  %4875 = vmatprep.subr.mxu0 %v3642_v23  ;;  %v3690_v56 = vld [vmem:[%s7243_s3 + $0x9b8] sm:$0xff] }
 0x125   : > { %4908 = vmatprep.subr.mxu1 %v3660_v60  ;;  %4876 = vmatpush3.msra.mxu0 %v3642_v23  ;;  %v6724_v23 = vld [vmem:[%s6492_s19] sm:$0x3f] }
 0x126   : > { %4909 = vmatpush3.msra.mxu1 %v3660_v60  ;;  %4877 = vmatprep.subr.mxu0 %v3641_v44  ;;  %v3668_v60 = vld [vmem:[%s7243_s3 + $0x928] sm:$0xff] }
 0x127   : > { %4910 = vmatprep.subr.mxu1 %v3659_v1  ;;  %4878 = vmatpush3.msra.mxu0 %v3641_v44  ;;  %v3689_v44 = vld [vmem:[%s7243_s3 + $0x9b0] sm:$0xff] }
 0x128   : > { %4911 = vmatpush3.msra.mxu1 %v3659_v1  ;;  %4879 = vmatprep.subr.mxu0 %v3640_v2  ;;  %v6733_v1 = vld [vmem:[%s6492_s19 + $0x18] sm:$0x3f] }
 0x129   : > { %4912 = vmatprep.subr.mxu1 %v3658_v12  ;;  %4880 = vmatpush3.msra.mxu0 %v3640_v2  ;;  %v3667_v2 = vld [vmem:[%s7243_s3 + $0x920] sm:$0xff]  ;;  %v6783_v29 = vcombine.low %v6514_v25, %v6733_v1 }
 0x12a   : > { %4913 = vmatpush3.msra.mxu1 %v3658_v12  ;;  %4881 = vmatprep.subr.mxu0 %v3639_v3  ;;  %v3688_v12 = vld [vmem:[%s7243_s3 + $0x9a8] sm:$0xff] }
 0x12b   : > { %4914 = vmatprep.subr.mxu1 %v3657_v0  ;;  %4882 = vmatpush3.msra.mxu0 %v3639_v3  ;;  %v6743_v3 = vcombine.high %v6724_v23, %v6724_v23 }
 0x12c   : > { %4915 = vmatpush3.msra.mxu1 %v3657_v0  ;;  %4883 = vmatprep.subr.mxu0 %v3638_v34  ;;  %v6747_v0 = vcombine.high %v6733_v1, %v6733_v1 }
 0x12d   : > { %4916 = vmatprep.subr.mxu1 %v3656_v54  ;;  %4884 = vmatpush3.msra.mxu0 %v3638_v34  ;;  %v3666_v34 = vld [vmem:[%s7243_s3 + $0x918] sm:$0xff] }
 0x12e   : > { %4917 = vmatpush3.msra.mxu1 %v3656_v54  ;;  %4885 = vmatprep.subr.mxu0 %v3637_v59  ;;  %v3687_v54 = vld [vmem:[%s7243_s3 + $0x9a0] sm:$0xff] }
 0x12f   : > { %4918 = vmatprep.subr.mxu1 %v3655_v14  ;;  %4886 = vmatpush3.msra.mxu0 %v3637_v59  ;;  %v3665_v59 = vld [vmem:[%s7243_s3 + $0x910] sm:$0xff] }
 0x130   : > { %4919 = vmatpush3.msra.mxu1 %v3655_v14  ;;  %4887 = vmatprep.subr.mxu0 %v3636_v15  ;;  %v3686_v14 = vld [vmem:[%s7243_s3 + $0x998] sm:$0xff] }
 0x131   : > { %4920 = vmatprep.subr.mxu1 %v3654_v32  ;;  %4888 = vmatpush3.msra.mxu0 %v3636_v15  ;;  %v3679_v15 = vrot.slane %v6724_v23, 9 }
 0x132   : > { %4921 = vmatpush3.msra.mxu1 %v3654_v32  ;;  %4889 = vmatprep.subr.mxu0 %v3635_v5  ;;  %v2369_v32 = vrot.slane %v6743_v3, 5 }
 0x133   : > { %4922 = vmatprep.subr.mxu1 %v3653_v6  ;;  %4890 = vmatpush3.msra.mxu0 %v3635_v5  ;;  %v3682_v5 = vrot.slane %v6733_v1, 9 }
 0x134   : > { %4923 = vmatpush3.msra.mxu1 %v3653_v6  ;;  %4891 = vmatprep.subr.mxu0 %v3634_v9  ;;  %v2381_v6 = vrot.slane %v6747_v0, 5  ;;  %v2370_v28 = vsel %vm5517_vm2, %v3679_v15, %v2369_v32  ;;  %v3703_v15 = vld [vmem:[%s7243_s3 + $0xa00] sm:$0xff]  ;;  %v3720_v32 = vld [vmem:[%s7243_s3 + $0xa88] sm:$0xff] }
 0x135   : > { %4924 = vmatprep.subr.mxu1 %v3652_v20  ;;  %4892 = vmatpush3.msra.mxu0 %v3634_v9  ;;  %v3685_v9 = vld [vmem:[%s7243_s3 + $0x990] sm:$0xff]  ;;  %v2400_v36 = vcombine.low %v2370_v28, %v6565_v58  ;;  %v3782_v58 = vld [vmem:[%s7243_s3 + $0xc68] sm:$0xff] }
 0x136   : > { %4925 = vmatpush3.msra.mxu1 %v3652_v20  ;;  %4893 = vmatprep.subr.mxu0 %v3633_v21  ;;  %v3663_v20 = vld [vmem:[%s7243_s3 + $0x900] sm:$0xff]  ;;  %v3750_v28 = vld [vmem:[%s7243_s3 + $0xb70] sm:$0xff] }
 0x137   : > { %4926 = vmatprep.subr.mxu1 %v3651_v24  ;;  %4894 = vmatpush3.msra.mxu0 %v3633_v21  ;;  %v3684_v21 = vld [vmem:[%s7243_s3 + $0x988] sm:$0xff] }
 0x138   : > { %4927 = vmatpush3.msra.mxu1 %v3651_v24  ;;  %4895 = vmatprep.subr.mxu0 %v3632_v38  ;;  %v2282_v24 = vcombine.low %v6724_v23, %v6511_v57 }
 0x139   : > { %4928 = vmatprep.subr.mxu1 %v3650_v61  ;;  %4896 = vmatpush3.msra.mxu0 %v3632_v38  ;;  %v6787_v38 = vsel %vm5517_vm2, %v3682_v5, %v2381_v6 }
 0x13a   : > { %4929 = vmatpush3.msra.mxu1 %v3650_v61  ;;  %4897 = vmatprep.subr.mxu0 %v3631_v39  ;;  %v3683_v61 = vld [vmem:[%s7243_s3 + $0x980] sm:$0xff] }
 0x13b   : > { %4930 = vmatprep.subr.mxu1 %v3649_v16  ;;  %4898 = vmatpush3.msra.mxu0 %v3631_v39  ;;  %v6798_v39 = vcombine.low %v6569_v43, %v6787_v38  ;;  %v3800_v43 = vld [vmem:[%s7243_s3 + $0xcf0] sm:$0xff] }
 0x13c   : > { %4931 = vmatpush3.msra.mxu1 %v3649_v16  ;;  %4899 = vmatprep.subr.mxu0 %v3630_v41  ;;  %v3717_v16 = vld [vmem:[%s7243_s3 + $0xa70] sm:$0xff] }
 0x13d   : > { %4932 = vmatprep.subr.mxu1 %v3648_v42  ;;  %4900 = vmatpush3.msra.mxu0 %v3630_v41  ;;  %v3716_v41 = vld [vmem:[%s7243_s3 + $0xa68] sm:$0xff] }
 0x13e   : > { %4901 = vmatprep.mubr.f32.mxu0 %v6276_v10  ;;  %4933 = vmatpush3.msra.mxu1 %v3648_v42  ;;  %v3676_v10 = vld [vmem:[%s7243_s3 + $0x968] sm:$0xff]  ;;  %v3733_v42 = vld [vmem:[%s7243_s3 + $0xaf0] sm:$0xff] }
 0x13f   : > { %4902 = vmatmul.mubr.f32.vlgmr.msra.gmra.mxu0 %v2076_v45  ;;  %4934 = vmatprep.subr.mxu1 %v3647_v7  ;;  %v3715_v45 = vld [vmem:[%s7243_s3 + $0xa60] sm:$0xff] }
 0x140   : > { %4939 = vmatprep.subr.mxu0 %v3678_v18  ;;  %4935 = vmatpush3.msra.mxu1 %v3647_v7  ;;  %v3714_v7 = vld [vmem:[%s7243_s3 + $0xa58] sm:$0xff] }
 0x141   : > { %4936 = vmatprep.mubr.f32.mxu1 %v6291_v26  ;;  %4940 = vmatpush3.msra.mxu0 %v3678_v18  ;;  %v3696_v26 = vld [vmem:[%s7243_s3 + $0x9e8] sm:$0xff]  ;;  %v3731_v18 = vld [vmem:[%s7243_s3 + $0xae0] sm:$0xff] }
 0x142   : > { %4937 = vmatmul.mubr.f32.vlgmr.msra.gmra.mxu1 %v2176_v63  ;;  %4941 = vmatprep.subr.mxu0 %v3677_v4  ;;  %v3713_v63 = vld [vmem:[%s7243_s3 + $0xa50] sm:$0xff] }
 0x143   : > { %4974 = vmatprep.subr.mxu1 %v3698_v11  ;;  %4942 = vmatpush3.msra.mxu0 %v3677_v4  ;;  %v3730_v4 = vld [vmem:[%s7243_s3 + $0xad8] sm:$0xff] }
 0x144   : > { %4975 = vmatpush3.msra.mxu1 %v3698_v11  ;;  %4943 = vmatprep.subr.mxu0 %v3676_v10  ;;  %v3712_v11 = vld [vmem:[%s7243_s3 + $0xa48] sm:$0xff] }
 0x145   : > { %4976 = vmatprep.subr.mxu1 %v3697_v33  ;;  %4944 = vmatpush3.msra.mxu0 %v3676_v10  ;;  %v3729_v10 = vld [vmem:[%s7243_s3 + $0xad0] sm:$0xff] }
 0x146   : > { %4977 = vmatpush3.msra.mxu1 %v3697_v33  ;;  %4945 = vmatprep.subr.mxu0 %v3675_v48  ;;  %v3711_v33 = vld [vmem:[%s7243_s3 + $0xa40] sm:$0xff] }
 0x147   : > { %4978 = vmatprep.subr.mxu1 %v3696_v26  ;;  %4946 = vmatpush3.msra.mxu0 %v3675_v48  ;;  %v3728_v48 = vld [vmem:[%s7243_s3 + $0xac8] sm:$0xff] }
 0x148   : > { %4979 = vmatpush3.msra.mxu1 %v3696_v26  ;;  %4947 = vmatprep.subr.mxu0 %v3674_v19  ;;  %v3710_v26 = vld [vmem:[%s7243_s3 + $0xa38] sm:$0xff] }
 0x149   : > { %4980 = vmatprep.subr.mxu1 %v3695_v51  ;;  %4948 = vmatpush3.msra.mxu0 %v3674_v19  ;;  %v3727_v19 = vld [vmem:[%s7243_s3 + $0xac0] sm:$0xff] }
 0x14a   : > { %4981 = vmatpush3.msra.mxu1 %v3695_v51  ;;  %4949 = vmatprep.subr.mxu0 %v3673_v17  ;;  %v3709_v51 = vld [vmem:[%s7243_s3 + $0xa30] sm:$0xff] }
 0x14b   : > { %4982 = vmatprep.subr.mxu1 %v3694_v37  ;;  %4950 = vmatpush3.msra.mxu0 %v3673_v17  ;;  %v3726_v17 = vld [vmem:[%s7243_s3 + $0xab8] sm:$0xff] }
 0x14c   : > { %4983 = vmatpush3.msra.mxu1 %v3694_v37  ;;  %4951 = vmatprep.subr.mxu0 %v3672_v50  ;;  %v3708_v37 = vld [vmem:[%s7243_s3 + $0xa28] sm:$0xff] }
 0x14d   : > { %4984 = vmatprep.subr.mxu1 %v3693_v30  ;;  %4952 = vmatpush3.msra.mxu0 %v3672_v50  ;;  %v3725_v50 = vld [vmem:[%s7243_s3 + $0xab0] sm:$0xff] }
 0x14e   : > { %4985 = vmatpush3.msra.mxu1 %v3693_v30  ;;  %4953 = vmatprep.subr.mxu0 %v3671_v31  ;;  %v3707_v30 = vld [vmem:[%s7243_s3 + $0xa20] sm:$0xff] }
 0x14f   : > { %4986 = vmatprep.subr.mxu1 %v3692_v55  ;;  %4954 = vmatpush3.msra.mxu0 %v3671_v31  ;;  %v3724_v31 = vld [vmem:[%s7243_s3 + $0xaa8] sm:$0xff] }
 0x150   : > { %4987 = vmatpush3.msra.mxu1 %v3692_v55  ;;  %4955 = vmatprep.subr.mxu0 %v3670_v13  ;;  %v3699_v55 = vrot.slane %v6724_v23, 10  ;;  %v2491_v23 = vrot.slane %v6533_v53, 6 }
 0x151   : > { %4988 = vmatprep.subr.mxu1 %v3691_v47  ;;  %4956 = vmatpush3.msra.mxu0 %v3670_v13  ;;  %v2483_v13 = vrot.slane %v6743_v3, 6  ;;  %v3722_v3 = vld [vmem:[%s7243_s3 + $0xa98] sm:$0xff] }
 0x152   : > { %4989 = vmatpush3.msra.mxu1 %v3691_v47  ;;  %4957 = vmatprep.subr.mxu0 %v3669_v49  ;;  %v3700_v47 = vrot.slane %v6511_v57, 10 }
 0x153   : > { %4990 = vmatprep.subr.mxu1 %v3690_v56  ;;  %4958 = vmatpush3.msra.mxu0 %v3669_v49  ;;  %v2487_v49 = vrot.slane %v6529_v52, 6  ;;  %v3705_v52 = vld [vmem:[%s7243_s3 + $0xa10] sm:$0xff]  ;;  %v2484_v53 = vsel %vm5694_vm5, %v3699_v55, %v2483_v13 }
 0x154   : > { %4991 = vmatpush3.msra.mxu1 %v3690_v56  ;;  %4959 = vmatprep.subr.mxu0 %v3668_v60  ;;  %v3706_v56 = vld [vmem:[%s7243_s3 + $0xa18] sm:$0xff] }
 0x155   : > { %4992 = vmatprep.subr.mxu1 %v3689_v44  ;;  %4960 = vmatpush3.msra.mxu0 %v3668_v60  ;;  %v3723_v60 = vld [vmem:[%s7243_s3 + $0xaa0] sm:$0xff] }
 0x156   : > { %4993 = vmatpush3.msra.mxu1 %v3689_v44  ;;  %4961 = vmatprep.subr.mxu0 %v3667_v2  ;;  %v3701_v44 = vrot.slane %v6514_v25, 10 }
 0x157   : > { %4994 = vmatprep.subr.mxu1 %v3688_v12  ;;  %4962 = vmatpush3.msra.mxu0 %v3667_v2  ;;  %v3702_v2 = vrot.slane %v6733_v1, 10 }
 0x158   : > { %4995 = vmatpush3.msra.mxu1 %v3688_v12  ;;  %4963 = vmatprep.subr.mxu0 %v3666_v34  ;;  %v2495_v12 = vrot.slane %v6747_v0, 6  ;;  %v6892_v0 = vsel %vm5694_vm5, %v3700_v47, %v2487_v49  ;;  %v3737_v47 = vld [vmem:[%s7243_s3 + $0xb08] sm:$0xff]  ;;  %v3755_v49 = vld [vmem:[%s7243_s3 + $0xb90] sm:$0xff] }
 0x159   : > { %4996 = vmatprep.subr.mxu1 %v3687_v54  ;;  %4964 = vmatpush3.msra.mxu0 %v3666_v34  ;;  %v3704_v34 = vld [vmem:[%s7243_s3 + $0xa08] sm:$0xff]  ;;  %v2514_v5 = vcombine.low %v2484_v53, %v6892_v0  ;;  %v3783_v53 = vld [vmem:[%s7243_s3 + $0xc70] sm:$0xff] }
 0x15a   : > { %4997 = vmatpush3.msra.mxu1 %v3687_v54  ;;  %4965 = vmatprep.subr.mxu0 %v3665_v59  ;;  %v3721_v54 = vld [vmem:[%s7243_s3 + $0xa90] sm:$0xff] }
 0x15b   : > { %4998 = vmatprep.subr.mxu1 %v3686_v14  ;;  %4966 = vmatpush3.msra.mxu0 %v3665_v59  ;;  %v6902_v59 = vsel %vm5694_vm5, %v3701_v44, %v2491_v23  ;;  %v3754_v44 = vld [vmem:[%s7243_s3 + $0xb88] sm:$0xff] }
 0x15c   : > { %4999 = vmatpush3.msra.mxu1 %v3686_v14  ;;  %4967 = vmatprep.subr.mxu0 %v3664_v8  ;;  %v6906_v14 = vsel %vm5694_vm5, %v3702_v2, %v2495_v12  ;;  %v3753_v12 = vld [vmem:[%s7243_s3 + $0xb80] sm:$0xff] }
 0x15d   : > { %5000 = vmatprep.subr.mxu1 %v3685_v9  ;;  %4968 = vmatpush3.msra.mxu0 %v3664_v8  ;;  %v6917_v6 = vcombine.low %v6902_v59, %v6906_v14  ;;  %v6920_v8 = vld [vmem:[%s6492_s19 + $0x20] sm:$0x3f] }
 0x15e   : > { %5001 = vmatpush3.msra.mxu1 %v3685_v9  ;;  %4969 = vmatprep.subr.mxu0 %v3663_v20  ;;  %v3719_v9 = vld [vmem:[%s7243_s3 + $0xa80] sm:$0xff]  ;;  %v3752_v55 = vrot.slane %v6920_v8, 10 }
 0x15f   : > { %5002 = vmatprep.subr.mxu1 %v3684_v21  ;;  %4970 = vmatpush3.msra.mxu0 %v3663_v20  ;;  %v3751_v20 = vld [vmem:[%s7243_s3 + $0xb78] sm:$0xff] }
 0x160   : > { %4971 = vmatprep.mubr.f32.mxu0 %v2282_v24  ;;  %5003 = vmatpush3.msra.mxu1 %v3684_v21  ;;  %v2613_v21 = vcombine.low %v6511_v57, %v6514_v25  ;;  %v2614_v24 = vcombine.low %v6733_v1, %v6920_v8  ;;  %v3749_v57 = vld [vmem:[%s7243_s3 + $0xb68] sm:$0xff]  ;;  %v3767_v25 = vld [vmem:[%s7243_s3 + $0xbf0] sm:$0xff]  ;;  %v3748_v1 = vld [vmem:[%s7243_s3 + $0xb60] sm:$0xff] }
 0x161   : > { %4972 = vmatmul.mubr.f32.vlgmr.msra.gmra.mxu0 %v6783_v29  ;;  %5004 = vmatprep.subr.mxu1 %v3683_v61 }
 0x162   : > { %5009 = vmatprep.subr.mxu0 %v3718_v35  ;;  %5005 = vmatpush3.msra.mxu1 %v3683_v61  ;;  %v3768_v61 = vld [vmem:[%s7243_s3 + $0xbf8] sm:$0xff] }
 0x163   : > { %5006 = vmatprep.mubr.f32.mxu1 %v2400_v36  ;;  %5010 = vmatpush3.msra.mxu0 %v3718_v35  ;;  %v3766_v35 = vld [vmem:[%s7243_s3 + $0xbe8] sm:$0xff]  ;;  %v3747_v36 = vld [vmem:[%s7243_s3 + $0xb58] sm:$0xff] }
 0x164   : > { %5007 = vmatmul.mubr.f32.vlgmr.msra.gmra.mxu1 %v6798_v39  ;;  %5011 = vmatprep.subr.mxu0 %v3717_v16 }
 0x165   : > { %5044 = vmatprep.subr.mxu1 %v3734_v40  ;;  %5012 = vmatpush3.msra.mxu0 %v3717_v16  ;;  %v3765_v16 = vld [vmem:[%s7243_s3 + $0xbe0] sm:$0xff] }
 0x166   : > { %5045 = vmatpush3.msra.mxu1 %v3734_v40  ;;  %5013 = vmatprep.subr.mxu0 %v3716_v41  ;;  %v3746_v40 = vld [vmem:[%s7243_s3 + $0xb50] sm:$0xff] }
 0x167   : > { %5046 = vmatprep.subr.mxu1 %v3733_v42  ;;  %5014 = vmatpush3.msra.mxu0 %v3716_v41  ;;  %v3764_v41 = vld [vmem:[%s7243_s3 + $0xbd8] sm:$0xff] }
 0x168   : > { %5047 = vmatpush3.msra.mxu1 %v3733_v42  ;;  %5015 = vmatprep.subr.mxu0 %v3715_v45  ;;  %v3745_v42 = vld [vmem:[%s7243_s3 + $0xb48] sm:$0xff] }
 0x169   : > { %5048 = vmatprep.subr.mxu1 %v3732_v46  ;;  %5016 = vmatpush3.msra.mxu0 %v3715_v45  ;;  %v3763_v45 = vld [vmem:[%s7243_s3 + $0xbd0] sm:$0xff] }
 0x16a   : > { %5049 = vmatpush3.msra.mxu1 %v3732_v46  ;;  %5017 = vmatprep.subr.mxu0 %v3714_v7  ;;  %v3744_v46 = vld [vmem:[%s7243_s3 + $0xb40] sm:$0xff] }
 0x16b   : > { %5050 = vmatprep.subr.mxu1 %v3731_v18  ;;  %5018 = vmatpush3.msra.mxu0 %v3714_v7  ;;  %v3762_v7 = vld [vmem:[%s7243_s3 + $0xbc8] sm:$0xff] }
 0x16c   : > { %5051 = vmatpush3.msra.mxu1 %v3731_v18  ;;  %5019 = vmatprep.subr.mxu0 %v3713_v63  ;;  %v3743_v18 = vld [vmem:[%s7243_s3 + $0xb38] sm:$0xff] }
 0x16d   : > { %5052 = vmatprep.subr.mxu1 %v3730_v4  ;;  %5020 = vmatpush3.msra.mxu0 %v3713_v63  ;;  %v3761_v63 = vld [vmem:[%s7243_s3 + $0xbc0] sm:$0xff] }
 0x16e   : > { %5053 = vmatpush3.msra.mxu1 %v3730_v4  ;;  %5021 = vmatprep.subr.mxu0 %v3712_v11  ;;  %v3742_v4 = vld [vmem:[%s7243_s3 + $0xb30] sm:$0xff] }
 0x16f   : > { %5054 = vmatprep.subr.mxu1 %v3729_v10  ;;  %5022 = vmatpush3.msra.mxu0 %v3712_v11  ;;  %v3760_v11 = vld [vmem:[%s7243_s3 + $0xbb8] sm:$0xff] }
 0x170   : > { %5055 = vmatpush3.msra.mxu1 %v3729_v10  ;;  %5023 = vmatprep.subr.mxu0 %v3711_v33  ;;  %v3741_v10 = vld [vmem:[%s7243_s3 + $0xb28] sm:$0xff] }
 0x171   : > { %5056 = vmatprep.subr.mxu1 %v3728_v48  ;;  %5024 = vmatpush3.msra.mxu0 %v3711_v33  ;;  %v3759_v33 = vld [vmem:[%s7243_s3 + $0xbb0] sm:$0xff] }
 0x172   : > { %5057 = vmatpush3.msra.mxu1 %v3728_v48  ;;  %5025 = vmatprep.subr.mxu0 %v3710_v26  ;;  %v2694_v48 = vcombine.high %v6920_v8, %v6920_v8 }
 0x173   : > { %5058 = vmatprep.subr.mxu1 %v3727_v19  ;;  %5026 = vmatpush3.msra.mxu0 %v3710_v26  ;;  %v3740_v26 = vld [vmem:[%s7243_s3 + $0xb20] sm:$0xff] }
 0x174   : > { %5059 = vmatpush3.msra.mxu1 %v3727_v19  ;;  %5027 = vmatprep.subr.mxu0 %v3709_v51  ;;  %v3758_v19 = vld [vmem:[%s7243_s3 + $0xba8] sm:$0xff]  ;;  %v2799_v13 = vrot.slane %v2694_v48, 6 }
 0x175   : > { %5060 = vmatprep.subr.mxu1 %v3726_v17  ;;  %5028 = vmatpush3.msra.mxu0 %v3709_v51  ;;  %v3739_v51 = vld [vmem:[%s7243_s3 + $0xb18] sm:$0xff] }
 0x176   : > { %5061 = vmatpush3.msra.mxu1 %v3726_v17  ;;  %5029 = vmatprep.subr.mxu0 %v3708_v37  ;;  %v3757_v17 = vld [vmem:[%s7243_s3 + $0xba0] sm:$0xff]  ;;  %v7035_v2 = vsel %vm5694_vm5, %v3752_v55, %v2799_v13  ;;  %v3806_v55 = vld [vmem:[%s7243_s3 + $0xd18] sm:$0xff] }
 0x177   : > { %5062 = vmatprep.subr.mxu1 %v3725_v50  ;;  %5030 = vmatpush3.msra.mxu0 %v3708_v37  ;;  %v3735_v37 = vrot.slane %v6920_v8, 9 }
 0x178   : > { %5063 = vmatpush3.msra.mxu1 %v3725_v50  ;;  %5031 = vmatprep.subr.mxu0 %v3707_v30  ;;  %v2697_v50 = vrot.slane %v2694_v48, 5  ;;  %v3786_v48 = vld [vmem:[%s7243_s3 + $0xc80] sm:$0xff] }
 0x179   : > { %5064 = vmatprep.subr.mxu1 %v3724_v31  ;;  %5032 = vmatpush3.msra.mxu0 %v3707_v30  ;;  %v3738_v30 = vld [vmem:[%s7243_s3 + $0xb10] sm:$0xff] }
 0x17a   : > { %5065 = vmatpush3.msra.mxu1 %v3724_v31  ;;  %5033 = vmatprep.subr.mxu0 %v3706_v56  ;;  %v3756_v31 = vld [vmem:[%s7243_s3 + $0xb98] sm:$0xff] }
 0x17b   : > { %5066 = vmatprep.subr.mxu1 %v3723_v60  ;;  %5034 = vmatpush3.msra.mxu0 %v3706_v56  ;;  %v7023_v56 = vsel %vm5517_vm2, %v3735_v37, %v2697_v50  ;;  %v3810_v37 = vld [vmem:[%s7243_s3 + $0xd38] sm:$0xff]  ;;  %v3809_v50 = vld [vmem:[%s7243_s3 + $0xd30] sm:$0xff] }
 0x17c   : > { %5067 = vmatpush3.msra.mxu1 %v3723_v60  ;;  %5035 = vmatprep.subr.mxu0 %v3705_v52  ;;  %v3736_v60 = vld [vmem:[%s7243_s3 + $0xb00] sm:$0xff]  ;;  %v2717_v23 = vcombine.low %v6787_v38, %v7023_v56  ;;  %v2819_v38 = vcombine.low %v6906_v14, %v7035_v2  ;;  %v3779_v14 = vld [vmem:[%s7243_s3 + $0xc50] sm:$0xff] }
 0x17d   : > { %5068 = vmatprep.subr.mxu1 %v3722_v3  ;;  %5036 = vmatpush3.msra.mxu0 %v3705_v52  ;;  %v3784_v52 = vld [vmem:[%s7243_s3 + $0xc78] sm:$0xff] }
 0x17e   : > { %5069 = vmatpush3.msra.mxu1 %v3722_v3  ;;  %5037 = vmatprep.subr.mxu0 %v3704_v34  ;;  %v2818_v3 = vcombine.low %v6892_v0, %v6902_v59  ;;  %v3801_v0 = vld [vmem:[%s7243_s3 + $0xcf8] sm:$0xff]  ;;  %v3798_v59 = vld [vmem:[%s7243_s3 + $0xce0] sm:$0xff] }
 0x17f   : > { %5070 = vmatprep.subr.mxu1 %v3721_v54  ;;  %5038 = vmatpush3.msra.mxu0 %v3704_v34  ;;  %v3799_v34 = vld [vmem:[%s7243_s3 + $0xce8] sm:$0xff] }
 0x180   : > { %5071 = vmatpush3.msra.mxu1 %v3721_v54  ;;  %5039 = vmatprep.subr.mxu0 %v3703_v15  ;;  %v3780_v54 = vld [vmem:[%s7243_s3 + $0xc58] sm:$0xff] }
 0x181   : > { %5072 = vmatprep.subr.mxu1 %v3720_v32  ;;  %5040 = vmatpush3.msra.mxu0 %v3703_v15  ;;  %v3797_v15 = vld [vmem:[%s7243_s3 + $0xcd8] sm:$0xff] }
 0x182   : > { %5041 = vmatprep.mubr.f32.mxu0 %v2514_v5  ;;  %5073 = vmatpush3.msra.mxu1 %v3720_v32  ;;  %v3778_v32 = vld [vmem:[%s7243_s3 + $0xc48] sm:$0xff]  ;;  %v3796_v5 = vld [vmem:[%s7243_s3 + $0xcd0] sm:$0xff] }
 0x183   : > { %5042 = vmatmul.mubr.f32.vlgmr.msra.gmra.mxu0 %v6917_v6  ;;  %5074 = vmatprep.subr.mxu1 %v3719_v9 }
 0x184   : > { %5079 = vmatprep.subr.mxu0 %v3751_v20  ;;  %5075 = vmatpush3.msra.mxu1 %v3719_v9  ;;  %v3777_v9 = vld [vmem:[%s7243_s3 + $0xc40] sm:$0xff] }
 0x185   : > { %5076 = vmatprep.mubr.f32.mxu1 %v2613_v21  ;;  %5080 = vmatpush3.msra.mxu0 %v3751_v20  ;;  %v3795_v20 = vld [vmem:[%s7243_s3 + $0xcc8] sm:$0xff]  ;;  %v3776_v21 = vld [vmem:[%s7243_s3 + $0xc38] sm:$0xff] }
 0x186   : > { %5077 = vmatmul.mubr.f32.vlgmr.msra.gmra.mxu1 %v2614_v24  ;;  %5081 = vmatprep.subr.mxu0 %v3750_v28  ;;  %v3794_v24 = vld [vmem:[%s7243_s3 + $0xcc0] sm:$0xff] }
 0x187   : > { %5114 = vmatprep.subr.mxu1 %v3768_v61  ;;  %5082 = vmatpush3.msra.mxu0 %v3750_v28  ;;  %v3775_v28 = vld [vmem:[%s7243_s3 + $0xc30] sm:$0xff] }
 0x188   : > { %5115 = vmatpush3.msra.mxu1 %v3768_v61  ;;  %5083 = vmatprep.subr.mxu0 %v3749_v57  ;;  %v3793_v61 = vld [vmem:[%s7243_s3 + $0xcb8] sm:$0xff] }
 0x189   : > { %5116 = vmatprep.subr.mxu1 %v3767_v25  ;;  %5084 = vmatpush3.msra.mxu0 %v3749_v57  ;;  %v3774_v57 = vld [vmem:[%s7243_s3 + $0xc28] sm:$0xff] }
 0x18a   : > { %5117 = vmatpush3.msra.mxu1 %v3767_v25  ;;  %5085 = vmatprep.subr.mxu0 %v3748_v1  ;;  %v3792_v25 = vld [vmem:[%s7243_s3 + $0xcb0] sm:$0xff] }
 0x18b   : > { %5118 = vmatprep.subr.mxu1 %v3766_v35  ;;  %5086 = vmatpush3.msra.mxu0 %v3748_v1  ;;  %v7111_v1 = vld [vmem:[%s6492_s19 + $0x28] sm:$0x3f]  ;;  %s3365_s19 = sshll.u32 %s7262_s22, 3 }
 0x18c   : > { %5119 = vmatpush3.msra.mxu1 %v3766_v35  ;;  %5087 = vmatprep.subr.mxu0 %v3747_v36  ;;  %v3773_v35 = vld [vmem:[%s7243_s3 + $0xc20] sm:$0xff]  ;;  %v3802_v13 = vrot.slane %v7111_v1, 10  ;;  %s367_s15 = sadd.s32 %s3365_s19, %s3364_s14 }
 0x18d   : > { %5120 = vmatprep.subr.mxu1 %v3765_v16  ;;  %5088 = vmatpush3.msra.mxu0 %v3747_v36  ;;  %v3791_v36 = vld [vmem:[%s7243_s3 + $0xca8] sm:$0xff]  ;;  %s3366_s29 = sshll.u32 %s367_s15, 3 }
 0x18e   : > { %5121 = vmatpush3.msra.mxu1 %v3765_v16  ;;  %5089 = vmatprep.subr.mxu0 %v3746_v40  ;;  %v7121_v16 = vcombine.high %v7111_v1, %v7111_v1  ;;  %s369_s30 = scalar_lea.vmem %s7246_s6, %s3366_s29 }
 0x18f   : > { %5122 = vmatprep.subr.mxu1 %v3764_v41  ;;  %5090 = vmatpush3.msra.mxu0 %v3746_v40  ;;  %v3772_v40 = vld [vmem:[%s7243_s3 + $0xc18] sm:$0xff] }
 0x190   : > { %5123 = vmatpush3.msra.mxu1 %v3764_v41  ;;  %5091 = vmatprep.subr.mxu0 %v3745_v42  ;;  %v3790_v41 = vld [vmem:[%s7243_s3 + $0xca0] sm:$0xff] }
 0x191   : > { %5124 = vmatprep.subr.mxu1 %v3763_v45  ;;  %5092 = vmatpush3.msra.mxu0 %v3745_v42  ;;  %v3771_v42 = vld [vmem:[%s7243_s3 + $0xc10] sm:$0xff] }
 0x192   : > { %5125 = vmatpush3.msra.mxu1 %v3763_v45  ;;  %5093 = vmatprep.subr.mxu0 %v3744_v46  ;;  %v3789_v45 = vld [vmem:[%s7243_s3 + $0xc98] sm:$0xff] }
 0x193   : > { %5126 = vmatprep.subr.mxu1 %v3762_v7  ;;  %5094 = vmatpush3.msra.mxu0 %v3744_v46  ;;  %v3785_v46 = vrot.slane %v7111_v1, 9 }
 0x194   : > { %5127 = vmatpush3.msra.mxu1 %v3762_v7  ;;  %5095 = vmatprep.subr.mxu0 %v3743_v18  ;;  %v2999_v7 = vrot.slane %v7121_v16, 5 }
 0x195   : > { %5128 = vmatprep.subr.mxu1 %v3761_v63  ;;  %5096 = vmatpush3.msra.mxu0 %v3743_v18  ;;  %v3770_v18 = vld [vmem:[%s7243_s3 + $0xc08] sm:$0xff] }
 0x196   : > { %5129 = vmatpush3.msra.mxu1 %v3761_v63  ;;  %5097 = vmatprep.subr.mxu0 %v3742_v4  ;;  %v3788_v63 = vld [vmem:[%s7243_s3 + $0xc90] sm:$0xff] }
 0x197   : > { %5130 = vmatprep.subr.mxu1 %v3760_v11  ;;  %5098 = vmatpush3.msra.mxu0 %v3742_v4  ;;  %v3769_v4 = vld [vmem:[%s7243_s3 + $0xc00] sm:$0xff] }
 0x198   : > { %5131 = vmatpush3.msra.mxu1 %v3760_v11  ;;  %5099 = vmatprep.subr.mxu0 %v3741_v10  ;;  %v3787_v11 = vld [vmem:[%s7243_s3 + $0xc88] sm:$0xff] }
 0x199   : > { %5132 = vmatprep.subr.mxu1 %v3759_v33  ;;  %5100 = vmatpush3.msra.mxu0 %v3741_v10  ;;  %v2917_v10 = vcombine.low %v6920_v8, %v7111_v1 }
 0x19a   : > { %5133 = vmatpush3.msra.mxu1 %v3759_v33  ;;  %5101 = vmatprep.subr.mxu0 %v3740_v26  ;;  %v3000_v33 = vsel %vm5517_vm2, %v3785_v46, %v2999_v7 }
 0x19b   : > { %5134 = vmatprep.subr.mxu1 %v3758_v19  ;;  %5102 = vmatpush3.msra.mxu0 %v3740_v26  ;;  %v3818_v26 = vld [vmem:[%s7243_s3 + $0xd78] sm:$0xff]  ;;  %v3018_v8 = vcombine.low %v7023_v56, %v3000_v33  ;;  %v3804_v56 = vld [vmem:[%s7243_s3 + $0xd08] sm:$0xff] }
 0x19c   : > { %5135 = vmatpush3.msra.mxu1 %v3758_v19  ;;  %5103 = vmatprep.subr.mxu0 %v3739_v51  ;;  %v3816_v19 = vld [vmem:[%s7243_s3 + $0xd68] sm:$0xff] }
 0x19d   : > { %5136 = vmatprep.subr.mxu1 %v3757_v17  ;;  %5104 = vmatpush3.msra.mxu0 %v3739_v51  ;;  %v3813_v51 = vld [vmem:[%s7243_s3 + $0xd50] sm:$0xff] }
 0x19e   : > { %5137 = vmatpush3.msra.mxu1 %v3757_v17  ;;  %5105 = vmatprep.subr.mxu0 %v3738_v30  ;;  %v3811_v17 = vld [vmem:[%s7243_s3 + $0xd40] sm:$0xff] }
 0x19f   : > { %5138 = vmatprep.subr.mxu1 %v3756_v31  ;;  %5106 = vmatpush3.msra.mxu0 %v3738_v30  ;;  %v3808_v30 = vld [vmem:[%s7243_s3 + $0xd28] sm:$0xff] }
 0x1a0   : > { %5139 = vmatpush3.msra.mxu1 %v3756_v31  ;;  %5107 = vmatprep.subr.mxu0 %v3737_v47  ;;  %v3807_v31 = vld [vmem:[%s7243_s3 + $0xd20] sm:$0xff] }
 0x1a1   : > { %5140 = vmatprep.subr.mxu1 %v3755_v49  ;;  %5108 = vmatpush3.msra.mxu0 %v3737_v47  ;;  %v3099_v47 = vrot.slane %v7121_v16, 6 }
 0x1a2   : > { %5141 = vmatpush3.msra.mxu1 %v3755_v49  ;;  %5109 = vmatprep.subr.mxu0 %v3736_v60  ;;  %v3805_v49 = vld [vmem:[%s7243_s3 + $0xd10] sm:$0xff] }
 0x1a3   : > { %5142 = vmatprep.subr.mxu1 %v3754_v44  ;;  %5110 = vmatpush3.msra.mxu0 %v3736_v60  ;;  %v3100_v60 = vsel %vm5694_vm5, %v3802_v13, %v3099_v47 }
 0x1a4   : > { %5111 = vmatprep.mubr.f32.mxu0 %v2716_v62  ;;  %5143 = vmatpush3.msra.mxu1 %v3754_v44  ;;  %v3781_v62 = vld [vmem:[%s7243_s3 + $0xc60] sm:$0xff] }
 0x1a5   : > { %5112 = vmatmul.mubr.f32.vlgmr.msra.gmra.mxu0 %v2717_v23  ;;  %5144 = vmatprep.subr.mxu1 %v3753_v12  ;;  %v3803_v44 = vld [vmem:[%s7243_s3 + $0xd00] sm:$0xff]  ;;  %v3118_v23 = vcombine.low %v7035_v2, %v3100_v60 }
 0x1a6   : > { %5149 = vmatprep.subr.mxu0 %v3784_v52  ;;  %5145 = vmatpush3.msra.mxu1 %v3753_v12  ;;  %v4343_v12 = vpop.f32.mrf.mxu0 }
 0x1a7   : > { %5146 = vmatprep.mubr.f32.mxu1 %v2818_v3  ;;  %5150 = vmatpush3.msra.mxu0 %v3784_v52  ;;  %v4378_v52 = vpop.f32.mrf.mxu1 }
 0x1a8   : > { %5147 = vmatmul.mubr.f32.vlgmr.msra.gmra.mxu1 %v2819_v38  ;;  %5151 = vmatprep.subr.mxu0 %v3783_v53  ;;  %v506_v3 = vpop.f32.mrf.mxu0  ;;  %v591_v27 = vadd.f32 %v4378_v52, %v4343_v12 }
 0x1a9   : > { %5184 = vmatprep.subr.mxu1 %v3801_v0  ;;  %5152 = vmatpush3.msra.mxu0 %v3783_v53  ;;  %v585_v53 = vpop.f32.mrf.mxu1 }
 0x1aa   : > { %5185 = vmatpush3.msra.mxu1 %v3801_v0  ;;  %5153 = vmatprep.subr.mxu0 %v3782_v58  ;;  %v4413_v38 = vpop.f32.mrf.mxu0 }
 0x1ab   : > { %5186 = vmatprep.subr.mxu1 %v3800_v43  ;;  %5154 = vmatpush3.msra.mxu0 %v3782_v58  ;;  %v4448_v58 = vpop.f32.mrf.mxu1 }
 0x1ac   : > { %5187 = vmatpush3.msra.mxu1 %v3800_v43  ;;  %5155 = vmatprep.subr.mxu0 %v3781_v62  ;;  %v700_v0 = vpop.f32.mrf.mxu0  ;;  %v586_v43 = vadd.f32 %v585_v53, %v506_v3 }
 0x1ad   : > { %5188 = vmatprep.subr.mxu1 %v3799_v34  ;;  %5156 = vmatpush3.msra.mxu0 %v3781_v62  ;;  %v710_v62 = vadd.f32 %v4413_v38, %v591_v27 }
 0x1ae   : > { %5189 = vmatpush3.msra.mxu1 %v3799_v34  ;;  %5157 = vmatprep.subr.mxu0 %v3780_v54  ;;  %v4483_v34 = vpop.f32.mrf.mxu0 }
 0x1af   : > { %5190 = vmatprep.subr.mxu1 %v3798_v59  ;;  %5158 = vmatpush3.msra.mxu0 %v3780_v54  ;;  %v709_v54 = vadd.f32 %v700_v0, %v586_v43 }
 0x1b0   : > { %5191 = vmatpush3.msra.mxu1 %v3798_v59  ;;  %5159 = vmatprep.subr.mxu0 %v3779_v14  ;;  %v799_v59 = vpop.f32.mrf.mxu1 }
 0x1b1   : > { %5192 = vmatprep.subr.mxu1 %v3797_v15  ;;  %5160 = vmatpush3.msra.mxu0 %v3779_v14  ;;  %v809_v14 = vadd.f32 %v4448_v58, %v710_v62 }
 0x1b2   : > { %5193 = vmatpush3.msra.mxu1 %v3797_v15  ;;  %5161 = vmatprep.subr.mxu0 %v3778_v32  ;;  %v902_v15 = vpop.f32.mrf.mxu0  ;;  %v4518_v2 = vpop.f32.mrf.mxu1 }
 0x1b3   : > { %5194 = vmatprep.subr.mxu1 %v3796_v5  ;;  %5162 = vmatpush3.msra.mxu0 %v3778_v32  ;;  %v808_v32 = vadd.f32 %v799_v59, %v709_v54 }
 0x1b4   : > { %5195 = vmatpush3.msra.mxu1 %v3796_v5  ;;  %5163 = vmatprep.subr.mxu0 %v3777_v9  ;;  %v912_v5 = vadd.f32 %v4483_v34, %v809_v14 }
 0x1b5   : > { %5196 = vmatprep.subr.mxu1 %v3795_v20  ;;  %5164 = vmatpush3.msra.mxu0 %v3777_v9  ;;  %v4553_v9 = vpop.f32.mrf.mxu0 }
 0x1b6   : > { %5197 = vmatpush3.msra.mxu1 %v3795_v20  ;;  %5165 = vmatprep.subr.mxu0 %v3776_v21  ;;  %v911_v20 = vadd.f32 %v902_v15, %v808_v32 }
 0x1b7   : > { %5198 = vmatprep.subr.mxu1 %v3794_v24  ;;  %5166 = vmatpush3.msra.mxu0 %v3776_v21  ;;  %v1004_v21 = vpop.f32.mrf.mxu1 }
 0x1b8   : > { %5199 = vmatpush3.msra.mxu1 %v3794_v24  ;;  %5167 = vmatprep.subr.mxu0 %v3775_v28  ;;  %v1014_v24 = vadd.f32 %v4518_v2, %v912_v5 }
 0x1b9   : > { %5200 = vmatprep.subr.mxu1 %v3793_v61  ;;  %5168 = vmatpush3.msra.mxu0 %v3775_v28  ;;  %v1101_v28 = vpop.f32.mrf.mxu0 }
 0x1ba   : > { %5201 = vmatpush3.msra.mxu1 %v3793_v61  ;;  %5169 = vmatprep.subr.mxu0 %v3774_v57  ;;  %v4588_v61 = vpop.f32.mrf.mxu1 }
 0x1bb   : > { %5202 = vmatprep.subr.mxu1 %v3792_v25  ;;  %5170 = vmatpush3.msra.mxu0 %v3774_v57  ;;  %v1013_v57 = vadd.f32 %v1004_v21, %v911_v20  ;;  %v4623_v1 = vpop.f32.mrf.mxu0 }
 0x1bc   : > { %5203 = vmatpush3.msra.mxu1 %v3792_v25  ;;  %5171 = vmatprep.subr.mxu0 %v3773_v35  ;;  %v1111_v25 = vadd.f32 %v4553_v9, %v1014_v24 }
 0x1bd   : > { %5204 = vmatprep.subr.mxu1 %v3791_v36  ;;  %5172 = vmatpush3.msra.mxu0 %v3773_v35  ;;  %v1110_v35 = vadd.f32 %v1101_v28, %v1013_v57 }
 0x1be   : > { %5205 = vmatpush3.msra.mxu1 %v3791_v36  ;;  %5173 = vmatprep.subr.mxu0 %v3772_v40  ;;  %v1202_v36 = vpop.f32.mrf.mxu1  ;;  %v1212_v16 = vadd.f32 %v4588_v61, %v1111_v25 }
 0x1bf   : > { %5206 = vmatprep.subr.mxu1 %v3790_v41  ;;  %5174 = vmatpush3.msra.mxu0 %v3772_v40  ;;  %v1302_v40 = vpop.f32.mrf.mxu0 }
 0x1c0   : > { %5207 = vmatpush3.msra.mxu1 %v3790_v41  ;;  %5175 = vmatprep.subr.mxu0 %v3771_v42  ;;  %v4658_v41 = vpop.f32.mrf.mxu1 }
 0x1c1   : > { %5208 = vmatprep.subr.mxu1 %v3789_v45  ;;  %5176 = vmatpush3.msra.mxu0 %v3771_v42  ;;  %v1211_v42 = vadd.f32 %v1202_v36, %v1110_v35  ;;  %v4693_v46 = vpop.f32.mrf.mxu0 }
 0x1c2   : > { %5209 = vmatpush3.msra.mxu1 %v3789_v45  ;;  %5177 = vmatprep.subr.mxu0 %v3770_v18  ;;  %v1312_v45 = vadd.f32 %v4623_v1, %v1212_v16 }
 0x1c3   : > { %5210 = vmatprep.subr.mxu1 %v3788_v63  ;;  %5178 = vmatpush3.msra.mxu0 %v3770_v18  ;;  %v1311_v7 = vadd.f32 %v1302_v40, %v1211_v42  ;;  %v1410_v18 = vpop.f32.mrf.mxu1 }
 0x1c4   : > { %5211 = vmatpush3.msra.mxu1 %v3788_v63  ;;  %5179 = vmatprep.subr.mxu0 %v3769_v4  ;;  %v1420_v63 = vadd.f32 %v4658_v41, %v1312_v45 }
 0x1c5   : > { %5212 = vmatprep.subr.mxu1 %v3787_v11  ;;  %5180 = vmatpush3.msra.mxu0 %v3769_v4  ;;  %v1528_v4 = vpop.f32.mrf.mxu0 }
 0x1c6   : > { %5181 = vmatprep.mubr.f32.mxu0 %v6783_v29  ;;  %5213 = vmatpush3.msra.mxu1 %v3787_v11  ;;  %v3815_v29 = vld [vmem:[%s7243_s3 + $0xd60] sm:$0xff]  ;;  %v4728_v11 = vpop.f32.mrf.mxu1  ;;  %v1538_v33 = vadd.f32 %v4693_v46, %v1420_v63 }
 0x1c7   : > { %5182 = vmatmul.mubr.f32.vlgmr.msra.gmra.mxu0 %v2917_v10  ;;  %5214 = vmatprep.subr.mxu1 %v3786_v48  ;;  %v1419_v10 = vadd.f32 %v1410_v18, %v1311_v7 }
 0x1c8   : > { %5219 = vmatprep.subr.mxu0 %v3818_v26  ;;  %5215 = vmatpush3.msra.mxu1 %v3786_v48  ;;  %v4763_v48 = vpop.f32.mrf.mxu0 }
 0x1c9   : > { %5216 = vmatprep.mubr.f32.mxu1 %v6798_v39  ;;  %5220 = vmatpush3.msra.mxu0 %v3818_v26  ;;  %v3814_v39 = vld [vmem:[%s7243_s3 + $0xd58] sm:$0xff]  ;;  %v1537_v26 = vadd.f32 %v1528_v4, %v1419_v10  ;;  %v3819_v4 = vld [vmem:[%s7244_s4] ss:$0 sm:$0xff] }
 0x1ca   : > { %5217 = vmatmul.mubr.f32.vlgmr.msra.gmra.mxu1 %v3018_v8  ;;  %5221 = vmatprep.subr.mxu0 %v3817_v22  ;;  %v1642_v8 = vpop.f32.mrf.mxu1 }
 0x1cb   : > { %5251 = vmatprep.mubr.f32.mxu0 %v6917_v6  ;;  %5222 = vmatpush3.msra.mxu0 %v3817_v22  ;;  %v3812_v6 = vld [vmem:[%s7243_s3 + $0xd48] sm:$0xff]  ;;  %v1652_v22 = vadd.f32 %v4728_v11, %v1538_v33  ;;  %v3820_v33 = vld [vmem:[%s7245_s5] ss:$0 sm:$0xff] }
 0x1cc   : > { %5223 = vmatprep.subr.mxu0 %v3816_v19 }
 0x1cd   : > { %5224 = vmatpush3.msra.mxu0 %v3816_v19  ;;  %v1741_v19 = vpop.f32.mrf.mxu0 }
 0x1ce   : > { %5225 = vmatprep.subr.mxu0 %v3815_v29 }
 0x1cf   : > { %5226 = vmatpush3.msra.mxu0 %v3815_v29  ;;  %v4798_v29 = vpop.f32.mrf.mxu1 }
 0x1d0   : > { %5227 = vmatprep.subr.mxu0 %v3814_v39 }
 0x1d1   : > { %5228 = vmatpush3.msra.mxu0 %v3814_v39  ;;  %v1651_v39 = vadd.f32 %v1642_v8, %v1537_v26 }
 0x1d2   : > { %5229 = vmatprep.subr.mxu0 %v3813_v51 }
 0x1d3   : > { %5230 = vmatpush3.msra.mxu0 %v3813_v51  ;;  %v1751_v51 = vadd.f32 %v4763_v48, %v1652_v22 }
 0x1d4   : > { %5231 = vmatprep.subr.mxu0 %v3812_v6 }
 0x1d5   : > { %5232 = vmatpush3.msra.mxu0 %v3812_v6 }
 0x1d6   : > { %5233 = vmatprep.subr.mxu0 %v3811_v17 }
 0x1d7   : > { %5234 = vmatpush3.msra.mxu0 %v3811_v17  ;;  %v1750_v17 = vadd.f32 %v1741_v19, %v1651_v39 }
 0x1d8   : > { %5235 = vmatprep.subr.mxu0 %v3810_v37 }
 0x1d9   : > { %5236 = vmatpush3.msra.mxu0 %v3810_v37  ;;  %v1844_v37 = vpop.f32.mrf.mxu1 }
 0x1da   : > { %5237 = vmatprep.subr.mxu0 %v3809_v50 }
 0x1db   : > { %5238 = vmatpush3.msra.mxu0 %v3809_v50  ;;  %v1854_v50 = vadd.f32 %v4798_v29, %v1751_v51 }
 0x1dc   : > { %5239 = vmatprep.subr.mxu0 %v3808_v30 }
 0x1dd   : > { %5240 = vmatpush3.msra.mxu0 %v3808_v30  ;;  %v4833_v6 = vpop.f32.mrf.mxu0 }
 0x1de   : > { %5241 = vmatprep.subr.mxu0 %v3807_v31  ;;  %v1956_v13 = vadd.f32 %v4833_v6, %v1854_v50 }
 0x1df   : > { %5242 = vmatpush3.msra.mxu0 %v3807_v31  ;;  %v1946_v30 = vpop.f32.mrf.mxu0 }
 0x1e0   : > { %5243 = vmatprep.subr.mxu0 %v3806_v55  ;;  %v4868_v31 = vpop.f32.mrf.mxu1 }
 0x1e1   : > { %5244 = vmatpush3.msra.mxu0 %v3806_v55  ;;  %v1853_v55 = vadd.f32 %v1844_v37, %v1750_v17  ;;  %v2053_v60 = vadd.f32 %v4868_v31, %v1956_v13 }
 0x1e2   : > { %5245 = vmatprep.subr.mxu0 %v3805_v49 }
 0x1e3   : > { %5246 = vmatpush3.msra.mxu0 %v3805_v49  ;;  %v1955_v49 = vadd.f32 %v1946_v30, %v1853_v55 }
 0x1e4   : > { %5247 = vmatprep.subr.mxu0 %v3804_v56 }
 0x1e5   : > { %5248 = vmatpush3.msra.mxu0 %v3804_v56  ;;  %v2043_v56 = vpop.f32.mrf.mxu1 }
 0x1e6   : > { %5249 = vmatprep.subr.mxu0 %v3803_v44  ;;  %v2052_v12 = vadd.f32 %v2043_v56, %v1955_v49 }
 0x1e7   : > { %5250 = vmatpush3.msra.mxu0 %v3803_v44 }
 0x1e8   : > { %5252 = vmatmul.mubr.f32.vlgmr.msra.gmra.mxu0 %v3118_v23 }
 0x1ff   : > { %v4903_v47 = vpop.f32.mrf.mxu0 }
 0x200   : > { %v2154_v52 = vadd.f32 %v4903_v47, %v2053_v60 }
 0x201   : > { %v2144_v44 = vpop.f32.mrf.mxu0 }
 0x202   : > { %v4938_v23 = vpop.f32.mrf.mxu1  ;;  %v2153_v38 = vadd.f32 %v2144_v44, %v2052_v12 }
 0x203   : > { %v2254_v27 = vadd.f32 %v4938_v23, %v2154_v52 }
 0x204   : > { %v2244_v53 = vpop.f32.mrf.mxu1 }
 0x205   : > { %v2253_v43 = vadd.f32 %v2244_v53, %v2153_v38 }
 0x221   : > { %v4973_v3 = vpop.f32.mrf.mxu0 }
 0x222   : > { %v2362_v62 = vadd.f32 %v4973_v3, %v2254_v27 }
 0x223   : > { %v2352_v0 = vpop.f32.mrf.mxu0 }
 0x224   : > { %v5008_v58 = vpop.f32.mrf.mxu1  ;;  %v2361_v54 = vadd.f32 %v2352_v0, %v2253_v43 }
 0x225   : > { %v2480_v14 = vadd.f32 %v5008_v58, %v2362_v62 }
 0x226   : > { %v2470_v59 = vpop.f32.mrf.mxu1 }
 0x227   : > { %v2479_v32 = vadd.f32 %v2470_v59, %v2361_v54 }
 0x243   : > { %v5043_v34 = vpop.f32.mrf.mxu0 }
 0x244   : > { %v2594_v5 = vadd.f32 %v5043_v34, %v2480_v14 }
 0x245   : > { %v2584_v15 = vpop.f32.mrf.mxu0 }
 0x246   : > { %v5078_v2 = vpop.f32.mrf.mxu1  ;;  %v2593_v20 = vadd.f32 %v2584_v15, %v2479_v32 }
 0x247   : > { %v2693_v24 = vadd.f32 %v5078_v2, %v2594_v5 }
 0x248   : > { %v2683_v21 = vpop.f32.mrf.mxu1 }
 0x249   : > { %v2692_v57 = vadd.f32 %v2683_v21, %v2593_v20 }
 0x265   : > { %v5113_v9 = vpop.f32.mrf.mxu0 }
 0x266   : > { %v2796_v25 = vadd.f32 %v5113_v9, %v2693_v24 }
 0x267   : > { %v2786_v28 = vpop.f32.mrf.mxu0 }
 0x268   : > { %v5148_v61 = vpop.f32.mrf.mxu1  ;;  %v2795_v35 = vadd.f32 %v2786_v28, %v2692_v57 }
 0x269   : > { %v2898_v16 = vadd.f32 %v5148_v61, %v2796_v25 }
 0x26a   : > { %v2888_v36 = vpop.f32.mrf.mxu1 }
 0x26b   : > { %v2897_v42 = vadd.f32 %v2888_v36, %v2795_v35 }
 0x287   : > { %v5183_v1 = vpop.f32.mrf.mxu0 }
 0x288   : > { %v2995_v45 = vadd.f32 %v5183_v1, %v2898_v16 }
 0x289   : > { %v2985_v40 = vpop.f32.mrf.mxu0 }
 0x28a   : > { %v5218_v41 = vpop.f32.mrf.mxu1  ;;  %v2994_v46 = vadd.f32 %v2985_v40, %v2897_v42 }
 0x28b   : > { %v3096_v18 = vadd.f32 %v5218_v41, %v2995_v45 }
 0x28c   : > { %v3086_v7 = vpop.f32.mrf.mxu1 }
 0x28d   : > { %v3095_v11 = vadd.f32 %v3086_v7, %v2994_v46 }
 0x2a8   : > { %v5253_v63 = vpop.f32.mrf.mxu0 }
 0x2a9   : > { %v3196_v10 = vadd.f32 %v5253_v63, %v3096_v18 }
 0x2aa   : > { %v3186_v48 = vpop.f32.mrf.mxu0 }
 0x2ab   : > { %v3205_v26 = vmul.f32 %v3819_v4, %v3196_v10  ;;  %v3195_v8 = vadd.f32 %v3186_v48, %v3095_v11 }
 0x2ad   : > { %v3214_v22 = vadd.f32 %v3820_v33, %v3205_v26  ;;  %v3204_v19 = vmul.f32 %v3819_v4, %v3195_v8 }
 0x2af   : > { %v3216_v29 = vmax.f32 %v3214_v22, 0.0  ;;  %v3213_v39 = vadd.f32 %v3820_v33, %v3204_v19 }
 0x2b1   : > { %3218 = vst [vmem:[%s369_s30 + $0x8] sm:$0xff] %v3216_v29  ;;  %v3215_v51 = vmax.f32 %v3213_v39, 0.0 }
 0x2b3   : > { %3217 = vst [vmem:[%s369_s30] sm:$0xff] %v3215_v51 }
 0x2b4 PF: > { %s16_s25 = sadd.s32 1, %s5369_s25   ;;  %s7251_s21 = smov %s5361_s23 }
 0x2b5   : > { %p13_p10 = scmp.ge.s32.totalorder %s16_s25, 10   ;;  %s7252_s22 = smov %s5365_s24 }
 0x2b6   : > { %s7253_s23 = smov %s7256_s26  ;;  %s7254_s24 = smov %s7260_s27 }
 0x2b7   :  { %15 = sbr.rel (!%p13_p10) target bundleno = 3 (0x3), region = 106 }

</bundles_post_ra>
